<compile_context>
chip_gen: v5e
topology: v5e:2x2
jax: 0.10.0
libtpu: 0.0.40
codegen_flags: <defaults>
</compile_context>

<pallas_src>
import functools

import jax
import jax.numpy as jnp
from jax.experimental import pallas as pl
from jax.experimental.pallas import tpu as pltpu

EPS = 1e-5     # nn.BatchNorm2d default eps
LANE = 128     # lane width / Cout padding target


def _round_up(x, m):
    return ((x + m - 1) // m) * m


def _vmem_spec():
    return pl.BlockSpec(memory_space=pltpu.MemorySpace.VMEM)


# ---------------------------------------------------------------------------
# Pallas kernels: matmul (MXU, bf16 in / f32 acc) + fused BN/activation epilogue
# ---------------------------------------------------------------------------
def _bn_relu_kernel(p_ref, w_ref, g_ref, beta_ref, o_ref, *, m_true):
    # p_ref: (M_pad, K) bf16 patches, w_ref: (K, 128) bf16, g/beta: (1, 128) f32.
    x = jnp.dot(p_ref[...], w_ref[...], preferred_element_type=jnp.float32)

    # Training-mode BatchNorm2d statistics over the true N*OH*OW rows only
    # (zero-padded rows are masked out).  Single pass: E[x] and E[x^2].
    rows = jax.lax.broadcasted_iota(jnp.int32, x.shape, 0)
    valid = (rows < m_true).astype(jnp.float32)
    xm = x * valid
    inv_m = 1.0 / float(m_true)
    mean = jnp.sum(xm, axis=0, keepdims=True) * inv_m
    ex2 = jnp.sum(xm * xm, axis=0, keepdims=True) * inv_m
    var = ex2 - mean * mean                      # biased variance (PyTorch BN)

    # Fold gamma / rsqrt / beta into a single scale & shift.  The ConvTranspose2d
    # bias cancels exactly under training-mode BN, so it is omitted here.
    scale = g_ref[...] * jax.lax.rsqrt(var + EPS)
    shift = beta_ref[...] - mean * scale
    o_ref[...] = jnp.maximum(x * scale + shift, 0.0)     # ReLU


def _tanh_kernel(p_ref, w_ref, b_ref, o_ref):
    x = jnp.dot(p_ref[...], w_ref[...], preferred_element_type=jnp.float32)
    o_ref[...] = jnp.tanh(x + b_ref[...])


# ---------------------------------------------------------------------------
# JAX glue: ConvTranspose2d -> dilate + pad + im2col (channels-last, bf16)
# ---------------------------------------------------------------------------
def _convt_patches(x_nhwc, ksize, stride):
    # x: (N, H, W, C) -> bf16 patches (M_pad, k*k*C); returns (patches, OH, OW, M).
    n, h, w, c = x_nhwc.shape
    x = x_nhwc.astype(jnp.bfloat16)
    hd, wd = (h - 1) * stride + 1, (w - 1) * stride + 1
    xd = jnp.zeros((n, hd, wd, c), x.dtype).at[:, ::stride, ::stride, :].set(x)
    pad = ksize - 1
    xp = jnp.pad(xd, ((0, 0), (pad, pad), (pad, pad), (0, 0)))
    oh, ow = (h - 1) * stride + ksize, (w - 1) * stride + ksize
    cols = [xp[:, i:i + oh, j:j + ow, :] for i in range(ksize) for j in range(ksize)]
    p = jnp.stack(cols, axis=3)                        # (N, OH, OW, k*k, C)
    p = p.reshape(n * oh * ow, ksize * ksize * c)      # (M, K), K order = (i,j,cin)
    m = n * oh * ow
    m_pad = _round_up(m, 8)
    if m_pad != m:
        p = jnp.pad(p, ((0, m_pad - m), (0, 0)))
    return p, oh, ow, m


def _gen_block(x_nhwc, p):
    n = x_nhwc.shape[0]
    patches, oh, ow, m = _convt_patches(x_nhwc, p["ksize"], p["stride"])
    m_pad = patches.shape[0]
    out = pl.pallas_call(
        functools.partial(_bn_relu_kernel, m_true=m),
        out_shape=jax.ShapeDtypeStruct((m_pad, LANE), jnp.float32),
        in_specs=[_vmem_spec()] * 4,
        out_specs=_vmem_spec(),
    )(patches, p["w_mat"], p["gamma_pad"], p["beta_pad"])
    return out[:m, :p["cout"]].reshape(n, oh, ow, p["cout"])   # stay NHWC


def _gen_final_block(x_nhwc, p):
    n = x_nhwc.shape[0]
    patches, oh, ow, m = _convt_patches(x_nhwc, p["ksize"], p["stride"])
    m8 = patches.shape[0]
    # Tile M so the big final layer runs on both TensorCores (v7x megacore); no
    # batch statistics here, so tiling over rows is safe.
    tm = min(1024, m8)
    m_pad = _round_up(m8, tm)
    if m_pad != m8:
        patches = jnp.pad(patches, ((0, m_pad - m8), (0, 0)))
    kdim = patches.shape[1]
    out = pl.pallas_call(
        _tanh_kernel,
        out_shape=jax.ShapeDtypeStruct((m_pad, LANE), jnp.float32),
        grid=(m_pad // tm,),
        in_specs=[pl.BlockSpec((tm, kdim), lambda i: (i, 0)),
                  pl.BlockSpec((kdim, LANE), lambda i: (0, 0)),
                  pl.BlockSpec((1, LANE), lambda i: (0, 0))],
        out_specs=pl.BlockSpec((tm, LANE), lambda i: (i, 0)),
        compiler_params=pltpu.CompilerParams(dimension_semantics=("parallel",)),
    )(patches, p["w_mat"], p["b_pad"])
    return out[:m, :p["cout"]].reshape(n, oh, ow, p["cout"])   # stay NHWC


# ---------------------------------------------------------------------------
# Generator: parameter init (weight prep hoisted here) + forward
# ---------------------------------------------------------------------------
def generator_init(key, z_dim=8, im_chan=3, hidden_dim=8):
    # (Cin, Cout, kernel_size, stride, final) per block, mirroring the PyTorch module.
    cfg = [
        (z_dim,          hidden_dim * 8, 3, 2, False),
        (hidden_dim * 8, hidden_dim * 4, 3, 2, False),
        (hidden_dim * 4, hidden_dim * 2, 3, 2, False),
        (hidden_dim * 2, hidden_dim,     3, 2, False),
        (hidden_dim,     im_chan,        4, 2, True),    # final layer (Tanh)
    ]
    prepared, raw = [], []
    for (cin, cout, ksize, stride, final) in cfg:
        key, wk, bk = jax.random.split(key, 3)
        w = jax.random.normal(wk, (cin, cout, ksize, ksize), jnp.float32) * 0.05
        b = jax.random.normal(bk, (cout,), jnp.float32) * 0.05
        gamma = jnp.ones((cout,), jnp.float32)    # BatchNorm2d default affine init
        beta = jnp.zeros((cout,), jnp.float32)
        raw.append(dict(w=w, b=b, gamma=gamma, beta=beta,
                        ksize=ksize, stride=stride))

        # Hoisted weight prep: flip spatial taps, lay out as (k,k,Cin) x Cout to
        # match the channels-last im2col, pad the lane (Cout) dim to 128, cast bf16.
        wf = w[:, :, ::-1, ::-1]
        w_mat = wf.transpose(2, 3, 0, 1).reshape(ksize * ksize * cin, cout)
        w_mat = jnp.pad(w_mat, ((0, 0), (0, LANE - cout))).astype(jnp.bfloat16)

        def _pad1(v):
            return jnp.pad(v, (0, LANE - cout)).reshape(1, LANE)

        prepared.append(dict(w_mat=w_mat, b_pad=_pad1(b), gamma_pad=_pad1(gamma),
                             beta_pad=_pad1(beta), cout=cout, ksize=ksize,
                             stride=stride, final=final))
    return prepared, raw


def generator_forward(params, noise, z_dim):
    n = noise.shape[0]
    x = noise.reshape(n, 1, 1, z_dim)          # noise.view(N, z_dim, 1, 1) in NHWC
    for p in params:
        x = _gen_final_block(x, p) if p["final"] else _gen_block(x, p)
    return x.transpose(0, 3, 1, 2)             # single NHWC -> NCHW at the very end


# ---------------------------------------------------------------------------
# Plain-JAX reference (same bf16 matmul precision) for a numeric cross-check
# ---------------------------------------------------------------------------
def _reference_forward(raw_params, noise, z_dim):
    x = noise.reshape(noise.shape[0], z_dim, 1, 1)      # NCHW
    n_layers = len(raw_params)
    for idx, p in enumerate(raw_params):
        w, b, ksize, stride = p["w"], p["b"], p["ksize"], p["stride"]
        cout = w.shape[1]
        wf = w[:, :, ::-1, ::-1].transpose(1, 0, 2, 3)  # flipped, OIHW
        y = jax.lax.conv_general_dilated(
            x.astype(jnp.bfloat16), wf.astype(jnp.bfloat16),
            window_strides=(1, 1),
            padding=[(ksize - 1, ksize - 1)] * 2,
            lhs_dilation=(stride, stride),
            dimension_numbers=("NCHW", "OIHW", "NCHW"),
            preferred_element_type=jnp.float32)
        y = y + b.reshape(1, cout, 1, 1)
        if idx < n_layers - 1:
            mean = jnp.mean(y, axis=(0, 2, 3), keepdims=True)
            var = jnp.mean((y - mean) ** 2, axis=(0, 2, 3), keepdims=True)
            y = (y - mean) * jax.lax.rsqrt(var + EPS)
            y = p["gamma"].reshape(1, cout, 1, 1) * y + p["beta"].reshape(1, cout, 1, 1)
            y = jnp.maximum(y, 0.0)
        else:
            y = jnp.tanh(y)
        x = y
    return x


if __name__ == "__main__":
    # Small deterministic configuration: z_dim=8, im_chan=3, hidden_dim=8, batch=2.
    # Spatial sizes follow the module exactly: 1 -> 3 -> 7 -> 15 -> 31 -> 64.
    z_dim = 8
    key = jax.random.PRNGKey(0)
    pkey, nkey = jax.random.split(key)
    params, raw_params = generator_init(pkey, z_dim=z_dim, im_chan=3, hidden_dim=8)
    noise = jax.random.normal(nkey, (2, z_dim), jnp.float32)

    fwd = jax.jit(lambda nz: generator_forward(params, nz, z_dim))
    out = jax.block_until_ready(fwd(noise))

    assert out.shape == (2, 3, 64, 64), out.shape
    assert bool(jnp.all(jnp.isfinite(out)))
    assert bool(jnp.all(jnp.abs(out) <= 1.0 + 1e-5))      # tanh range

    ref = jax.block_until_ready(_reference_forward(raw_params, noise, z_dim))
    max_err = float(jnp.max(jnp.abs(out - ref)))
    assert max_err < 5e-2, f"max_err={max_err}"

    print("KERNEL_OK")
</pallas_src>

<mosaic_0001>
module attributes {stable_mosaic.version = 11 : i64} {
  func.func @_bn_relu_kernel(%arg0: memref<24x72xbf16, #tpu.memory_space<vmem>>, %arg1: memref<72x128xbf16, #tpu.memory_space<vmem>>, %arg2: memref<1x128xf32, #tpu.memory_space<vmem>>, %arg3: memref<1x128xf32, #tpu.memory_space<vmem>>, %arg4: memref<24x128xf32, #tpu.memory_space<vmem>>) attributes {dimension_semantics = [], scalar_prefetch = 0 : i64, scratch_operands = 0 : i64, tpu.core_type = #tpu.core_type<tc>} {
    %c0 = arith.constant 0 : index
    %c0_0 = arith.constant 0 : index
    %0 = vector.load %arg0[%c0, %c0_0] : memref<24x72xbf16, #tpu.memory_space<vmem>>, vector<24x72xbf16>
    %c0_1 = arith.constant 0 : index
    %c0_2 = arith.constant 0 : index
    %1 = vector.load %arg1[%c0_1, %c0_2] : memref<72x128xbf16, #tpu.memory_space<vmem>>, vector<72x128xbf16>
    %cst = arith.constant dense<0.000000e+00> : vector<24x128xf32>
    %2 = tpu.matmul %0, %1, %cst {dimension_numbers = #tpu.dot_dimension_numbers<[1], [0], [0], [1], [0, 0, 1, 1], [], []>} : vector<24x72xbf16>, vector<72x128xbf16>, vector<24x128xf32> -> vector<24x128xf32>
    %3 = tpu.iota {dimensions = array<i32: 0>} : vector<24x128xi32>
    %c18_i32 = arith.constant 18 : i32
    %4 = vector.broadcast %c18_i32 : i32 to vector<24x128xi32>
    %5 = arith.cmpi slt, %3, %4 : vector<24x128xi32>
    %6 = arith.extui %5 : vector<24x128xi1> to vector<24x128xi32>
    %7 = arith.sitofp %6 : vector<24x128xi32> to vector<24x128xf32>
    %8 = arith.mulf %2, %7 : vector<24x128xf32>
    %cst_3 = arith.constant dense<0.000000e+00> : vector<128xf32>
    %9 = vector.multi_reduction <add>, %8, %cst_3 [0] : vector<24x128xf32> to vector<128xf32>
    %10 = vector.shape_cast %9 : vector<128xf32> to vector<1x128xf32>
    %cst_4 = arith.constant 0.055555556 : f32
    %11 = vector.broadcast %cst_4 : f32 to vector<1x128xf32>
    %12 = arith.mulf %10, %11 : vector<1x128xf32>
    %13 = arith.mulf %8, %8 : vector<24x128xf32>
    %cst_5 = arith.constant dense<0.000000e+00> : vector<128xf32>
    %14 = vector.multi_reduction <add>, %13, %cst_5 [0] : vector<24x128xf32> to vector<128xf32>
    %15 = vector.shape_cast %14 : vector<128xf32> to vector<1x128xf32>
    %cst_6 = arith.constant 0.055555556 : f32
    %16 = vector.broadcast %cst_6 : f32 to vector<1x128xf32>
    %17 = arith.mulf %15, %16 : vector<1x128xf32>
    %18 = arith.mulf %12, %12 : vector<1x128xf32>
    %19 = arith.subf %17, %18 : vector<1x128xf32>
    %c0_7 = arith.constant 0 : index
    %c0_8 = arith.constant 0 : index
    %20 = vector.load %arg2[%c0_7, %c0_8] : memref<1x128xf32, #tpu.memory_space<vmem>>, vector<1x128xf32>
    %cst_9 = arith.constant 9.99999974E-6 : f32
    %21 = vector.broadcast %cst_9 : f32 to vector<1x128xf32>
    %22 = arith.addf %19, %21 : vector<1x128xf32>
    %23 = math.rsqrt %22 : vector<1x128xf32>
    %24 = arith.mulf %20, %23 : vector<1x128xf32>
    %c0_10 = arith.constant 0 : index
    %c0_11 = arith.constant 0 : index
    %25 = vector.load %arg3[%c0_10, %c0_11] : memref<1x128xf32, #tpu.memory_space<vmem>>, vector<1x128xf32>
    %26 = arith.mulf %12, %24 : vector<1x128xf32>
    %27 = arith.subf %25, %26 : vector<1x128xf32>
    %28 = vector.broadcast %24 : vector<1x128xf32> to vector<24x128xf32>
    %29 = arith.mulf %2, %28 : vector<24x128xf32>
    %30 = vector.broadcast %27 : vector<1x128xf32> to vector<24x128xf32>
    %31 = arith.addf %29, %30 : vector<24x128xf32>
    %cst_12 = arith.constant 0.000000e+00 : f32
    %32 = vector.broadcast %cst_12 : f32 to vector<24x128xf32>
    %33 = arith.maximumf %31, %32 : vector<24x128xf32>
    %c0_13 = arith.constant 0 : index
    %c0_14 = arith.constant 0 : index
    %34 = vector.load %arg4[%c0_13, %c0_14] : memref<24x128xf32, #tpu.memory_space<vmem>>, vector<24x128xf32>
    tpu.vector_store %arg4[%c0_13, %c0_14], %33 {strides = array<i32>} : memref<24x128xf32, #tpu.memory_space<vmem>>, vector<24x128xf32>,
    return
  }
}

module attributes {stable_mosaic.version = 11 : i64} {
  func.func @_bn_relu_kernel(%arg0: memref<104x576xbf16, #tpu.memory_space<vmem>>, %arg1: memref<576x128xbf16, #tpu.memory_space<vmem>>, %arg2: memref<1x128xf32, #tpu.memory_space<vmem>>, %arg3: memref<1x128xf32, #tpu.memory_space<vmem>>, %arg4: memref<104x128xf32, #tpu.memory_space<vmem>>) attributes {dimension_semantics = [], scalar_prefetch = 0 : i64, scratch_operands = 0 : i64, tpu.core_type = #tpu.core_type<tc>} {
    %c0 = arith.constant 0 : index
    %c0_0 = arith.constant 0 : index
    %0 = vector.load %arg0[%c0, %c0_0] : memref<104x576xbf16, #tpu.memory_space<vmem>>, vector<104x576xbf16>
    %c0_1 = arith.constant 0 : index
    %c0_2 = arith.constant 0 : index
    %1 = vector.load %arg1[%c0_1, %c0_2] : memref<576x128xbf16, #tpu.memory_space<vmem>>, vector<576x128xbf16>
    %cst = arith.constant dense<0.000000e+00> : vector<104x128xf32>
    %2 = tpu.matmul %0, %1, %cst {dimension_numbers = #tpu.dot_dimension_numbers<[1], [0], [0], [1], [0, 0, 1, 1], [], []>} : vector<104x576xbf16>, vector<576x128xbf16>, vector<104x128xf32> -> vector<104x128xf32>
    %3 = tpu.iota {dimensions = array<i32: 0>} : vector<104x128xi32>
    %c98_i32 = arith.constant 98 : i32
    %4 = vector.broadcast %c98_i32 : i32 to vector<104x128xi32>
    %5 = arith.cmpi slt, %3, %4 : vector<104x128xi32>
    %6 = arith.extui %5 : vector<104x128xi1> to vector<104x128xi32>
    %7 = arith.sitofp %6 : vector<104x128xi32> to vector<104x128xf32>
    %8 = arith.mulf %2, %7 : vector<104x128xf32>
    %cst_3 = arith.constant dense<0.000000e+00> : vector<128xf32>
    %9 = vector.multi_reduction <add>, %8, %cst_3 [0] : vector<104x128xf32> to vector<128xf32>
    %10 = vector.shape_cast %9 : vector<128xf32> to vector<1x128xf32>
    %cst_4 = arith.constant 0.0102040814 : f32
    %11 = vector.broadcast %cst_4 : f32 to vector<1x128xf32>
    %12 = arith.mulf %10, %11 : vector<1x128xf32>
    %13 = arith.mulf %8, %8 : vector<104x128xf32>
    %cst_5 = arith.constant dense<0.000000e+00> : vector<128xf32>
    %14 = vector.multi_reduction <add>, %13, %cst_5 [0] : vector<104x128xf32> to vector<128xf32>
    %15 = vector.shape_cast %14 : vector<128xf32> to vector<1x128xf32>
    %cst_6 = arith.constant 0.0102040814 : f32
    %16 = vector.broadcast %cst_6 : f32 to vector<1x128xf32>
    %17 = arith.mulf %15, %16 : vector<1x128xf32>
    %18 = arith.mulf %12, %12 : vector<1x128xf32>
    %19 = arith.subf %17, %18 : vector<1x128xf32>
    %c0_7 = arith.constant 0 : index
    %c0_8 = arith.constant 0 : index
    %20 = vector.load %arg2[%c0_7, %c0_8] : memref<1x128xf32, #tpu.memory_space<vmem>>, vector<1x128xf32>
    %cst_9 = arith.constant 9.99999974E-6 : f32
    %21 = vector.broadcast %cst_9 : f32 to vector<1x128xf32>
    %22 = arith.addf %19, %21 : vector<1x128xf32>
    %23 = math.rsqrt %22 : vector<1x128xf32>
    %24 = arith.mulf %20, %23 : vector<1x128xf32>
    %c0_10 = arith.constant 0 : index
    %c0_11 = arith.constant 0 : index
    %25 = vector.load %arg3[%c0_10, %c0_11] : memref<1x128xf32, #tpu.memory_space<vmem>>, vector<1x128xf32>
    %26 = arith.mulf %12, %24 : vector<1x128xf32>
    %27 = arith.subf %25, %26 : vector<1x128xf32>
    %28 = vector.broadcast %24 : vector<1x128xf32> to vector<104x128xf32>
    %29 = arith.mulf %2, %28 : vector<104x128xf32>
    %30 = vector.broadcast %27 : vector<1x128xf32> to vector<104x128xf32>
    %31 = arith.addf %29, %30 : vector<104x128xf32>
    %cst_12 = arith.constant 0.000000e+00 : f32
    %32 = vector.broadcast %cst_12 : f32 to vector<104x128xf32>
    %33 = arith.maximumf %31, %32 : vector<104x128xf32>
    %c0_13 = arith.constant 0 : index
    %c0_14 = arith.constant 0 : index
    %34 = vector.load %arg4[%c0_13, %c0_14] : memref<104x128xf32, #tpu.memory_space<vmem>>, vector<104x128xf32>
    tpu.vector_store %arg4[%c0_13, %c0_14], %33 {strides = array<i32>} : memref<104x128xf32, #tpu.memory_space<vmem>>, vector<104x128xf32>,
    return
  }
}

module attributes {stable_mosaic.version = 11 : i64} {
  func.func @_bn_relu_kernel(%arg0: memref<456x288xbf16, #tpu.memory_space<vmem>>, %arg1: memref<288x128xbf16, #tpu.memory_space<vmem>>, %arg2: memref<1x128xf32, #tpu.memory_space<vmem>>, %arg3: memref<1x128xf32, #tpu.memory_space<vmem>>, %arg4: memref<456x128xf32, #tpu.memory_space<vmem>>) attributes {dimension_semantics = [], scalar_prefetch = 0 : i64, scratch_operands = 0 : i64, tpu.core_type = #tpu.core_type<tc>} {
    %c0 = arith.constant 0 : index
    %c0_0 = arith.constant 0 : index
    %0 = vector.load %arg0[%c0, %c0_0] : memref<456x288xbf16, #tpu.memory_space<vmem>>, vector<456x288xbf16>
    %c0_1 = arith.constant 0 : index
    %c0_2 = arith.constant 0 : index
    %1 = vector.load %arg1[%c0_1, %c0_2] : memref<288x128xbf16, #tpu.memory_space<vmem>>, vector<288x128xbf16>
    %cst = arith.constant dense<0.000000e+00> : vector<456x128xf32>
    %2 = tpu.matmul %0, %1, %cst {dimension_numbers = #tpu.dot_dimension_numbers<[1], [0], [0], [1], [0, 0, 1, 1], [], []>} : vector<456x288xbf16>, vector<288x128xbf16>, vector<456x128xf32> -> vector<456x128xf32>
    %3 = tpu.iota {dimensions = array<i32: 0>} : vector<456x128xi32>
    %c450_i32 = arith.constant 450 : i32
    %4 = vector.broadcast %c450_i32 : i32 to vector<456x128xi32>
    %5 = arith.cmpi slt, %3, %4 : vector<456x128xi32>
    %6 = arith.extui %5 : vector<456x128xi1> to vector<456x128xi32>
    %7 = arith.sitofp %6 : vector<456x128xi32> to vector<456x128xf32>
    %8 = arith.mulf %2, %7 : vector<456x128xf32>
    %cst_3 = arith.constant dense<0.000000e+00> : vector<128xf32>
    %9 = vector.multi_reduction <add>, %8, %cst_3 [0] : vector<456x128xf32> to vector<128xf32>
    %10 = vector.shape_cast %9 : vector<128xf32> to vector<1x128xf32>
    %cst_4 = arith.constant 0.00222222228 : f32
    %11 = vector.broadcast %cst_4 : f32 to vector<1x128xf32>
    %12 = arith.mulf %10, %11 : vector<1x128xf32>
    %13 = arith.mulf %8, %8 : vector<456x128xf32>
    %cst_5 = arith.constant dense<0.000000e+00> : vector<128xf32>
    %14 = vector.multi_reduction <add>, %13, %cst_5 [0] : vector<456x128xf32> to vector<128xf32>
    %15 = vector.shape_cast %14 : vector<128xf32> to vector<1x128xf32>
    %cst_6 = arith.constant 0.00222222228 : f32
    %16 = vector.broadcast %cst_6 : f32 to vector<1x128xf32>
    %17 = arith.mulf %15, %16 : vector<1x128xf32>
    %18 = arith.mulf %12, %12 : vector<1x128xf32>
    %19 = arith.subf %17, %18 : vector<1x128xf32>
    %c0_7 = arith.constant 0 : index
    %c0_8 = arith.constant 0 : index
    %20 = vector.load %arg2[%c0_7, %c0_8] : memref<1x128xf32, #tpu.memory_space<vmem>>, vector<1x128xf32>
    %cst_9 = arith.constant 9.99999974E-6 : f32
    %21 = vector.broadcast %cst_9 : f32 to vector<1x128xf32>
    %22 = arith.addf %19, %21 : vector<1x128xf32>
    %23 = math.rsqrt %22 : vector<1x128xf32>
    %24 = arith.mulf %20, %23 : vector<1x128xf32>
    %c0_10 = arith.constant 0 : index
    %c0_11 = arith.constant 0 : index
    %25 = vector.load %arg3[%c0_10, %c0_11] : memref<1x128xf32, #tpu.memory_space<vmem>>, vector<1x128xf32>
    %26 = arith.mulf %12, %24 : vector<1x128xf32>
    %27 = arith.subf %25, %26 : vector<1x128xf32>
    %28 = vector.broadcast %24 : vector<1x128xf32> to vector<456x128xf32>
    %29 = arith.mulf %2, %28 : vector<456x128xf32>
    %30 = vector.broadcast %27 : vector<1x128xf32> to vector<456x128xf32>
    %31 = arith.addf %29, %30 : vector<456x128xf32>
    %cst_12 = arith.constant 0.000000e+00 : f32
    %32 = vector.broadcast %cst_12 : f32 to vector<456x128xf32>
    %33 = arith.maximumf %31, %32 : vector<456x128xf32>
    %c0_13 = arith.constant 0 : index
    %c0_14 = arith.constant 0 : index
    %34 = vector.load %arg4[%c0_13, %c0_14] : memref<456x128xf32, #tpu.memory_space<vmem>>, vector<456x128xf32>
    tpu.vector_store %arg4[%c0_13, %c0_14], %33 {strides = array<i32>} : memref<456x128xf32, #tpu.memory_space<vmem>>, vector<456x128xf32>,
    return
  }
}

module attributes {stable_mosaic.version = 11 : i64} {
  func.func @_bn_relu_kernel(%arg0: memref<1928x144xbf16, #tpu.memory_space<vmem>>, %arg1: memref<144x128xbf16, #tpu.memory_space<vmem>>, %arg2: memref<1x128xf32, #tpu.memory_space<vmem>>, %arg3: memref<1x128xf32, #tpu.memory_space<vmem>>, %arg4: memref<1928x128xf32, #tpu.memory_space<vmem>>) attributes {dimension_semantics = [], scalar_prefetch = 0 : i64, scratch_operands = 0 : i64, tpu.core_type = #tpu.core_type<tc>} {
    %c0 = arith.constant 0 : index
    %c0_0 = arith.constant 0 : index
    %0 = vector.load %arg0[%c0, %c0_0] : memref<1928x144xbf16, #tpu.memory_space<vmem>>, vector<1928x144xbf16>
    %c0_1 = arith.constant 0 : index
    %c0_2 = arith.constant 0 : index
    %1 = vector.load %arg1[%c0_1, %c0_2] : memref<144x128xbf16, #tpu.memory_space<vmem>>, vector<144x128xbf16>
    %cst = arith.constant dense<0.000000e+00> : vector<1928x128xf32>
    %2 = tpu.matmul %0, %1, %cst {dimension_numbers = #tpu.dot_dimension_numbers<[1], [0], [0], [1], [0, 0, 1, 1], [], []>} : vector<1928x144xbf16>, vector<144x128xbf16>, vector<1928x128xf32> -> vector<1928x128xf32>
    %3 = tpu.iota {dimensions = array<i32: 0>} : vector<1928x128xi32>
    %c1922_i32 = arith.constant 1922 : i32
    %4 = vector.broadcast %c1922_i32 : i32 to vector<1928x128xi32>
    %5 = arith.cmpi slt, %3, %4 : vector<1928x128xi32>
    %6 = arith.extui %5 : vector<1928x128xi1> to vector<1928x128xi32>
    %7 = arith.sitofp %6 : vector<1928x128xi32> to vector<1928x128xf32>
    %8 = arith.mulf %2, %7 : vector<1928x128xf32>
    %cst_3 = arith.constant dense<0.000000e+00> : vector<128xf32>
    %9 = vector.multi_reduction <add>, %8, %cst_3 [0] : vector<1928x128xf32> to vector<128xf32>
    %10 = vector.shape_cast %9 : vector<128xf32> to vector<1x128xf32>
    %cst_4 = arith.constant 5.20291389E-4 : f32
    %11 = vector.broadcast %cst_4 : f32 to vector<1x128xf32>
    %12 = arith.mulf %10, %11 : vector<1x128xf32>
    %13 = arith.mulf %8, %8 : vector<1928x128xf32>
    %cst_5 = arith.constant dense<0.000000e+00> : vector<128xf32>
    %14 = vector.multi_reduction <add>, %13, %cst_5 [0] : vector<1928x128xf32> to vector<128xf32>
    %15 = vector.shape_cast %14 : vector<128xf32> to vector<1x128xf32>
    %cst_6 = arith.constant 5.20291389E-4 : f32
    %16 = vector.broadcast %cst_6 : f32 to vector<1x128xf32>
    %17 = arith.mulf %15, %16 : vector<1x128xf32>
    %18 = arith.mulf %12, %12 : vector<1x128xf32>
    %19 = arith.subf %17, %18 : vector<1x128xf32>
    %c0_7 = arith.constant 0 : index
    %c0_8 = arith.constant 0 : index
    %20 = vector.load %arg2[%c0_7, %c0_8] : memref<1x128xf32, #tpu.memory_space<vmem>>, vector<1x128xf32>
    %cst_9 = arith.constant 9.99999974E-6 : f32
    %21 = vector.broadcast %cst_9 : f32 to vector<1x128xf32>
    %22 = arith.addf %19, %21 : vector<1x128xf32>
    %23 = math.rsqrt %22 : vector<1x128xf32>
    %24 = arith.mulf %20, %23 : vector<1x128xf32>
    %c0_10 = arith.constant 0 : index
    %c0_11 = arith.constant 0 : index
    %25 = vector.load %arg3[%c0_10, %c0_11] : memref<1x128xf32, #tpu.memory_space<vmem>>, vector<1x128xf32>
    %26 = arith.mulf %12, %24 : vector<1x128xf32>
    %27 = arith.subf %25, %26 : vector<1x128xf32>
    %28 = vector.broadcast %24 : vector<1x128xf32> to vector<1928x128xf32>
    %29 = arith.mulf %2, %28 : vector<1928x128xf32>
    %30 = vector.broadcast %27 : vector<1x128xf32> to vector<1928x128xf32>
    %31 = arith.addf %29, %30 : vector<1928x128xf32>
    %cst_12 = arith.constant 0.000000e+00 : f32
    %32 = vector.broadcast %cst_12 : f32 to vector<1928x128xf32>
    %33 = arith.maximumf %31, %32 : vector<1928x128xf32>
    %c0_13 = arith.constant 0 : index
    %c0_14 = arith.constant 0 : index
    %34 = vector.load %arg4[%c0_13, %c0_14] : memref<1928x128xf32, #tpu.memory_space<vmem>>, vector<1928x128xf32>
    tpu.vector_store %arg4[%c0_13, %c0_14], %33 {strides = array<i32>} : memref<1928x128xf32, #tpu.memory_space<vmem>>, vector<1928x128xf32>,
    return
  }
}

module attributes {stable_mosaic.version = 11 : i64} {
  func.func @_tanh_kernel(%arg0: i32, %arg1: memref<1024x128xbf16, #tpu.memory_space<vmem>>, %arg2: memref<128x128xbf16, #tpu.memory_space<vmem>>, %arg3: memref<1x128xf32, #tpu.memory_space<vmem>>, %arg4: memref<1024x128xf32, #tpu.memory_space<vmem>>) attributes {dimension_semantics = [#tpu.dimension_semantics<parallel>], iteration_bounds = array<i64: 8>, scalar_prefetch = 0 : i64, scratch_operands = 0 : i64, tpu.core_type = #tpu.core_type<tc>, window_params = [{transform_indices = @transform_0, window_bounds = array<i64: 1024, 128>}, {pipeline_mode = #tpu.pipeline_mode<synchronous>, transform_indices = @transform_1, window_bounds = array<i64: 128, 128>}, {pipeline_mode = #tpu.pipeline_mode<synchronous>, transform_indices = @transform_2, window_bounds = array<i64: 1, 128>}, {transform_indices = @transform_3, window_bounds = array<i64: 1024, 128>}]} {
    %c0 = arith.constant 0 : index
    %c0_0 = arith.constant 0 : index
    %0 = vector.load %arg1[%c0, %c0_0] : memref<1024x128xbf16, #tpu.memory_space<vmem>>, vector<1024x128xbf16>
    %c0_1 = arith.constant 0 : index
    %c0_2 = arith.constant 0 : index
    %1 = vector.load %arg2[%c0_1, %c0_2] : memref<128x128xbf16, #tpu.memory_space<vmem>>, vector<128x128xbf16>
    %cst = arith.constant dense<0.000000e+00> : vector<1024x128xf32>
    %2 = tpu.matmul %0, %1, %cst {dimension_numbers = #tpu.dot_dimension_numbers<[1], [0], [0], [1], [0, 0, 1, 1], [], []>} : vector<1024x128xbf16>, vector<128x128xbf16>, vector<1024x128xf32> -> vector<1024x128xf32>
    %c0_3 = arith.constant 0 : index
    %c0_4 = arith.constant 0 : index
    %3 = vector.load %arg3[%c0_3, %c0_4] : memref<1x128xf32, #tpu.memory_space<vmem>>, vector<1x128xf32>
    %4 = vector.broadcast %3 : vector<1x128xf32> to vector<1024x128xf32>
    %5 = arith.addf %2, %4 : vector<1024x128xf32>
    %6 = math.tanh %5 : vector<1024x128xf32>
    %c0_5 = arith.constant 0 : index
    %c0_6 = arith.constant 0 : index
    %7 = vector.load %arg4[%c0_5, %c0_6] : memref<1024x128xf32, #tpu.memory_space<vmem>>, vector<1024x128xf32>
    tpu.vector_store %arg4[%c0_5, %c0_6], %6 {strides = array<i32>} : memref<1024x128xf32, #tpu.memory_space<vmem>>, vector<1024x128xf32>,
    return
  }
  func.func @transform_0(%arg0: i32) -> (i32, i32) {
    %c0_i32 = arith.constant 0 : i32
    %c0_i32_0 = arith.constant 0 : i32
    return %arg0, %c0_i32 : i32, i32
  }
  func.func @transform_1(%arg0: i32) -> (i32, i32) {
    %c0_i32 = arith.constant 0 : i32
    %c0_i32_0 = arith.constant 0 : i32
    %c0_i32_1 = arith.constant 0 : i32
    return %c0_i32, %c0_i32_0 : i32, i32
  }
  func.func @transform_2(%arg0: i32) -> (i32, i32) {
    %c0_i32 = arith.constant 0 : i32
    %c0_i32_0 = arith.constant 0 : i32
    %c0_i32_1 = arith.constant 0 : i32
    return %c0_i32, %c0_i32_0 : i32, i32
  }
  func.func @transform_3(%arg0: i32) -> (i32, i32) {
    %c0_i32 = arith.constant 0 : i32
    %c0_i32_0 = arith.constant 0 : i32
    return %arg0, %c0_i32 : i32, i32
  }
}

</mosaic_0001>

<bundles_post_ra>
// kernel: _lambda_.5
= control target key start
LH: loop header
LB: loop body
LE: loop exit
PB: predicated region body
PF: predicated region fallthrough
CT: control target
= control target key end

     0   :  { %9 = vsyncpa [#allocation3], 0  ;;  %s349_s0 = inlined_call_operand.vmem [shape: bf16[24,72], index: 0, kind: input, shape index: {}]   ;;  %s350_s1 = inlined_call_operand.hbm [shape: bf16[72,128], index: 1, kind: input, shape index: {}]   ;;  %s351_s2 = inlined_call_operand.hbm [shape: f32[1,128], index: 2, kind: input, shape index: {}]   ;;  %s352_s3 = inlined_call_operand.vmem [shape: f32[1,128], index: 3, kind: input, shape index: {}]   ;;  %s353_s4 = inlined_call_operand.vmem [shape: f32[24,128], index: 4, kind: output, shape index: {}]  }
   0x1   :  { %s17_s17 = sshll.u32 %s350_s1, 4  ;;  %s18_s17 = int_to_ptr.hbm [resolvable:$true] %s17_s17 }
   0x2   :  { %10 = vsyncpa [#allocation5], 0  ;;  %s295_s18 = smov [#allocation2]   ;;  %s31_s22 = sshll.u32 %s351_s2, 4  ;;  %s32_s22 = int_to_ptr.hbm [resolvable:$true] %s31_s22 }
   0x3   :  { %s19_s19 = sshll.u32 %s295_s18, 4  ;;  %s296_s23 = smov 64   ;;  %s20_s19 = int_to_ptr.vmem [resolvable:$true] %s19_s19 }
   0x4   :  { %s297_s24 = smov 4   ;;  %s298_s25 = smov [#allocation4]  }
   0x5   :  { %25 = dma.hbm_to_vmem [thread:$0]  %s18_s17, 576, %s20_s19, [#allocation3], %s296_s23, %s296_s23, %s297_s24  }
   0x6   :  { %s33_s26 = sshll.u32 %s298_s25, 4  ;;  %s34_s26 = int_to_ptr.vmem [resolvable:$true] %s33_s26 }
   0x7   :  { %36 = dma.hbm_to_vmem [thread:$0]  %s32_s22, 16, %s34_s26, [#allocation5]  }
   0x8   :  { %291 = dma.done.wait [#allocation3], 576  }
   0x9   :  { %292 = vsyncadd [#allocation3], 4294966720 }
   0xa   :  { %293 = dma.done.wait [#allocation5], 16  }
   0xb   :  { %294 = vsyncadd [#allocation5], 4294967280  ;;  %v59_v0 = vld [vmem:[#allocation2 + $0x20] sm:$0xf]  ;;  %vm102_vm0 = vcmask 1043456   ;;  %v230_v4 = vld [vmem:[#allocation2 + $0x18] sm:$0xff]  ;;  %v124_v12 = vlaneseq }
   0xc   :  { %v85_v1 = vunpack.c.l.b16 %v59_v0  ;;  %v229_v5 = vld [vmem:[#allocation2 + $0x10] sm:$0xff]  ;;  %v228_v6 = vld [vmem:[#allocation2 + $0x8] sm:$0xff]  ;;  %v227_v9 = vld [vmem:[#allocation2] sm:$0xff]  ;;  %vm95_vm1 = vcmask 588800   ;;  %v299_v17 = vmov 0.0  }
   0xd   :  { %v50_v7 = vld [vmem:[%s349_s0 + $0x8] sm:$0xf]  ;;  %v226_v10 = vld [vmem:[%s349_s0] sm:$0xff]  ;;  %v125_v13 = vshrl.u32 %v124_v12, 7 }
   0xe   :  { %v90_v2 = vpack.c.b16 %v85_v1, %v85_v1  ;;  %v65_v8 = vunpack.c.l.b16 %v50_v7  ;;  %v163_v51 = vld [vmem:[#allocation4] sm:$0x1]  ;;  %v176_v55 = vld [vmem:[%s352_s3] sm:$0x1] }
   0xf   :  { %v127_v14 = vadd.s32 16, %v125_v13 }
  0x10   :  { %v104_v3 = vsel %vm102_vm0, %v90_v2, 0  ;;  %v67_v11 = vpack.c.b16 %v65_v8, %v65_v8 }
  0x11   :  { %109 = vmatpush.bf16.msra.mxu0 %v104_v3  ;;  %231 = vmatpush.bf16.msra.mxu1 %v104_v3  ;;  %vm130_vm2 = vcmp.lt.s32.totalorder %v127_v14, 18 }
  0x12   :  { %v225_v18 = vsel %vm130_vm2, 1.0, %v299_v17 }
  0x15   :  { %110 = vmatpush.bf16.msra.mxu0 %v230_v4  ;;  %232 = vmatpush.bf16.msra.mxu1 %v230_v4 }
  0x19   :  { %111 = vmatpush.bf16.msra.mxu0 %v229_v5  ;;  %233 = vmatpush.bf16.msra.mxu1 %v229_v5 }
  0x1d   :  { %112 = vmatpush.bf16.msra.mxu0 %v228_v6  ;;  %234 = vmatpush.bf16.msra.mxu1 %v228_v6 }
  0x21   :  { %113 = vmatpush.bf16.msra.mxu0 %v227_v9  ;;  %235 = vmatpush.bf16.msra.mxu1 %v227_v9 }
  0x24   :  { %223 = vmatmul.msk.bf16.vlgmr.msra.gmra.mxu0 %vm95_vm1, %v226_v10  ;;  %224 = vmatmul.msk.bf16.vlgmr.msra.gmra.mxu1 %vm95_vm1, %v67_v11 }
  0xa1   :  { %v115_v15 = vpop.f32.mrf.mxu0  ;;  %v120_v16 = vpop.f32.mrf.mxu1 }
  0xa2   :  { %v139_v19 = vmul.f32 %v225_v18, %v120_v16  ;;  %v149_v22 = vmul.f32 %v115_v15, %v115_v15 }
  0xa4   :  { %v151_v23 = vmul.f32 %v139_v19, %v139_v19 }
  0xa9   :  { %v117_v20 = vpop.f32.mrf.mxu0  ;;  %v122_v21 = vpop.f32.mrf.mxu1 }
  0xaa   :  { %v140_v24 = vadd.f32 %v117_v20, %v115_v15  ;;  %v150_v25 = vmul.f32 %v117_v20, %v117_v20 }
  0xac   :  { %v141_v26 = vadd.f32 %v140_v24, %v139_v19  ;;  %v152_v27 = vadd.f32 %v150_v25, %v149_v22 }
  0xae   :  { %v142_v28 = vrot.slane %v141_v26, 4  ;;  %v153_v29 = vadd.f32 %v152_v27, %v151_v23 }
  0xb0   :  { %v143_v30 = vadd.f32 %v142_v28, %v141_v26  ;;  %v154_v31 = vrot.slane %v153_v29, 4 }
  0xb2   :  { %v144_v32 = vrot.slane %v143_v30, 2  ;;  %v155_v33 = vadd.f32 %v154_v31, %v153_v29 }
  0xb4   :  { %v145_v34 = vadd.f32 %v144_v32, %v143_v30  ;;  %v156_v35 = vrot.slane %v155_v33, 2 }
  0xb6   :  { %v146_v36 = vrot.slane %v145_v34, 1  ;;  %v157_v37 = vadd.f32 %v156_v35, %v155_v33 }
  0xb8   :  { %v147_v38 = vadd.f32 %v146_v36, %v145_v34  ;;  %v158_v39 = vrot.slane %v157_v37, 1 }
  0xba   :  { %v148_v40 = vmul.f32 0.055555556, %v147_v38  ;;  %v159_v41 = vadd.f32 %v158_v39, %v157_v37 }
  0xbc   :  { %v160_v42 = vmul.f32 0.055555556, %v159_v41  ;;  %v161_v43 = vmul.f32 %v148_v40, %v148_v40 }
  0xbe   :  { %v162_v44 = vsub.f32 %v160_v42, %v161_v43 }
  0xc0   :  { %v164_v45 = vadd.f32 1e-05, %v162_v44 }
  0xc2   :  { %241 = vrsqrt.f32 %v164_v45  ;;  %vm171_vm4 = vweird.f32 %v164_v45 }
  0xc8   :  { %v242_v46 = vpop.eup %241 }
  0xc9   :  { %v166_v47 = vmul.f32 %v242_v46, %v164_v45  ;;  %vm172_vm3 = vweird.f32 %v242_v46 }
  0xca   :  { %vm173_vm5 = vmor %vm171_vm4, %vm172_vm3 }
  0xcb   :  { %v167_v48 = vmul.f32 %v242_v46, %v166_v47 }
  0xcd   :  { %v168_v49 = vmul.f32 0.5, %v167_v48 }
  0xcf   :  { %v169_v50 = vsub.f32 1.5, %v168_v49 }
  0xd1   :  { %v170_v52 = vmul.f32 %v242_v46, %v169_v50 }
  0xd3   :  { %v174_v53 = vsel %vm173_vm5, %v242_v46, %v170_v52 }
  0xd4   :  { %v175_v54 = vmul.f32 %v174_v53, %v163_v51 }
  0xd6   :  { %v177_v56 = vmul.f32 %v175_v54, %v148_v40  ;;  %v180_v57 = vperm.slane %v175_v54, 0 }
  0xd8   :  { %v178_v58 = vsub.f32 %v176_v55, %v177_v56  ;;  %v182_v59 = vmul.f32 %v180_v57, %v115_v15  ;;  %v183_v60 = vmul.f32 %v180_v57, %v117_v20  ;;  %v184_v61 = vmul.f32 %v180_v57, %v120_v16 }
  0xda   :  { %v186_v62 = vperm.slane %v178_v58, 0 }
  0xdc   :  { %v188_v63 = vadd.f32 %v186_v62, %v182_v59  ;;  %v189_v0 = vadd.f32 %v186_v62, %v183_v60  ;;  %v190_v1 = vadd.f32 %v186_v62, %v184_v61 }
  0xde   :  { %v191_v2 = vmax.f32 %v188_v63, 0.0  ;;  %v192_v3 = vmax.f32 %v189_v0, 0.0  ;;  %v193_v4 = vmax.f32 %v190_v1, 0.0 }
  0xe0   :  { %194 = vst [vmem:[%s353_s4] sm:$0xff] %v191_v2 }
  0xe1   :  { %195 = vst [vmem:[%s353_s4 + $0x8] sm:$0xff] %v192_v3 }
  0xe2   :  { %196 = vst [vmem:[%s353_s4 + $0x10] sm:$0xff] %v193_v4 }
  0xe3   :  { %201 = vsyncpa [#allocation3], 1 }
  0xe4   :  { %202 = vsyncpa [#allocation5], 1 }

// kernel: _lambda_.6
= control target key start
LH: loop header
LB: loop body
LE: loop exit
PB: predicated region body
PF: predicated region fallthrough
CT: control target
= control target key end

     0   :  { %9 = vsyncpa [#allocation3], 0  ;;  %s1767_s0 = inlined_call_operand.vmem [shape: bf16[104,576], index: 0, kind: input, shape index: {}]   ;;  %s1768_s1 = inlined_call_operand.hbm [shape: bf16[576,128], index: 1, kind: input, shape index: {}]   ;;  %s1769_s2 = inlined_call_operand.hbm [shape: f32[1,128], index: 2, kind: input, shape index: {}]   ;;  %s1770_s3 = inlined_call_operand.vmem [shape: f32[1,128], index: 3, kind: input, shape index: {}]   ;;  %s1771_s4 = inlined_call_operand.vmem [shape: f32[104,128], index: 4, kind: output, shape index: {}]  }
   0x1   :  { %s17_s17 = sshll.u32 %s1768_s1, 4  ;;  %s18_s17 = int_to_ptr.hbm [resolvable:$true] %s17_s17 }
   0x2   :  { %10 = vsyncpa [#allocation5], 0  ;;  %s1399_s18 = smov [#allocation2]   ;;  %s31_s22 = sshll.u32 %s1769_s2, 4  ;;  %s32_s22 = int_to_ptr.hbm [resolvable:$true] %s31_s22 }
   0x3   :  { %s19_s19 = sshll.u32 %s1399_s18, 4  ;;  %s1400_s23 = smov 64   ;;  %s20_s19 = int_to_ptr.vmem [resolvable:$true] %s19_s19 }
   0x4   :  { %s1401_s24 = smov 4   ;;  %s1402_s25 = smov [#allocation4]  }
   0x5   :  { %25 = dma.hbm_to_vmem [thread:$0]  %s18_s17, 4608, %s20_s19, [#allocation3], %s1400_s23, %s1400_s23, %s1401_s24  }
   0x6   :  { %s33_s26 = sshll.u32 %s1402_s25, 4  ;;  %s34_s26 = int_to_ptr.vmem [resolvable:$true] %s33_s26 }
   0x7   :  { %36 = dma.hbm_to_vmem [thread:$0]  %s32_s22, 16, %s34_s26, [#allocation5]  }
   0x8   :  { %1395 = dma.done.wait [#allocation3], 4608  }
   0x9   :  { %1396 = vsyncadd [#allocation3], 4294962688 }
   0xa   :  { %1397 = dma.done.wait [#allocation5], 16  }
   0xb   :  { %1398 = vsyncadd [#allocation5], 4294967280  ;;  %v1287_v0 = vld [vmem:[#allocation2 + $0x38] sm:$0xff]  ;;  %v1286_v1 = vld [vmem:[#allocation2 + $0x30] sm:$0xff]  ;;  %vm542_vm0 = vcmask 523264  }
   0xc   :  { %1316 = vmatpush.bf16.msra.mxu1 %v1287_v0  ;;  %1317 = vmatpush.bf16.msra.mxu2 %v1287_v0  ;;  %v1285_v2 = vld [vmem:[#allocation2 + $0x28] sm:$0xff]  ;;  %v1284_v3 = vld [vmem:[#allocation2 + $0x20] sm:$0xff]  ;;  %v1283_v4 = vld [vmem:[#allocation2 + $0x18] sm:$0xff] }
   0xd   :  { %1318 = vmatpush.bf16.msra.mxu3 %v1287_v0  ;;  %564 = vmatpush.bf16.msra.mxu0 %v1287_v0  ;;  %v1282_v5 = vld [vmem:[#allocation2 + $0x10] sm:$0xff]  ;;  %v1281_v6 = vld [vmem:[#allocation2 + $0x8] sm:$0xff]  ;;  %v1280_v8 = vld [vmem:[#allocation2] sm:$0xff] }
   0xe   :  { %v1438_v7 = vld [vmem:[%s1767_s0 + $0xf0] sm:$0xff]  ;;  %v1262_v10 = vld [vmem:[%s1767_s0 + $0x60] sm:$0xf0]  ;;  %v1060_v11 = vld [vmem:[%s1767_s0 + $0xa0] sm:$0xf] }
   0xf   :  { %v1020_v9 = vld [vmem:[%s1767_s0 + $0x50] sm:$0xf]  ;;  %v1272_v12 = vld [vmem:[%s1767_s0 + $0xb0] sm:$0xf0]  ;;  %v980_v13 = vld [vmem:[%s1767_s0] sm:$0xf]  ;;  %v258_v15 = vunpack.c.l.b16 %v1438_v7 }
  0x10   :  { %1319 = vmatpush.bf16.msra.mxu1 %v1286_v1  ;;  %1320 = vmatpush.bf16.msra.mxu2 %v1286_v1  ;;  %v1252_v14 = vld [vmem:[%s1767_s0 + $0x10] sm:$0xf0]  ;;  %v1311_v16 = vld [vmem:[#allocation2 + $0xf8] sm:$0xff]  ;;  %v1021_v18 = vor.u32 %v1262_v10, %v1020_v9  ;;  %v1061_v19 = vor.u32 %v1272_v12, %v1060_v11  ;;  %v1309_v28 = vld [vmem:[#allocation2 + $0xe8] sm:$0xff] }
  0x11   :  { %1321 = vmatpush.bf16.msra.mxu3 %v1286_v1  ;;  %565 = vmatpush.bf16.msra.mxu0 %v1286_v1  ;;  %v1303_v17 = vld [vmem:[#allocation2 + $0xb8] sm:$0xff]  ;;  %v981_v21 = vor.u32 %v1252_v14, %v980_v13  ;;  %v293_v22 = vpack.c.b16 %v258_v15, %v258_v15  ;;  %v1310_v24 = vld [vmem:[#allocation2 + $0xf0] sm:$0xff]  ;;  %v1301_v29 = vld [vmem:[#allocation2 + $0xa8] sm:$0xff] }
  0x12   :  { %v1295_v20 = vld [vmem:[#allocation2 + $0x78] sm:$0xff]  ;;  %v1302_v25 = vld [vmem:[#allocation2 + $0xb0] sm:$0xff]  ;;  %v1293_v30 = vld [vmem:[#allocation2 + $0x68] sm:$0xff] }
  0x13   :  { %v1315_v23 = vld [vmem:[#allocation2 + $0x118] sm:$0xff]  ;;  %v1294_v26 = vld [vmem:[#allocation2 + $0x70] sm:$0xff]  ;;  %v1313_v31 = vld [vmem:[#allocation2 + $0x108] sm:$0xff] }
  0x14   :  { %1322 = vmatpush.bf16.msra.mxu1 %v1285_v2  ;;  %1323 = vmatpush.bf16.msra.mxu2 %v1285_v2  ;;  %v1314_v27 = vld [vmem:[#allocation2 + $0x110] sm:$0xff]  ;;  %v1308_v32 = vld [vmem:[#allocation2 + $0xe0] sm:$0xff]  ;;  %v1040_v35 = vld [vmem:[%s1767_s0 + $0x78] sm:$0xf] }
  0x15   :  { %1324 = vmatpush.bf16.msra.mxu3 %v1285_v2  ;;  %566 = vmatpush.bf16.msra.mxu0 %v1285_v2  ;;  %v1300_v33 = vld [vmem:[#allocation2 + $0xa0] sm:$0xff]  ;;  %v1267_v36 = vld [vmem:[%s1767_s0 + $0x88] sm:$0xf0]  ;;  %v1080_v37 = vld [vmem:[%s1767_s0 + $0xc8] sm:$0xf] }
  0x16   :  { %v1292_v34 = vld [vmem:[#allocation2 + $0x60] sm:$0xff]  ;;  %v1277_v38 = vld [vmem:[%s1767_s0 + $0xd8] sm:$0xf0]  ;;  %v1000_v39 = vld [vmem:[%s1767_s0 + $0x28] sm:$0xf]  ;;  %v1041_v44 = vor.u32 %v1267_v36, %v1040_v35 }
  0x17   :  { %v1257_v40 = vld [vmem:[%s1767_s0 + $0x38] sm:$0xf0]  ;;  %v1312_v41 = vld [vmem:[#allocation2 + $0x100] sm:$0xff]  ;;  %v1081_v45 = vor.u32 %v1277_v38, %v1080_v37  ;;  %v1306_v48 = vld [vmem:[#allocation2 + $0xd0] sm:$0xff] }
  0x18   :  { %1325 = vmatpush.bf16.msra.mxu1 %v1284_v3  ;;  %1326 = vmatpush.bf16.msra.mxu2 %v1284_v3  ;;  %v1307_v42 = vld [vmem:[#allocation2 + $0xd8] sm:$0xff]  ;;  %v1001_v47 = vor.u32 %v1257_v40, %v1000_v39  ;;  %v1298_v49 = vld [vmem:[#allocation2 + $0x90] sm:$0xff]  ;;  %v1305_v51 = vld [vmem:[#allocation2 + $0xc8] sm:$0xff] }
  0x19   :  { %1327 = vmatpush.bf16.msra.mxu3 %v1284_v3  ;;  %567 = vmatpush.bf16.msra.mxu0 %v1284_v3  ;;  %v1299_v43 = vld [vmem:[#allocation2 + $0x98] sm:$0xff]  ;;  %v1290_v50 = vld [vmem:[#allocation2 + $0x50] sm:$0xff]  ;;  %v1297_v52 = vld [vmem:[#allocation2 + $0x88] sm:$0xff] }
  0x1a   :  { %v1291_v46 = vld [vmem:[#allocation2 + $0x58] sm:$0xff]  ;;  %v1289_v53 = vld [vmem:[#allocation2 + $0x48] sm:$0xff]  ;;  %v1304_v54 = vld [vmem:[#allocation2 + $0xc0] sm:$0xff] }
  0x1b   :  { %v1296_v55 = vld [vmem:[#allocation2 + $0x80] sm:$0xff]  ;;  %v1251_v56 = vld [vmem:[%s1767_s0 + $0xc] sm:$0xf]  ;;  %v982_v60 = vld [vmem:[%s1767_s0 + $0x14] sm:$0xf0] }
  0x1c   :  { %1328 = vmatpush.bf16.msra.mxu1 %v1283_v4  ;;  %1329 = vmatpush.bf16.msra.mxu2 %v1283_v4  ;;  %v990_v57 = vld [vmem:[%s1767_s0 + $0x1c] sm:$0xf0]  ;;  %v1250_v59 = vld [vmem:[%s1767_s0 + $0x4] sm:$0xf]  ;;  %v988_v61 = vld [vmem:[%s1767_s0 + $0x8] sm:$0xf] }
  0x1d   :  { %1330 = vmatpush.bf16.msra.mxu3 %v1283_v4  ;;  %568 = vmatpush.bf16.msra.mxu0 %v1283_v4  ;;  %v1288_v58 = vld [vmem:[#allocation2 + $0x40] sm:$0xff]  ;;  %v1253_v62 = vld [vmem:[%s1767_s0 + $0x18] sm:$0xf0]  ;;  %v993_v63 = vor.u32 %v1251_v56, %v990_v57  ;;  %v996_v0 = vld [vmem:[%s1767_s0 + $0x10] sm:$0xf]  ;;  %v985_v2 = vor.u32 %v1250_v59, %v982_v60 }
  0x1e   :  { %v1254_v1 = vld [vmem:[%s1767_s0 + $0x20] sm:$0xf0]  ;;  %v989_v3 = vor.u32 %v1253_v62, %v988_v61  ;;  %v1002_v9 = vld [vmem:[%s1767_s0 + $0x3c] sm:$0xf0]  ;;  %v1008_v10 = vld [vmem:[%s1767_s0 + $0x30] sm:$0xf] }
  0x1f   :  { %v997_v4 = vor.u32 %v1254_v1, %v996_v0  ;;  %v1258_v11 = vld [vmem:[%s1767_s0 + $0x40] sm:$0xf0]  ;;  %v1016_v13 = vld [vmem:[%s1767_s0 + $0x38] sm:$0xf]  ;;  %v1259_v14 = vld [vmem:[%s1767_s0 + $0x48] sm:$0xf0] }
  0x20   :  { %1331 = vmatpush.bf16.msra.mxu1 %v1282_v5  ;;  %1332 = vmatpush.bf16.msra.mxu2 %v1282_v5  ;;  %v1268_v35 = vld [vmem:[%s1767_s0 + $0x90] sm:$0xf0]  ;;  %v1056_v37 = vld [vmem:[%s1767_s0 + $0x88] sm:$0xf]  ;;  %v1269_v38 = vld [vmem:[%s1767_s0 + $0x98] sm:$0xf0] }
  0x21   :  { %1333 = vmatpush.bf16.msra.mxu3 %v1282_v5  ;;  %569 = vmatpush.bf16.msra.mxu0 %v1282_v5  ;;  %v1256_v5 = vld [vmem:[%s1767_s0 + $0x34] sm:$0xf]  ;;  %v1275_v56 = vld [vmem:[%s1767_s0 + $0xcc] sm:$0xf]  ;;  %v1082_v57 = vld [vmem:[%s1767_s0 + $0xdc] sm:$0xf0] }
  0x22   :  { %v1278_v59 = vld [vmem:[%s1767_s0 + $0xe0] sm:$0xf0]  ;;  %v1096_v61 = vld [vmem:[%s1767_s0 + $0xd8] sm:$0xf]  ;;  %v1279_v62 = vld [vmem:[%s1767_s0 + $0xe8] sm:$0xf0] }
  0x23   :  { %v1097_v1 = vor.u32 %v1279_v62, %v1096_v61 }
  0x24   :  { %1334 = vmatpush.bf16.msra.mxu1 %v1281_v6  ;;  %1335 = vmatpush.bf16.msra.mxu2 %v1281_v6 }
  0x25   :  { %1336 = vmatpush.bf16.msra.mxu3 %v1281_v6  ;;  %570 = vmatpush.bf16.msra.mxu0 %v1281_v6  ;;  %v1010_v6 = vld [vmem:[%s1767_s0 + $0x44] sm:$0xf0] }
  0x26   :  { %v1013_v12 = vor.u32 %v1256_v5, %v1010_v6  ;;  %v259_v5 = vunpack.c.h.b16 %v1438_v7 }
  0x28   :  { %1337 = vmatpush.bf16.msra.mxu1 %v1280_v8  ;;  %1338 = vmatpush.bf16.msra.mxu2 %v1280_v8 }
  0x29   :  { %1339 = vmatpush.bf16.msra.mxu3 %v1280_v8  ;;  %571 = vmatpush.bf16.msra.mxu0 %v1280_v8  ;;  %v1255_v8 = vld [vmem:[%s1767_s0 + $0x2c] sm:$0xf] }
  0x2a   :  { %v1005_v15 = vor.u32 %v1255_v8, %v1002_v9 }
  0x2b   :  { %582 = vmatmul.bf16.vlgmr.msra.gmra.mxu1 %v1021_v18  ;;  %592 = vmatmul.bf16.vlgmr.msra.gmra.mxu2 %v1061_v19  ;;  %v1261_v18 = vld [vmem:[%s1767_s0 + $0x5c] sm:$0xf]  ;;  %v1030_v19 = vld [vmem:[%s1767_s0 + $0x6c] sm:$0xf0] }
  0x2c   :  { %650 = vmatpush.bf16.msrb.mxu2 %v1303_v17  ;;  %607 = vmatpush.bf16.msrb.mxu1 %v1295_v20  ;;  %v1017_v17 = vor.u32 %v1259_v14, %v1016_v13  ;;  %v1260_v20 = vld [vmem:[%s1767_s0 + $0x54] sm:$0xf] }
  0x2d   :  { %693 = vmatpush.bf16.msrb.mxu3 %v1311_v16  ;;  %572 = vmatmul.bf16.vlgmr.msra.gmra.mxu0 %v981_v21  ;;  %v1009_v16 = vor.u32 %v1258_v11, %v1008_v10  ;;  %v1022_v21 = vld [vmem:[%s1767_s0 + $0x64] sm:$0xf0]  ;;  %v294_v10 = vpack.c.b16 %v259_v5, %v259_v5 }
  0x2e   :  { %602 = vmatmul.bf16.vlgmr.msra.gmra.mxu3 %v293_v22  ;;  %740 = vmatpush.bf16.msrb.mxu0 %v1315_v23  ;;  %v1028_v22 = vld [vmem:[%s1767_s0 + $0x58] sm:$0xf]  ;;  %v1263_v23 = vld [vmem:[%s1767_s0 + $0x68] sm:$0xf0] }
  0x30   :  { %651 = vmatpush.bf16.msrb.mxu2 %v1302_v25  ;;  %608 = vmatpush.bf16.msrb.mxu1 %v1294_v26  ;;  %v1036_v25 = vld [vmem:[%s1767_s0 + $0x60] sm:$0xf]  ;;  %v1264_v26 = vld [vmem:[%s1767_s0 + $0x70] sm:$0xf0] }
  0x31   :  { %694 = vmatpush.bf16.msrb.mxu3 %v1310_v24  ;;  %v1033_v24 = vor.u32 %v1261_v18, %v1030_v19 }
  0x32   :  { %741 = vmatpush.bf16.msrb.mxu0 %v1314_v27  ;;  %v1025_v27 = vor.u32 %v1260_v20, %v1022_v21 }
  0x34   :  { %652 = vmatpush.bf16.msrb.mxu2 %v1301_v29  ;;  %609 = vmatpush.bf16.msrb.mxu1 %v1293_v30  ;;  %v1037_v29 = vor.u32 %v1264_v26, %v1036_v25  ;;  %v1266_v30 = vld [vmem:[%s1767_s0 + $0x84] sm:$0xf] }
  0x35   :  { %695 = vmatpush.bf16.msrb.mxu3 %v1309_v28  ;;  %v1029_v28 = vor.u32 %v1263_v23, %v1028_v22 }
  0x36   :  { %742 = vmatpush.bf16.msrb.mxu0 %v1313_v31  ;;  %v1050_v31 = vld [vmem:[%s1767_s0 + $0x94] sm:$0xf0] }
  0x37   :  { %v1053_v36 = vor.u32 %v1266_v30, %v1050_v31 }
  0x38   :  { %653 = vmatpush.bf16.msrb.mxu2 %v1300_v33  ;;  %610 = vmatpush.bf16.msrb.mxu1 %v1292_v34  ;;  %v1042_v33 = vld [vmem:[%s1767_s0 + $0x8c] sm:$0xf0]  ;;  %v1048_v34 = vld [vmem:[%s1767_s0 + $0x80] sm:$0xf] }
  0x39   :  { %696 = vmatpush.bf16.msrb.mxu3 %v1308_v32  ;;  %v1265_v32 = vld [vmem:[%s1767_s0 + $0x7c] sm:$0xf]  ;;  %v1049_v40 = vor.u32 %v1268_v35, %v1048_v34 }
  0x3a   :  { %743 = vmatpush.bf16.msrb.mxu0 %v1312_v41  ;;  %v1045_v39 = vor.u32 %v1265_v32, %v1042_v33  ;;  %v1057_v41 = vor.u32 %v1269_v38, %v1056_v37 }
  0x3b   :  { %587 = vmatmul.bf16.gmra.mxu1 %v1041_v44  ;;  %597 = vmatmul.bf16.gmra.mxu2 %v1081_v45  ;;  %v1270_v44 = vld [vmem:[%s1767_s0 + $0xa4] sm:$0xf]  ;;  %v1062_v45 = vld [vmem:[%s1767_s0 + $0xb4] sm:$0xf0] }
  0x3c   :  { %654 = vmatpush.bf16.msrb.mxu2 %v1299_v43  ;;  %611 = vmatpush.bf16.msrb.mxu1 %v1291_v46  ;;  %v1070_v43 = vld [vmem:[%s1767_s0 + $0xbc] sm:$0xf0]  ;;  %v1068_v46 = vld [vmem:[%s1767_s0 + $0xa8] sm:$0xf] }
  0x3d   :  { %697 = vmatpush.bf16.msrb.mxu3 %v1307_v42  ;;  %577 = vmatmul.bf16.gmra.mxu0 %v1001_v47  ;;  %v1271_v42 = vld [vmem:[%s1767_s0 + $0xac] sm:$0xf]  ;;  %v1273_v47 = vld [vmem:[%s1767_s0 + $0xb8] sm:$0xf0] }
  0x40   :  { %655 = vmatpush.bf16.msrb.mxu2 %v1298_v49  ;;  %612 = vmatpush.bf16.msrb.mxu1 %v1290_v50  ;;  %v1076_v49 = vld [vmem:[%s1767_s0 + $0xb0] sm:$0xf]  ;;  %v1274_v50 = vld [vmem:[%s1767_s0 + $0xc0] sm:$0xf0] }
  0x41   :  { %698 = vmatpush.bf16.msrb.mxu3 %v1306_v48  ;;  %v1073_v48 = vor.u32 %v1271_v42, %v1070_v43 }
  0x44   :  { %656 = vmatpush.bf16.msrb.mxu2 %v1297_v52  ;;  %613 = vmatpush.bf16.msrb.mxu1 %v1289_v53  ;;  %v1069_v52 = vor.u32 %v1273_v47, %v1068_v46  ;;  %v1077_v53 = vor.u32 %v1274_v50, %v1076_v49 }
  0x45   :  { %699 = vmatpush.bf16.msrb.mxu3 %v1305_v51  ;;  %v1065_v51 = vor.u32 %v1270_v44, %v1062_v45 }
  0x48   :  { %657 = vmatpush.bf16.msrb.mxu2 %v1296_v55  ;;  %614 = vmatpush.bf16.msrb.mxu1 %v1288_v58  ;;  %v1090_v55 = vld [vmem:[%s1767_s0 + $0xe4] sm:$0xf0]  ;;  %v1088_v58 = vld [vmem:[%s1767_s0 + $0xd0] sm:$0xf] }
  0x49   :  { %700 = vmatpush.bf16.msrb.mxu3 %v1304_v54  ;;  %v1276_v54 = vld [vmem:[%s1767_s0 + $0xd4] sm:$0xf]  ;;  %v1089_v0 = vor.u32 %v1278_v59, %v1088_v58 }
  0x4a   :  { %v1093_v60 = vor.u32 %v1276_v54, %v1090_v55 }
  0x4b   :  { %615 = vmatmul.bf16.vlgmr.msrb.gmra.mxu1 %v985_v2  ;;  %658 = vmatmul.bf16.vlgmr.msrb.gmra.mxu2 %v989_v3  ;;  %v85_v2 = vld [vmem:[%s1767_s0 + $0xf8] sm:$0xff] }
  0x4c   :  { %701 = vmatmul.bf16.vlgmr.msrb.gmra.mxu3 %v993_v63  ;;  %v1085_v63 = vor.u32 %v1275_v56, %v1082_v57  ;;  %v261_v3 = vunpack.c.h.b16 %v85_v2  ;;  %v260_v6 = vunpack.c.l.b16 %v85_v2 }
  0x4d   :  { %1242 = vmatmul.msk.bf16.vlgmr.msrb.gmra.mxu0 %vm542_vm0, %v997_v4  ;;  %v86_v4 = vld [vmem:[%s1767_s0 + $0x100] sm:$0xf] }
  0x4e   :  { %v262_v8 = vunpack.c.l.b16 %v86_v4  ;;  %v296_v9 = vpack.c.b16 %v261_v3, %v261_v3  ;;  %v295_v11 = vpack.c.b16 %v260_v6, %v260_v6 }
  0x50   :  { %v297_v13 = vpack.c.b16 %v262_v8, %v262_v8 }
  0x5b   :  { %620 = vmatmul.bf16.gmra.mxu1 %v1005_v15  ;;  %663 = vmatmul.bf16.gmra.mxu2 %v1009_v16 }
  0x5c   :  { %706 = vmatmul.bf16.gmra.mxu3 %v1013_v12 }
  0x5d   :  { %1243 = vmatmul.msk.bf16.gmra.mxu0 %vm542_vm0, %v1017_v17 }
  0x6b   :  { %625 = vmatmul.bf16.gmra.mxu1 %v1025_v27  ;;  %668 = vmatmul.bf16.gmra.mxu2 %v1029_v28 }
  0x6c   :  { %711 = vmatmul.bf16.gmra.mxu3 %v1033_v24 }
  0x6d   :  { %1244 = vmatmul.msk.bf16.gmra.mxu0 %vm542_vm0, %v1037_v29 }
  0x7b   :  { %630 = vmatmul.bf16.gmra.mxu1 %v1045_v39  ;;  %673 = vmatmul.bf16.gmra.mxu2 %v1049_v40 }
  0x7c   :  { %716 = vmatmul.bf16.gmra.mxu3 %v1053_v36 }
  0x7d   :  { %1245 = vmatmul.msk.bf16.gmra.mxu0 %vm542_vm0, %v1057_v41 }
  0x8b   :  { %635 = vmatmul.bf16.gmra.mxu1 %v1065_v51  ;;  %678 = vmatmul.bf16.gmra.mxu2 %v1069_v52 }
  0x8c   :  { %721 = vmatmul.bf16.gmra.mxu3 %v1073_v48 }
  0x8d   :  { %1246 = vmatmul.msk.bf16.gmra.mxu0 %vm542_vm0, %v1077_v53 }
  0x9b   :  { %640 = vmatmul.bf16.gmra.mxu1 %v1085_v63  ;;  %683 = vmatmul.bf16.gmra.mxu2 %v1089_v0 }
  0x9c   :  { %726 = vmatmul.bf16.gmra.mxu3 %v1093_v60 }
  0x9d   :  { %1247 = vmatmul.msk.bf16.gmra.mxu0 %vm542_vm0, %v1097_v1 }
  0xa8   :  { %v583_v12 = vpop.f32.mrf.mxu1 }
  0xaa   :  { %v573_v14 = vpop.f32.mrf.mxu0 }
  0xab   :  { %645 = vmatmul.bf16.gmra.mxu1 %v294_v10  ;;  %688 = vmatmul.bf16.gmra.mxu2 %v295_v11 }
  0xac   :  { %731 = vmatmul.bf16.gmra.mxu3 %v296_v9 }
  0xad   :  { %1248 = vmatmul.msk.bf16.gmra.mxu0 %vm542_vm0, %v297_v13 }
  0xae   :  { %v1635_v15 = vpop.f32.mrf.mxu2 }
  0xb0   :  { %v585_v16 = vpop.f32.mrf.mxu1 }
  0xb1   :  { %v1637_v17 = vpop.f32.mrf.mxu3 }
  0xb2   :  { %v575_v18 = vpop.f32.mrf.mxu0 }
  0xb6   :  { %v1639_v7 = vpop.f32.mrf.mxu2 }
  0xb8   :  { %v588_v19 = vpop.f32.mrf.mxu1 }
  0xb9   :  { %v605_v20 = vpop.f32.mrf.mxu3 }
  0xba   :  { %v578_v21 = vpop.f32.mrf.mxu0 }
  0xbe   :  { %v1641_v22 = vpop.f32.mrf.mxu2 }
  0xc0   :  { %v1643_v23 = vpop.f32.mrf.mxu1 }
  0xc2   :  { %v580_v24 = vpop.f32.mrf.mxu0 }
  0xc6   :  { %v1645_v25 = vpop.f32.mrf.mxu2 }
  0xc8   :  { %v616_v26 = vpop.f32.mrf.mxu1 }
  0xc9   :  { %v617_v27 = vadd.f32 %v616_v26, %v573_v14 }
  0xca   :  { %v745_v28 = vpop.f32.mrf.mxu0 }
  0xce   :  { %v659_v30 = vpop.f32.mrf.mxu2 }
  0xcf   :  { %v702_v29 = vpop.f32.mrf.mxu3  ;;  %v660_v31 = vadd.f32 %v659_v30, %v617_v27 }
  0xd0   :  { %v618_v32 = vpop.f32.mrf.mxu1 }
  0xd1   :  { %v703_v33 = vadd.f32 %v702_v29, %v660_v31  ;;  %v619_v34 = vadd.f32 %v618_v32, %v575_v18 }
  0xd2   :  { %v747_v35 = vpop.f32.mrf.mxu0 }
  0xd3   :  { %v1647_v36 = vadd.f32 %v745_v28, %v703_v33 }
  0xd6   :  { %v661_v38 = vpop.f32.mrf.mxu2 }
  0xd7   :  { %v704_v37 = vpop.f32.mrf.mxu3  ;;  %v662_v39 = vadd.f32 %v661_v38, %v619_v34 }
  0xd8   :  { %v621_v40 = vpop.f32.mrf.mxu1 }
  0xd9   :  { %v705_v41 = vadd.f32 %v704_v37, %v662_v39  ;;  %v622_v42 = vadd.f32 %v621_v40, %v578_v21  ;;  %v864_v21 = vmul.f32 %v1647_v36, %v1647_v36 }
  0xda   :  { %v750_v43 = vpop.f32.mrf.mxu0 }
  0xdb   :  { %v1649_v44 = vadd.f32 %v747_v35, %v705_v41 }
  0xdd   :  { %v865_v13 = vmul.f32 %v1649_v44, %v1649_v44 }
  0xde   :  { %v664_v46 = vpop.f32.mrf.mxu2 }
  0xdf   :  { %v707_v45 = vpop.f32.mrf.mxu3  ;;  %v665_v47 = vadd.f32 %v664_v46, %v622_v42  ;;  %v877_v28 = vadd.f32 %v865_v13, %v864_v21 }
  0xe0   :  { %v623_v48 = vpop.f32.mrf.mxu1 }
  0xe1   :  { %v708_v49 = vadd.f32 %v707_v45, %v665_v47  ;;  %v624_v53 = vadd.f32 %v623_v48, %v580_v24 }
  0xe2   :  { %v752_v50 = vpop.f32.mrf.mxu0 }
  0xe3   :  { %v1651_v51 = vadd.f32 %v750_v43, %v708_v49 }
  0xe6   :  { %v666_v54 = vpop.f32.mrf.mxu2 }
  0xe7   :  { %v709_v52 = vpop.f32.mrf.mxu3  ;;  %v667_v55 = vadd.f32 %v666_v54, %v624_v53 }
  0xe8   :  { %v626_v56 = vpop.f32.mrf.mxu1 }
  0xe9   :  { %v710_v57 = vadd.f32 %v709_v52, %v667_v55  ;;  %v627_v2 = vadd.f32 %v626_v56, %v583_v12  ;;  %v866_v12 = vmul.f32 %v1651_v51, %v1651_v51 }
  0xea   :  { %v755_v58 = vpop.f32.mrf.mxu0 }
  0xeb   :  { %v1653_v59 = vadd.f32 %v752_v50, %v710_v57  ;;  %v878_v32 = vadd.f32 %v877_v28, %v866_v12 }
  0xed   :  { %v867_v30 = vmul.f32 %v1653_v59, %v1653_v59 }
  0xee   :  { %v669_v61 = vpop.f32.mrf.mxu2 }
  0xef   :  { %v712_v60 = vpop.f32.mrf.mxu3  ;;  %v670_v4 = vadd.f32 %v669_v61, %v627_v2  ;;  %v879_v40 = vadd.f32 %v878_v32, %v867_v30 }
  0xf0   :  { %v628_v62 = vpop.f32.mrf.mxu1 }
  0xf1   :  { %v629_v5 = vadd.f32 %v628_v62, %v585_v16  ;;  %v713_v10 = vadd.f32 %v712_v60, %v670_v4  ;;  %v845_v16 = vadd.f32 %v1649_v44, %v1647_v36 }
  0xf2   :  { %v757_v63 = vpop.f32.mrf.mxu0 }
  0xf3   :  { %v1663_v26 = vadd.f32 %v755_v58, %v713_v10  ;;  %v846_v29 = vadd.f32 %v845_v16, %v1651_v51 }
  0xf5   :  { %v847_v34 = vadd.f32 %v846_v29, %v1653_v59  ;;  %v868_v35 = vmul.f32 %v1663_v26, %v1663_v26 }
  0xf6   :  { %v671_v1 = vpop.f32.mrf.mxu2 }
  0xf7   :  { %v714_v0 = vpop.f32.mrf.mxu3  ;;  %v672_v8 = vadd.f32 %v671_v1, %v629_v5  ;;  %v848_v41 = vadd.f32 %v847_v34, %v1663_v26  ;;  %v880_v46 = vadd.f32 %v879_v40, %v868_v35 }
  0xf8   :  { %v631_v3 = vpop.f32.mrf.mxu1 }
  0xf9   :  { %v632_v11 = vadd.f32 %v631_v3, %v588_v19  ;;  %v715_v18 = vadd.f32 %v714_v0, %v672_v8 }
  0xfa   :  { %v760_v6 = vpop.f32.mrf.mxu0 }
  0xfb   :  { %v1668_v31 = vadd.f32 %v757_v63, %v715_v18 }
  0xfd   :  { %v869_v42 = vmul.f32 %v1668_v31, %v1668_v31  ;;  %v849_v47 = vadd.f32 %v848_v41, %v1668_v31 }
  0xfe   :  { %v674_v14 = vpop.f32.mrf.mxu2 }
  0xff   :  { %v717_v9 = vpop.f32.mrf.mxu3  ;;  %v675_v20 = vadd.f32 %v674_v14, %v632_v11  ;;  %v881_v52 = vadd.f32 %v880_v46, %v869_v42  ;;  %v779_v11 = vlaneseq }
 0x100   :  { %v633_v24 = vpop.f32.mrf.mxu1 }
 0x101   :  { %v718_v27 = vadd.f32 %v717_v9, %v675_v20  ;;  %v634_v38 = vadd.f32 %v633_v24, %v1643_v23  ;;  %v780_v16 = vshrl.u32 %v779_v11, 7 }
 0x102   :  { %v762_v19 = vpop.f32.mrf.mxu0 }
 0x103   :  { %v1673_v37 = vadd.f32 %v760_v6, %v718_v27 }
 0x105   :  { %v870_v48 = vmul.f32 %v1673_v37, %v1673_v37  ;;  %v850_v23 = vadd.f32 %v849_v47, %v1673_v37 }
 0x106   :  { %v676_v39 = vpop.f32.mrf.mxu2 }
 0x107   :  { %v719_v33 = vpop.f32.mrf.mxu3  ;;  %v677_v43 = vadd.f32 %v676_v39, %v634_v38  ;;  %v882_v55 = vadd.f32 %v881_v52, %v870_v48 }
 0x108   :  { %v636_v45 = vpop.f32.mrf.mxu1 }
 0x109   :  { %v720_v49 = vadd.f32 %v719_v33, %v677_v43  ;;  %v637_v5 = vadd.f32 %v636_v45, %v1635_v15 }
 0x10a   :  { %v765_v50 = vpop.f32.mrf.mxu0 }
 0x10b   :  { %v1683_v53 = vadd.f32 %v762_v19, %v720_v49 }
 0x10d   :  { %v851_v56 = vadd.f32 %v850_v23, %v1683_v53  ;;  %v871_v57 = vmul.f32 %v1683_v53, %v1683_v53 }
 0x10e   :  { %v679_v58 = vpop.f32.mrf.mxu2 }
 0x10f   :  { %v722_v54 = vpop.f32.mrf.mxu3  ;;  %v883_v60 = vadd.f32 %v882_v55, %v871_v57  ;;  %v680_v8 = vadd.f32 %v679_v58, %v637_v5 }
 0x110   :  { %v638_v61 = vpop.f32.mrf.mxu1 }
 0x111   :  { %v639_v9 = vadd.f32 %v638_v61, %v1639_v7  ;;  %v723_v20 = vadd.f32 %v722_v54, %v680_v8  ;;  %v792_v7 = vadd.s32 96, %v780_v16 }
 0x112   :  { %v767_v62 = vpop.f32.mrf.mxu0 }
 0x113   :  { %v1692_v15 = vadd.f32 %v765_v50, %v723_v20  ;;  %vm805_vm1 = vcmp.lt.s32.totalorder %v792_v7, 98  ;;  %v898_v7 = vld [vmem:[#allocation4] sm:$0x1] }
 0x115   :  { %v852_v39 = vadd.f32 %v851_v56, %v1692_v15 }
 0x116   :  { %v681_v0 = vpop.f32.mrf.mxu2 }
 0x117   :  { %v724_v63 = vpop.f32.mrf.mxu3  ;;  %v682_v13 = vadd.f32 %v681_v0, %v639_v9 }
 0x118   :  { %v641_v1 = vpop.f32.mrf.mxu1 }
 0x119   :  { %v642_v14 = vadd.f32 %v641_v1, %v1641_v22  ;;  %v725_v27 = vadd.f32 %v724_v63, %v682_v13  ;;  %v872_v22 = vmul.f32 %v1692_v15, %v1692_v15 }
 0x11a   :  { %v770_v2 = vpop.f32.mrf.mxu0 }
 0x11b   :  { %v1694_v32 = vadd.f32 %v767_v62, %v725_v27  ;;  %v884_v45 = vadd.f32 %v883_v60, %v872_v22 }
 0x11d   :  { %v873_v40 = vmul.f32 %v1694_v32, %v1694_v32  ;;  %v853_v46 = vadd.f32 %v852_v39, %v1694_v32 }
 0x11e   :  { %v684_v4 = vpop.f32.mrf.mxu2 }
 0x11f   :  { %v727_v3 = vpop.f32.mrf.mxu3  ;;  %v685_v21 = vadd.f32 %v684_v4, %v642_v14  ;;  %v885_v52 = vadd.f32 %v884_v45, %v873_v40 }
 0x120   :  { %v643_v6 = vpop.f32.mrf.mxu1 }
 0x121   :  { %v644_v12 = vadd.f32 %v643_v6, %v1645_v25  ;;  %v728_v29 = vadd.f32 %v727_v3, %v685_v21 }
 0x122   :  { %v772_v10 = vpop.f32.mrf.mxu0 }
 0x123   :  { %v1698_v35 = vadd.f32 %v770_v2, %v728_v29 }
 0x125   :  { %v874_v47 = vmul.f32 %v1698_v35, %v1698_v35  ;;  %v854_v23 = vadd.f32 %v853_v46, %v1698_v35 }
 0x126   :  { %v686_v24 = vpop.f32.mrf.mxu2 }
 0x127   :  { %v729_v18 = vpop.f32.mrf.mxu3  ;;  %v687_v19 = vadd.f32 %v686_v24, %v644_v12  ;;  %v886_v57 = vadd.f32 %v885_v52, %v874_v47 }
 0x128   :  { %v646_v28 = vpop.f32.mrf.mxu1 }
 0x129   :  { %v730_v33 = vadd.f32 %v729_v18, %v687_v19  ;;  %v647_v25 = vadd.f32 %v646_v28, %v1637_v17  ;;  %v1403_v17 = vmov 0.0  }
 0x12a   :  { %v775_v30 = vpop.f32.mrf.mxu0  ;;  %v1249_v50 = vsel %vm805_vm1, 1.0, %v1403_v17 }
 0x12b   :  { %v1704_v41 = vadd.f32 %v772_v10, %v730_v33 }
 0x12d   :  { %v875_v54 = vmul.f32 %v1704_v41, %v1704_v41  ;;  %v855_v58 = vadd.f32 %v854_v23, %v1704_v41 }
 0x12e   :  { %v689_v38 = vpop.f32.mrf.mxu2 }
 0x12f   :  { %v732_v34 = vpop.f32.mrf.mxu3  ;;  %v690_v42 = vadd.f32 %v689_v38, %v647_v25  ;;  %v887_v62 = vadd.f32 %v886_v57, %v875_v54  ;;  %v911_v25 = vld [vmem:[%s1770_s3] sm:$0x1] }
 0x130   :  { %v648_v43 = vpop.f32.mrf.mxu1 }
 0x131   :  { %v733_v48 = vadd.f32 %v732_v34, %v690_v42 }
 0x132   :  { %v777_v49 = vpop.f32.mrf.mxu0 }
 0x133   :  { %v776_v55 = vadd.f32 %v775_v30, %v733_v48 }
 0x135   :  { %v844_v60 = vmul.f32 %v1249_v50, %v776_v55 }
 0x136   :  { %v691_v61 = vpop.f32.mrf.mxu2 }
 0x137   :  { %v734_v56 = vpop.f32.mrf.mxu3  ;;  %v856_v63 = vadd.f32 %v855_v58, %v844_v60  ;;  %v876_v0 = vmul.f32 %v844_v60, %v844_v60 }
 0x139   :  { %v857_v1 = vrot.slane %v856_v63, 4  ;;  %v888_v2 = vadd.f32 %v887_v62, %v876_v0 }
 0x13b   :  { %v858_v3 = vadd.f32 %v857_v1, %v856_v63  ;;  %v889_v4 = vrot.slane %v888_v2, 4 }
 0x13d   :  { %v859_v5 = vrot.slane %v858_v3, 2  ;;  %v890_v6 = vadd.f32 %v889_v4, %v888_v2 }
 0x13f   :  { %v860_v8 = vadd.f32 %v859_v5, %v858_v3  ;;  %v891_v9 = vrot.slane %v890_v6, 2 }
 0x141   :  { %v861_v10 = vrot.slane %v860_v8, 1  ;;  %v892_v11 = vadd.f32 %v891_v9, %v890_v6 }
 0x143   :  { %v862_v13 = vadd.f32 %v861_v10, %v860_v8  ;;  %v893_v14 = vrot.slane %v892_v11, 1 }
 0x145   :  { %v863_v18 = vmul.f32 0.010204081, %v862_v13  ;;  %v894_v20 = vadd.f32 %v893_v14, %v892_v11 }
 0x147   :  { %v895_v21 = vmul.f32 0.010204081, %v894_v20  ;;  %v896_v12 = vmul.f32 %v863_v18, %v863_v18 }
 0x149   :  { %v897_v24 = vsub.f32 %v895_v21, %v896_v12 }
 0x14b   :  { %v899_v16 = vadd.f32 1e-05, %v897_v24 }
 0x14d   :  { %1345 = vrsqrt.f32 %v899_v16  ;;  %vm906_vm3 = vweird.f32 %v899_v16 }
 0x153   :  { %v1346_v27 = vpop.eup %1345 }
 0x154   :  { %v901_v19 = vmul.f32 %v1346_v27, %v899_v16  ;;  %vm907_vm2 = vweird.f32 %v1346_v27 }
 0x155   :  { %vm908_vm4 = vmor %vm906_vm3, %vm907_vm2 }
 0x156   :  { %v902_v28 = vmul.f32 %v1346_v27, %v901_v19 }
 0x158   :  { %v903_v29 = vmul.f32 0.5, %v902_v28 }
 0x15a   :  { %v904_v30 = vsub.f32 1.5, %v903_v29 }
 0x15c   :  { %v905_v33 = vmul.f32 %v1346_v27, %v904_v30 }
 0x15e   :  { %v909_v34 = vsel %vm908_vm4, %v1346_v27, %v905_v33 }
 0x15f   :  { %v910_v22 = vmul.f32 %v909_v34, %v898_v7 }
 0x161   :  { %v912_v38 = vmul.f32 %v910_v22, %v863_v18  ;;  %v915_v39 = vperm.slane %v910_v22, 0 }
 0x163   :  { %v913_v40 = vsub.f32 %v911_v25, %v912_v38  ;;  %v917_v42 = vmul.f32 %v915_v39, %v1647_v36  ;;  %v923_v43 = vmul.f32 %v915_v39, %v1673_v37  ;;  %v918_v45 = vmul.f32 %v915_v39, %v1649_v44 }
 0x164   :  { %v919_v46 = vmul.f32 %v915_v39, %v1651_v51  ;;  %v920_v47 = vmul.f32 %v915_v39, %v1653_v59  ;;  %v924_v48 = vmul.f32 %v915_v39, %v1683_v53  ;;  %v921_v49 = vmul.f32 %v915_v39, %v1663_v26 }
 0x165   :  { %v922_v17 = vmul.f32 %v915_v39, %v1668_v31  ;;  %v925_v50 = vmul.f32 %v915_v39, %v1692_v15  ;;  %v931_v52 = vperm.slane %v913_v40, 0  ;;  %v926_v23 = vmul.f32 %v915_v39, %v1694_v32 }
 0x166   :  { %v927_v36 = vmul.f32 %v915_v39, %v1698_v35  ;;  %v928_v37 = vmul.f32 %v915_v39, %v1704_v41  ;;  %v929_v44 = vmul.f32 %v915_v39, %v776_v55 }
 0x167   :  { %v933_v54 = vadd.f32 %v931_v52, %v917_v42  ;;  %v934_v51 = vadd.f32 %v931_v52, %v918_v45  ;;  %v935_v56 = vadd.f32 %v931_v52, %v919_v46  ;;  %v936_v59 = vadd.f32 %v931_v52, %v920_v47 }
 0x168   :  { %v937_v57 = vadd.f32 %v931_v52, %v921_v49  ;;  %v938_v53 = vadd.f32 %v931_v52, %v922_v17  ;;  %v939_v58 = vadd.f32 %v931_v52, %v923_v43  ;;  %v940_v26 = vadd.f32 %v931_v52, %v924_v48 }
 0x169   :  { %v941_v60 = vadd.f32 %v931_v52, %v925_v50  ;;  %v942_v31 = vadd.f32 %v931_v52, %v926_v23  ;;  %v943_v61 = vadd.f32 %v931_v52, %v927_v36  ;;  %v944_v15 = vadd.f32 %v931_v52, %v928_v37 }
 0x16a   :  { %v945_v62 = vadd.f32 %v931_v52, %v929_v44  ;;  %v946_v63 = vmax.f32 %v933_v54, 0.0  ;;  %v947_v32 = vmax.f32 %v934_v51, 0.0  ;;  %v948_v0 = vmax.f32 %v935_v56, 0.0 }
 0x16b   :  { %v949_v35 = vmax.f32 %v936_v59, 0.0  ;;  %v950_v1 = vmax.f32 %v937_v57, 0.0  ;;  %v951_v41 = vmax.f32 %v938_v53, 0.0  ;;  %v952_v55 = vmax.f32 %v939_v58, 0.0 }
 0x16c   :  { %959 = vst [vmem:[%s1771_s4] sm:$0xff] %v946_v63  ;;  %v953_v2 = vmax.f32 %v940_v26, 0.0  ;;  %v954_v3 = vmax.f32 %v941_v60, 0.0  ;;  %v955_v4 = vmax.f32 %v942_v31, 0.0  ;;  %v956_v5 = vmax.f32 %v943_v61, 0.0 }
 0x16d   :  { %960 = vst [vmem:[%s1771_s4 + $0x8] sm:$0xff] %v947_v32  ;;  %v957_v6 = vmax.f32 %v944_v15, 0.0  ;;  %v958_v8 = vmax.f32 %v945_v62, 0.0 }
 0x16e   :  { %961 = vst [vmem:[%s1771_s4 + $0x10] sm:$0xff] %v948_v0 }
 0x16f   :  { %962 = vst [vmem:[%s1771_s4 + $0x18] sm:$0xff] %v949_v35 }
 0x170   :  { %963 = vst [vmem:[%s1771_s4 + $0x20] sm:$0xff] %v950_v1 }
 0x171   :  { %964 = vst [vmem:[%s1771_s4 + $0x28] sm:$0xff] %v951_v41 }
 0x172   :  { %965 = vst [vmem:[%s1771_s4 + $0x30] sm:$0xff] %v952_v55 }
 0x173   :  { %966 = vst [vmem:[%s1771_s4 + $0x38] sm:$0xff] %v953_v2 }
 0x174   :  { %967 = vst [vmem:[%s1771_s4 + $0x40] sm:$0xff] %v954_v3 }
 0x175   :  { %968 = vst [vmem:[%s1771_s4 + $0x48] sm:$0xff] %v955_v4 }
 0x176   :  { %969 = vst [vmem:[%s1771_s4 + $0x50] sm:$0xff] %v956_v5 }
 0x177   :  { %970 = vst [vmem:[%s1771_s4 + $0x58] sm:$0xff] %v957_v6 }
 0x178   :  { %971 = vst [vmem:[%s1771_s4 + $0x60] sm:$0xff] %v958_v8 }
 0x179   :  { %976 = vsyncpa [#allocation3], 1 }
 0x17a   :  { %977 = vsyncpa [#allocation5], 1 }

// kernel: _lambda_.7
= control target key start
LH: loop header
LB: loop body
LE: loop exit
PB: predicated region body
PF: predicated region fallthrough
CT: control target
= control target key end

     0   :  { %vm706_vm0 = vcmask 261120   ;;  %s3943_s1 = inlined_call_operand.vmem [shape: bf16[288,128], index: 1, kind: input, shape index: {}]   ;;  %s3944_s0 = inlined_call_operand.vmem [shape: bf16[456,288], index: 0, kind: input, shape index: {}]   ;;  %s3945_s2 = inlined_call_operand.vmem [shape: f32[1,128], index: 2, kind: input, shape index: {}]   ;;  %s3946_s3 = inlined_call_operand.vmem [shape: f32[1,128], index: 3, kind: input, shape index: {}]   ;;  %s3947_s4 = inlined_call_operand.vmem [shape: f32[456,128], index: 4, kind: output, shape index: {}]  }
   0x1   :  { %v2507_v0 = vld [vmem:[%s3943_s1 + $0x38] sm:$0xff]  ;;  %v2574_v2 = vld [vmem:[%s3943_s1 + $0x88] sm:$0xff]  ;;  %v2506_v3 = vld [vmem:[%s3943_s1 + $0x30] sm:$0xff] }
   0x2   :  { %v2515_v1 = vld [vmem:[%s3943_s1 + $0x78] sm:$0xff]  ;;  %794 = vmatpush.bf16.msra.mxu0 %v2507_v0  ;;  %2518 = vmatpush.bf16.msra.mxu3 %v2507_v0  ;;  %v2514_v4 = vld [vmem:[%s3943_s1 + $0x70] sm:$0xff]  ;;  %v2586_v5 = vld [vmem:[%s3943_s1 + $0x80] sm:$0xff] }
   0x3   :  { %947 = vmatpush.bf16.msra.mxu1 %v2515_v1  ;;  %1106 = vmatpush.bf16.msra.mxu2 %v2574_v2  ;;  %v1988_v6 = vld [vmem:[%s3944_s0 + $0x8] sm:$0xf]  ;;  %v2418_v7 = vld [vmem:[%s3944_s0 + $0x10] sm:$0xf0]  ;;  %v2504_v11 = vld [vmem:[%s3943_s1 + $0x20] sm:$0xff] }
   0x4   :  { %v1989_v8 = vor.u32 %v2418_v7, %v1988_v6  ;;  %v2505_v9 = vld [vmem:[%s3943_s1 + $0x28] sm:$0xff]  ;;  %v2512_v12 = vld [vmem:[%s3943_s1 + $0x60] sm:$0xff]  ;;  %v2503_v13 = vld [vmem:[%s3943_s1 + $0x18] sm:$0xff] }
   0x5   :  { %v2513_v10 = vld [vmem:[%s3943_s1 + $0x68] sm:$0xff]  ;;  %v2511_v14 = vld [vmem:[%s3943_s1 + $0x58] sm:$0xff]  ;;  %v2502_v15 = vld [vmem:[%s3943_s1 + $0x10] sm:$0xff] }
   0x6   :  { %795 = vmatpush.bf16.msra.mxu0 %v2506_v3  ;;  %2519 = vmatpush.bf16.msra.mxu3 %v2506_v3  ;;  %v2510_v16 = vld [vmem:[%s3943_s1 + $0x50] sm:$0xff]  ;;  %v2000_v17 = vld [vmem:[%s3944_s0 + $0x20] sm:$0xf]  ;;  %v2421_v18 = vld [vmem:[%s3944_s0 + $0x28] sm:$0xf0] }
   0x7   :  { %948 = vmatpush.bf16.msra.mxu1 %v2514_v4  ;;  %1107 = vmatpush.bf16.msra.mxu2 %v2586_v5  ;;  %v2001_v19 = vor.u32 %v2421_v18, %v2000_v17  ;;  %v2501_v20 = vld [vmem:[%s3943_s1 + $0x8] sm:$0xff]  ;;  %v2500_v22 = vld [vmem:[%s3943_s1] sm:$0xff]  ;;  %v2244_v26 = vld [vmem:[%s3944_s0 + $0x210] sm:$0xf] }
   0x8   :  { %v2509_v21 = vld [vmem:[%s3943_s1 + $0x48] sm:$0xff]  ;;  %v2508_v23 = vld [vmem:[%s3943_s1 + $0x40] sm:$0xff]  ;;  %v2483_v27 = vld [vmem:[%s3944_s0 + $0x218] sm:$0xf0] }
   0x9   :  { %v1980_v24 = vld [vmem:[%s3944_s0] sm:$0xf]  ;;  %v2417_v25 = vld [vmem:[%s3944_s0 + $0x8] sm:$0xf0]  ;;  %v2416_v28 = vld [vmem:[%s3944_s0 + $0x4] sm:$0xf]  ;;  %v2245_v31 = vor.u32 %v2483_v27, %v2244_v26 }
   0xa   :  { %2386 = vmatmul.msk.bf16.vlgmr.msra.gmra.mxu2 %vm706_vm0, %v1989_v8  ;;  %796 = vmatpush.bf16.msra.mxu0 %v2505_v9  ;;  %v1982_v29 = vld [vmem:[%s3944_s0 + $0xc] sm:$0xf0]  ;;  %v1981_v30 = vor.u32 %v2417_v25, %v1980_v24  ;;  %v2012_v33 = vld [vmem:[%s3944_s0 + $0x38] sm:$0xf]  ;;  %v2424_v34 = vld [vmem:[%s3944_s0 + $0x40] sm:$0xf0] }
   0xb   :  { %2520 = vmatpush.bf16.msra.mxu3 %v2505_v9  ;;  %949 = vmatpush.bf16.msra.mxu1 %v2513_v10  ;;  %v1985_v32 = vor.u32 %v2416_v28, %v1982_v29  ;;  %v2013_v35 = vor.u32 %v2424_v34, %v2012_v33  ;;  %v1992_v36 = vld [vmem:[%s3944_s0 + $0x18] sm:$0xf]  ;;  %v2420_v37 = vld [vmem:[%s3944_s0 + $0x20] sm:$0xf0]  ;;  %v2256_v38 = vld [vmem:[%s3944_s0 + $0x228] sm:$0xf] }
   0xc   :  { %v2486_v39 = vld [vmem:[%s3944_s0 + $0x230] sm:$0xf0]  ;;  %v2419_v40 = vld [vmem:[%s3944_s0 + $0x1c] sm:$0xf]  ;;  %v1994_v41 = vld [vmem:[%s3944_s0 + $0x24] sm:$0xf0]  ;;  %v1993_v42 = vor.u32 %v2420_v37, %v1992_v36 }
   0xd   :  { %v2257_v43 = vor.u32 %v2486_v39, %v2256_v38  ;;  %v1997_v44 = vor.u32 %v2419_v40, %v1994_v41  ;;  %v2024_v45 = vld [vmem:[%s3944_s0 + $0x50] sm:$0xf]  ;;  %v2427_v46 = vld [vmem:[%s3944_s0 + $0x58] sm:$0xf0]  ;;  %v2268_v50 = vld [vmem:[%s3944_s0 + $0x240] sm:$0xf] }
   0xe   :  { %797 = vmatpush.bf16.msra.mxu0 %v2504_v11  ;;  %v2025_v47 = vor.u32 %v2427_v46, %v2024_v45  ;;  %v2004_v48 = vld [vmem:[%s3944_s0 + $0x30] sm:$0xf]  ;;  %v2423_v49 = vld [vmem:[%s3944_s0 + $0x38] sm:$0xf0]  ;;  %v2489_v51 = vld [vmem:[%s3944_s0 + $0x248] sm:$0xf0] }
   0xf   :  { %2521 = vmatpush.bf16.msra.mxu3 %v2504_v11  ;;  %950 = vmatpush.bf16.msra.mxu1 %v2512_v12  ;;  %v2422_v52 = vld [vmem:[%s3944_s0 + $0x34] sm:$0xf]  ;;  %v2006_v53 = vld [vmem:[%s3944_s0 + $0x3c] sm:$0xf0]  ;;  %v2005_v54 = vor.u32 %v2423_v49, %v2004_v48  ;;  %v2269_v55 = vor.u32 %v2489_v51, %v2268_v50  ;;  %v2036_v57 = vld [vmem:[%s3944_s0 + $0x68] sm:$0xf] }
  0x10   :  { %v2009_v56 = vor.u32 %v2422_v52, %v2006_v53  ;;  %v2430_v58 = vld [vmem:[%s3944_s0 + $0x70] sm:$0xf0]  ;;  %v2016_v60 = vld [vmem:[%s3944_s0 + $0x48] sm:$0xf]  ;;  %v2280_v62 = vld [vmem:[%s3944_s0 + $0x258] sm:$0xf] }
  0x11   :  { %v2037_v59 = vor.u32 %v2430_v58, %v2036_v57  ;;  %v2426_v61 = vld [vmem:[%s3944_s0 + $0x50] sm:$0xf0]  ;;  %v2492_v63 = vld [vmem:[%s3944_s0 + $0x260] sm:$0xf0]  ;;  %v2425_v0 = vld [vmem:[%s3944_s0 + $0x4c] sm:$0xf] }
  0x12   :  { %798 = vmatpush.bf16.msra.mxu0 %v2503_v13  ;;  %v2281_v3 = vor.u32 %v2492_v63, %v2280_v62  ;;  %v2433_v6 = vld [vmem:[%s3944_s0 + $0x88] sm:$0xf0]  ;;  %v2028_v8 = vld [vmem:[%s3944_s0 + $0x60] sm:$0xf]  ;;  %v2495_v11 = vld [vmem:[%s3944_s0 + $0x278] sm:$0xf0] }
  0x13   :  { %2522 = vmatpush.bf16.msra.mxu3 %v2503_v13  ;;  %951 = vmatpush.bf16.msra.mxu1 %v2511_v14  ;;  %v2429_v9 = vld [vmem:[%s3944_s0 + $0x68] sm:$0xf0]  ;;  %v2030_v13 = vld [vmem:[%s3944_s0 + $0x6c] sm:$0xf0]  ;;  %v2060_v17 = vld [vmem:[%s3944_s0 + $0x98] sm:$0xf] }
  0x14   :  { %v2436_v18 = vld [vmem:[%s3944_s0 + $0xa0] sm:$0xf0]  ;;  %v2431_v24 = vld [vmem:[%s3944_s0 + $0x7c] sm:$0xf]  ;;  %v2042_v25 = vld [vmem:[%s3944_s0 + $0x84] sm:$0xf0] }
  0x15   :  { %v2045_v28 = vor.u32 %v2431_v24, %v2042_v25  ;;  %v2072_v29 = vld [vmem:[%s3944_s0 + $0xb0] sm:$0xf]  ;;  %v2435_v34 = vld [vmem:[%s3944_s0 + $0x98] sm:$0xf0]  ;;  %v2434_v36 = vld [vmem:[%s3944_s0 + $0x94] sm:$0xf] }
  0x16   :  { %799 = vmatpush.bf16.msra.mxu0 %v2502_v15  ;;  %v2052_v33 = vld [vmem:[%s3944_s0 + $0x90] sm:$0xf]  ;;  %v2054_v37 = vld [vmem:[%s3944_s0 + $0x9c] sm:$0xf0]  ;;  %v2084_v41 = vld [vmem:[%s3944_s0 + $0xc8] sm:$0xf] }
  0x17   :  { %2523 = vmatpush.bf16.msra.mxu3 %v2502_v15  ;;  %952 = vmatpush.bf16.msra.mxu1 %v2510_v16  ;;  %v2053_v38 = vor.u32 %v2435_v34, %v2052_v33  ;;  %v2057_v40 = vor.u32 %v2434_v36, %v2054_v37  ;;  %v2438_v45 = vld [vmem:[%s3944_s0 + $0xb0] sm:$0xf0]  ;;  %v2437_v46 = vld [vmem:[%s3944_s0 + $0xac] sm:$0xf]  ;;  %v2246_v49 = vld [vmem:[%s3944_s0 + $0x21c] sm:$0xf0] }
  0x18   :  { %v2482_v48 = vld [vmem:[%s3944_s0 + $0x214] sm:$0xf]  ;;  %v2076_v58 = vld [vmem:[%s3944_s0 + $0xc0] sm:$0xf]  ;;  %v2485_v62 = vld [vmem:[%s3944_s0 + $0x22c] sm:$0xf] }
  0x19   :  { %v2249_v53 = vor.u32 %v2482_v48, %v2246_v49  ;;  %v2258_v63 = vld [vmem:[%s3944_s0 + $0x234] sm:$0xf0]  ;;  %v2120_v33 = vld [vmem:[%s3944_s0 + $0x110] sm:$0xf]  ;;  %v2451_v34 = vld [vmem:[%s3944_s0 + $0x118] sm:$0xf0] }
  0x1a   :  { %2387 = vmatmul.msk.bf16.gmra.mxu2 %vm706_vm0, %v2001_v19  ;;  %800 = vmatpush.bf16.msra.mxu0 %v2501_v20  ;;  %v2061_v19 = vor.u32 %v2436_v18, %v2060_v17  ;;  %v2088_v17 = vld [vmem:[%s3944_s0 + $0xd8] sm:$0xf]  ;;  %v2444_v18 = vld [vmem:[%s3944_s0 + $0xe0] sm:$0xf0] }
  0x1b   :  { %2524 = vmatpush.bf16.msra.mxu3 %v2501_v20  ;;  %953 = vmatpush.bf16.msra.mxu1 %v2509_v21  ;;  %v2040_v20 = vld [vmem:[%s3944_s0 + $0x78] sm:$0xf]  ;;  %v2089_v25 = vor.u32 %v2444_v18, %v2088_v17 }
  0x1e   :  { %801 = vmatpush.bf16.msra.mxu0 %v2500_v22 }
  0x1f   :  { %2525 = vmatpush.bf16.msra.mxu3 %v2500_v22  ;;  %954 = vmatpush.bf16.msra.mxu1 %v2508_v23  ;;  %v2304_v22 = vld [vmem:[%s3944_s0 + $0x288] sm:$0xf] }
  0x21   :  { %802 = vmatmul.bf16.vlgmr.msra.gmra.mxu0 %v1981_v30  ;;  %v2439_v30 = vld [vmem:[%s3944_s0 + $0xb8] sm:$0xf0] }
  0x22   :  { %912 = vmatmul.bf16.vlgmr.msra.gmra.mxu3 %v2245_v31  ;;  %955 = vmatmul.bf16.vlgmr.msra.gmra.mxu1 %v1985_v32  ;;  %v2073_v31 = vor.u32 %v2439_v30, %v2072_v29  ;;  %v2793_v32 = vld [vmem:[%s3944_s0 + $0x2a0] sm:$0xff] }
  0x23   :  { %2526 = vmatpush.bf16.msrb.mxu3 %v2515_v1  ;;  %v2018_v1 = vld [vmem:[%s3944_s0 + $0x54] sm:$0xf0] }
  0x27   :  { %2527 = vmatpush.bf16.msrb.mxu3 %v2514_v4  ;;  %v2021_v4 = vor.u32 %v2425_v0, %v2018_v1 }
  0x2a   :  { %2388 = vmatmul.msk.bf16.gmra.mxu2 %vm706_vm0, %v2013_v35  ;;  %v450_v35 = vunpack.c.l.b16 %v2793_v32 }
  0x2b   :  { %2528 = vmatpush.bf16.msrb.mxu3 %v2513_v10  ;;  %v2292_v10 = vld [vmem:[%s3944_s0 + $0x270] sm:$0xf] }
  0x2c   :  { %v2293_v15 = vor.u32 %v2495_v11, %v2292_v10  ;;  %v537_v39 = vpack.c.b16 %v450_v35, %v450_v35 }
  0x2f   :  { %2529 = vmatpush.bf16.msrb.mxu3 %v2512_v12  ;;  %v2428_v12 = vld [vmem:[%s3944_s0 + $0x64] sm:$0xf] }
  0x31   :  { %807 = vmatmul.bf16.gmra.mxu0 %v1993_v42  ;;  %v2442_v42 = vld [vmem:[%s3944_s0 + $0xd0] sm:$0xf0] }
  0x32   :  { %917 = vmatmul.bf16.gmra.mxu3 %v2257_v43  ;;  %960 = vmatmul.bf16.gmra.mxu1 %v1997_v44  ;;  %v2085_v43 = vor.u32 %v2442_v42, %v2084_v41  ;;  %v2064_v44 = vld [vmem:[%s3944_s0 + $0xa8] sm:$0xf]  ;;  %v2100_v42 = vld [vmem:[%s3944_s0 + $0xf0] sm:$0xf] }
  0x33   :  { %2530 = vmatpush.bf16.msrb.mxu3 %v2511_v14  ;;  %v2029_v14 = vor.u32 %v2429_v9, %v2028_v8  ;;  %v2065_v51 = vor.u32 %v2438_v45, %v2064_v44  ;;  %v2108_v8 = vld [vmem:[%s3944_s0 + $0xf8] sm:$0xf]  ;;  %v2448_v9 = vld [vmem:[%s3944_s0 + $0x100] sm:$0xf0]  ;;  %v2446_v44 = vld [vmem:[%s3944_s0 + $0xf4] sm:$0xf] }
  0x34   :  { %v2102_v45 = vld [vmem:[%s3944_s0 + $0xfc] sm:$0xf0] }
  0x37   :  { %2531 = vmatpush.bf16.msrb.mxu3 %v2510_v16  ;;  %v2033_v16 = vor.u32 %v2428_v12, %v2030_v13  ;;  %v2109_v13 = vor.u32 %v2448_v9, %v2108_v8  ;;  %v2294_v8 = vld [vmem:[%s3944_s0 + $0x27c] sm:$0xf0] }
  0x3a   :  { %2389 = vmatmul.msk.bf16.gmra.mxu2 %vm706_vm0, %v2025_v47  ;;  %v2066_v47 = vld [vmem:[%s3944_s0 + $0xb4] sm:$0xf0] }
  0x3b   :  { %2532 = vmatpush.bf16.msrb.mxu3 %v2509_v21  ;;  %v2432_v21 = vld [vmem:[%s3944_s0 + $0x80] sm:$0xf0]  ;;  %v2069_v52 = vor.u32 %v2437_v46, %v2066_v47  ;;  %v2491_v46 = vld [vmem:[%s3944_s0 + $0x25c] sm:$0xf]  ;;  %v2282_v47 = vld [vmem:[%s3944_s0 + $0x264] sm:$0xf0] }
  0x3c   :  { %v2041_v26 = vor.u32 %v2432_v21, %v2040_v20  ;;  %v2090_v20 = vld [vmem:[%s3944_s0 + $0xe4] sm:$0xf0]  ;;  %v2488_v21 = vld [vmem:[%s3944_s0 + $0x244] sm:$0xf] }
  0x3f   :  { %2533 = vmatpush.bf16.msrb.mxu3 %v2508_v23  ;;  %v2498_v23 = vld [vmem:[%s3944_s0 + $0x290] sm:$0xf0] }
  0x40   :  { %v2305_v27 = vor.u32 %v2498_v23, %v2304_v22  ;;  %v2270_v22 = vld [vmem:[%s3944_s0 + $0x24c] sm:$0xf0] }
  0x41   :  { %812 = vmatmul.bf16.gmra.mxu0 %v2005_v54  ;;  %v2096_v54 = vld [vmem:[%s3944_s0 + $0xe0] sm:$0xf] }
  0x42   :  { %922 = vmatmul.bf16.gmra.mxu3 %v2269_v55  ;;  %965 = vmatmul.bf16.gmra.mxu1 %v2009_v56  ;;  %v2445_v55 = vld [vmem:[%s3944_s0 + $0xe8] sm:$0xf0] }
  0x43   :  { %2534 = vmatpush.bf16.msra.mxu3 %v2574_v2  ;;  %v2017_v2 = vor.u32 %v2426_v61, %v2016_v60  ;;  %v2097_v57 = vor.u32 %v2445_v55, %v2096_v54  ;;  %v2440_v60 = vld [vmem:[%s3944_s0 + $0xc4] sm:$0xf]  ;;  %v2078_v61 = vld [vmem:[%s3944_s0 + $0xcc] sm:$0xf0] }
  0x47   :  { %2535 = vmatpush.bf16.msra.mxu3 %v2586_v5  ;;  %v2048_v5 = vld [vmem:[%s3944_s0 + $0x80] sm:$0xf] }
  0x48   :  { %v2049_v7 = vor.u32 %v2433_v6, %v2048_v5 }
  0x4a   :  { %2390 = vmatmul.msk.bf16.gmra.mxu2 %vm706_vm0, %v2037_v59  ;;  %v2441_v59 = vld [vmem:[%s3944_s0 + $0xc8] sm:$0xf0] }
  0x4b   :  { %v2077_v1 = vor.u32 %v2441_v59, %v2076_v58  ;;  %v2454_v58 = vld [vmem:[%s3944_s0 + $0x130] sm:$0xf0] }
  0x51   :  { %817 = vmatmul.bf16.gmra.mxu0 %v2017_v2 }
  0x52   :  { %927 = vmatmul.bf16.gmra.mxu3 %v2281_v3  ;;  %970 = vmatmul.bf16.gmra.mxu1 %v2021_v4  ;;  %v2081_v3 = vor.u32 %v2440_v60, %v2078_v61  ;;  %v2261_v4 = vor.u32 %v2485_v62, %v2258_v63 }
  0x5a   :  { %2391 = vmatmul.msk.bf16.gmra.mxu2 %vm706_vm0, %v2049_v7 }
  0x61   :  { %822 = vmatmul.bf16.gmra.mxu0 %v2029_v14 }
  0x62   :  { %932 = vmatmul.bf16.gmra.mxu3 %v2293_v15  ;;  %975 = vmatmul.bf16.gmra.mxu1 %v2033_v16 }
  0x6a   :  { %2392 = vmatmul.msk.bf16.gmra.mxu2 %vm706_vm0, %v2061_v19  ;;  %v2443_v19 = vld [vmem:[%s3944_s0 + $0xdc] sm:$0xf] }
  0x71   :  { %827 = vmatmul.bf16.gmra.mxu0 %v2041_v26 }
  0x72   :  { %937 = vmatmul.bf16.gmra.mxu3 %v2305_v27  ;;  %980 = vmatmul.bf16.gmra.mxu1 %v2045_v28  ;;  %v2093_v27 = vor.u32 %v2443_v19, %v2090_v20  ;;  %v2273_v28 = vor.u32 %v2488_v21, %v2270_v22  ;;  %v2144_v20 = vld [vmem:[%s3944_s0 + $0x140] sm:$0xf]  ;;  %v2457_v21 = vld [vmem:[%s3944_s0 + $0x148] sm:$0xf0] }
  0x7a   :  { %2393 = vmatmul.msk.bf16.gmra.mxu2 %vm706_vm0, %v2073_v31 }
  0x81   :  { %832 = vmatmul.bf16.gmra.mxu0 %v2053_v38  ;;  %v2121_v38 = vor.u32 %v2451_v34, %v2120_v33  ;;  %v2453_v33 = vld [vmem:[%s3944_s0 + $0x128] sm:$0xf0]  ;;  %v2452_v34 = vld [vmem:[%s3944_s0 + $0x124] sm:$0xf] }
  0x82   :  { %942 = vmatmul.bf16.gmra.mxu3 %v537_v39  ;;  %985 = vmatmul.bf16.gmra.mxu1 %v2057_v40 }
  0x8a   :  { %2394 = vmatmul.msk.bf16.gmra.mxu2 %vm706_vm0, %v2085_v43  ;;  %v2447_v43 = vld [vmem:[%s3944_s0 + $0xf8] sm:$0xf0] }
  0x8d   :  { %v1109_v50 = vpop.f32.mrf.mxu2 }
  0x91   :  { %837 = vmatmul.bf16.gmra.mxu0 %v2065_v51 }
  0x92   :  { %990 = vmatmul.bf16.gmra.mxu1 %v2069_v52  ;;  %1065 = vmatmul.bf16.vlgmr.msrb.gmra.mxu3 %v2249_v53  ;;  %v2105_v52 = vor.u32 %v2446_v44, %v2102_v45  ;;  %v2285_v53 = vor.u32 %v2491_v46, %v2282_v47 }
  0x95   :  { %v1111_v56 = vpop.f32.mrf.mxu2 }
  0x9a   :  { %2395 = vmatmul.msk.bf16.gmra.mxu2 %vm706_vm0, %v2097_v57  ;;  %v2132_v57 = vld [vmem:[%s3944_s0 + $0x128] sm:$0xf] }
  0x9b   :  { %v2133_v62 = vor.u32 %v2454_v58, %v2132_v57 }
  0x9d   :  { %v1114_v0 = vpop.f32.mrf.mxu2 }
  0x9e   :  { %v803_v2 = vpop.f32.mrf.mxu0 }
  0x9f   :  { %v956_v5 = vpop.f32.mrf.mxu1 }
  0xa0   :  { %v957_v6 = vadd.f32 %v956_v5, %v803_v2  ;;  %v2112_v2 = vld [vmem:[%s3944_s0 + $0x108] sm:$0xf]  ;;  %v2114_v5 = vld [vmem:[%s3944_s0 + $0x114] sm:$0xf0] }
  0xa1   :  { %842 = vmatmul.bf16.gmra.mxu0 %v2077_v1 }
  0xa2   :  { %v2859_v7 = vadd.f32 %v1109_v50, %v957_v6  ;;  %995 = vmatmul.bf16.gmra.mxu1 %v2081_v3  ;;  %1070 = vmatmul.bf16.gmra.mxu3 %v2261_v4  ;;  %v2101_v50 = vor.u32 %v2447_v43, %v2100_v42  ;;  %v2450_v3 = vld [vmem:[%s3944_s0 + $0x110] sm:$0xf0]  ;;  %v2449_v4 = vld [vmem:[%s3944_s0 + $0x10c] sm:$0xf] }
  0xa3   :  { %v2494_v6 = vld [vmem:[%s3944_s0 + $0x274] sm:$0xf] }
  0xa5   :  { %v2867_v10 = vpop.f32.mrf.mxu3  ;;  %v1116_v11 = vpop.f32.mrf.mxu2 }
  0xa6   :  { %3971 = vst [vmem:[#allocation2_spill] sm:$0xff] %v2867_v10  ;;  %v805_v12 = vpop.f32.mrf.mxu0 }
  0xa7   :  { %v958_v14 = vpop.f32.mrf.mxu1 }
  0xa8   :  { %v959_v15 = vadd.f32 %v958_v14, %v805_v12  ;;  %v2113_v12 = vor.u32 %v2450_v3, %v2112_v2  ;;  %v2117_v14 = vor.u32 %v2449_v4, %v2114_v5 }
  0xaa   :  { %v2869_v16 = vadd.f32 %v1111_v56, %v959_v15  ;;  %2396 = vmatmul.msk.bf16.gmra.mxu2 %vm706_vm0, %v2109_v13  ;;  %v2297_v15 = vor.u32 %v2494_v6, %v2294_v8 }
  0xac   :  { %3972 = vst [vmem:[#allocation3_spill] sm:$0xff] %v2869_v16 }
  0xad   :  { %v2890_v23 = vpop.f32.mrf.mxu3  ;;  %v1119_v24 = vpop.f32.mrf.mxu2 }
  0xae   :  { %3973 = vst [vmem:[#allocation4_spill] sm:$0xff] %v2890_v23  ;;  %v808_v26 = vpop.f32.mrf.mxu0 }
  0xaf   :  { %v961_v29 = vpop.f32.mrf.mxu1 }
  0xb0   :  { %v962_v30 = vadd.f32 %v961_v29, %v808_v26  ;;  %v2145_v26 = vor.u32 %v2457_v21, %v2144_v20 }
  0xb1   :  { %847 = vmatmul.bf16.gmra.mxu0 %v2089_v25 }
  0xb2   :  { %v2892_v31 = vadd.f32 %v1114_v0, %v962_v30  ;;  %1000 = vmatmul.bf16.gmra.mxu1 %v2093_v27  ;;  %1075 = vmatmul.bf16.gmra.mxu3 %v2273_v28  ;;  %v2124_v30 = vld [vmem:[%s3944_s0 + $0x120] sm:$0xf] }
  0xb3   :  { %v2125_v42 = vor.u32 %v2453_v33, %v2124_v30  ;;  %v2458_v30 = vld [vmem:[%s3944_s0 + $0x154] sm:$0xf]  ;;  %v2150_v33 = vld [vmem:[%s3944_s0 + $0x15c] sm:$0xf0] }
  0xb5   :  { %v2900_v35 = vpop.f32.mrf.mxu3  ;;  %v1121_v36 = vpop.f32.mrf.mxu2 }
  0xb6   :  { %v810_v37 = vpop.f32.mrf.mxu0 }
  0xb7   :  { %v963_v39 = vpop.f32.mrf.mxu1 }
  0xb8   :  { %v964_v40 = vadd.f32 %v963_v39, %v810_v37  ;;  %v2497_v37 = vld [vmem:[%s3944_s0 + $0x28c] sm:$0xf] }
  0xba   :  { %v2902_v41 = vadd.f32 %v1116_v11, %v964_v40  ;;  %2397 = vmatmul.msk.bf16.gmra.mxu2 %vm706_vm0, %v2121_v38  ;;  %v2306_v38 = vld [vmem:[%s3944_s0 + $0x294] sm:$0xf0] }
  0xbb   :  { %v2309_v45 = vor.u32 %v2497_v37, %v2306_v38 }
  0xbc   :  { %3974 = vst [vmem:[#allocation5_spill] sm:$0xff] %v2902_v41 }
  0xbd   :  { %v2923_v48 = vpop.f32.mrf.mxu3  ;;  %v1124_v49 = vpop.f32.mrf.mxu2 }
  0xbe   :  { %v813_v51 = vpop.f32.mrf.mxu0 }
  0xbf   :  { %v966_v54 = vpop.f32.mrf.mxu1 }
  0xc0   :  { %v967_v55 = vadd.f32 %v966_v54, %v813_v51  ;;  %v2460_v51 = vld [vmem:[%s3944_s0 + $0x160] sm:$0xf0] }
  0xc1   :  { %852 = vmatmul.bf16.gmra.mxu0 %v2101_v50  ;;  %v2156_v50 = vld [vmem:[%s3944_s0 + $0x158] sm:$0xf] }
  0xc2   :  { %v2925_v56 = vadd.f32 %v1119_v24, %v967_v55  ;;  %1005 = vmatmul.bf16.gmra.mxu1 %v2105_v52  ;;  %1080 = vmatmul.bf16.gmra.mxu3 %v2285_v53  ;;  %v2157_v55 = vor.u32 %v2460_v51, %v2156_v50  ;;  %v2180_v50 = vld [vmem:[%s3944_s0 + $0x188] sm:$0xf]  ;;  %v2466_v51 = vld [vmem:[%s3944_s0 + $0x190] sm:$0xf0] }
  0xc5   :  { %v2933_v59 = vpop.f32.mrf.mxu3  ;;  %v1126_v60 = vpop.f32.mrf.mxu2 }
  0xc6   :  { %v815_v61 = vpop.f32.mrf.mxu0 }
  0xc7   :  { %v968_v63 = vpop.f32.mrf.mxu1 }
  0xc8   :  { %v969_v0 = vadd.f32 %v968_v63, %v815_v61  ;;  %v2456_v63 = vld [vmem:[%s3944_s0 + $0x140] sm:$0xf0] }
  0xca   :  { %v2935_v1 = vadd.f32 %v1121_v36, %v969_v0  ;;  %2398 = vmatmul.msk.bf16.gmra.mxu2 %vm706_vm0, %v2133_v62  ;;  %v2126_v36 = vld [vmem:[%s3944_s0 + $0x12c] sm:$0xf0]  ;;  %v2136_v62 = vld [vmem:[%s3944_s0 + $0x138] sm:$0xf]  ;;  %v2455_v0 = vld [vmem:[%s3944_s0 + $0x13c] sm:$0xf] }
  0xcb   :  { %v2129_v44 = vor.u32 %v2452_v34, %v2126_v36  ;;  %v2137_v4 = vor.u32 %v2456_v63, %v2136_v62  ;;  %v2264_v34 = vld [vmem:[%s3944_s0 + $0x230] sm:$0xf]  ;;  %v2487_v36 = vld [vmem:[%s3944_s0 + $0x238] sm:$0xf0]  ;;  %v2160_v63 = vld [vmem:[%s3944_s0 + $0x168] sm:$0xf] }
  0xcc   :  { %3975 = vst [vmem:[#allocation6_spill] sm:$0xff] %v2935_v1 }
  0xcd   :  { %v2956_v9 = vpop.f32.mrf.mxu3  ;;  %v1129_v11 = vpop.f32.mrf.mxu2 }
  0xce   :  { %v818_v13 = vpop.f32.mrf.mxu0 }
  0xcf   :  { %v971_v17 = vpop.f32.mrf.mxu1 }
  0xd0   :  { %v972_v18 = vadd.f32 %v971_v17, %v818_v13 }
  0xd1   :  { %857 = vmatmul.bf16.gmra.mxu0 %v2113_v12 }
  0xd2   :  { %v2958_v19 = vadd.f32 %v1124_v49, %v972_v18  ;;  %1010 = vmatmul.bf16.gmra.mxu1 %v2117_v14  ;;  %1085 = vmatmul.bf16.gmra.mxu3 %v2297_v15  ;;  %v2168_v14 = vld [vmem:[%s3944_s0 + $0x170] sm:$0xf]  ;;  %v2463_v15 = vld [vmem:[%s3944_s0 + $0x178] sm:$0xf0] }
  0xd3   :  { %v2169_v21 = vor.u32 %v2463_v15, %v2168_v14 }
  0xd5   :  { %v2966_v22 = vpop.f32.mrf.mxu3  ;;  %v1131_v24 = vpop.f32.mrf.mxu2 }
  0xd6   :  { %v820_v25 = vpop.f32.mrf.mxu0 }
  0xd7   :  { %v973_v27 = vpop.f32.mrf.mxu1 }
  0xd8   :  { %v974_v28 = vadd.f32 %v973_v27, %v820_v25  ;;  %v2148_v27 = vld [vmem:[%s3944_s0 + $0x150] sm:$0xf] }
  0xda   :  { %v2968_v29 = vadd.f32 %v1126_v60, %v974_v28  ;;  %2399 = vmatmul.msk.bf16.gmra.mxu2 %vm706_vm0, %v2145_v26  ;;  %v451_v60 = vunpack.c.h.b16 %v2793_v32  ;;  %v2138_v32 = vld [vmem:[%s3944_s0 + $0x144] sm:$0xf0]  ;;  %v2459_v28 = vld [vmem:[%s3944_s0 + $0x158] sm:$0xf0] }
  0xdb   :  { %v2141_v6 = vor.u32 %v2455_v0, %v2138_v32  ;;  %v2462_v0 = vld [vmem:[%s3944_s0 + $0x170] sm:$0xf0]  ;;  %v2461_v32 = vld [vmem:[%s3944_s0 + $0x16c] sm:$0xf] }
  0xdc   :  { %3976 = vst [vmem:[#allocation7_spill] sm:$0xff] %v2968_v29  ;;  %v538_v8 = vpack.c.b16 %v451_v60, %v451_v60 }
  0xdd   :  { %v2989_v39 = vpop.f32.mrf.mxu3  ;;  %v1134_v40 = vpop.f32.mrf.mxu2 }
  0xde   :  { %v823_v43 = vpop.f32.mrf.mxu0 }
  0xdf   :  { %v976_v46 = vpop.f32.mrf.mxu1 }
  0xe0   :  { %v977_v47 = vadd.f32 %v976_v46, %v823_v43  ;;  %v2153_v43 = vor.u32 %v2458_v30, %v2150_v33 }
  0xe1   :  { %862 = vmatmul.bf16.gmra.mxu0 %v2125_v42 }
  0xe2   :  { %v2991_v49 = vadd.f32 %v1129_v11, %v977_v47  ;;  %1015 = vmatmul.bf16.gmra.mxu1 %v2129_v44  ;;  %1090 = vmatmul.bf16.gmra.mxu3 %v2309_v45  ;;  %v2265_v44 = vor.u32 %v2487_v36, %v2264_v34 }
  0xe5   :  { %v2999_v52 = vpop.f32.mrf.mxu3  ;;  %v1136_v53 = vpop.f32.mrf.mxu2 }
  0xe6   :  { %v825_v54 = vpop.f32.mrf.mxu0 }
  0xe7   :  { %v978_v57 = vpop.f32.mrf.mxu1 }
  0xe8   :  { %v979_v58 = vadd.f32 %v978_v57, %v825_v54  ;;  %v2181_v57 = vor.u32 %v2466_v51, %v2180_v50 }
  0xea   :  { %v3002_v61 = vadd.f32 %v1131_v24, %v979_v58  ;;  %2400 = vmatmul.msk.bf16.gmra.mxu2 %vm706_vm0, %v2157_v55 }
  0xec   :  { %3977 = vst [vmem:[#allocation8_spill] sm:$0xff] %v3002_v61 }
  0xed   :  { %v3017_v2 = vpop.f32.mrf.mxu3  ;;  %v1139_v3 = vpop.f32.mrf.mxu2 }
  0xee   :  { %v828_v5 = vpop.f32.mrf.mxu0 }
  0xef   :  { %v981_v11 = vpop.f32.mrf.mxu1 }
  0xf0   :  { %v982_v12 = vadd.f32 %v981_v11, %v828_v5  ;;  %v2490_v5 = vld [vmem:[%s3944_s0 + $0x250] sm:$0xf0]  ;;  %v2161_v11 = vor.u32 %v2462_v0, %v2160_v63 }
  0xf1   :  { %867 = vmatmul.bf16.gmra.mxu0 %v2137_v4  ;;  %v2276_v4 = vld [vmem:[%s3944_s0 + $0x248] sm:$0xf] }
  0xf2   :  { %v3019_v13 = vadd.f32 %v1134_v40, %v982_v12  ;;  %1020 = vmatmul.bf16.gmra.mxu1 %v2141_v6  ;;  %1095 = vmatmul.bf16.gmra.mxu3 %v538_v8  ;;  %v2149_v40 = vor.u32 %v2459_v28, %v2148_v27  ;;  %v2277_v15 = vor.u32 %v2490_v5, %v2276_v4 }
  0xf5   :  { %v3027_v17 = vpop.f32.mrf.mxu3  ;;  %v1141_v18 = vpop.f32.mrf.mxu2 }
  0xf6   :  { %v830_v20 = vpop.f32.mrf.mxu0 }
  0xf7   :  { %v983_v24 = vpop.f32.mrf.mxu1 }
  0xf8   :  { %v984_v25 = vadd.f32 %v983_v24, %v830_v20  ;;  %v2192_v24 = vld [vmem:[%s3944_s0 + $0x1a0] sm:$0xf] }
  0xfa   :  { %v3029_v26 = vadd.f32 %v1136_v53, %v984_v25  ;;  %2401 = vmatmul.msk.bf16.gmra.mxu2 %vm706_vm0, %v2169_v21  ;;  %v2469_v25 = vld [vmem:[%s3944_s0 + $0x1a8] sm:$0xf0] }
  0xfb   :  { %v2193_v33 = vor.u32 %v2469_v25, %v2192_v24  ;;  %v2186_v24 = vld [vmem:[%s3944_s0 + $0x1a4] sm:$0xf0]  ;;  %v2300_v25 = vld [vmem:[%s3944_s0 + $0x278] sm:$0xf] }
  0xfc   :  { %3978 = vst [vmem:[#allocation9_spill] sm:$0xff] %v3029_v26 }
  0xfd   :  { %v3050_v37 = vpop.f32.mrf.mxu3  ;;  %v1144_v38 = vpop.f32.mrf.mxu2 }
  0xfe   :  { %v833_v42 = vpop.f32.mrf.mxu0 }
  0xff   :  { %v986_v45 = vpop.f32.mrf.mxu1 }
 0x100   :  { %v987_v46 = vadd.f32 %v986_v45, %v833_v42  ;;  %v2465_v42 = vld [vmem:[%s3944_s0 + $0x188] sm:$0xf0]  ;;  %v2288_v45 = vld [vmem:[%s3944_s0 + $0x260] sm:$0xf] }
 0x101   :  { %872 = vmatmul.bf16.gmra.mxu0 %v2149_v40  ;;  %v2172_v40 = vld [vmem:[%s3944_s0 + $0x180] sm:$0xf] }
 0x102   :  { %v3052_v47 = vadd.f32 %v1139_v3, %v987_v46  ;;  %1025 = vmatmul.bf16.gmra.mxu1 %v2153_v43  ;;  %2409 = vmatmul.msk.bf16.vlgmr.msra.gmra.mxu3 %vm706_vm0, %v2265_v44  ;;  %v2162_v3 = vld [vmem:[%s3944_s0 + $0x174] sm:$0xf0]  ;;  %v2464_v43 = vld [vmem:[%s3944_s0 + $0x184] sm:$0xf]  ;;  %v2174_v44 = vld [vmem:[%s3944_s0 + $0x18c] sm:$0xf0] }
 0x103   :  { %v2165_v14 = vor.u32 %v2461_v32, %v2162_v3  ;;  %v2493_v46 = vld [vmem:[%s3944_s0 + $0x268] sm:$0xf0]  ;;  %v2204_v32 = vld [vmem:[%s3944_s0 + $0x1b8] sm:$0xf]  ;;  %v2472_v3 = vld [vmem:[%s3944_s0 + $0x1c0] sm:$0xf0] }
 0x104   :  { %3979 = vst [vmem:[#allocation10_spill] sm:$0xff] %v3052_v47 }
 0x105   :  { %v3061_v53 = vpop.f32.mrf.mxu3  ;;  %v1146_v54 = vpop.f32.mrf.mxu2 }
 0x106   :  { %3980 = vst [vmem:[#allocation11_spill] sm:$0xff] %v3061_v53  ;;  %v835_v55 = vpop.f32.mrf.mxu0 }
 0x107   :  { %v988_v58 = vpop.f32.mrf.mxu1 }
 0x108   :  { %v989_v60 = vadd.f32 %v988_v58, %v835_v55  ;;  %v2289_v58 = vor.u32 %v2493_v46, %v2288_v45  ;;  %v2216_v46 = vld [vmem:[%s3944_s0 + $0x1d0] sm:$0xf] }
 0x10a   :  { %v3063_v62 = vadd.f32 %v1141_v18, %v989_v60  ;;  %2402 = vmatmul.msk.bf16.gmra.mxu2 %vm706_vm0, %v2181_v57  ;;  %v2177_v57 = vor.u32 %v2464_v43, %v2174_v44 }
 0x10c   :  { %3981 = vst [vmem:[#allocation12_spill] sm:$0xff] %v3063_v62 }
 0x10d   :  { %v945_v6 = vpop.f32.mrf.mxu3  ;;  %v1149_v8 = vpop.f32.mrf.mxu2 }
 0x10e   :  { %v838_v12 = vpop.f32.mrf.mxu0 }
 0x10f   :  { %v991_v18 = vpop.f32.mrf.mxu1 }
 0x110   :  { %v992_v20 = vadd.f32 %v991_v18, %v838_v12  ;;  %v2468_v18 = vld [vmem:[%s3944_s0 + $0x1a0] sm:$0xf0] }
 0x111   :  { %877 = vmatmul.bf16.gmra.mxu0 %v2161_v11  ;;  %v2205_v11 = vor.u32 %v2472_v3, %v2204_v32  ;;  %v2196_v3 = vld [vmem:[%s3944_s0 + $0x1b0] sm:$0xf] }
 0x112   :  { %v3084_v21 = vadd.f32 %v1144_v38, %v992_v20  ;;  %1030 = vmatmul.bf16.gmra.mxu1 %v2165_v14  ;;  %2410 = vmatmul.msk.bf16.gmra.mxu3 %vm706_vm0, %v2277_v15  ;;  %v2184_v15 = vld [vmem:[%s3944_s0 + $0x198] sm:$0xf]  ;;  %v2467_v20 = vld [vmem:[%s3944_s0 + $0x19c] sm:$0xf] }
 0x114   :  { %3982 = vst [vmem:[#allocation13_spill] sm:$0xff] %v3084_v21 }
 0x115   :  { %v3093_v27 = vpop.f32.mrf.mxu3  ;;  %v1151_v28 = vpop.f32.mrf.mxu2 }
 0x116   :  { %3983 = vst [vmem:[#allocation14_spill] sm:$0xff] %v3093_v27  ;;  %v840_v30 = vpop.f32.mrf.mxu0 }
 0x117   :  { %v993_v34 = vpop.f32.mrf.mxu1 }
 0x118   :  { %v994_v36 = vadd.f32 %v993_v34, %v840_v30  ;;  %v2185_v34 = vor.u32 %v2468_v18, %v2184_v15 }
 0x11a   :  { %v3095_v38 = vadd.f32 %v1146_v54, %v994_v36  ;;  %2403 = vmatmul.msk.bf16.gmra.mxu2 %vm706_vm0, %v2193_v33  ;;  %v2173_v54 = vor.u32 %v2465_v42, %v2172_v40  ;;  %v2189_v40 = vor.u32 %v2467_v20, %v2186_v24 }
 0x11c   :  { %3984 = vst [vmem:[#allocation15_spill] sm:$0xff] %v3095_v38 }
 0x11d   :  { %v3116_v50 = vpop.f32.mrf.mxu3  ;;  %v1154_v51 = vpop.f32.mrf.mxu2 }
 0x11e   :  { %3985 = vst [vmem:[#allocation16_spill] sm:$0xff] %v3116_v50  ;;  %v843_v55 = vpop.f32.mrf.mxu0 }
 0x11f   :  { %v996_v60 = vpop.f32.mrf.mxu1 }
 0x120   :  { %v997_v63 = vadd.f32 %v996_v60, %v843_v55 }
 0x121   :  { %882 = vmatmul.bf16.gmra.mxu0 %v2173_v54  ;;  %v2475_v54 = vld [vmem:[%s3944_s0 + $0x1d8] sm:$0xf0] }
 0x122   :  { %v3118_v0 = vadd.f32 %v1149_v8, %v997_v63  ;;  %1035 = vmatmul.bf16.gmra.mxu1 %v2177_v57  ;;  %2411 = vmatmul.msk.bf16.gmra.mxu3 %vm706_vm0, %v2289_v58  ;;  %v2217_v60 = vor.u32 %v2475_v54, %v2216_v46 }
 0x124   :  { %3986 = vst [vmem:[#allocation17_spill] sm:$0xff] %v3118_v0 }
 0x125   :  { %v3127_v4 = vpop.f32.mrf.mxu3  ;;  %v1156_v5 = vpop.f32.mrf.mxu2 }
 0x126   :  { %v845_v6 = vpop.f32.mrf.mxu0 }
 0x127   :  { %v998_v12 = vpop.f32.mrf.mxu1 }
 0x128   :  { %v999_v14 = vadd.f32 %v998_v12, %v845_v6  ;;  %v2471_v6 = vld [vmem:[%s3944_s0 + $0x1b8] sm:$0xf0]  ;;  %v2198_v12 = vld [vmem:[%s3944_s0 + $0x1bc] sm:$0xf0] }
 0x129   :  { %v2197_v20 = vor.u32 %v2471_v6, %v2196_v3  ;;  %v2208_v3 = vld [vmem:[%s3944_s0 + $0x1c8] sm:$0xf]  ;;  %v2474_v6 = vld [vmem:[%s3944_s0 + $0x1d0] sm:$0xf0] }
 0x12a   :  { %v3129_v8 = vadd.f32 %v1151_v28, %v999_v14  ;;  %2404 = vmatmul.msk.bf16.gmra.mxu2 %vm706_vm0, %v2205_v11  ;;  %v2496_v28 = vld [vmem:[%s3944_s0 + $0x280] sm:$0xf0]  ;;  %v2470_v11 = vld [vmem:[%s3944_s0 + $0x1b4] sm:$0xf]  ;;  %v2499_v14 = vld [vmem:[%s3944_s0 + $0x298] sm:$0xf0] }
 0x12b   :  { %v2301_v42 = vor.u32 %v2496_v28, %v2300_v25  ;;  %v2201_v25 = vor.u32 %v2470_v11, %v2198_v12  ;;  %v2473_v12 = vld [vmem:[%s3944_s0 + $0x1cc] sm:$0xf] }
 0x12c   :  { %3987 = vst [vmem:[#allocation18_spill] sm:$0xff] %v3129_v8 }
 0x12d   :  { %v3150_v30 = vpop.f32.mrf.mxu3  ;;  %v1159_v33 = vpop.f32.mrf.mxu2 }
 0x12e   :  { %v848_v36 = vpop.f32.mrf.mxu0 }
 0x12f   :  { %v1001_v43 = vpop.f32.mrf.mxu1 }
 0x130   :  { %v1002_v44 = vadd.f32 %v1001_v43, %v848_v36  ;;  %v2478_v43 = vld [vmem:[%s3944_s0 + $0x1f0] sm:$0xf0] }
 0x131   :  { %887 = vmatmul.bf16.gmra.mxu0 %v2185_v34 }
 0x132   :  { %v3152_v45 = vadd.f32 %v1154_v51, %v1002_v44  ;;  %1040 = vmatmul.bf16.gmra.mxu1 %v2189_v40  ;;  %2412 = vmatmul.msk.bf16.gmra.mxu3 %vm706_vm0, %v2301_v42  ;;  %v2228_v42 = vld [vmem:[%s3944_s0 + $0x1e8] sm:$0xf] }
 0x134   :  { %3988 = vst [vmem:[#allocation19_spill] sm:$0xff] %v3152_v45 }
 0x135   :  { %v3161_v55 = vpop.f32.mrf.mxu3  ;;  %v1161_v57 = vpop.f32.mrf.mxu2 }
 0x136   :  { %v850_v58 = vpop.f32.mrf.mxu0 }
 0x137   :  { %v1003_v63 = vpop.f32.mrf.mxu1 }
 0x138   :  { %v1004_v32 = vadd.f32 %v1003_v63, %v850_v58  ;;  %v2229_v58 = vor.u32 %v2478_v43, %v2228_v42  ;;  %v2240_v43 = vld [vmem:[%s3944_s0 + $0x200] sm:$0xf] }
 0x13a   :  { %v3163_v51 = vadd.f32 %v1156_v5, %v1004_v32  ;;  %2405 = vmatmul.msk.bf16.gmra.mxu2 %vm706_vm0, %v2217_v60  ;;  %v2312_v5 = vld [vmem:[%s3944_s0 + $0x290] sm:$0xf] }
 0x13b   :  { %v2313_v28 = vor.u32 %v2499_v14, %v2312_v5 }
 0x13c   :  { %3989 = vst [vmem:[#allocation20_spill] sm:$0xff] %v3163_v51 }
 0x13d   :  { %v3184_v15 = vpop.f32.mrf.mxu3  ;;  %v1164_v18 = vpop.f32.mrf.mxu2 }
 0x13e   :  { %v853_v24 = vpop.f32.mrf.mxu0 }
 0x13f   :  { %v1006_v34 = vpop.f32.mrf.mxu1 }
 0x140   :  { %v1007_v36 = vadd.f32 %v1006_v34, %v853_v24 }
 0x141   :  { %892 = vmatmul.bf16.gmra.mxu0 %v2197_v20  ;;  %v2209_v20 = vor.u32 %v2474_v6, %v2208_v3 }
 0x142   :  { %v3186_v40 = vadd.f32 %v1159_v33, %v1007_v36  ;;  %1045 = vmatmul.bf16.gmra.mxu1 %v2201_v25  ;;  %2413 = vmatmul.msk.bf16.gmra.mxu3 %vm706_vm0, %v2313_v28  ;;  %v131_v33 = vld [vmem:[%s3944_s0 + $0x2a8] sm:$0xf] }
 0x143   :  { %v452_v11 = vunpack.c.l.b16 %v131_v33 }
 0x144   :  { %3990 = vst [vmem:[#allocation21_spill] sm:$0xff] %v3186_v40 }
 0x145   :  { %v3195_v44 = vpop.f32.mrf.mxu3  ;;  %v1166_v46 = vpop.f32.mrf.mxu2  ;;  %v539_v28 = vpack.c.b16 %v452_v11, %v452_v11  ;;  %v2220_v11 = vld [vmem:[%s3944_s0 + $0x1e0] sm:$0xf] }
 0x146   :  { %v855_v54 = vpop.f32.mrf.mxu0 }
 0x147   :  { %v1008_v60 = vpop.f32.mrf.mxu1 }
 0x148   :  { %v1009_v63 = vadd.f32 %v1008_v60, %v855_v54  ;;  %v2481_v54 = vld [vmem:[%s3944_s0 + $0x208] sm:$0xf0] }
 0x14a   :  { %v3200_v32 = vadd.f32 %v1161_v57, %v1009_v63  ;;  %2406 = vmatmul.msk.bf16.gmra.mxu2 %vm706_vm0, %v2229_v58  ;;  %v2210_v57 = vld [vmem:[%s3944_s0 + $0x1d4] sm:$0xf0]  ;;  %v2241_v63 = vor.u32 %v2481_v54, %v2240_v43 }
 0x14b   :  { %v2213_v25 = vor.u32 %v2473_v12, %v2210_v57  ;;  %v2477_v12 = vld [vmem:[%s3944_s0 + $0x1e8] sm:$0xf0]  ;;  %v2476_v57 = vld [vmem:[%s3944_s0 + $0x1e4] sm:$0xf] }
 0x14c   :  { %3991 = vst [vmem:[#allocation22_spill] sm:$0xff] %v3200_v32 }
 0x14d   :  { %v3215_v5 = vpop.f32.mrf.mxu3  ;;  %v1169_v14 = vpop.f32.mrf.mxu2 }
 0x14e   :  { %v858_v24 = vpop.f32.mrf.mxu0 }
 0x14f   :  { %v1011_v34 = vpop.f32.mrf.mxu1 }
 0x150   :  { %v1012_v36 = vadd.f32 %v1011_v34, %v858_v24 }
 0x151   :  { %897 = vmatmul.bf16.gmra.mxu0 %v2209_v20  ;;  %v2222_v20 = vld [vmem:[%s3944_s0 + $0x1ec] sm:$0xf0] }
 0x152   :  { %v3217_v42 = vadd.f32 %v1164_v18, %v1012_v36  ;;  %1050 = vmatmul.bf16.gmra.mxu1 %v2213_v25  ;;  %2414 = vmatmul.msk.bf16.gmra.mxu3 %vm706_vm0, %v539_v28  ;;  %v2221_v25 = vor.u32 %v2477_v12, %v2220_v11  ;;  %v2225_v34 = vor.u32 %v2476_v57, %v2222_v20 }
 0x154   :  { %3992 = vst [vmem:[#allocation23_spill] sm:$0xff] %v3217_v42 }
 0x155   :  { %v3226_v58 = vpop.f32.mrf.mxu3  ;;  %v1171_v60 = vpop.f32.mrf.mxu2 }
 0x156   :  { %v860_v33 = vpop.f32.mrf.mxu0 }
 0x157   :  { %v1013_v3 = vpop.f32.mrf.mxu1 }
 0x158   :  { %v1014_v6 = vadd.f32 %v1013_v3, %v860_v33  ;;  %v2252_v33 = vld [vmem:[%s3944_s0 + $0x218] sm:$0xf] }
 0x15a   :  { %v3228_v18 = vadd.f32 %v1166_v46, %v1014_v6  ;;  %2407 = vmatmul.msk.bf16.gmra.mxu2 %vm706_vm0, %v2241_v63  ;;  %v2484_v63 = vld [vmem:[%s3944_s0 + $0x220] sm:$0xf0] }
 0x15b   :  { %v2253_v12 = vor.u32 %v2484_v63, %v2252_v33 }
 0x15c   :  { %3993 = vst [vmem:[#allocation24_spill] sm:$0xff] %v3228_v18 }
 0x15d   :  { %v3243_v46 = vpop.f32.mrf.mxu3  ;;  %v1174_v24 = vpop.f32.mrf.mxu2 }
 0x15e   :  { %v863_v28 = vpop.f32.mrf.mxu0 }
 0x15f   :  { %v1016_v36 = vpop.f32.mrf.mxu1 }
 0x160   :  { %v1017_v43 = vadd.f32 %v1016_v36, %v863_v28  ;;  %v2234_v36 = vld [vmem:[%s3944_s0 + $0x204] sm:$0xf0] }
 0x161   :  { %902 = vmatmul.bf16.gmra.mxu0 %v2221_v25  ;;  %v2480_v25 = vld [vmem:[%s3944_s0 + $0x200] sm:$0xf0] }
 0x162   :  { %v3245_v54 = vadd.f32 %v1169_v14, %v1017_v43  ;;  %1055 = vmatmul.bf16.gmra.mxu1 %v2225_v34  ;;  %v2232_v14 = vld [vmem:[%s3944_s0 + $0x1f8] sm:$0xf]  ;;  %v2479_v34 = vld [vmem:[%s3944_s0 + $0x1fc] sm:$0xf] }
 0x163   :  { %v2233_v33 = vor.u32 %v2480_v25, %v2232_v14 }
 0x164   :  { %3994 = vst [vmem:[#allocation25_spill] sm:$0xff] %v3245_v54 }
 0x165   :  { %v3253_v3 = vpop.f32.mrf.mxu3  ;;  %v1176_v6 = vpop.f32.mrf.mxu2 }
 0x166   :  { %v865_v11 = vpop.f32.mrf.mxu0 }
 0x167   :  { %v1018_v57 = vpop.f32.mrf.mxu1 }
 0x168   :  { %v1019_v20 = vadd.f32 %v1018_v57, %v865_v11  ;;  %v2237_v11 = vor.u32 %v2479_v34, %v2234_v36 }
 0x16a   :  { %v3255_v28 = vadd.f32 %v1171_v60, %v1019_v20  ;;  %2408 = vmatmul.msk.bf16.gmra.mxu2 %vm706_vm0, %v2253_v12 }
 0x16c   :  { %3995 = vst [vmem:[#allocation26_spill] sm:$0xff] %v3255_v28 }
 0x16d   :  { %v3270_v60 = vpop.f32.mrf.mxu3  ;;  %v1179_v43 = vpop.f32.mrf.mxu2 }
 0x16e   :  { %v868_v63 = vpop.f32.mrf.mxu0 }
 0x16f   :  { %v1021_v12 = vpop.f32.mrf.mxu1 }
 0x170   :  { %v1022_v57 = vadd.f32 %v1021_v12, %v868_v63 }
 0x171   :  { %907 = vmatmul.bf16.gmra.mxu0 %v2233_v33 }
 0x172   :  { %v3272_v20 = vadd.f32 %v1174_v24, %v1022_v57  ;;  %1060 = vmatmul.bf16.gmra.mxu1 %v2237_v11  ;;  %v1072_v24 = vadd.f32 %v3127_v4, %v2900_v35  ;;  %v1077_v4 = vadd.f32 %v3161_v55, %v2933_v59 }
 0x175   :  { %v3274_v50 = vpop.f32.mrf.mxu3  ;;  %v1181_v23 = vpop.f32.mrf.mxu2 }
 0x176   :  { %v870_v27 = vpop.f32.mrf.mxu0 }
 0x177   :  { %v1023_v10 = vpop.f32.mrf.mxu1 }
 0x178   :  { %v1024_v28 = vadd.f32 %v1023_v10, %v870_v27  ;;  %v1074_v27 = vadd.f32 %v3150_v30, %v2923_v48 }
 0x17a   :  { %v3276_v53 = vadd.f32 %v1176_v6, %v1024_v28 }
 0x17d   :  { %v1098_v54 = vpop.f32.mrf.mxu3  ;;  %v1184_v18 = vpop.f32.mrf.mxu2 }
 0x17e   :  { %v873_v42 = vpop.f32.mrf.mxu0 }
 0x17f   :  { %v1026_v14 = vpop.f32.mrf.mxu1 }
 0x180   :  { %v1027_v25 = vadd.f32 %v1026_v14, %v873_v42 }
 0x182   :  { %v3278_v34 = vadd.f32 %v1179_v43, %v1027_v25 }
 0x185   :  { %v1186_v36 = vpop.f32.mrf.mxu2  ;;  %v1224_v33 = vpop.f32.mrf.mxu3 }
 0x186   :  { %v3282_v63 = vadd.f32 %v1224_v33, %v1072_v24  ;;  %v875_v11 = vpop.f32.mrf.mxu0 }
 0x187   :  { %v1028_v12 = vpop.f32.mrf.mxu1 }
 0x188   :  { %v1029_v57 = vadd.f32 %v1028_v12, %v875_v11  ;;  %v1079_v12 = vadd.f32 %v3184_v15, %v2956_v9 }
 0x18a   :  { %v3284_v10 = vadd.f32 %v1181_v23, %v1029_v57 }
 0x18d   :  { %v1189_v54 = vpop.f32.mrf.mxu2  ;;  %v1226_v6 = vpop.f32.mrf.mxu3 }
 0x18e   :  { %v3288_v42 = vadd.f32 %v1226_v6, %v1074_v27  ;;  %v878_v28 = vpop.f32.mrf.mxu0 }
 0x18f   :  { %v1031_v43 = vpop.f32.mrf.mxu1 }
 0x190   :  { %v1032_v14 = vadd.f32 %v1031_v43, %v878_v28  ;;  %v1082_v43 = vadd.f32 %v3195_v44, %v2966_v22  ;;  %v1539_v22 = vadd.f32 %v2869_v16, %v2859_v7 }
 0x192   :  { %v3290_v35 = vadd.f32 %v1184_v18, %v1032_v14 }
 0x195   :  { %v3294_v25 = vpop.f32.mrf.mxu2  ;;  %v1229_v24 = vpop.f32.mrf.mxu3 }
 0x196   :  { %v3296_v23 = vadd.f32 %v1229_v24, %v1077_v4  ;;  %v880_v33 = vpop.f32.mrf.mxu0  ;;  %v1602_v24 = vmul.f32 %v2859_v7, %v2859_v7 }
 0x197   :  { %v1033_v11 = vpop.f32.mrf.mxu1 }
 0x198   :  { %v1034_v48 = vadd.f32 %v1033_v11, %v880_v33  ;;  %v1605_v11 = vmul.f32 %v2902_v41, %v2902_v41 }
 0x19a   :  { %v3298_v30 = vadd.f32 %v1186_v36, %v1034_v48  ;;  %v1603_v36 = vmul.f32 %v2869_v16, %v2869_v16  ;;  %v1540_v48 = vadd.f32 %v1539_v22, %v2892_v31 }
 0x19c   :  { %v1659_v44 = vadd.f32 %v1603_v36, %v1602_v24 }
 0x19d   :  { %v3302_v57 = vpop.f32.mrf.mxu2  ;;  %v1231_v18 = vpop.f32.mrf.mxu3 }
 0x19e   :  { %v3304_v27 = vadd.f32 %v1231_v18, %v1079_v12  ;;  %v883_v6 = vpop.f32.mrf.mxu0  ;;  %v1606_v18 = vmul.f32 %v2925_v56, %v2925_v56 }
 0x19f   :  { %v1036_v59 = vpop.f32.mrf.mxu1 }
 0x1a0   :  { %v1037_v55 = vadd.f32 %v1036_v59, %v883_v6  ;;  %v1541_v6 = vadd.f32 %v1540_v48, %v2902_v41  ;;  %v1084_v59 = vadd.f32 %v3215_v5, %v2989_v39 }
 0x1a2   :  { %v3306_v28 = vadd.f32 %v1189_v54, %v1037_v55  ;;  %v1604_v54 = vmul.f32 %v2892_v31, %v2892_v31  ;;  %v1542_v24 = vadd.f32 %v1541_v6, %v2925_v56  ;;  %v1610_v6 = vmul.f32 %v2991_v49, %v2991_v49 }
 0x1a4   :  { %v1660_v12 = vadd.f32 %v1659_v44, %v1604_v54  ;;  %v1608_v44 = vmul.f32 %v2958_v19, %v2958_v19  ;;  %v1543_v39 = vadd.f32 %v1542_v24, %v2935_v1 }
 0x1a5   :  { %v3312_v14 = vpop.f32.mrf.mxu2  ;;  %v1234_v4 = vpop.f32.mrf.mxu3 }
 0x1a6   :  { %v3314_v9 = vadd.f32 %v1234_v4, %v1082_v43  ;;  %v3316_v15 = vpop.f32.mrf.mxu0  ;;  %v1661_v55 = vadd.f32 %v1660_v12, %v1605_v11  ;;  %v1607_v43 = vmul.f32 %v2935_v1, %v2935_v1  ;;  %v1609_v11 = vmul.f32 %v2968_v29, %v2968_v29 }
 0x1a7   :  { %v3322_v33 = vpop.f32.mrf.mxu1  ;;  %v1544_v12 = vadd.f32 %v1543_v39, %v2958_v19 }
 0x1a8   :  { %v1662_v22 = vadd.f32 %v1661_v55, %v1606_v18  ;;  %v1087_v18 = vadd.f32 %v3226_v58, %v2999_v52  ;;  %v1613_v58 = vmul.f32 %v3029_v26, %v3029_v26 }
 0x1aa   :  { %v1663_v5 = vadd.f32 %v1662_v22, %v1607_v43 }
 0x1ac   :  { %v1664_v41 = vadd.f32 %v1663_v5, %v1608_v44  ;;  %v1612_v5 = vmul.f32 %v3019_v13, %v3019_v13 }
 0x1ad   :  { %v3336_v4 = vpop.f32.mrf.mxu2  ;;  %v1236_v36 = vpop.f32.mrf.mxu3 }
 0x1ae   :  { %v3339_v16 = vadd.f32 %v1236_v36, %v1084_v59  ;;  %v3341_v54 = vpop.f32.mrf.mxu0  ;;  %v1545_v59 = vadd.f32 %v1544_v12, %v2968_v29  ;;  %v1665_v55 = vadd.f32 %v1664_v41, %v1609_v11  ;;  %v1611_v36 = vmul.f32 %v3002_v61, %v3002_v61 }
 0x1af   :  { %v3345_v48 = vpop.f32.mrf.mxu1 }
 0x1b0   :  { %v1546_v22 = vadd.f32 %v1545_v59, %v2991_v49  ;;  %v1666_v39 = vadd.f32 %v1665_v55, %v1610_v6  ;;  %v1614_v59 = vmul.f32 %v3052_v47, %v3052_v47  ;;  %v1089_v6 = vadd.f32 %v3243_v46, %v3017_v2 }
 0x1b1   :  { %v1617_v46 = vmul.f32 %v3095_v38, %v3095_v38 }
 0x1b2   :  { %v1547_v41 = vadd.f32 %v1546_v22, %v3002_v61  ;;  %v1667_v52 = vadd.f32 %v1666_v39, %v1611_v36 }
 0x1b4   :  { %v1548_v11 = vadd.f32 %v1547_v41, %v3019_v13  ;;  %v1668_v29 = vadd.f32 %v1667_v52, %v1612_v5  ;;  %v1616_v52 = vmul.f32 %v3084_v21, %v3084_v21 }
 0x1b5   :  { %v3358_v24 = vpop.f32.mrf.mxu2  ;;  %v1239_v43 = vpop.f32.mrf.mxu3 }
 0x1b6   :  { %v3361_v1 = vadd.f32 %v1239_v43, %v1087_v18  ;;  %v3363_v44 = vpop.f32.mrf.mxu0  ;;  %v1549_v18 = vadd.f32 %v1548_v11, %v3029_v26  ;;  %v1669_v55 = vadd.f32 %v1668_v29, %v1613_v58  ;;  %v1615_v43 = vmul.f32 %v3063_v62, %v3063_v62 }
 0x1b7   :  { %v3367_v12 = vpop.f32.mrf.mxu1 }
 0x1b8   :  { %v1550_v39 = vadd.f32 %v1549_v18, %v3052_v47  ;;  %v1670_v41 = vadd.f32 %v1669_v55, %v1614_v59  ;;  %v1618_v18 = vmul.f32 %v3118_v0, %v3118_v0  ;;  %v1092_v59 = vadd.f32 %v3253_v3, %v3027_v17 }
 0x1b9   :  { %v1621_v3 = vmul.f32 %v3163_v51, %v3163_v51 }
 0x1ba   :  { %v1551_v29 = vadd.f32 %v1550_v39, %v3063_v62  ;;  %v1671_v2 = vadd.f32 %v1670_v41, %v1615_v43 }
 0x1bc   :  { %v1552_v58 = vadd.f32 %v1551_v29, %v3084_v21  ;;  %v1672_v26 = vadd.f32 %v1671_v2, %v1616_v52  ;;  %v1620_v2 = vmul.f32 %v3152_v45, %v3152_v45  ;;  %v3998_v21 = vld [vmem:[#allocation25_spill] sm:$0xff] }
 0x1bd   :  { %v3380_v22 = vpop.f32.mrf.mxu2  ;;  %v1241_v36 = vpop.f32.mrf.mxu3 }
 0x1be   :  { %v3383_v61 = vadd.f32 %v1241_v36, %v1089_v6  ;;  %v3385_v5 = vpop.f32.mrf.mxu0  ;;  %v1553_v6 = vadd.f32 %v1552_v58, %v3095_v38  ;;  %v1673_v55 = vadd.f32 %v1672_v26, %v1617_v46  ;;  %v1619_v36 = vmul.f32 %v3129_v8, %v3129_v8 }
 0x1bf   :  { %v3389_v11 = vpop.f32.mrf.mxu1 }
 0x1c0   :  { %v1554_v41 = vadd.f32 %v1553_v6, %v3118_v0  ;;  %v1674_v29 = vadd.f32 %v1673_v55, %v1618_v18  ;;  %v1622_v6 = vmul.f32 %v3186_v40, %v3186_v40  ;;  %v1094_v18 = vadd.f32 %v3270_v60, %v3050_v37  ;;  %v3997_v60 = vld [vmem:[#allocation24_spill] sm:$0xff] }
 0x1c2   :  { %v1555_v17 = vadd.f32 %v1554_v41, %v3129_v8  ;;  %v1675_v26 = vadd.f32 %v1674_v29, %v1619_v36 }
 0x1c4   :  { %v1556_v46 = vadd.f32 %v1555_v17, %v3152_v45  ;;  %v1676_v38 = vadd.f32 %v1675_v26, %v1620_v2  ;;  %v3996_v26 = vld [vmem:[#allocation23_spill] sm:$0xff] }
 0x1c5   :  { %v3402_v39 = vpop.f32.mrf.mxu2  ;;  %v1244_v43 = vpop.f32.mrf.mxu3 }
 0x1c6   :  { %v3405_v62 = vadd.f32 %v1244_v43, %v1092_v59  ;;  %v3407_v52 = vpop.f32.mrf.mxu0  ;;  %v1557_v59 = vadd.f32 %v1556_v46, %v3163_v51  ;;  %v1677_v55 = vadd.f32 %v1676_v38, %v1621_v3  ;;  %v1623_v43 = vmul.f32 %v3200_v32, %v3200_v32 }
 0x1c7   :  { %v3411_v58 = vpop.f32.mrf.mxu1  ;;  %v1624_v46 = vmul.f32 %v3996_v26, %v3996_v26  ;;  %v1625_v3 = vmul.f32 %v3997_v60, %v3997_v60 }
 0x1c8   :  { %v1558_v29 = vadd.f32 %v1557_v59, %v3186_v40  ;;  %v1678_v17 = vadd.f32 %v1677_v55, %v1622_v6  ;;  %v1626_v59 = vmul.f32 %v3998_v21, %v3998_v21  ;;  %v4000_v40 = vld [vmem:[#allocation26_spill] sm:$0xff] }
 0x1c9   :  { %v1627_v47 = vmul.f32 %v4000_v40, %v4000_v40 }
 0x1ca   :  { %v1559_v37 = vadd.f32 %v1558_v29, %v3200_v32  ;;  %v1679_v38 = vadd.f32 %v1678_v17, %v1623_v43 }
 0x1cc   :  { %v1560_v45 = vadd.f32 %v1559_v37, %v3996_v26  ;;  %v1680_v0 = vadd.f32 %v1679_v38, %v1624_v46  ;;  %v1628_v38 = vmul.f32 %v3272_v20, %v3272_v20 }
 0x1cd   :  { %v3424_v41 = vpop.f32.mrf.mxu2  ;;  %v1246_v36 = vpop.f32.mrf.mxu3 }
 0x1ce   :  { %v3427_v8 = vadd.f32 %v1246_v36, %v1094_v18  ;;  %v3429_v2 = vpop.f32.mrf.mxu0  ;;  %v1561_v18 = vadd.f32 %v1560_v45, %v3997_v60  ;;  %v3999_v36 = vld [vmem:[#allocation11_spill] sm:$0xff]  ;;  %v1681_v55 = vadd.f32 %v1680_v0, %v1625_v3  ;;  %v1629_v0 = vmul.f32 %v3276_v53, %v3276_v53 }
 0x1cf   :  { %v1051_v51 = vpop.f32.mrf.mxu1  ;;  %v1097_v6 = vadd.f32 %v3274_v50, %v3999_v36 }
 0x1d0   :  { %v1562_v17 = vadd.f32 %v1561_v18, %v3998_v21  ;;  %v1682_v37 = vadd.f32 %v1681_v55, %v1626_v59  ;;  %v1630_v18 = vmul.f32 %v3278_v34, %v3278_v34  ;;  %v1631_v59 = vmul.f32 %v3284_v10, %v3284_v10 }
 0x1d1   :  { %v1039_v55 = vadd.f32 %v3322_v33, %v3316_v15  ;;  %v1044_v33 = vadd.f32 %v3367_v12, %v3363_v44 }
 0x1d2   :  { %v1563_v60 = vadd.f32 %v1562_v17, %v4000_v40  ;;  %v1683_v50 = vadd.f32 %v1682_v37, %v1627_v47 }
 0x1d3   :  { %v3471_v15 = vadd.f32 %v3294_v25, %v1039_v55  ;;  %v3487_v44 = vadd.f32 %v3312_v14, %v1044_v33  ;;  %v1052_v14 = vadd.f32 %v1051_v51, %v3429_v2 }
 0x1d4   :  { %v1564_v3 = vadd.f32 %v1563_v60, %v3272_v20  ;;  %v1684_v36 = vadd.f32 %v1683_v50, %v1628_v38  ;;  %v1632_v60 = vmul.f32 %v3290_v35, %v3290_v35  ;;  %v1042_v38 = vadd.f32 %v3345_v48, %v3341_v54 }
 0x1d5   :  { %v3444_v29 = vpop.f32.mrf.mxu2  ;;  %v1249_v43 = vpop.f32.mrf.mxu3  ;;  %v1635_v25 = vmul.f32 %v3471_v15, %v3471_v15 }
 0x1d6   :  { %v3447_v32 = vadd.f32 %v1249_v43, %v1097_v6  ;;  %v900_v46 = vpop.f32.mrf.mxu0  ;;  %v1565_v6 = vadd.f32 %v1564_v3, %v3276_v53  ;;  %v1685_v43 = vadd.f32 %v1684_v36, %v1629_v0  ;;  %v1633_v36 = vmul.f32 %v3298_v30, %v3298_v30 }
 0x1d7   :  { %v1053_v45 = vpop.f32.mrf.mxu1  ;;  %v3479_v54 = vadd.f32 %v3302_v57, %v1042_v38 }
 0x1d8   :  { %v1566_v37 = vadd.f32 %v1565_v6, %v3278_v34  ;;  %v1686_v21 = vadd.f32 %v1685_v43, %v1630_v18  ;;  %v1634_v43 = vmul.f32 %v3306_v28, %v3306_v28 }
 0x1da   :  { %v1567_v0 = vadd.f32 %v1566_v37, %v3284_v10  ;;  %v1687_v3 = vadd.f32 %v1686_v21, %v1631_v59  ;;  %v1047_v21 = vadd.f32 %v3389_v11, %v3385_v5  ;;  %v1636_v5 = vmul.f32 %v3479_v54, %v3479_v54 }
 0x1dc   :  { %v1568_v18 = vadd.f32 %v1567_v0, %v3290_v35  ;;  %v1688_v6 = vadd.f32 %v1687_v3, %v1632_v60  ;;  %v3495_v11 = vadd.f32 %v3336_v4, %v1047_v21  ;;  %v1637_v3 = vmul.f32 %v3487_v44, %v3487_v44 }
 0x1dd   :  { %v1214_v17 = vpop.f32.mrf.mxu2  ;;  %v1251_v47 = vpop.f32.mrf.mxu3 }
 0x1de   :  { %v903_v40 = vpop.f32.mrf.mxu0  ;;  %v1569_v48 = vadd.f32 %v1568_v18, %v3298_v30  ;;  %v1689_v59 = vadd.f32 %v1688_v6, %v1633_v36  ;;  %v1049_v47 = vadd.f32 %v3411_v58, %v3407_v52  ;;  %v1054_v58 = vadd.f32 %v1053_v45, %v900_v46 }
 0x1df   :  { %v1056_v50 = vpop.f32.mrf.mxu1  ;;  %v1638_v4 = vmul.f32 %v3495_v11, %v3495_v11  ;;  %v3509_v6 = vadd.f32 %v3380_v22, %v1052_v14 }
 0x1e0   :  { %v1570_v55 = vadd.f32 %v1569_v48, %v3306_v28  ;;  %v1690_v37 = vadd.f32 %v1689_v59, %v1634_v43  ;;  %v3503_v52 = vadd.f32 %v3358_v24, %v1049_v47  ;;  %v1057_v51 = vadd.f32 %v1056_v50, %v903_v40 }
 0x1e1   :  { %v3515_v24 = vadd.f32 %v3402_v39, %v1054_v58  ;;  %v1640_v22 = vmul.f32 %v3509_v6, %v3509_v6  ;;  %v4001_v58 = vld [vmem:[#allocation2_spill] sm:$0xff] }
 0x1e2   :  { %v1571_v38 = vadd.f32 %v1570_v55, %v3471_v15  ;;  %v1691_v0 = vadd.f32 %v1690_v37, %v1635_v25  ;;  %v1639_v21 = vmul.f32 %v3503_v52, %v3503_v52  ;;  %v3521_v40 = vadd.f32 %v3424_v41, %v1057_v51 }
 0x1e3   :  { %v1641_v39 = vmul.f32 %v3515_v24, %v3515_v24 }
 0x1e4   :  { %v1572_v36 = vadd.f32 %v1571_v38, %v3479_v54  ;;  %v1692_v33 = vadd.f32 %v1691_v0, %v1636_v5  ;;  %v1642_v38 = vmul.f32 %v3521_v40, %v3521_v40 }
 0x1e5   :  { %v1216_v12 = vpop.f32.mrf.mxu2 }
 0x1e6   :  { %v905_v57 = vpop.f32.mrf.mxu0  ;;  %v1573_v18 = vadd.f32 %v1572_v36, %v3487_v44  ;;  %v1693_v2 = vadd.f32 %v1692_v33, %v1637_v3  ;;  %v4002_v33 = vld [vmem:[#allocation14_spill] sm:$0xff] }
 0x1e7   :  { %v1058_v60 = vpop.f32.mrf.mxu1 }
 0x1e8   :  { %v1574_v43 = vadd.f32 %v1573_v18, %v3495_v11  ;;  %v1059_v46 = vadd.f32 %v1058_v60, %v905_v57  ;;  %v1694_v48 = vadd.f32 %v1693_v2, %v1638_v4  ;;  %v1067_v4 = vadd.f32 %v4002_v33, %v4001_v58 }
 0x1e9   :  { %v1649_v33 = vmul.f32 %v3288_v42, %v3288_v42 }
 0x1ea   :  { %v1575_v55 = vadd.f32 %v1574_v43, %v3503_v52  ;;  %v1695_v47 = vadd.f32 %v1694_v48, %v1639_v21  ;;  %v3527_v57 = vadd.f32 %v3444_v29, %v1059_v46  ;;  %v4004_v21 = vld [vmem:[#allocation16_spill] sm:$0xff] }
 0x1ec   :  { %v1576_v37 = vadd.f32 %v1575_v55, %v3509_v6  ;;  %v1696_v5 = vadd.f32 %v1695_v47, %v1640_v22  ;;  %v1643_v3 = vmul.f32 %v3527_v57, %v3527_v57 }
 0x1ed   :  { %v1219_v59 = vpop.f32.mrf.mxu2 }
 0x1ee   :  { %v908_v45 = vpop.f32.mrf.mxu0  ;;  %v1577_v60 = vadd.f32 %v1576_v37, %v3515_v24  ;;  %v1697_v41 = vadd.f32 %v1696_v5, %v1641_v39 }
 0x1ef   :  { %v1061_v25 = vpop.f32.mrf.mxu1 }
 0x1f0   :  { %v1062_v50 = vadd.f32 %v1061_v25, %v908_v45  ;;  %v1578_v0 = vadd.f32 %v1577_v60, %v3521_v40  ;;  %v1698_v18 = vadd.f32 %v1697_v41, %v1642_v38  ;;  %v3544_v25 = vadd.f32 %v1219_v59, %v1067_v4 }
 0x1f1   :  { %v1253_v59 = vlaneseq }
 0x1f2   :  { %v3532_v14 = vadd.f32 %v1214_v17, %v1062_v50  ;;  %v1579_v51 = vadd.f32 %v1578_v0, %v3527_v57  ;;  %v4003_v17 = vld [vmem:[#allocation4_spill] sm:$0xff]  ;;  %v1699_v48 = vadd.f32 %v1698_v18, %v1643_v3  ;;  %v1646_v5 = vmul.f32 %v3544_v25, %v3544_v25 }
 0x1f3   :  { %v1069_v46 = vadd.f32 %v4004_v21, %v4003_v17  ;;  %v1648_v3 = vmul.f32 %v3282_v63, %v3282_v63  ;;  %v1254_v4 = vshrl.u32 %v1253_v59, 7  ;;  %v1651_v17 = vmul.f32 %v3304_v27, %v3304_v27 }
 0x1f4   :  { %v1644_v2 = vmul.f32 %v3532_v14, %v3532_v14  ;;  %v1580_v55 = vadd.f32 %v1579_v51, %v3532_v14  ;;  %v1650_v51 = vmul.f32 %v3296_v23, %v3296_v23 }
 0x1f5   :  { %v1221_v45 = vpop.f32.mrf.mxu2  ;;  %v1310_v21 = vadd.s32 448, %v1254_v4 }
 0x1f6   :  { %v910_v36 = vpop.f32.mrf.mxu0  ;;  %v1700_v50 = vadd.f32 %v1699_v48, %v1644_v2  ;;  %v3549_v47 = vadd.f32 %v1221_v45, %v1069_v46  ;;  %v1652_v48 = vmul.f32 %v3314_v9, %v3314_v9 }
 0x1f7   :  { %v1063_v29 = vpop.f32.mrf.mxu1  ;;  %vm1367_vm1 = vcmp.lt.s32.totalorder %v1310_v21, 450 }
 0x1f8   :  { %v1064_v43 = vadd.f32 %v1063_v29, %v910_v36  ;;  %v1647_v41 = vmul.f32 %v3549_v47, %v3549_v47 }
 0x1fa   :  { %v3547_v22 = vadd.f32 %v1216_v12, %v1064_v43 }
 0x1fc   :  { %v1581_v37 = vadd.f32 %v1580_v55, %v3547_v22  ;;  %v1645_v39 = vmul.f32 %v3547_v22, %v3547_v22 }
 0x1fe   :  { %v1582_v60 = vadd.f32 %v1581_v37, %v3544_v25  ;;  %v1701_v38 = vadd.f32 %v1700_v50, %v1645_v39  ;;  %v1653_v37 = vmul.f32 %v3339_v16, %v3339_v16 }
 0x200   :  { %v1583_v12 = vadd.f32 %v1582_v60, %v3549_v47  ;;  %v1702_v0 = vadd.f32 %v1701_v38, %v1646_v5  ;;  %v1654_v60 = vmul.f32 %v3361_v1, %v3361_v1 }
 0x202   :  { %v1584_v36 = vadd.f32 %v1583_v12, %v3282_v63  ;;  %v1703_v58 = vadd.f32 %v1702_v0, %v1647_v41  ;;  %v2539_v41 = vmov 0.0   ;;  %v1655_v0 = vmul.f32 %v3383_v61, %v3383_v61 }
 0x203   :  { %v2415_v12 = vsel %vm1367_vm1, 1.0, %v2539_v41 }
 0x204   :  { %v1585_v29 = vadd.f32 %v1584_v36, %v3288_v42  ;;  %v1704_v18 = vadd.f32 %v1703_v58, %v1648_v3  ;;  %v1656_v58 = vmul.f32 %v3405_v62, %v3405_v62 }
 0x206   :  { %v1586_v2 = vadd.f32 %v1585_v29, %v3296_v23  ;;  %v1705_v43 = vadd.f32 %v1704_v18, %v1649_v33  ;;  %v1538_v33 = vmul.f32 %v2415_v12, %v3447_v32  ;;  %v1657_v18 = vmul.f32 %v3427_v8, %v3427_v8 }
 0x208   :  { %v1587_v46 = vadd.f32 %v1586_v2, %v3304_v27  ;;  %v1706_v45 = vadd.f32 %v1705_v43, %v1650_v51  ;;  %v1658_v43 = vmul.f32 %v1538_v33, %v1538_v33 }
 0x20a   :  { %v1588_v55 = vadd.f32 %v1587_v46, %v3314_v9  ;;  %v1707_v50 = vadd.f32 %v1706_v45, %v1651_v17 }
 0x20c   :  { %v1589_v39 = vadd.f32 %v1588_v55, %v3339_v16  ;;  %v1708_v5 = vadd.f32 %v1707_v50, %v1652_v48 }
 0x20e   :  { %v1590_v38 = vadd.f32 %v1589_v39, %v3361_v1  ;;  %v1709_v59 = vadd.f32 %v1708_v5, %v1653_v37 }
 0x210   :  { %v1591_v3 = vadd.f32 %v1590_v38, %v3383_v61  ;;  %v1710_v36 = vadd.f32 %v1709_v59, %v1654_v60 }
 0x212   :  { %v1592_v4 = vadd.f32 %v1591_v3, %v3405_v62  ;;  %v1711_v29 = vadd.f32 %v1710_v36, %v1655_v0 }
 0x214   :  { %v1593_v51 = vadd.f32 %v1592_v4, %v3427_v8  ;;  %v1712_v2 = vadd.f32 %v1711_v29, %v1656_v58 }
 0x216   :  { %v1594_v17 = vadd.f32 %v1593_v51, %v1538_v33  ;;  %v1713_v21 = vadd.f32 %v1712_v2, %v1657_v18 }
 0x218   :  { %v1595_v46 = vrot.slane %v1594_v17, 4  ;;  %v1714_v45 = vadd.f32 %v1713_v21, %v1658_v43 }
 0x21a   :  { %v1596_v48 = vadd.f32 %v1595_v46, %v1594_v17  ;;  %v1715_v55 = vrot.slane %v1714_v45, 4  ;;  %v1724_v17 = vld [vmem:[%s3945_s2] sm:$0x1] }
 0x21c   :  { %v1597_v50 = vrot.slane %v1596_v48, 2  ;;  %v1716_v37 = vadd.f32 %v1715_v55, %v1714_v45 }
 0x21e   :  { %v1598_v39 = vadd.f32 %v1597_v50, %v1596_v48  ;;  %v1717_v5 = vrot.slane %v1716_v37, 2  ;;  %v1737_v48 = vld [vmem:[%s3946_s3] sm:$0x1] }
 0x220   :  { %v1599_v60 = vrot.slane %v1598_v39, 1  ;;  %v1718_v38 = vadd.f32 %v1717_v5, %v1716_v37  ;;  %v4005_v5 = vld [vmem:[#allocation3_spill] sm:$0xff] }
 0x222   :  { %v1600_v59 = vadd.f32 %v1599_v60, %v1598_v39  ;;  %v1719_v41 = vrot.slane %v1718_v38, 1 }
 0x224   :  { %v1601_v12 = vmul.f32 0.0022222223, %v1600_v59  ;;  %v1720_v0 = vadd.f32 %v1719_v41, %v1718_v38  ;;  %v4006_v59 = vld [vmem:[#allocation5_spill] sm:$0xff] }
 0x226   :  { %v1721_v3 = vmul.f32 0.0022222223, %v1720_v0  ;;  %v1722_v36 = vmul.f32 %v1601_v12, %v1601_v12 }
 0x228   :  { %v1723_v58 = vsub.f32 %v1721_v3, %v1722_v36 }
 0x22a   :  { %v1725_v4 = vadd.f32 1e-05, %v1723_v58  ;;  %v4007_v58 = vld [vmem:[#allocation6_spill] sm:$0xff] }
 0x22c   :  { %2537 = vrsqrt.f32 %v1725_v4  ;;  %vm1732_vm3 = vweird.f32 %v1725_v4 }
 0x232   :  { %v2538_v33 = vpop.eup %2537 }
 0x233   :  { %v1727_v29 = vmul.f32 %v2538_v33, %v1725_v4  ;;  %vm1733_vm2 = vweird.f32 %v2538_v33 }
 0x234   :  { %vm1734_vm4 = vmor %vm1732_vm3, %vm1733_vm2 }
 0x235   :  { %v1728_v18 = vmul.f32 %v2538_v33, %v1727_v29  ;;  %v4008_v29 = vld [vmem:[#allocation7_spill] sm:$0xff] }
 0x237   :  { %v1729_v51 = vmul.f32 0.5, %v1728_v18 }
 0x239   :  { %v1730_v2 = vsub.f32 1.5, %v1729_v51 }
 0x23b   :  { %v1731_v43 = vmul.f32 %v2538_v33, %v1730_v2 }
 0x23d   :  { %v1735_v21 = vsel %vm1734_vm4, %v2538_v33, %v1731_v43 }
 0x23e   :  { %v1736_v46 = vmul.f32 %v1735_v21, %v1724_v17 }
 0x240   :  { %v1738_v45 = vmul.f32 %v1736_v46, %v1601_v12  ;;  %v3597_v50 = vperm.slane %v1736_v46, 0  ;;  %v4009_v46 = vld [vmem:[#allocation8_spill] sm:$0xff] }
 0x242   :  { %v1739_v55 = vsub.f32 %v1737_v48, %v1738_v45  ;;  %v1743_v39 = vmul.f32 %v3597_v50, %v2859_v7  ;;  %v1744_v60 = vmul.f32 %v3597_v50, %v4005_v5  ;;  %v1745_v38 = vmul.f32 %v3597_v50, %v2892_v31 }
 0x243   :  { %v1746_v41 = vmul.f32 %v3597_v50, %v4006_v59  ;;  %v1747_v12 = vmul.f32 %v3597_v50, %v2925_v56  ;;  %v1748_v7 = vmul.f32 %v3597_v50, %v4007_v58  ;;  %v1749_v31 = vmul.f32 %v3597_v50, %v2958_v19 }
 0x244   :  { %v3599_v37 = vperm.slane %v1739_v55, 0  ;;  %v1750_v18 = vmul.f32 %v3597_v50, %v4008_v29  ;;  %v1751_v56 = vmul.f32 %v3597_v50, %v2991_v49  ;;  %v1752_v45 = vmul.f32 %v3597_v50, %v4009_v46  ;;  %v4010_v49 = vld [vmem:[#allocation9_spill] sm:$0xff] }
 0x245   :  { %v1753_v55 = vmul.f32 %v3597_v50, %v3019_v13 }
 0x246   :  { %v1803_v0 = vadd.f32 %v3599_v37, %v1743_v39  ;;  %v1804_v3 = vadd.f32 %v3599_v37, %v1744_v60  ;;  %v1805_v36 = vadd.f32 %v3599_v37, %v1745_v38  ;;  %v1806_v4 = vadd.f32 %v3599_v37, %v1746_v41  ;;  %v4011_v41 = vld [vmem:[#allocation10_spill] sm:$0xff] }
 0x247   :  { %v1807_v33 = vadd.f32 %v3599_v37, %v1747_v12  ;;  %v1808_v51 = vadd.f32 %v3599_v37, %v1748_v7  ;;  %v1809_v2 = vadd.f32 %v3599_v37, %v1749_v31  ;;  %v1810_v19 = vadd.f32 %v3599_v37, %v1750_v18  ;;  %v4014_v18 = vld [vmem:[#allocation15_spill] sm:$0xff] }
 0x248   :  { %v1860_v43 = vmax.f32 %v1803_v0, 0.0  ;;  %v1861_v17 = vmax.f32 %v1804_v3, 0.0  ;;  %v1862_v21 = vmax.f32 %v1805_v36, 0.0  ;;  %v1863_v48 = vmax.f32 %v1806_v4, 0.0  ;;  %v4012_v3 = vld [vmem:[#allocation12_spill] sm:$0xff]  ;;  %v4013_v4 = vld [vmem:[#allocation13_spill] sm:$0xff] }
 0x249   :  { %v1811_v39 = vadd.f32 %v3599_v37, %v1751_v56  ;;  %v1864_v5 = vmax.f32 %v1807_v33, 0.0  ;;  %v1754_v60 = vmul.f32 %v3597_v50, %v4010_v49  ;;  %v1812_v38 = vadd.f32 %v3599_v37, %v1752_v45  ;;  %v4016_v45 = vld [vmem:[#allocation18_spill] sm:$0xff] }
 0x24a   :  { %1917 = vst [vmem:[%s3947_s4] sm:$0xff] %v1860_v43  ;;  %v1865_v59 = vmax.f32 %v1808_v51, 0.0  ;;  %v1755_v13 = vmul.f32 %v3597_v50, %v4011_v41  ;;  %v1813_v12 = vadd.f32 %v3599_v37, %v1753_v55  ;;  %v1866_v0 = vmax.f32 %v1809_v2, 0.0  ;;  %v4015_v43 = vld [vmem:[#allocation17_spill] sm:$0xff] }
 0x24b   :  { %1918 = vst [vmem:[%s3947_s4 + $0x8] sm:$0xff] %v1861_v17  ;;  %v1756_v36 = vmul.f32 %v3597_v50, %v4012_v3  ;;  %v1814_v58 = vadd.f32 %v3599_v37, %v1754_v60  ;;  %v1867_v7 = vmax.f32 %v1810_v19, 0.0  ;;  %v1757_v31 = vmul.f32 %v3597_v50, %v4013_v4 }
 0x24c   :  { %1919 = vst [vmem:[%s3947_s4 + $0x10] sm:$0xff] %v1862_v21  ;;  %v1815_v33 = vadd.f32 %v3599_v37, %v1755_v13  ;;  %v1868_v29 = vmax.f32 %v1811_v39, 0.0  ;;  %v1758_v56 = vmul.f32 %v3597_v50, %v4014_v18  ;;  %v1869_v2 = vmax.f32 %v1812_v38, 0.0  ;;  %v4017_v39 = vld [vmem:[#allocation19_spill] sm:$0xff]  ;;  %v4018_v38 = vld [vmem:[#allocation20_spill] sm:$0xff] }
 0x24d   :  { %1920 = vst [vmem:[%s3947_s4 + $0x18] sm:$0xff] %v1863_v48  ;;  %v1816_v51 = vadd.f32 %v3599_v37, %v1756_v36  ;;  %v1759_v17 = vmul.f32 %v3597_v50, %v4015_v43  ;;  %v1817_v21 = vadd.f32 %v3599_v37, %v1757_v31  ;;  %v1870_v46 = vmax.f32 %v1813_v12, 0.0  ;;  %v4019_v12 = vld [vmem:[#allocation21_spill] sm:$0xff] }
 0x24e   :  { %1921 = vst [vmem:[%s3947_s4 + $0x20] sm:$0xff] %v1864_v5  ;;  %v1760_v19 = vmul.f32 %v3597_v50, %v4016_v45  ;;  %v1818_v48 = vadd.f32 %v3599_v37, %v1758_v56  ;;  %v1871_v55 = vmax.f32 %v1814_v58, 0.0  ;;  %v1761_v5 = vmul.f32 %v3597_v50, %v4017_v39  ;;  %v4020_v58 = vld [vmem:[#allocation22_spill] sm:$0xff]  ;;  %v4021_v56 = vld [vmem:[#allocation24_spill] sm:$0xff] }
 0x24f   :  { %1922 = vst [vmem:[%s3947_s4 + $0x28] sm:$0xff] %v1865_v59  ;;  %v1819_v49 = vadd.f32 %v3599_v37, %v1759_v17  ;;  %v1872_v60 = vmax.f32 %v1815_v33, 0.0  ;;  %v1762_v59 = vmul.f32 %v3597_v50, %v4018_v38  ;;  %v1873_v13 = vmax.f32 %v1816_v51, 0.0  ;;  %v4022_v17 = vld [vmem:[#allocation25_spill] sm:$0xff]  ;;  %v4023_v45 = vld [vmem:[#allocation26_spill] sm:$0xff] }
 0x250   :  { %1923 = vst [vmem:[%s3947_s4 + $0x30] sm:$0xff] %v1866_v0  ;;  %v1820_v41 = vadd.f32 %v3599_v37, %v1760_v19  ;;  %v1763_v0 = vmul.f32 %v3597_v50, %v4019_v12  ;;  %v1821_v3 = vadd.f32 %v3599_v37, %v1761_v5  ;;  %v1874_v36 = vmax.f32 %v1817_v21, 0.0 }
 0x251   :  { %1924 = vst [vmem:[%s3947_s4 + $0x38] sm:$0xff] %v1867_v7  ;;  %v1764_v7 = vmul.f32 %v3597_v50, %v4020_v58  ;;  %v1822_v4 = vadd.f32 %v3599_v37, %v1762_v59  ;;  %v1875_v31 = vmax.f32 %v1818_v48, 0.0  ;;  %v1765_v33 = vmul.f32 %v3597_v50, %v3996_v26 }
 0x252   :  { %1925 = vst [vmem:[%s3947_s4 + $0x40] sm:$0xff] %v1868_v29  ;;  %v1823_v29 = vadd.f32 %v3599_v37, %v1763_v0  ;;  %v1876_v18 = vmax.f32 %v1819_v49, 0.0  ;;  %v1766_v51 = vmul.f32 %v3597_v50, %v4021_v56  ;;  %v1877_v43 = vmax.f32 %v1820_v41, 0.0 }
 0x253   :  { %1926 = vst [vmem:[%s3947_s4 + $0x48] sm:$0xff] %v1869_v2  ;;  %v1824_v2 = vadd.f32 %v3599_v37, %v1764_v7  ;;  %v1767_v26 = vmul.f32 %v3597_v50, %v4022_v17  ;;  %v1825_v21 = vadd.f32 %v3599_v37, %v1765_v33  ;;  %v1768_v19 = vmul.f32 %v3597_v50, %v4023_v45 }
 0x254   :  { %1927 = vst [vmem:[%s3947_s4 + $0x50] sm:$0xff] %v1870_v46  ;;  %v1878_v46 = vmax.f32 %v1821_v3, 0.0  ;;  %v1826_v48 = vadd.f32 %v3599_v37, %v1766_v51  ;;  %v1769_v39 = vmul.f32 %v3597_v50, %v3272_v20  ;;  %v1880_v49 = vmax.f32 %v1823_v29, 0.0 }
 0x255   :  { %1928 = vst [vmem:[%s3947_s4 + $0x58] sm:$0xff] %v1871_v55  ;;  %v1879_v55 = vmax.f32 %v1822_v4, 0.0  ;;  %v1827_v5 = vadd.f32 %v3599_v37, %v1767_v26  ;;  %v1828_v38 = vadd.f32 %v3599_v37, %v1768_v19  ;;  %v1881_v59 = vmax.f32 %v1824_v2, 0.0 }
 0x256   :  { %1929 = vst [vmem:[%s3947_s4 + $0x60] sm:$0xff] %v1872_v60  ;;  %v1770_v60 = vmul.f32 %v3597_v50, %v3276_v53  ;;  %v1771_v20 = vmul.f32 %v3597_v50, %v3278_v34  ;;  %v1829_v41 = vadd.f32 %v3599_v37, %v1769_v39  ;;  %v1772_v53 = vmul.f32 %v3597_v50, %v3284_v10 }
 0x257   :  { %1930 = vst [vmem:[%s3947_s4 + $0x68] sm:$0xff] %v1873_v13  ;;  %v1882_v13 = vmax.f32 %v1825_v21, 0.0  ;;  %v1883_v0 = vmax.f32 %v1826_v48, 0.0  ;;  %v1773_v34 = vmul.f32 %v3597_v50, %v3290_v35  ;;  %v1774_v10 = vmul.f32 %v3597_v50, %v3298_v30 }
 0x258   :  { %1931 = vst [vmem:[%s3947_s4 + $0x70] sm:$0xff] %v1874_v36  ;;  %v1830_v12 = vadd.f32 %v3599_v37, %v1770_v60  ;;  %v1831_v3 = vadd.f32 %v3599_v37, %v1771_v20  ;;  %v1884_v36 = vmax.f32 %v1827_v5, 0.0  ;;  %v1832_v58 = vadd.f32 %v3599_v37, %v1772_v53 }
 0x259   :  { %1932 = vst [vmem:[%s3947_s4 + $0x78] sm:$0xff] %v1875_v31  ;;  %v1885_v7 = vmax.f32 %v1828_v38, 0.0  ;;  %v1775_v35 = vmul.f32 %v3597_v50, %v3306_v28  ;;  %v1833_v4 = vadd.f32 %v3599_v37, %v1773_v34  ;;  %v1886_v31 = vmax.f32 %v1829_v41, 0.0 }
 0x25a   :  { %1933 = vst [vmem:[%s3947_s4 + $0x80] sm:$0xff] %v1876_v18  ;;  %v1776_v30 = vmul.f32 %v3597_v50, %v3471_v15  ;;  %v1834_v33 = vadd.f32 %v3599_v37, %v1774_v10  ;;  %v1887_v29 = vmax.f32 %v1830_v12, 0.0  ;;  %v1777_v28 = vmul.f32 %v3597_v50, %v3479_v54 }
 0x25b   :  { %1934 = vst [vmem:[%s3947_s4 + $0x88] sm:$0xff] %v1877_v43  ;;  %v1835_v18 = vadd.f32 %v3599_v37, %v1775_v35  ;;  %v1888_v56 = vmax.f32 %v1831_v3, 0.0  ;;  %v1778_v15 = vmul.f32 %v3597_v50, %v3487_v44  ;;  %v1889_v2 = vmax.f32 %v1832_v58, 0.0 }
 0x25c   :  { %1935 = vst [vmem:[%s3947_s4 + $0x90] sm:$0xff] %v1878_v46  ;;  %v1836_v51 = vadd.f32 %v3599_v37, %v1776_v30  ;;  %v1779_v54 = vmul.f32 %v3597_v50, %v3495_v11  ;;  %v1837_v43 = vadd.f32 %v3599_v37, %v1777_v28  ;;  %v1890_v17 = vmax.f32 %v1833_v4, 0.0 }
 0x25d   :  { %1936 = vst [vmem:[%s3947_s4 + $0x98] sm:$0xff] %v1879_v55  ;;  %v1780_v44 = vmul.f32 %v3597_v50, %v3503_v52  ;;  %v1838_v26 = vadd.f32 %v3599_v37, %v1778_v15  ;;  %v1891_v21 = vmax.f32 %v1834_v33, 0.0  ;;  %v1781_v11 = vmul.f32 %v3597_v50, %v3509_v6 }
 0x25e   :  { %1937 = vst [vmem:[%s3947_s4 + $0xa0] sm:$0xff] %v1880_v49  ;;  %v1839_v46 = vadd.f32 %v3599_v37, %v1779_v54  ;;  %v1892_v45 = vmax.f32 %v1835_v18, 0.0  ;;  %v1782_v52 = vmul.f32 %v3597_v50, %v3515_v24  ;;  %v1893_v48 = vmax.f32 %v1836_v51, 0.0 }
 0x25f   :  { %1938 = vst [vmem:[%s3947_s4 + $0xa8] sm:$0xff] %v1881_v59  ;;  %v1840_v19 = vadd.f32 %v3599_v37, %v1780_v44  ;;  %v1783_v6 = vmul.f32 %v3597_v50, %v3521_v40  ;;  %v1841_v55 = vadd.f32 %v3599_v37, %v1781_v11  ;;  %v1894_v39 = vmax.f32 %v1837_v43, 0.0 }
 0x260   :  { %1939 = vst [vmem:[%s3947_s4 + $0xb0] sm:$0xff] %v1882_v13  ;;  %v1784_v24 = vmul.f32 %v3597_v50, %v3527_v57  ;;  %v1842_v5 = vadd.f32 %v3599_v37, %v1782_v52  ;;  %v1895_v49 = vmax.f32 %v1838_v26, 0.0  ;;  %v1785_v40 = vmul.f32 %v3597_v50, %v3532_v14 }
 0x261   :  { %1940 = vst [vmem:[%s3947_s4 + $0xb8] sm:$0xff] %v1883_v0  ;;  %v1843_v60 = vadd.f32 %v3599_v37, %v1783_v6  ;;  %v1896_v38 = vmax.f32 %v1839_v46, 0.0  ;;  %v1786_v57 = vmul.f32 %v3597_v50, %v3547_v22  ;;  %v1897_v20 = vmax.f32 %v1840_v19, 0.0 }
 0x262   :  { %1941 = vst [vmem:[%s3947_s4 + $0xc0] sm:$0xff] %v1884_v36  ;;  %v1844_v59 = vadd.f32 %v3599_v37, %v1784_v24  ;;  %v1787_v14 = vmul.f32 %v3597_v50, %v3544_v25  ;;  %v1845_v41 = vadd.f32 %v3599_v37, %v1785_v40  ;;  %v1898_v13 = vmax.f32 %v1841_v55, 0.0 }
 0x263   :  { %1942 = vst [vmem:[%s3947_s4 + $0xc8] sm:$0xff] %v1885_v7  ;;  %v1788_v22 = vmul.f32 %v3597_v50, %v3549_v47  ;;  %v1846_v53 = vadd.f32 %v3599_v37, %v1786_v57  ;;  %v1899_v12 = vmax.f32 %v1842_v5, 0.0  ;;  %v1789_v25 = vmul.f32 %v3597_v50, %v3282_v63 }
 0x264   :  { %1943 = vst [vmem:[%s3947_s4 + $0xd0] sm:$0xff] %v1886_v31  ;;  %v1847_v0 = vadd.f32 %v3599_v37, %v1787_v14  ;;  %v1900_v34 = vmax.f32 %v1843_v60, 0.0  ;;  %v1790_v47 = vmul.f32 %v3597_v50, %v3288_v42  ;;  %v1901_v36 = vmax.f32 %v1844_v59, 0.0 }
 0x265   :  { %1944 = vst [vmem:[%s3947_s4 + $0xd8] sm:$0xff] %v1887_v29  ;;  %v1848_v3 = vadd.f32 %v3599_v37, %v1788_v22  ;;  %v1791_v63 = vmul.f32 %v3597_v50, %v3296_v23  ;;  %v1849_v10 = vadd.f32 %v3599_v37, %v1789_v25  ;;  %v1902_v58 = vmax.f32 %v1845_v41, 0.0 }
 0x266   :  { %1945 = vst [vmem:[%s3947_s4 + $0xe0] sm:$0xff] %v1888_v56  ;;  %v1792_v42 = vmul.f32 %v3597_v50, %v3304_v27  ;;  %v1850_v7 = vadd.f32 %v3599_v37, %v1790_v47  ;;  %v1903_v35 = vmax.f32 %v1846_v53, 0.0  ;;  %v1793_v23 = vmul.f32 %v3597_v50, %v3314_v9 }
 0x267   :  { %1946 = vst [vmem:[%s3947_s4 + $0xe8] sm:$0xff] %v1889_v2  ;;  %v1851_v4 = vadd.f32 %v3599_v37, %v1791_v63  ;;  %v1904_v31 = vmax.f32 %v1847_v0, 0.0  ;;  %v1794_v27 = vmul.f32 %v3597_v50, %v3339_v16  ;;  %v1905_v33 = vmax.f32 %v1848_v3, 0.0 }
 0x268   :  { %1947 = vst [vmem:[%s3947_s4 + $0xf0] sm:$0xff] %v1890_v17  ;;  %v1852_v30 = vadd.f32 %v3599_v37, %v1792_v42  ;;  %v1795_v9 = vmul.f32 %v3597_v50, %v3361_v1  ;;  %v1853_v29 = vadd.f32 %v3599_v37, %v1793_v23  ;;  %v1906_v28 = vmax.f32 %v1849_v10, 0.0 }
 0x269   :  { %1948 = vst [vmem:[%s3947_s4 + $0xf8] sm:$0xff] %v1891_v21  ;;  %v1796_v16 = vmul.f32 %v3597_v50, %v3383_v61  ;;  %v1854_v18 = vadd.f32 %v3599_v37, %v1794_v27  ;;  %v1907_v56 = vmax.f32 %v1850_v7, 0.0  ;;  %v1797_v1 = vmul.f32 %v3597_v50, %v3405_v62 }
 0x26a   :  { %1949 = vst [vmem:[%s3947_s4 + $0x100] sm:$0xff] %v1892_v45  ;;  %v1855_v15 = vadd.f32 %v3599_v37, %v1795_v9  ;;  %v1908_v51 = vmax.f32 %v1851_v4, 0.0  ;;  %v1798_v61 = vmul.f32 %v3597_v50, %v3427_v8  ;;  %v1909_v54 = vmax.f32 %v1852_v30, 0.0 }
 0x26b   :  { %1950 = vst [vmem:[%s3947_s4 + $0x108] sm:$0xff] %v1893_v48  ;;  %v1856_v2 = vadd.f32 %v3599_v37, %v1796_v16  ;;  %v1799_v62 = vmul.f32 %v3597_v50, %v3447_v32  ;;  %v1857_v43 = vadd.f32 %v3599_v37, %v1797_v1  ;;  %v1910_v17 = vmax.f32 %v1853_v29, 0.0 }
 0x26c   :  { %1951 = vst [vmem:[%s3947_s4 + $0x110] sm:$0xff] %v1894_v39  ;;  %v1858_v44 = vadd.f32 %v3599_v37, %v1798_v61  ;;  %v1911_v8 = vmax.f32 %v1854_v18, 0.0  ;;  %v1912_v21 = vmax.f32 %v1855_v15, 0.0 }
 0x26d   :  { %1952 = vst [vmem:[%s3947_s4 + $0x118] sm:$0xff] %v1895_v49  ;;  %v1859_v26 = vadd.f32 %v3599_v37, %v1799_v62  ;;  %v1913_v32 = vmax.f32 %v1856_v2, 0.0  ;;  %v1914_v50 = vmax.f32 %v1857_v43, 0.0 }
 0x26e   :  { %1953 = vst [vmem:[%s3947_s4 + $0x120] sm:$0xff] %v1896_v38  ;;  %v1915_v11 = vmax.f32 %v1858_v44, 0.0 }
 0x26f   :  { %1954 = vst [vmem:[%s3947_s4 + $0x128] sm:$0xff] %v1897_v20  ;;  %v1916_v37 = vmax.f32 %v1859_v26, 0.0 }
 0x270   :  { %1955 = vst [vmem:[%s3947_s4 + $0x130] sm:$0xff] %v1898_v13 }
 0x271   :  { %1956 = vst [vmem:[%s3947_s4 + $0x138] sm:$0xff] %v1899_v12 }
 0x272   :  { %1957 = vst [vmem:[%s3947_s4 + $0x140] sm:$0xff] %v1900_v34 }
 0x273   :  { %1958 = vst [vmem:[%s3947_s4 + $0x148] sm:$0xff] %v1901_v36 }
 0x274   :  { %1959 = vst [vmem:[%s3947_s4 + $0x150] sm:$0xff] %v1902_v58 }
 0x275   :  { %1960 = vst [vmem:[%s3947_s4 + $0x158] sm:$0xff] %v1903_v35 }
 0x276   :  { %1961 = vst [vmem:[%s3947_s4 + $0x160] sm:$0xff] %v1904_v31 }
 0x277   :  { %1962 = vst [vmem:[%s3947_s4 + $0x168] sm:$0xff] %v1905_v33 }
 0x278   :  { %1963 = vst [vmem:[%s3947_s4 + $0x170] sm:$0xff] %v1906_v28 }
 0x279   :  { %1964 = vst [vmem:[%s3947_s4 + $0x178] sm:$0xff] %v1907_v56 }
 0x27a   :  { %1965 = vst [vmem:[%s3947_s4 + $0x180] sm:$0xff] %v1908_v51 }
 0x27b   :  { %1966 = vst [vmem:[%s3947_s4 + $0x188] sm:$0xff] %v1909_v54 }
 0x27c   :  { %1967 = vst [vmem:[%s3947_s4 + $0x190] sm:$0xff] %v1910_v17 }
 0x27d   :  { %1968 = vst [vmem:[%s3947_s4 + $0x198] sm:$0xff] %v1911_v8 }
 0x27e   :  { %1969 = vst [vmem:[%s3947_s4 + $0x1a0] sm:$0xff] %v1912_v21 }
 0x27f   :  { %1970 = vst [vmem:[%s3947_s4 + $0x1a8] sm:$0xff] %v1913_v32 }
 0x280   :  { %1971 = vst [vmem:[%s3947_s4 + $0x1b0] sm:$0xff] %v1914_v50 }
 0x281   :  { %1972 = vst [vmem:[%s3947_s4 + $0x1b8] sm:$0xff] %v1915_v11 }
 0x282   :  { %1973 = vst [vmem:[%s3947_s4 + $0x1c0] sm:$0xff] %v1916_v37 }

// kernel: _lambda_.8
= control target key start
LH: loop header
LB: loop body
LE: loop exit
PB: predicated region body
PF: predicated region fallthrough
CT: control target
= control target key end

     0   :  { %vm1417_vm0 = vcmask 130048   ;;  %s12840_s1 = inlined_call_operand.vmem [shape: bf16[144,128], index: 1, kind: input, shape index: {}]   ;;  %s12841_s0 = inlined_call_operand.vmem [shape: bf16[1928,144], index: 0, kind: input, shape index: {}]   ;;  %s12842_s2 = inlined_call_operand.vmem [shape: f32[1,128], index: 2, kind: input, shape index: {}]   ;;  %s12843_s3 = inlined_call_operand.vmem [shape: f32[1,128], index: 3, kind: input, shape index: {}]   ;;  %s12844_s4 = inlined_call_operand.vmem [shape: f32[1928,128], index: 4, kind: output, shape index: {}]  }
   0x1   :  { %v7305_v0 = vld [vmem:[%s12840_s1 + $0x38] sm:$0xff]  ;;  %v7306_v1 = vld [vmem:[%s12840_s1 + $0x40] sm:$0xff]  ;;  %v5944_v3 = vld [vmem:[%s12841_s0 + $0x8] sm:$0xf0] }
   0x2   :  { %v7058_v2 = vld [vmem:[%s12841_s0 + $0x4] sm:$0xf]  ;;  %1781 = vmatpush.bf16.msra.mxu0 %v7305_v0  ;;  %2401 = vmatpush.bf16.msra.mxu1 %v7306_v1  ;;  %v7304_v5 = vld [vmem:[%s12840_s1 + $0x30] sm:$0xff]  ;;  %v7303_v6 = vld [vmem:[%s12840_s1 + $0x28] sm:$0xff] }
   0x3   :  { %v5947_v4 = vor.u32 %v7058_v2, %v5944_v3  ;;  %7307 = vmatpush.bf16.msra.mxu2 %v7305_v0  ;;  %7315 = vmatpush.bf16.msra.mxu3 %v7306_v1  ;;  %v7302_v7 = vld [vmem:[%s12840_s1 + $0x20] sm:$0xff]  ;;  %v7301_v8 = vld [vmem:[%s12840_s1 + $0x18] sm:$0xff]  ;;  %v7060_v9 = vld [vmem:[%s12841_s0 + $0x14] sm:$0xf] }
   0x4   :  { %v5952_v10 = vld [vmem:[%s12841_s0 + $0x18] sm:$0xf0]  ;;  %v7300_v12 = vld [vmem:[%s12840_s1 + $0x10] sm:$0xff]  ;;  %v7299_v13 = vld [vmem:[%s12840_s1 + $0x8] sm:$0xff] }
   0x5   :  { %6936 = vmatmul.msk.bf16.vlgmr.msra.gmra.mxu1 %vm1417_vm0, %v5947_v4  ;;  %v5955_v11 = vor.u32 %v7060_v9, %v5952_v10  ;;  %v7298_v14 = vld [vmem:[%s12840_s1] sm:$0xff]  ;;  %v7059_v16 = vld [vmem:[%s12841_s0 + $0x4] sm:$0xf0]  ;;  %v5960_v19 = vld [vmem:[%s12841_s0 + $0x28] sm:$0xf0] }
   0x6   :  { %1782 = vmatpush.bf16.msra.mxu0 %v7304_v5  ;;  %v5942_v15 = vld [vmem:[%s12841_s0] sm:$0xf]  ;;  %v7062_v18 = vld [vmem:[%s12841_s0 + $0x24] sm:$0xf]  ;;  %v5950_v21 = vld [vmem:[%s12841_s0 + $0x10] sm:$0xf] }
   0x7   :  { %7308 = vmatpush.bf16.msra.mxu2 %v7304_v5  ;;  %v5943_v17 = vor.u32 %v7059_v16, %v5942_v15  ;;  %v5963_v20 = vor.u32 %v7062_v18, %v5960_v19  ;;  %v7061_v22 = vld [vmem:[%s12841_s0 + $0x14] sm:$0xf0]  ;;  %v7064_v24 = vld [vmem:[%s12841_s0 + $0x34] sm:$0xf]  ;;  %v5968_v25 = vld [vmem:[%s12841_s0 + $0x38] sm:$0xf0] }
   0x8   :  { %v5951_v23 = vor.u32 %v7061_v22, %v5950_v21  ;;  %v5971_v26 = vor.u32 %v7064_v24, %v5968_v25  ;;  %v5958_v27 = vld [vmem:[%s12841_s0 + $0x20] sm:$0xf]  ;;  %v7063_v28 = vld [vmem:[%s12841_s0 + $0x24] sm:$0xf0]  ;;  %v7066_v30 = vld [vmem:[%s12841_s0 + $0x44] sm:$0xf] }
   0x9   :  { %v5959_v29 = vor.u32 %v7063_v28, %v5958_v27  ;;  %v5976_v31 = vld [vmem:[%s12841_s0 + $0x48] sm:$0xf0]  ;;  %v5966_v33 = vld [vmem:[%s12841_s0 + $0x30] sm:$0xf]  ;;  %v7065_v34 = vld [vmem:[%s12841_s0 + $0x34] sm:$0xf0] }
   0xa   :  { %1783 = vmatpush.bf16.msra.mxu0 %v7303_v6  ;;  %v5979_v32 = vor.u32 %v7066_v30, %v5976_v31  ;;  %v5967_v35 = vor.u32 %v7065_v34, %v5966_v33  ;;  %v7068_v36 = vld [vmem:[%s12841_s0 + $0x54] sm:$0xf]  ;;  %v5984_v37 = vld [vmem:[%s12841_s0 + $0x58] sm:$0xf0]  ;;  %v5974_v39 = vld [vmem:[%s12841_s0 + $0x40] sm:$0xf] }
   0xb   :  { %7309 = vmatpush.bf16.msra.mxu2 %v7303_v6  ;;  %v5987_v38 = vor.u32 %v7068_v36, %v5984_v37  ;;  %v7067_v40 = vld [vmem:[%s12841_s0 + $0x44] sm:$0xf0]  ;;  %v7070_v42 = vld [vmem:[%s12841_s0 + $0x64] sm:$0xf]  ;;  %v5992_v43 = vld [vmem:[%s12841_s0 + $0x68] sm:$0xf0] }
   0xc   :  { %v5975_v41 = vor.u32 %v7067_v40, %v5974_v39  ;;  %v5995_v44 = vor.u32 %v7070_v42, %v5992_v43  ;;  %v5982_v45 = vld [vmem:[%s12841_s0 + $0x50] sm:$0xf]  ;;  %v7069_v46 = vld [vmem:[%s12841_s0 + $0x54] sm:$0xf0]  ;;  %v7072_v48 = vld [vmem:[%s12841_s0 + $0x74] sm:$0xf] }
   0xd   :  { %v5983_v47 = vor.u32 %v7069_v46, %v5982_v45  ;;  %v6000_v49 = vld [vmem:[%s12841_s0 + $0x78] sm:$0xf0]  ;;  %v5990_v51 = vld [vmem:[%s12841_s0 + $0x60] sm:$0xf]  ;;  %v7071_v52 = vld [vmem:[%s12841_s0 + $0x64] sm:$0xf0] }
   0xe   :  { %1784 = vmatpush.bf16.msra.mxu0 %v7302_v7  ;;  %v6003_v50 = vor.u32 %v7072_v48, %v6000_v49  ;;  %v5991_v53 = vor.u32 %v7071_v52, %v5990_v51  ;;  %v7074_v54 = vld [vmem:[%s12841_s0 + $0x84] sm:$0xf]  ;;  %v6008_v55 = vld [vmem:[%s12841_s0 + $0x88] sm:$0xf0]  ;;  %v5998_v59 = vld [vmem:[%s12841_s0 + $0x70] sm:$0xf] }
   0xf   :  { %7310 = vmatpush.bf16.msra.mxu2 %v7302_v7  ;;  %v6011_v56 = vor.u32 %v7074_v54, %v6008_v55  ;;  %v7073_v60 = vld [vmem:[%s12841_s0 + $0x74] sm:$0xf0]  ;;  %v7076_v62 = vld [vmem:[%s12841_s0 + $0x94] sm:$0xf]  ;;  %v6016_v63 = vld [vmem:[%s12841_s0 + $0x98] sm:$0xf0] }
  0x10   :  { %v5999_v61 = vor.u32 %v7073_v60, %v5998_v59  ;;  %v6019_v0 = vor.u32 %v7076_v62, %v6016_v63  ;;  %v6006_v3 = vld [vmem:[%s12841_s0 + $0x80] sm:$0xf]  ;;  %v7075_v4 = vld [vmem:[%s12841_s0 + $0x84] sm:$0xf0]  ;;  %v7078_v7 = vld [vmem:[%s12841_s0 + $0xa4] sm:$0xf] }
  0x11   :  { %v6007_v5 = vor.u32 %v7075_v4, %v6006_v3  ;;  %v6014_v15 = vld [vmem:[%s12841_s0 + $0x90] sm:$0xf]  ;;  %v7077_v16 = vld [vmem:[%s12841_s0 + $0x94] sm:$0xf0]  ;;  %v7080_v19 = vld [vmem:[%s12841_s0 + $0xb4] sm:$0xf] }
  0x12   :  { %1785 = vmatpush.bf16.msra.mxu0 %v7301_v8  ;;  %v6022_v27 = vld [vmem:[%s12841_s0 + $0xa0] sm:$0xf]  ;;  %v7079_v28 = vld [vmem:[%s12841_s0 + $0xa4] sm:$0xf0]  ;;  %v7082_v31 = vld [vmem:[%s12841_s0 + $0xc4] sm:$0xf] }
  0x13   :  { %7311 = vmatpush.bf16.msra.mxu2 %v7301_v8  ;;  %v6024_v8 = vld [vmem:[%s12841_s0 + $0xa8] sm:$0xf0]  ;;  %v6030_v39 = vld [vmem:[%s12841_s0 + $0xb0] sm:$0xf]  ;;  %v7081_v40 = vld [vmem:[%s12841_s0 + $0xb4] sm:$0xf0] }
  0x14   :  { %v6027_v10 = vor.u32 %v7078_v7, %v6024_v8  ;;  %v7084_v43 = vld [vmem:[%s12841_s0 + $0xd4] sm:$0xf]  ;;  %v7179_v51 = vld [vmem:[%s12841_s0 + $0x3c4] sm:$0xf0]  ;;  %v6038_v54 = vld [vmem:[%s12841_s0 + $0xc0] sm:$0xf] }
  0x15   :  { %6937 = vmatmul.msk.bf16.gmra.mxu1 %vm1417_vm0, %v5955_v11  ;;  %v7083_v55 = vld [vmem:[%s12841_s0 + $0xc4] sm:$0xf0]  ;;  %v6056_v59 = vld [vmem:[%s12841_s0 + $0xe8] sm:$0xf0] }
  0x16   :  { %1786 = vmatpush.bf16.msra.mxu0 %v7300_v12 }
  0x17   :  { %7312 = vmatpush.bf16.msra.mxu2 %v7300_v12 }
  0x1a   :  { %1787 = vmatpush.bf16.msra.mxu0 %v7299_v13 }
  0x1b   :  { %7313 = vmatpush.bf16.msra.mxu2 %v7299_v13 }
  0x1e   :  { %1788 = vmatpush.bf16.msra.mxu0 %v7298_v14 }
  0x1f   :  { %7314 = vmatpush.bf16.msra.mxu2 %v7298_v14 }
  0x21   :  { %1789 = vmatmul.bf16.vlgmr.msra.gmra.mxu0 %v5943_v17  ;;  %v6015_v17 = vor.u32 %v7077_v16, %v6014_v15 }
  0x25   :  { %6938 = vmatmul.msk.bf16.gmra.mxu1 %vm1417_vm0, %v5963_v20  ;;  %v6032_v20 = vld [vmem:[%s12841_s0 + $0xb8] sm:$0xf0] }
  0x26   :  { %v6035_v22 = vor.u32 %v7080_v19, %v6032_v20  ;;  %v7183_v19 = vld [vmem:[%s12841_s0 + $0x3e4] sm:$0xf0]  ;;  %v7182_v20 = vld [vmem:[%s12841_s0 + $0x3e4] sm:$0xf] }
  0x31   :  { %1794 = vmatmul.bf16.gmra.mxu0 %v5951_v23 }
  0x35   :  { %6939 = vmatmul.msk.bf16.gmra.mxu1 %vm1417_vm0, %v5971_v26 }
  0x41   :  { %1799 = vmatmul.bf16.gmra.mxu0 %v5959_v29  ;;  %v6023_v29 = vor.u32 %v7079_v28, %v6022_v27  ;;  %v7087_v27 = vld [vmem:[%s12841_s0 + $0xe4] sm:$0xf0] }
  0x45   :  { %6940 = vmatmul.msk.bf16.gmra.mxu1 %vm1417_vm0, %v5979_v32  ;;  %v6040_v32 = vld [vmem:[%s12841_s0 + $0xc8] sm:$0xf0] }
  0x46   :  { %v6043_v34 = vor.u32 %v7082_v31, %v6040_v32  ;;  %v7090_v31 = vld [vmem:[%s12841_s0 + $0x104] sm:$0xf]  ;;  %v6072_v32 = vld [vmem:[%s12841_s0 + $0x108] sm:$0xf0] }
  0x51   :  { %1804 = vmatmul.bf16.gmra.mxu0 %v5967_v35 }
  0x55   :  { %6941 = vmatmul.msk.bf16.gmra.mxu1 %vm1417_vm0, %v5987_v38 }
  0x61   :  { %1809 = vmatmul.bf16.gmra.mxu0 %v5975_v41  ;;  %v6031_v41 = vor.u32 %v7081_v40, %v6030_v39  ;;  %v6446_v40 = vld [vmem:[%s12841_s0 + $0x3f0] sm:$0xf] }
  0x65   :  { %6942 = vmatmul.msk.bf16.gmra.mxu1 %vm1417_vm0, %v5995_v44  ;;  %v6048_v44 = vld [vmem:[%s12841_s0 + $0xd8] sm:$0xf0] }
  0x66   :  { %v6051_v46 = vor.u32 %v7084_v43, %v6048_v44  ;;  %v6448_v44 = vld [vmem:[%s12841_s0 + $0x3f8] sm:$0xf0] }
  0x71   :  { %1814 = vmatmul.bf16.gmra.mxu0 %v5983_v47 }
  0x75   :  { %6943 = vmatmul.msk.bf16.gmra.mxu1 %vm1417_vm0, %v6003_v50  ;;  %v6422_v50 = vld [vmem:[%s12841_s0 + $0x3c0] sm:$0xf] }
  0x76   :  { %v6423_v52 = vor.u32 %v7179_v51, %v6422_v50 }
  0x78   :  { %2089 = vmatmul.bf16.vlgmr.msra.gmra.mxu2 %v6423_v52 }
  0x81   :  { %1819 = vmatmul.bf16.gmra.mxu0 %v5991_v53 }
  0x82   :  { %v2403_v57 = vpop.f32.mrf.mxu1 }
  0x85   :  { %6944 = vmatmul.msk.bf16.gmra.mxu1 %vm1417_vm0, %v6011_v56  ;;  %v6039_v56 = vor.u32 %v7083_v55, %v6038_v54  ;;  %v6080_v54 = vld [vmem:[%s12841_s0 + $0x118] sm:$0xf0] }
  0x8a   :  { %v2405_v58 = vpop.f32.mrf.mxu1 }
  0x91   :  { %1824 = vmatmul.bf16.gmra.mxu0 %v5999_v61 }
  0x92   :  { %v2408_v1 = vpop.f32.mrf.mxu1 }
  0x95   :  { %6945 = vmatmul.msk.bf16.gmra.mxu1 %vm1417_vm0, %v6019_v0 }
  0x9a   :  { %v2410_v2 = vpop.f32.mrf.mxu1 }
  0x9e   :  { %v1790_v6 = vpop.f32.mrf.mxu0 }
  0x9f   :  { %v7502_v9 = vadd.f32 %v2403_v57, %v1790_v6  ;;  %v7085_v6 = vld [vmem:[%s12841_s0 + $0xd4] sm:$0xf0] }
  0xa1   :  { %13163 = vst [vmem:[#allocation2_spill] sm:$0xff] %v7502_v9  ;;  %1829 = vmatmul.bf16.gmra.mxu0 %v6007_v5  ;;  %v6046_v5 = vld [vmem:[%s12841_s0 + $0xd0] sm:$0xf] }
  0xa2   :  { %v2413_v11 = vpop.f32.mrf.mxu1  ;;  %v6047_v7 = vor.u32 %v7085_v6, %v6046_v5  ;;  %v7091_v5 = vld [vmem:[%s12841_s0 + $0x104] sm:$0xf0] }
  0xa5   :  { %6946 = vmatmul.msk.bf16.gmra.mxu1 %vm1417_vm0, %v6027_v10  ;;  %v7088_v10 = vld [vmem:[%s12841_s0 + $0xf4] sm:$0xf] }
  0xa6   :  { %v1792_v12 = vpop.f32.mrf.mxu0 }
  0xa7   :  { %v7505_v13 = vadd.f32 %v2405_v58, %v1792_v12  ;;  %v7086_v58 = vld [vmem:[%s12841_s0 + $0xe4] sm:$0xf] }
  0xa8   :  { %v6059_v61 = vor.u32 %v7086_v58, %v6056_v59 }
  0xa9   :  { %13164 = vst [vmem:[#allocation3_spill] sm:$0xff] %v7505_v13 }
  0xaa   :  { %v2415_v14 = vpop.f32.mrf.mxu1 }
  0xae   :  { %v1795_v18 = vpop.f32.mrf.mxu0 }
  0xaf   :  { %v7519_v21 = vadd.f32 %v2408_v1, %v1795_v18  ;;  %v6430_v1 = vld [vmem:[%s12841_s0 + $0x3d0] sm:$0xf]  ;;  %v6438_v18 = vld [vmem:[%s12841_s0 + $0x3e0] sm:$0xf] }
  0xb1   :  { %13165 = vst [vmem:[#allocation4_spill] sm:$0xff] %v7519_v21  ;;  %1834 = vmatmul.bf16.gmra.mxu0 %v6015_v17 }
  0xb2   :  { %v2418_v23 = vpop.f32.mrf.mxu1 }
  0xb5   :  { %6947 = vmatmul.msk.bf16.gmra.mxu1 %vm1417_vm0, %v6035_v22  ;;  %v6439_v22 = vor.u32 %v7183_v19, %v6438_v18 }
  0xb6   :  { %v1797_v24 = vpop.f32.mrf.mxu0 }
  0xb7   :  { %v7522_v25 = vadd.f32 %v2410_v2, %v1797_v24  ;;  %v7181_v2 = vld [vmem:[%s12841_s0 + $0x3d4] sm:$0xf0] }
  0xb8   :  { %v6431_v3 = vor.u32 %v7181_v2, %v6430_v1  ;;  %v6456_v2 = vld [vmem:[%s12841_s0 + $0x408] sm:$0xf0] }
  0xb9   :  { %13166 = vst [vmem:[#allocation5_spill] sm:$0xff] %v7522_v25 }
  0xba   :  { %v2420_v26 = vpop.f32.mrf.mxu1  ;;  %2094 = vmatmul.bf16.gmra.mxu2 %v6431_v3 }
  0xbe   :  { %v1800_v30 = vpop.f32.mrf.mxu0 }
  0xbf   :  { %v7536_v33 = vadd.f32 %v2413_v11, %v1800_v30  ;;  %v6064_v11 = vld [vmem:[%s12841_s0 + $0xf8] sm:$0xf0] }
  0xc1   :  { %13167 = vst [vmem:[#allocation6_spill] sm:$0xff] %v7536_v33  ;;  %1839 = vmatmul.bf16.gmra.mxu0 %v6023_v29 }
  0xc2   :  { %v2423_v35 = vpop.f32.mrf.mxu1 }
  0xc5   :  { %6948 = vmatmul.msk.bf16.gmra.mxu1 %vm1417_vm0, %v6043_v34 }
  0xc6   :  { %v1802_v36 = vpop.f32.mrf.mxu0 }
  0xc7   :  { %v7539_v37 = vadd.f32 %v2415_v14, %v1802_v36  ;;  %v6067_v14 = vor.u32 %v7088_v10, %v6064_v11  ;;  %v7094_v10 = vld [vmem:[%s12841_s0 + $0x124] sm:$0xf]  ;;  %v6088_v11 = vld [vmem:[%s12841_s0 + $0x128] sm:$0xf0] }
  0xc9   :  { %13168 = vst [vmem:[#allocation7_spill] sm:$0xff] %v7539_v37 }
  0xca   :  { %v2425_v38 = vpop.f32.mrf.mxu1  ;;  %2099 = vmatmul.bf16.gmra.mxu2 %v6439_v22  ;;  %v7189_v22 = vld [vmem:[%s12841_s0 + $0x414] sm:$0xf0] }
  0xce   :  { %v1805_v42 = vpop.f32.mrf.mxu0 }
  0xcf   :  { %v7553_v45 = vadd.f32 %v2418_v23, %v1805_v42  ;;  %v6440_v23 = vld [vmem:[%s12841_s0 + $0x3e8] sm:$0xf0]  ;;  %v7184_v42 = vld [vmem:[%s12841_s0 + $0x3f4] sm:$0xf] }
  0xd0   :  { %v6443_v28 = vor.u32 %v7182_v20, %v6440_v23  ;;  %v6451_v50 = vor.u32 %v7184_v42, %v6448_v44  ;;  %v6462_v20 = vld [vmem:[%s12841_s0 + $0x410] sm:$0xf]  ;;  %v7188_v23 = vld [vmem:[%s12841_s0 + $0x414] sm:$0xf]  ;;  %v6470_v44 = vld [vmem:[%s12841_s0 + $0x420] sm:$0xf] }
  0xd1   :  { %13169 = vst [vmem:[#allocation8_spill] sm:$0xff] %v7553_v45  ;;  %1844 = vmatmul.bf16.gmra.mxu0 %v6031_v41  ;;  %v7185_v41 = vld [vmem:[%s12841_s0 + $0x3f4] sm:$0xf0] }
  0xd2   :  { %v2428_v47 = vpop.f32.mrf.mxu1  ;;  %6998 = vmatmul.msk.bf16.vlgmr.msra.gmra.mxu3 %vm1417_vm0, %v6443_v28  ;;  %v6447_v43 = vor.u32 %v7185_v41, %v6446_v40  ;;  %v6078_v28 = vld [vmem:[%s12841_s0 + $0x110] sm:$0xf] }
  0xd5   :  { %6949 = vmatmul.msk.bf16.gmra.mxu1 %vm1417_vm0, %v6051_v46 }
  0xd6   :  { %v1807_v48 = vpop.f32.mrf.mxu0 }
  0xd7   :  { %v7556_v49 = vadd.f32 %v2420_v26, %v1807_v48  ;;  %v6054_v26 = vld [vmem:[%s12841_s0 + $0xe0] sm:$0xf]  ;;  %v7089_v48 = vld [vmem:[%s12841_s0 + $0xf4] sm:$0xf0] }
  0xd8   :  { %v6055_v29 = vor.u32 %v7087_v27, %v6054_v26  ;;  %v6464_v26 = vld [vmem:[%s12841_s0 + $0x418] sm:$0xf0] }
  0xd9   :  { %13170 = vst [vmem:[#allocation9_spill] sm:$0xff] %v7556_v49 }
  0xda   :  { %v2430_v53 = vpop.f32.mrf.mxu1  ;;  %2104 = vmatmul.bf16.gmra.mxu2 %v6447_v43 }
  0xde   :  { %v1810_v57 = vpop.f32.mrf.mxu0 }
  0xdf   :  { %v7576_v60 = vadd.f32 %v2423_v35, %v1810_v57  ;;  %v6075_v35 = vor.u32 %v7090_v31, %v6072_v32 }
  0xe1   :  { %13171 = vst [vmem:[#allocation10_spill] sm:$0xff] %v7576_v60  ;;  %1849 = vmatmul.bf16.gmra.mxu0 %v6039_v56 }
  0xe2   :  { %v2433_v62 = vpop.f32.mrf.mxu1  ;;  %6999 = vmatmul.msk.bf16.gmra.mxu3 %vm1417_vm0, %v6451_v50  ;;  %v6472_v50 = vld [vmem:[%s12841_s0 + $0x428] sm:$0xf0] }
  0xe5   :  { %6950 = vmatmul.msk.bf16.gmra.mxu1 %vm1417_vm0, %v6059_v61  ;;  %v6454_v61 = vld [vmem:[%s12841_s0 + $0x400] sm:$0xf] }
  0xe6   :  { %v1812_v63 = vpop.f32.mrf.mxu0 }
  0xe7   :  { %v7579_v0 = vadd.f32 %v2425_v38, %v1812_v63  ;;  %v7186_v63 = vld [vmem:[%s12841_s0 + $0x404] sm:$0xf] }
  0xe8   :  { %v6459_v6 = vor.u32 %v7186_v63, %v6456_v2 }
  0xe9   :  { %13172 = vst [vmem:[#allocation11_spill] sm:$0xff] %v7579_v0 }
  0xea   :  { %v2435_v4 = vpop.f32.mrf.mxu1 }
  0xee   :  { %v1815_v8 = vpop.f32.mrf.mxu0 }
  0xef   :  { %v7599_v12 = vadd.f32 %v2428_v47, %v1815_v8  ;;  %v6062_v47 = vld [vmem:[%s12841_s0 + $0xf0] sm:$0xf] }
  0xf0   :  { %v6063_v51 = vor.u32 %v7089_v48, %v6062_v47  ;;  %v7190_v47 = vld [vmem:[%s12841_s0 + $0x424] sm:$0xf] }
  0xf1   :  { %13173 = vst [vmem:[#allocation12_spill] sm:$0xff] %v7599_v12  ;;  %1854 = vmatmul.bf16.gmra.mxu0 %v6047_v7 }
  0xf2   :  { %v2438_v15 = vpop.f32.mrf.mxu1  ;;  %7000 = vmatmul.msk.bf16.gmra.mxu3 %vm1417_vm0, %v6459_v6  ;;  %v7192_v6 = vld [vmem:[%s12841_s0 + $0x434] sm:$0xf] }
  0xf5   :  { %6951 = vmatmul.msk.bf16.gmra.mxu1 %vm1417_vm0, %v6067_v14 }
  0xf6   :  { %v1817_v16 = vpop.f32.mrf.mxu0 }
  0xf7   :  { %v7602_v17 = vadd.f32 %v2430_v53, %v1817_v16  ;;  %v7092_v53 = vld [vmem:[%s12841_s0 + $0x114] sm:$0xf] }
  0xf8   :  { %v6083_v56 = vor.u32 %v7092_v53, %v6080_v54  ;;  %v7095_v53 = vld [vmem:[%s12841_s0 + $0x124] sm:$0xf0]  ;;  %v6475_v54 = vor.u32 %v7190_v47, %v6472_v50  ;;  %v6120_v50 = vld [vmem:[%s12841_s0 + $0x168] sm:$0xf0] }
  0xf9   :  { %13174 = vst [vmem:[#allocation13_spill] sm:$0xff] %v7602_v17 }
  0xfa   :  { %v2440_v24 = vpop.f32.mrf.mxu1 }
  0xfe   :  { %v1820_v30 = vpop.f32.mrf.mxu0 }
  0xff   :  { %v7629_v34 = vadd.f32 %v2433_v62, %v1820_v30  ;;  %v7187_v62 = vld [vmem:[%s12841_s0 + $0x404] sm:$0xf0]  ;;  %v6467_v30 = vor.u32 %v7188_v23, %v6464_v26  ;;  %v6112_v23 = vld [vmem:[%s12841_s0 + $0x158] sm:$0xf0] }
 0x100   :  { %v6455_v1 = vor.u32 %v7187_v62, %v6454_v61  ;;  %v6104_v61 = vld [vmem:[%s12841_s0 + $0x148] sm:$0xf0] }
 0x101   :  { %13175 = vst [vmem:[#allocation14_spill] sm:$0xff] %v7629_v34  ;;  %1859 = vmatmul.bf16.gmra.mxu0 %v6055_v29  ;;  %v7093_v29 = vld [vmem:[%s12841_s0 + $0x114] sm:$0xf0] }
 0x102   :  { %v2443_v36 = vpop.f32.mrf.mxu1  ;;  %2109 = vmatmul.bf16.gmra.mxu2 %v6455_v1  ;;  %7001 = vmatmul.msk.bf16.gmra.mxu3 %vm1417_vm0, %v6467_v30  ;;  %v6079_v31 = vor.u32 %v7093_v29, %v6078_v28  ;;  %v6486_v30 = vld [vmem:[%s12841_s0 + $0x440] sm:$0xf] }
 0x105   :  { %6952 = vmatmul.msk.bf16.gmra.mxu1 %vm1417_vm0, %v6075_v35  ;;  %v7096_v35 = vld [vmem:[%s12841_s0 + $0x134] sm:$0xf] }
 0x106   :  { %v1822_v38 = vpop.f32.mrf.mxu0 }
 0x107   :  { %v7632_v39 = vadd.f32 %v2435_v4, %v1822_v38  ;;  %v6070_v4 = vld [vmem:[%s12841_s0 + $0x100] sm:$0xf] }
 0x108   :  { %v6071_v7 = vor.u32 %v7091_v5, %v6070_v4  ;;  %v6478_v4 = vld [vmem:[%s12841_s0 + $0x430] sm:$0xf]  ;;  %v7193_v5 = vld [vmem:[%s12841_s0 + $0x434] sm:$0xf0] }
 0x109   :  { %13176 = vst [vmem:[#allocation15_spill] sm:$0xff] %v7632_v39 }
 0x10a   :  { %v2445_v46 = vpop.f32.mrf.mxu1 }
 0x10e   :  { %v1825_v52 = vpop.f32.mrf.mxu0 }
 0x10f   :  { %v7659_v55 = vadd.f32 %v2438_v15, %v1825_v52  ;;  %v6091_v15 = vor.u32 %v7094_v10, %v6088_v11  ;;  %v6086_v52 = vld [vmem:[%s12841_s0 + $0x120] sm:$0xf]  ;;  %v6094_v11 = vld [vmem:[%s12841_s0 + $0x130] sm:$0xf] }
 0x111   :  { %13177 = vst [vmem:[#allocation16_spill] sm:$0xff] %v7659_v55  ;;  %1864 = vmatmul.bf16.gmra.mxu0 %v6063_v51 }
 0x112   :  { %v2448_v57 = vpop.f32.mrf.mxu1  ;;  %7002 = vmatmul.msk.bf16.gmra.mxu3 %vm1417_vm0, %v6475_v54 }
 0x115   :  { %6953 = vmatmul.msk.bf16.gmra.mxu1 %vm1417_vm0, %v6083_v56  ;;  %v6087_v56 = vor.u32 %v7095_v53, %v6086_v52 }
 0x116   :  { %v1827_v58 = vpop.f32.mrf.mxu0 }
 0x117   :  { %v7662_v59 = vadd.f32 %v2440_v24, %v1827_v58  ;;  %v6463_v24 = vor.u32 %v7189_v22, %v6462_v20  ;;  %v7098_v58 = vld [vmem:[%s12841_s0 + $0x144] sm:$0xf]  ;;  %v7100_v22 = vld [vmem:[%s12841_s0 + $0x154] sm:$0xf] }
 0x118   :  { %v6107_v63 = vor.u32 %v7098_v58, %v6104_v61  ;;  %v6115_v26 = vor.u32 %v7100_v22, %v6112_v23  ;;  %v6494_v61 = vld [vmem:[%s12841_s0 + $0x450] sm:$0xf] }
 0x119   :  { %13178 = vst [vmem:[#allocation17_spill] sm:$0xff] %v7662_v59  ;;  %2114 = vmatmul.bf16.gmra.mxu2 %v6463_v24 }
 0x11a   :  { %v2450_v3 = vpop.f32.mrf.mxu1 }
 0x11e   :  { %v1830_v8 = vpop.f32.mrf.mxu0 }
 0x11f   :  { %v7689_v14 = vadd.f32 %v2443_v36, %v1830_v8  ;;  %v6096_v36 = vld [vmem:[%s12841_s0 + $0x138] sm:$0xf0] }
 0x120   :  { %v6099_v40 = vor.u32 %v7096_v35, %v6096_v36  ;;  %v6480_v8 = vld [vmem:[%s12841_s0 + $0x438] sm:$0xf0]  ;;  %v6488_v36 = vld [vmem:[%s12841_s0 + $0x448] sm:$0xf0] }
 0x121   :  { %13179 = vst [vmem:[#allocation18_spill] sm:$0xff] %v7689_v14  ;;  %1869 = vmatmul.bf16.gmra.mxu0 %v6071_v7  ;;  %v6479_v7 = vor.u32 %v7193_v5, %v6478_v4  ;;  %v6496_v4 = vld [vmem:[%s12841_s0 + $0x458] sm:$0xf0] }
 0x122   :  { %v2453_v16 = vpop.f32.mrf.mxu1 }
 0x125   :  { %6954 = vmatmul.msk.bf16.gmra.mxu1 %vm1417_vm0, %v6091_v15  ;;  %v7097_v15 = vld [vmem:[%s12841_s0 + $0x134] sm:$0xf0] }
 0x126   :  { %v1832_v18 = vpop.f32.mrf.mxu0 }
 0x127   :  { %v7692_v19 = vadd.f32 %v2445_v46, %v1832_v18  ;;  %v7191_v46 = vld [vmem:[%s12841_s0 + $0x424] sm:$0xf0]  ;;  %v6095_v18 = vor.u32 %v7097_v15, %v6094_v11  ;;  %v7104_v15 = vld [vmem:[%s12841_s0 + $0x174] sm:$0xf] }
 0x128   :  { %v6471_v48 = vor.u32 %v7191_v46, %v6470_v44 }
 0x129   :  { %13180 = vst [vmem:[#allocation19_spill] sm:$0xff] %v7692_v19 }
 0x12a   :  { %v2455_v27 = vpop.f32.mrf.mxu1  ;;  %2119 = vmatmul.bf16.gmra.mxu2 %v6471_v48  ;;  %v7102_v48 = vld [vmem:[%s12841_s0 + $0x164] sm:$0xf] }
 0x12b   :  { %v6123_v53 = vor.u32 %v7102_v48, %v6120_v50  ;;  %v7106_v48 = vld [vmem:[%s12841_s0 + $0x184] sm:$0xf]  ;;  %v6136_v50 = vld [vmem:[%s12841_s0 + $0x188] sm:$0xf0] }
 0x12e   :  { %v1835_v32 = vpop.f32.mrf.mxu0 }
 0x12f   :  { %v7719_v38 = vadd.f32 %v2448_v57, %v1835_v32  ;;  %v7194_v32 = vld [vmem:[%s12841_s0 + $0x444] sm:$0xf] }
 0x130   :  { %v6491_v44 = vor.u32 %v7194_v32, %v6488_v36  ;;  %v7199_v32 = vld [vmem:[%s12841_s0 + $0x464] sm:$0xf0]  ;;  %v6504_v36 = vld [vmem:[%s12841_s0 + $0x468] sm:$0xf0] }
 0x131   :  { %13181 = vst [vmem:[#allocation20_spill] sm:$0xff] %v7719_v38  ;;  %1874 = vmatmul.bf16.gmra.mxu0 %v6079_v31  ;;  %v7195_v31 = vld [vmem:[%s12841_s0 + $0x444] sm:$0xf0] }
 0x132   :  { %v2458_v41 = vpop.f32.mrf.mxu1  ;;  %v6487_v35 = vor.u32 %v7195_v31, %v6486_v30  ;;  %v6502_v31 = vld [vmem:[%s12841_s0 + $0x460] sm:$0xf] }
 0x135   :  { %6955 = vmatmul.msk.bf16.gmra.mxu1 %vm1417_vm0, %v6099_v40 }
 0x136   :  { %v1837_v42 = vpop.f32.mrf.mxu0 }
 0x137   :  { %v7722_v43 = vadd.f32 %v2450_v3, %v1837_v42  ;;  %v7099_v42 = vld [vmem:[%s12841_s0 + $0x144] sm:$0xf0] }
 0x139   :  { %13182 = vst [vmem:[#allocation21_spill] sm:$0xff] %v7722_v43 }
 0x13a   :  { %v2460_v51 = vpop.f32.mrf.mxu1  ;;  %2124 = vmatmul.bf16.gmra.mxu2 %v6479_v7  ;;  %v7101_v7 = vld [vmem:[%s12841_s0 + $0x154] sm:$0xf0] }
 0x13e   :  { %v1840_v57 = vpop.f32.mrf.mxu0 }
 0x13f   :  { %v7749_v62 = vadd.f32 %v2453_v16, %v1840_v57  ;;  %v6483_v16 = vor.u32 %v7192_v6, %v6480_v8  ;;  %v6110_v6 = vld [vmem:[%s12841_s0 + $0x150] sm:$0xf] }
 0x141   :  { %13183 = vst [vmem:[#allocation22_spill] sm:$0xff] %v7749_v62  ;;  %1879 = vmatmul.bf16.gmra.mxu0 %v6087_v56  ;;  %7003 = vmatmul.msk.bf16.gmra.mxu3 %vm1417_vm0, %v6483_v16  ;;  %v6128_v16 = vld [vmem:[%s12841_s0 + $0x178] sm:$0xf0] }
 0x142   :  { %v2463_v1 = vpop.f32.mrf.mxu1  ;;  %v6131_v22 = vor.u32 %v7104_v15, %v6128_v16  ;;  %v7200_v15 = vld [vmem:[%s12841_s0 + $0x474] sm:$0xf] }
 0x145   :  { %6956 = vmatmul.msk.bf16.gmra.mxu1 %vm1417_vm0, %v6107_v63  ;;  %v7197_v63 = vld [vmem:[%s12841_s0 + $0x454] sm:$0xf0] }
 0x146   :  { %v1842_v2 = vpop.f32.mrf.mxu0 }
 0x147   :  { %v7752_v3 = vadd.f32 %v2455_v27, %v1842_v2  ;;  %v6495_v2 = vor.u32 %v7197_v63, %v6494_v61  ;;  %v6139_v63 = vor.u32 %v7106_v48, %v6136_v50 }
 0x149   :  { %13184 = vst [vmem:[#allocation23_spill] sm:$0xff] %v7752_v3 }
 0x14a   :  { %v2465_v10 = vpop.f32.mrf.mxu1  ;;  %2129 = vmatmul.bf16.gmra.mxu2 %v6487_v35  ;;  %v6503_v35 = vor.u32 %v7199_v32, %v6502_v31  ;;  %v7105_v31 = vld [vmem:[%s12841_s0 + $0x174] sm:$0xf0] }
 0x14e   :  { %v1845_v20 = vpop.f32.mrf.mxu0 }
 0x14f   :  { %v7779_v24 = vadd.f32 %v2458_v41, %v1845_v20  ;;  %v6102_v41 = vld [vmem:[%s12841_s0 + $0x140] sm:$0xf] }
 0x150   :  { %v6103_v46 = vor.u32 %v7099_v42, %v6102_v41  ;;  %v7103_v42 = vld [vmem:[%s12841_s0 + $0x164] sm:$0xf0] }
 0x151   :  { %13185 = vst [vmem:[#allocation24_spill] sm:$0xff] %v7779_v24  ;;  %1884 = vmatmul.bf16.gmra.mxu0 %v6095_v18  ;;  %7004 = vmatmul.msk.bf16.gmra.mxu3 %vm1417_vm0, %v6491_v44 }
 0x152   :  { %v2468_v27 = vpop.f32.mrf.mxu1 }
 0x155   :  { %6957 = vmatmul.msk.bf16.gmra.mxu1 %vm1417_vm0, %v6115_v26  ;;  %v2713_v61 = vpop.f32.mrf.mxu3 }
 0x156   :  { %v1847_v28 = vpop.f32.mrf.mxu0 }
 0x157   :  { %v7782_v29 = vadd.f32 %v2460_v51, %v1847_v28  ;;  %v7809_v51 = vpop.f32.mrf.mxu2 }
 0x158   :  { %13187 = vst [vmem:[#allocation26_spill] sm:$0xff] %v7809_v51 }
 0x159   :  { %13186 = vst [vmem:[#allocation25_spill] sm:$0xff] %v7782_v29 }
 0x15a   :  { %v2470_v40 = vpop.f32.mrf.mxu1  ;;  %2134 = vmatmul.bf16.gmra.mxu2 %v6495_v2 }
 0x15e   :  { %v1850_v47 = vpop.f32.mrf.mxu0 }
 0x15f   :  { %v7811_v52 = vadd.f32 %v2463_v1, %v1850_v47  ;;  %v7814_v57 = vpop.f32.mrf.mxu2  ;;  %v7196_v1 = vld [vmem:[%s12841_s0 + $0x454] sm:$0xf] }
 0x160   :  { %13189 = vst [vmem:[#allocation28_spill] sm:$0xff] %v7814_v57  ;;  %v6499_v8 = vor.u32 %v7196_v1, %v6496_v4 }
 0x161   :  { %13188 = vst [vmem:[#allocation27_spill] sm:$0xff] %v7811_v52  ;;  %1889 = vmatmul.bf16.gmra.mxu0 %v6103_v46 }
 0x162   :  { %v2473_v54 = vpop.f32.mrf.mxu1  ;;  %7005 = vmatmul.msk.bf16.gmra.mxu3 %vm1417_vm0, %v6499_v8  ;;  %v2715_v8 = vpop.f32.mrf.mxu3 }
 0x165   :  { %6958 = vmatmul.msk.bf16.gmra.mxu1 %vm1417_vm0, %v6123_v53 }
 0x166   :  { %v1852_v56 = vpop.f32.mrf.mxu0 }
 0x167   :  { %v7816_v58 = vadd.f32 %v2465_v10, %v1852_v56  ;;  %v6111_v10 = vor.u32 %v7101_v7, %v6110_v6  ;;  %v7843_v18 = vpop.f32.mrf.mxu2 }
 0x168   :  { %13191 = vst [vmem:[#allocation30_spill] sm:$0xff] %v7843_v18 }
 0x169   :  { %13190 = vst [vmem:[#allocation29_spill] sm:$0xff] %v7816_v58 }
 0x16a   :  { %v2475_v5 = vpop.f32.mrf.mxu1  ;;  %2139 = vmatmul.bf16.gmra.mxu2 %v6503_v35 }
 0x16e   :  { %v1855_v11 = vpop.f32.mrf.mxu0 }
 0x16f   :  { %v7845_v20 = vadd.f32 %v2468_v27, %v1855_v11  ;;  %v7848_v28 = vpop.f32.mrf.mxu2  ;;  %v7198_v27 = vld [vmem:[%s12841_s0 + $0x464] sm:$0xf]  ;;  %v7201_v11 = vld [vmem:[%s12841_s0 + $0x474] sm:$0xf0] }
 0x170   :  { %13193 = vst [vmem:[#allocation32_spill] sm:$0xff] %v7848_v28  ;;  %v6507_v44 = vor.u32 %v7198_v27, %v6504_v36  ;;  %v7108_v36 = vld [vmem:[%s12841_s0 + $0x194] sm:$0xf] }
 0x171   :  { %13192 = vst [vmem:[#allocation31_spill] sm:$0xff] %v7845_v20  ;;  %1894 = vmatmul.bf16.gmra.mxu0 %v6111_v10 }
 0x172   :  { %v2478_v23 = vpop.f32.mrf.mxu1  ;;  %7006 = vmatmul.msk.bf16.gmra.mxu3 %vm1417_vm0, %v6507_v44 }
 0x175   :  { %6959 = vmatmul.msk.bf16.gmra.mxu1 %vm1417_vm0, %v6131_v22 }
 0x176   :  { %v1857_v26 = vpop.f32.mrf.mxu0 }
 0x177   :  { %v7850_v30 = vadd.f32 %v2470_v40, %v1857_v26  ;;  %v6118_v40 = vld [vmem:[%s12841_s0 + $0x160] sm:$0xf]  ;;  %v2100_v53 = vpop.f32.mrf.mxu2  ;;  %v6126_v26 = vld [vmem:[%s12841_s0 + $0x170] sm:$0xf] }
 0x178   :  { %v6119_v46 = vor.u32 %v7103_v42, %v6118_v40  ;;  %v7879_v2 = vadd.f32 %v2713_v61, %v2100_v53  ;;  %v6127_v27 = vor.u32 %v7105_v31, %v6126_v26  ;;  %v6144_v40 = vld [vmem:[%s12841_s0 + $0x198] sm:$0xf0] }
 0x179   :  { %13194 = vst [vmem:[#allocation33_spill] sm:$0xff] %v7850_v30 }
 0x17a   :  { %v2480_v41 = vpop.f32.mrf.mxu1  ;;  %13196 = vst [vmem:[#allocation35_spill] sm:$0xff] %v7879_v2 }
 0x17e   :  { %v1860_v47 = vpop.f32.mrf.mxu0 }
 0x17f   :  { %v7877_v56 = vadd.f32 %v2473_v54, %v1860_v47  ;;  %v2102_v6 = vpop.f32.mrf.mxu2  ;;  %v6510_v54 = vld [vmem:[%s12841_s0 + $0x470] sm:$0xf]  ;;  %v6147_v47 = vor.u32 %v7108_v36, %v6144_v40 }
 0x180   :  { %v7884_v10 = vadd.f32 %v2715_v8, %v2102_v6  ;;  %v6511_v16 = vor.u32 %v7201_v11, %v6510_v54  ;;  %v7203_v8 = vld [vmem:[%s12841_s0 + $0x484] sm:$0xf0]  ;;  %v7202_v54 = vld [vmem:[%s12841_s0 + $0x484] sm:$0xf] }
 0x181   :  { %13195 = vst [vmem:[#allocation34_spill] sm:$0xff] %v7877_v56  ;;  %1899 = vmatmul.bf16.gmra.mxu0 %v6119_v46  ;;  %v2718_v46 = vpop.f32.mrf.mxu3 }
 0x182   :  { %v2483_v1 = vpop.f32.mrf.mxu1  ;;  %13198 = vst [vmem:[#allocation37_spill] sm:$0xff] %v7884_v10  ;;  %2144 = vmatmul.bf16.gmra.mxu2 %v6511_v16  ;;  %v6134_v16 = vld [vmem:[%s12841_s0 + $0x180] sm:$0xf] }
 0x185   :  { %6960 = vmatmul.msk.bf16.gmra.mxu1 %vm1417_vm0, %v6139_v63 }
 0x186   :  { %v1862_v4 = vpop.f32.mrf.mxu0 }
 0x187   :  { %v7882_v7 = vadd.f32 %v2475_v5, %v1862_v4  ;;  %v6512_v5 = vld [vmem:[%s12841_s0 + $0x478] sm:$0xf0]  ;;  %v2105_v42 = vpop.f32.mrf.mxu2 }
 0x188   :  { %v6515_v32 = vor.u32 %v7200_v15, %v6512_v5  ;;  %v7913_v50 = vadd.f32 %v2718_v46, %v2105_v42  ;;  %v7107_v5 = vld [vmem:[%s12841_s0 + $0x184] sm:$0xf0] }
 0x189   :  { %13197 = vst [vmem:[#allocation36_spill] sm:$0xff] %v7882_v7  ;;  %v2720_v4 = vpop.f32.mrf.mxu3  ;;  %v6135_v31 = vor.u32 %v7107_v5, %v6134_v16 }
 0x18a   :  { %v2485_v22 = vpop.f32.mrf.mxu1  ;;  %7007 = vmatmul.msk.bf16.gmra.mxu3 %vm1417_vm0, %v6515_v32  ;;  %13200 = vst [vmem:[#allocation39_spill] sm:$0xff] %v7913_v50 }
 0x18e   :  { %v1865_v35 = vpop.f32.mrf.mxu0 }
 0x18f   :  { %v7911_v44 = vadd.f32 %v2478_v23, %v1865_v35  ;;  %v2107_v61 = vpop.f32.mrf.mxu2  ;;  %v6518_v23 = vld [vmem:[%s12841_s0 + $0x480] sm:$0xf]  ;;  %v6152_v35 = vld [vmem:[%s12841_s0 + $0x1a8] sm:$0xf0] }
 0x190   :  { %v7918_v6 = vadd.f32 %v2720_v4, %v2107_v61  ;;  %v6519_v11 = vor.u32 %v7203_v8, %v6518_v23 }
 0x191   :  { %13199 = vst [vmem:[#allocation38_spill] sm:$0xff] %v7911_v44  ;;  %1904 = vmatmul.bf16.gmra.mxu0 %v6127_v27  ;;  %v7110_v27 = vld [vmem:[%s12841_s0 + $0x1a4] sm:$0xf]  ;;  %v2723_v42 = vpop.f32.mrf.mxu3 }
 0x192   :  { %v2488_v48 = vpop.f32.mrf.mxu1  ;;  %13202 = vst [vmem:[#allocation41_spill] sm:$0xff] %v7918_v6  ;;  %2149 = vmatmul.bf16.gmra.mxu2 %v6519_v11  ;;  %v6155_v46 = vor.u32 %v7110_v27, %v6152_v35  ;;  %v7205_v11 = vld [vmem:[%s12841_s0 + $0x494] sm:$0xf0] }
 0x195   :  { %6961 = vmatmul.msk.bf16.gmra.mxu1 %vm1417_vm0, %v6147_v47 }
 0x196   :  { %v1867_v53 = vpop.f32.mrf.mxu0 }
 0x197   :  { %v7916_v63 = vadd.f32 %v2480_v41, %v1867_v53  ;;  %v6520_v41 = vld [vmem:[%s12841_s0 + $0x488] sm:$0xf0]  ;;  %v2110_v36 = vpop.f32.mrf.mxu2 }
 0x198   :  { %v6523_v26 = vor.u32 %v7202_v54, %v6520_v41  ;;  %v7947_v53 = vadd.f32 %v2723_v42, %v2110_v36  ;;  %v7204_v41 = vld [vmem:[%s12841_s0 + $0x494] sm:$0xf]  ;;  %v6160_v42 = vld [vmem:[%s12841_s0 + $0x1b8] sm:$0xf0] }
 0x199   :  { %13201 = vst [vmem:[#allocation40_spill] sm:$0xff] %v7916_v63  ;;  %v2725_v8 = vpop.f32.mrf.mxu3  ;;  %v7112_v36 = vld [vmem:[%s12841_s0 + $0x1b4] sm:$0xf] }
 0x19a   :  { %v2490_v15 = vpop.f32.mrf.mxu1  ;;  %7008 = vmatmul.msk.bf16.gmra.mxu3 %vm1417_vm0, %v6523_v26  ;;  %13204 = vst [vmem:[#allocation43_spill] sm:$0xff] %v7947_v53  ;;  %v6142_v26 = vld [vmem:[%s12841_s0 + $0x190] sm:$0xf] }
 0x19e   :  { %v1870_v32 = vpop.f32.mrf.mxu0 }
 0x19f   :  { %v7945_v40 = vadd.f32 %v2483_v1, %v1870_v32  ;;  %v2112_v4 = vpop.f32.mrf.mxu2  ;;  %v6526_v1 = vld [vmem:[%s12841_s0 + $0x490] sm:$0xf] }
 0x1a0   :  { %v7952_v54 = vadd.f32 %v2725_v8, %v2112_v4  ;;  %v6527_v16 = vor.u32 %v7205_v11, %v6526_v1  ;;  %v6163_v8 = vor.u32 %v7112_v36, %v6160_v42  ;;  %v6150_v42 = vld [vmem:[%s12841_s0 + $0x1a0] sm:$0xf] }
 0x1a1   :  { %13203 = vst [vmem:[#allocation42_spill] sm:$0xff] %v7945_v40  ;;  %1909 = vmatmul.bf16.gmra.mxu0 %v6135_v31  ;;  %v7109_v31 = vld [vmem:[%s12841_s0 + $0x194] sm:$0xf0]  ;;  %v2728_v4 = vpop.f32.mrf.mxu3 }
 0x1a2   :  { %v2493_v47 = vpop.f32.mrf.mxu1  ;;  %13206 = vst [vmem:[#allocation45_spill] sm:$0xff] %v7952_v54  ;;  %2154 = vmatmul.bf16.gmra.mxu2 %v6527_v16  ;;  %v6143_v27 = vor.u32 %v7109_v31, %v6142_v26 }
 0x1a5   :  { %6962 = vmatmul.msk.bf16.gmra.mxu1 %vm1417_vm0, %v6155_v46 }
 0x1a6   :  { %v1872_v61 = vpop.f32.mrf.mxu0 }
 0x1a7   :  { %v7950_v23 = vadd.f32 %v2485_v22, %v1872_v61  ;;  %v6528_v22 = vld [vmem:[%s12841_s0 + $0x498] sm:$0xf0]  ;;  %v2115_v46 = vpop.f32.mrf.mxu2 }
 0x1a8   :  { %v6531_v32 = vor.u32 %v7204_v41, %v6528_v22  ;;  %v7981_v11 = vadd.f32 %v2728_v4, %v2115_v46  ;;  %v7111_v46 = vld [vmem:[%s12841_s0 + $0x1a4] sm:$0xf0] }
 0x1a9   :  { %13205 = vst [vmem:[#allocation44_spill] sm:$0xff] %v7950_v23  ;;  %v2730_v26 = vpop.f32.mrf.mxu3 }
 0x1aa   :  { %v2495_v5 = vpop.f32.mrf.mxu1  ;;  %7009 = vmatmul.msk.bf16.gmra.mxu3 %vm1417_vm0, %v6531_v32  ;;  %13208 = vst [vmem:[#allocation47_spill] sm:$0xff] %v7981_v11  ;;  %v7207_v32 = vld [vmem:[%s12841_s0 + $0x4a4] sm:$0xf0] }
 0x1ae   :  { %v1875_v35 = vpop.f32.mrf.mxu0 }
 0x1af   :  { %v7979_v61 = vadd.f32 %v2488_v48, %v1875_v35  ;;  %v2117_v16 = vpop.f32.mrf.mxu2  ;;  %v6534_v48 = vld [vmem:[%s12841_s0 + $0x4a0] sm:$0xf] }
 0x1b0   :  { %v7986_v31 = vadd.f32 %v2730_v26, %v2117_v16  ;;  %v6535_v35 = vor.u32 %v7207_v32, %v6534_v48  ;;  %v7114_v16 = vld [vmem:[%s12841_s0 + $0x1c4] sm:$0xf]  ;;  %v6168_v26 = vld [vmem:[%s12841_s0 + $0x1c8] sm:$0xf0] }
 0x1b1   :  { %13207 = vst [vmem:[#allocation46_spill] sm:$0xff] %v7979_v61  ;;  %1914 = vmatmul.bf16.gmra.mxu0 %v6143_v27  ;;  %v7206_v27 = vld [vmem:[%s12841_s0 + $0x4a4] sm:$0xf]  ;;  %v6171_v11 = vor.u32 %v7114_v16, %v6168_v26  ;;  %v6158_v16 = vld [vmem:[%s12841_s0 + $0x1b0] sm:$0xf] }
 0x1b2   :  { %v2498_v1 = vpop.f32.mrf.mxu1  ;;  %13210 = vst [vmem:[#allocation49_spill] sm:$0xff] %v7986_v31  ;;  %2159 = vmatmul.bf16.gmra.mxu2 %v6535_v35  ;;  %v2733_v31 = vpop.f32.mrf.mxu3  ;;  %v7113_v26 = vld [vmem:[%s12841_s0 + $0x1b4] sm:$0xf0] }
 0x1b5   :  { %6963 = vmatmul.msk.bf16.gmra.mxu1 %vm1417_vm0, %v6163_v8  ;;  %v6151_v8 = vor.u32 %v7111_v46, %v6150_v42 }
 0x1b6   :  { %v1877_v41 = vpop.f32.mrf.mxu0 }
 0x1b7   :  { %v7984_v22 = vadd.f32 %v2490_v15, %v1877_v41  ;;  %v6536_v15 = vld [vmem:[%s12841_s0 + $0x4a8] sm:$0xf0]  ;;  %v2120_v48 = vpop.f32.mrf.mxu2 }
 0x1b8   :  { %v6539_v4 = vor.u32 %v7206_v27, %v6536_v15  ;;  %v8015_v35 = vadd.f32 %v2733_v31, %v2120_v48  ;;  %v7208_v31 = vld [vmem:[%s12841_s0 + $0x4b4] sm:$0xf] }
 0x1b9   :  { %13209 = vst [vmem:[#allocation48_spill] sm:$0xff] %v7984_v22 }
 0x1ba   :  { %v2500_v36 = vpop.f32.mrf.mxu1  ;;  %7010 = vmatmul.msk.bf16.gmra.mxu3 %vm1417_vm0, %v6539_v4  ;;  %13212 = vst [vmem:[#allocation51_spill] sm:$0xff] %v8015_v35  ;;  %v2735_v4 = vpop.f32.mrf.mxu3 }
 0x1be   :  { %v1880_v41 = vpop.f32.mrf.mxu0 }
 0x1bf   :  { %v8013_v32 = vadd.f32 %v2493_v47, %v1880_v41  ;;  %v2122_v42 = vpop.f32.mrf.mxu2  ;;  %v6542_v47 = vld [vmem:[%s12841_s0 + $0x4b0] sm:$0xf] }
 0x1c0   :  { %v8020_v54 = vadd.f32 %v2735_v4, %v2122_v42  ;;  %v7116_v4 = vld [vmem:[%s12841_s0 + $0x1d4] sm:$0xf] }
 0x1c1   :  { %13211 = vst [vmem:[#allocation50_spill] sm:$0xff] %v8013_v32  ;;  %1919 = vmatmul.bf16.gmra.mxu0 %v6151_v8  ;;  %v7209_v8 = vld [vmem:[%s12841_s0 + $0x4b4] sm:$0xf0] }
 0x1c2   :  { %v2503_v27 = vpop.f32.mrf.mxu1  ;;  %13214 = vst [vmem:[#allocation53_spill] sm:$0xff] %v8020_v54 }
 0x1c4   :  { %v2738_v35 = vpop.f32.mrf.mxu3 }
 0x1c5   :  { %6964 = vmatmul.msk.bf16.gmra.mxu1 %vm1417_vm0, %v6171_v11  ;;  %v6543_v11 = vor.u32 %v7209_v8, %v6542_v47  ;;  %v6176_v47 = vld [vmem:[%s12841_s0 + $0x1d8] sm:$0xf0] }
 0x1c6   :  { %v1882_v15 = vpop.f32.mrf.mxu0  ;;  %v6179_v53 = vor.u32 %v7116_v4, %v6176_v47  ;;  %v6166_v4 = vld [vmem:[%s12841_s0 + $0x1c0] sm:$0xf]  ;;  %v7115_v47 = vld [vmem:[%s12841_s0 + $0x1c4] sm:$0xf0] }
 0x1c7   :  { %v8018_v46 = vadd.f32 %v2495_v5, %v1882_v15  ;;  %v6544_v5 = vld [vmem:[%s12841_s0 + $0x4b8] sm:$0xf0]  ;;  %2164 = vmatmul.bf16.gmra.mxu2 %v6543_v11  ;;  %v6159_v15 = vor.u32 %v7113_v26, %v6158_v16  ;;  %v2125_v8 = vpop.f32.mrf.mxu2 }
 0x1c8   :  { %v6547_v48 = vor.u32 %v7208_v31, %v6544_v5  ;;  %v8049_v11 = vadd.f32 %v2738_v35, %v2125_v8  ;;  %v7210_v35 = vld [vmem:[%s12841_s0 + $0x4c4] sm:$0xf] }
 0x1c9   :  { %13213 = vst [vmem:[#allocation52_spill] sm:$0xff] %v8018_v46 }
 0x1ca   :  { %v2505_v41 = vpop.f32.mrf.mxu1  ;;  %7011 = vmatmul.msk.bf16.gmra.mxu3 %vm1417_vm0, %v6547_v48  ;;  %13216 = vst [vmem:[#allocation55_spill] sm:$0xff] %v8049_v11 }
 0x1cc   :  { %v2740_v48 = vpop.f32.mrf.mxu3 }
 0x1ce   :  { %v1885_v42 = vpop.f32.mrf.mxu0 }
 0x1cf   :  { %v8047_v54 = vadd.f32 %v2498_v1, %v1885_v42  ;;  %v2127_v16 = vpop.f32.mrf.mxu2  ;;  %v6550_v1 = vld [vmem:[%s12841_s0 + $0x4c0] sm:$0xf] }
 0x1d0   :  { %v8054_v6 = vadd.f32 %v2740_v48, %v2127_v16  ;;  %v7118_v48 = vld [vmem:[%s12841_s0 + $0x1e4] sm:$0xf] }
 0x1d1   :  { %13215 = vst [vmem:[#allocation54_spill] sm:$0xff] %v8047_v54  ;;  %1924 = vmatmul.bf16.gmra.mxu0 %v6159_v15  ;;  %v7211_v15 = vld [vmem:[%s12841_s0 + $0x4c4] sm:$0xf0] }
 0x1d2   :  { %v2508_v31 = vpop.f32.mrf.mxu1  ;;  %13218 = vst [vmem:[#allocation57_spill] sm:$0xff] %v8054_v6 }
 0x1d4   :  { %v2743_v11 = vpop.f32.mrf.mxu3 }
 0x1d5   :  { %6965 = vmatmul.msk.bf16.gmra.mxu1 %vm1417_vm0, %v6179_v53  ;;  %v6551_v53 = vor.u32 %v7211_v15, %v6550_v1  ;;  %v6184_v1 = vld [vmem:[%s12841_s0 + $0x1e8] sm:$0xf0] }
 0x1d6   :  { %v1887_v5 = vpop.f32.mrf.mxu0  ;;  %v6187_v50 = vor.u32 %v7118_v48, %v6184_v1  ;;  %v6174_v48 = vld [vmem:[%s12841_s0 + $0x1d0] sm:$0xf]  ;;  %v7117_v1 = vld [vmem:[%s12841_s0 + $0x1d4] sm:$0xf0] }
 0x1d7   :  { %v8052_v26 = vadd.f32 %v2500_v36, %v1887_v5  ;;  %v6552_v36 = vld [vmem:[%s12841_s0 + $0x4c8] sm:$0xf0]  ;;  %2169 = vmatmul.bf16.gmra.mxu2 %v6551_v53  ;;  %v6167_v5 = vor.u32 %v7115_v47, %v6166_v4  ;;  %v2130_v15 = vpop.f32.mrf.mxu2 }
 0x1d8   :  { %v6555_v8 = vor.u32 %v7210_v35, %v6552_v36  ;;  %v8083_v53 = vadd.f32 %v2743_v11, %v2130_v15  ;;  %v7212_v11 = vld [vmem:[%s12841_s0 + $0x4d4] sm:$0xf] }
 0x1d9   :  { %13217 = vst [vmem:[#allocation56_spill] sm:$0xff] %v8052_v26 }
 0x1da   :  { %v2510_v42 = vpop.f32.mrf.mxu1  ;;  %7012 = vmatmul.msk.bf16.gmra.mxu3 %vm1417_vm0, %v6555_v8  ;;  %13220 = vst [vmem:[#allocation59_spill] sm:$0xff] %v8083_v53 }
 0x1dc   :  { %v2745_v8 = vpop.f32.mrf.mxu3 }
 0x1de   :  { %v1890_v16 = vpop.f32.mrf.mxu0 }
 0x1df   :  { %v8081_v6 = vadd.f32 %v2503_v27, %v1890_v16  ;;  %v2132_v4 = vpop.f32.mrf.mxu2  ;;  %v6558_v27 = vld [vmem:[%s12841_s0 + $0x4d0] sm:$0xf] }
 0x1e0   :  { %v8088_v10 = vadd.f32 %v2745_v8, %v2132_v4  ;;  %v7120_v8 = vld [vmem:[%s12841_s0 + $0x1f4] sm:$0xf] }
 0x1e1   :  { %13219 = vst [vmem:[#allocation58_spill] sm:$0xff] %v8081_v6  ;;  %1929 = vmatmul.bf16.gmra.mxu0 %v6167_v5  ;;  %v7213_v5 = vld [vmem:[%s12841_s0 + $0x4d4] sm:$0xf0] }
 0x1e2   :  { %v2513_v35 = vpop.f32.mrf.mxu1  ;;  %13222 = vst [vmem:[#allocation61_spill] sm:$0xff] %v8088_v10 }
 0x1e5   :  { %6966 = vmatmul.msk.bf16.gmra.mxu1 %vm1417_vm0, %v6187_v50  ;;  %v6559_v50 = vor.u32 %v7213_v5, %v6558_v27  ;;  %v6192_v27 = vld [vmem:[%s12841_s0 + $0x1f8] sm:$0xf0]  ;;  %v2748_v53 = vpop.f32.mrf.mxu3 }
 0x1e6   :  { %v1892_v36 = vpop.f32.mrf.mxu0  ;;  %v6195_v2 = vor.u32 %v7120_v8, %v6192_v27  ;;  %v6182_v8 = vld [vmem:[%s12841_s0 + $0x1e0] sm:$0xf]  ;;  %v7119_v27 = vld [vmem:[%s12841_s0 + $0x1e4] sm:$0xf0] }
 0x1e7   :  { %v8086_v47 = vadd.f32 %v2505_v41, %v1892_v36  ;;  %v6560_v41 = vld [vmem:[%s12841_s0 + $0x4d8] sm:$0xf0]  ;;  %2174 = vmatmul.bf16.gmra.mxu2 %v6559_v50  ;;  %v6175_v36 = vor.u32 %v7117_v1, %v6174_v48  ;;  %v2135_v5 = vpop.f32.mrf.mxu2 }
 0x1e8   :  { %v6563_v15 = vor.u32 %v7212_v11, %v6560_v41  ;;  %v8117_v50 = vadd.f32 %v2748_v53, %v2135_v5  ;;  %v7214_v53 = vld [vmem:[%s12841_s0 + $0x4e4] sm:$0xf] }
 0x1e9   :  { %13221 = vst [vmem:[#allocation60_spill] sm:$0xff] %v8086_v47 }
 0x1ea   :  { %v2515_v16 = vpop.f32.mrf.mxu1  ;;  %7013 = vmatmul.msk.bf16.gmra.mxu3 %vm1417_vm0, %v6563_v15  ;;  %13224 = vst [vmem:[#allocation63_spill] sm:$0xff] %v8117_v50 }
 0x1ed   :  { %v2750_v15 = vpop.f32.mrf.mxu3 }
 0x1ee   :  { %v1895_v4 = vpop.f32.mrf.mxu0 }
 0x1ef   :  { %v8115_v10 = vadd.f32 %v2508_v31, %v1895_v4  ;;  %v2137_v48 = vpop.f32.mrf.mxu2  ;;  %v6566_v31 = vld [vmem:[%s12841_s0 + $0x4e0] sm:$0xf] }
 0x1f0   :  { %v8122_v28 = vadd.f32 %v2750_v15, %v2137_v48  ;;  %v7122_v15 = vld [vmem:[%s12841_s0 + $0x204] sm:$0xf] }
 0x1f1   :  { %13223 = vst [vmem:[#allocation62_spill] sm:$0xff] %v8115_v10  ;;  %1934 = vmatmul.bf16.gmra.mxu0 %v6175_v36  ;;  %v7215_v36 = vld [vmem:[%s12841_s0 + $0x4e4] sm:$0xf0] }
 0x1f2   :  { %v2518_v11 = vpop.f32.mrf.mxu1  ;;  %13226 = vst [vmem:[#allocation65_spill] sm:$0xff] %v8122_v28 }
 0x1f5   :  { %6967 = vmatmul.msk.bf16.gmra.mxu1 %vm1417_vm0, %v6195_v2  ;;  %v6567_v2 = vor.u32 %v7215_v36, %v6566_v31  ;;  %v6200_v31 = vld [vmem:[%s12841_s0 + $0x208] sm:$0xf0]  ;;  %v2753_v50 = vpop.f32.mrf.mxu3 }
 0x1f6   :  { %v1897_v41 = vpop.f32.mrf.mxu0  ;;  %v6203_v18 = vor.u32 %v7122_v15, %v6200_v31  ;;  %v6190_v15 = vld [vmem:[%s12841_s0 + $0x1f0] sm:$0xf]  ;;  %v7121_v31 = vld [vmem:[%s12841_s0 + $0x1f4] sm:$0xf0] }
 0x1f7   :  { %v8120_v1 = vadd.f32 %v2510_v42, %v1897_v41  ;;  %v6568_v42 = vld [vmem:[%s12841_s0 + $0x4e8] sm:$0xf0]  ;;  %2179 = vmatmul.bf16.gmra.mxu2 %v6567_v2  ;;  %v6183_v41 = vor.u32 %v7119_v27, %v6182_v8  ;;  %v2140_v36 = vpop.f32.mrf.mxu2 }
 0x1f8   :  { %v6571_v5 = vor.u32 %v7214_v53, %v6568_v42  ;;  %v8151_v2 = vadd.f32 %v2753_v50, %v2140_v36  ;;  %v7216_v50 = vld [vmem:[%s12841_s0 + $0x4f4] sm:$0xf] }
 0x1f9   :  { %13225 = vst [vmem:[#allocation64_spill] sm:$0xff] %v8120_v1 }
 0x1fa   :  { %v2520_v4 = vpop.f32.mrf.mxu1  ;;  %7014 = vmatmul.msk.bf16.gmra.mxu3 %vm1417_vm0, %v6571_v5  ;;  %13228 = vst [vmem:[#allocation67_spill] sm:$0xff] %v8151_v2 }
 0x1fd   :  { %v2755_v5 = vpop.f32.mrf.mxu3 }
 0x1fe   :  { %v1900_v48 = vpop.f32.mrf.mxu0 }
 0x1ff   :  { %v8149_v28 = vadd.f32 %v2513_v35, %v1900_v48  ;;  %v2142_v8 = vpop.f32.mrf.mxu2  ;;  %v6574_v35 = vld [vmem:[%s12841_s0 + $0x4f0] sm:$0xf] }
 0x200   :  { %v8156_v57 = vadd.f32 %v2755_v5, %v2142_v8  ;;  %v7124_v5 = vld [vmem:[%s12841_s0 + $0x214] sm:$0xf] }
 0x201   :  { %13227 = vst [vmem:[#allocation66_spill] sm:$0xff] %v8149_v28  ;;  %1939 = vmatmul.bf16.gmra.mxu0 %v6183_v41  ;;  %v7217_v41 = vld [vmem:[%s12841_s0 + $0x4f4] sm:$0xf0]  ;;  %v4465_v28 = vmul.f32 %v7539_v37, %v7539_v37 }
 0x202   :  { %v2523_v53 = vpop.f32.mrf.mxu1  ;;  %13230 = vst [vmem:[#allocation69_spill] sm:$0xff] %v8156_v57 }
 0x205   :  { %6968 = vmatmul.msk.bf16.gmra.mxu1 %vm1417_vm0, %v6203_v18  ;;  %v6575_v18 = vor.u32 %v7217_v41, %v6574_v35  ;;  %v6208_v35 = vld [vmem:[%s12841_s0 + $0x218] sm:$0xf0] }
 0x206   :  { %v1902_v42 = vpop.f32.mrf.mxu0  ;;  %v6211_v51 = vor.u32 %v7124_v5, %v6208_v35  ;;  %v6198_v5 = vld [vmem:[%s12841_s0 + $0x200] sm:$0xf]  ;;  %v7123_v35 = vld [vmem:[%s12841_s0 + $0x204] sm:$0xf0] }
 0x207   :  { %v8154_v27 = vadd.f32 %v2515_v16, %v1902_v42  ;;  %v6576_v16 = vld [vmem:[%s12841_s0 + $0x4f8] sm:$0xf0]  ;;  %2184 = vmatmul.bf16.gmra.mxu2 %v6575_v18  ;;  %v6191_v42 = vor.u32 %v7121_v31, %v6190_v15  ;;  %v2145_v41 = vpop.f32.mrf.mxu2 }
 0x208   :  { %v6579_v36 = vor.u32 %v7216_v50, %v6576_v16 }
 0x209   :  { %13229 = vst [vmem:[#allocation68_spill] sm:$0xff] %v8154_v27 }
 0x20a   :  { %v2525_v48 = vpop.f32.mrf.mxu1  ;;  %7015 = vmatmul.msk.bf16.gmra.mxu3 %vm1417_vm0, %v6579_v36 }
 0x20d   :  { %v2758_v2 = vpop.f32.mrf.mxu3 }
 0x20e   :  { %v1905_v8 = vpop.f32.mrf.mxu0  ;;  %v8185_v18 = vadd.f32 %v2758_v2, %v2145_v41  ;;  %v7218_v2 = vld [vmem:[%s12841_s0 + $0x504] sm:$0xf] }
 0x20f   :  { %v8183_v57 = vadd.f32 %v2518_v11, %v1905_v8  ;;  %v2147_v15 = vpop.f32.mrf.mxu2  ;;  %v6582_v11 = vld [vmem:[%s12841_s0 + $0x500] sm:$0xf] }
 0x210   :  { %13232 = vst [vmem:[#allocation71_spill] sm:$0xff] %v8185_v18 }
 0x211   :  { %13231 = vst [vmem:[#allocation70_spill] sm:$0xff] %v8183_v57  ;;  %1944 = vmatmul.bf16.gmra.mxu0 %v6191_v42  ;;  %v7219_v42 = vld [vmem:[%s12841_s0 + $0x504] sm:$0xf0] }
 0x212   :  { %v2528_v50 = vpop.f32.mrf.mxu1 }
 0x215   :  { %6969 = vmatmul.msk.bf16.gmra.mxu1 %vm1417_vm0, %v6211_v51  ;;  %v2760_v36 = vpop.f32.mrf.mxu3  ;;  %v6583_v51 = vor.u32 %v7219_v42, %v6582_v11  ;;  %v6216_v11 = vld [vmem:[%s12841_s0 + $0x228] sm:$0xf0] }
 0x216   :  { %v1907_v16 = vpop.f32.mrf.mxu0  ;;  %v8190_v27 = vadd.f32 %v2760_v36, %v2147_v15  ;;  %v7126_v36 = vld [vmem:[%s12841_s0 + $0x224] sm:$0xf] }
 0x217   :  { %v8188_v31 = vadd.f32 %v2520_v4, %v1907_v16  ;;  %v6584_v4 = vld [vmem:[%s12841_s0 + $0x508] sm:$0xf0]  ;;  %2189 = vmatmul.bf16.gmra.mxu2 %v6583_v51  ;;  %v6199_v16 = vor.u32 %v7123_v35, %v6198_v5  ;;  %v2150_v42 = vpop.f32.mrf.mxu2 }
 0x218   :  { %13234 = vst [vmem:[#allocation73_spill] sm:$0xff] %v8190_v27  ;;  %v6587_v41 = vor.u32 %v7218_v2, %v6584_v4 }
 0x219   :  { %13233 = vst [vmem:[#allocation72_spill] sm:$0xff] %v8188_v31  ;;  %v6219_v31 = vor.u32 %v7126_v36, %v6216_v11  ;;  %v6206_v36 = vld [vmem:[%s12841_s0 + $0x210] sm:$0xf]  ;;  %v7125_v11 = vld [vmem:[%s12841_s0 + $0x214] sm:$0xf0] }
 0x21a   :  { %v2530_v8 = vpop.f32.mrf.mxu1  ;;  %7016 = vmatmul.msk.bf16.gmra.mxu3 %vm1417_vm0, %v6587_v41 }
 0x21d   :  { %v2763_v18 = vpop.f32.mrf.mxu3 }
 0x21e   :  { %v1910_v15 = vpop.f32.mrf.mxu0  ;;  %v8219_v51 = vadd.f32 %v2763_v18, %v2150_v42  ;;  %v7220_v18 = vld [vmem:[%s12841_s0 + $0x514] sm:$0xf] }
 0x21f   :  { %v8217_v27 = vadd.f32 %v2523_v53, %v1910_v15  ;;  %v2152_v5 = vpop.f32.mrf.mxu2  ;;  %v6590_v53 = vld [vmem:[%s12841_s0 + $0x510] sm:$0xf] }
 0x220   :  { %13236 = vst [vmem:[#allocation75_spill] sm:$0xff] %v8219_v51 }
 0x221   :  { %13235 = vst [vmem:[#allocation74_spill] sm:$0xff] %v8217_v27  ;;  %1949 = vmatmul.bf16.gmra.mxu0 %v6199_v16  ;;  %v7221_v16 = vld [vmem:[%s12841_s0 + $0x514] sm:$0xf0] }
 0x222   :  { %v2533_v2 = vpop.f32.mrf.mxu1 }
 0x225   :  { %6970 = vmatmul.msk.bf16.gmra.mxu1 %vm1417_vm0, %v6219_v31  ;;  %v2765_v41 = vpop.f32.mrf.mxu3  ;;  %v6591_v31 = vor.u32 %v7221_v16, %v6590_v53  ;;  %v6224_v53 = vld [vmem:[%s12841_s0 + $0x238] sm:$0xf0] }
 0x226   :  { %v1912_v4 = vpop.f32.mrf.mxu0  ;;  %v8224_v57 = vadd.f32 %v2765_v41, %v2152_v5  ;;  %v7128_v41 = vld [vmem:[%s12841_s0 + $0x234] sm:$0xf] }
 0x227   :  { %v8222_v35 = vadd.f32 %v2525_v48, %v1912_v4  ;;  %v6592_v48 = vld [vmem:[%s12841_s0 + $0x518] sm:$0xf0]  ;;  %2194 = vmatmul.bf16.gmra.mxu2 %v6591_v31  ;;  %v6207_v4 = vor.u32 %v7125_v11, %v6206_v36  ;;  %v2155_v16 = vpop.f32.mrf.mxu2 }
 0x228   :  { %13238 = vst [vmem:[#allocation77_spill] sm:$0xff] %v8224_v57  ;;  %v6595_v42 = vor.u32 %v7220_v18, %v6592_v48 }
 0x229   :  { %13237 = vst [vmem:[#allocation76_spill] sm:$0xff] %v8222_v35  ;;  %v6227_v35 = vor.u32 %v7128_v41, %v6224_v53  ;;  %v6214_v41 = vld [vmem:[%s12841_s0 + $0x220] sm:$0xf]  ;;  %v7127_v53 = vld [vmem:[%s12841_s0 + $0x224] sm:$0xf0] }
 0x22a   :  { %v2535_v15 = vpop.f32.mrf.mxu1  ;;  %7017 = vmatmul.msk.bf16.gmra.mxu3 %vm1417_vm0, %v6595_v42 }
 0x22d   :  { %v2768_v51 = vpop.f32.mrf.mxu3 }
 0x22e   :  { %v1915_v5 = vpop.f32.mrf.mxu0  ;;  %v8253_v31 = vadd.f32 %v2768_v51, %v2155_v16  ;;  %v7222_v51 = vld [vmem:[%s12841_s0 + $0x524] sm:$0xf] }
 0x22f   :  { %v8251_v57 = vadd.f32 %v2528_v50, %v1915_v5  ;;  %v2157_v36 = vpop.f32.mrf.mxu2  ;;  %v6598_v50 = vld [vmem:[%s12841_s0 + $0x520] sm:$0xf] }
 0x230   :  { %13240 = vst [vmem:[#allocation79_spill] sm:$0xff] %v8253_v31 }
 0x231   :  { %13239 = vst [vmem:[#allocation78_spill] sm:$0xff] %v8251_v57  ;;  %1954 = vmatmul.bf16.gmra.mxu0 %v6207_v4  ;;  %v7223_v4 = vld [vmem:[%s12841_s0 + $0x524] sm:$0xf0] }
 0x232   :  { %v2538_v18 = vpop.f32.mrf.mxu1 }
 0x235   :  { %6971 = vmatmul.msk.bf16.gmra.mxu1 %vm1417_vm0, %v6227_v35  ;;  %v2770_v42 = vpop.f32.mrf.mxu3  ;;  %v6599_v35 = vor.u32 %v7223_v4, %v6598_v50  ;;  %v6232_v50 = vld [vmem:[%s12841_s0 + $0x248] sm:$0xf0] }
 0x236   :  { %v1917_v48 = vpop.f32.mrf.mxu0  ;;  %v8258_v27 = vadd.f32 %v2770_v42, %v2157_v36  ;;  %v7130_v42 = vld [vmem:[%s12841_s0 + $0x244] sm:$0xf] }
 0x237   :  { %v8256_v11 = vadd.f32 %v2530_v8, %v1917_v48  ;;  %v6600_v8 = vld [vmem:[%s12841_s0 + $0x528] sm:$0xf0]  ;;  %2199 = vmatmul.bf16.gmra.mxu2 %v6599_v35  ;;  %v6215_v48 = vor.u32 %v7127_v53, %v6214_v41  ;;  %v2160_v4 = vpop.f32.mrf.mxu2 }
 0x238   :  { %13242 = vst [vmem:[#allocation81_spill] sm:$0xff] %v8258_v27  ;;  %v6603_v16 = vor.u32 %v7222_v51, %v6600_v8 }
 0x239   :  { %13241 = vst [vmem:[#allocation80_spill] sm:$0xff] %v8256_v11  ;;  %v6235_v11 = vor.u32 %v7130_v42, %v6232_v50  ;;  %v6222_v42 = vld [vmem:[%s12841_s0 + $0x230] sm:$0xf]  ;;  %v7129_v50 = vld [vmem:[%s12841_s0 + $0x234] sm:$0xf0] }
 0x23a   :  { %v2540_v5 = vpop.f32.mrf.mxu1  ;;  %7018 = vmatmul.msk.bf16.gmra.mxu3 %vm1417_vm0, %v6603_v16 }
 0x23d   :  { %v2773_v31 = vpop.f32.mrf.mxu3 }
 0x23e   :  { %v1920_v36 = vpop.f32.mrf.mxu0  ;;  %v8287_v35 = vadd.f32 %v2773_v31, %v2160_v4  ;;  %v7224_v31 = vld [vmem:[%s12841_s0 + $0x534] sm:$0xf] }
 0x23f   :  { %v8285_v27 = vadd.f32 %v2533_v2, %v1920_v36  ;;  %v2162_v41 = vpop.f32.mrf.mxu2  ;;  %v6606_v2 = vld [vmem:[%s12841_s0 + $0x530] sm:$0xf] }
 0x240   :  { %13244 = vst [vmem:[#allocation83_spill] sm:$0xff] %v8287_v35 }
 0x241   :  { %13243 = vst [vmem:[#allocation82_spill] sm:$0xff] %v8285_v27  ;;  %1959 = vmatmul.bf16.gmra.mxu0 %v6215_v48  ;;  %v7225_v48 = vld [vmem:[%s12841_s0 + $0x534] sm:$0xf0] }
 0x242   :  { %v2543_v51 = vpop.f32.mrf.mxu1 }
 0x245   :  { %6972 = vmatmul.msk.bf16.gmra.mxu1 %vm1417_vm0, %v6235_v11  ;;  %v2775_v16 = vpop.f32.mrf.mxu3  ;;  %v6607_v11 = vor.u32 %v7225_v48, %v6606_v2  ;;  %v6240_v2 = vld [vmem:[%s12841_s0 + $0x258] sm:$0xf0] }
 0x246   :  { %v1922_v8 = vpop.f32.mrf.mxu0  ;;  %v8292_v57 = vadd.f32 %v2775_v16, %v2162_v41  ;;  %v7132_v16 = vld [vmem:[%s12841_s0 + $0x254] sm:$0xf] }
 0x247   :  { %v8290_v53 = vadd.f32 %v2535_v15, %v1922_v8  ;;  %v6608_v15 = vld [vmem:[%s12841_s0 + $0x538] sm:$0xf0]  ;;  %2204 = vmatmul.bf16.gmra.mxu2 %v6607_v11  ;;  %v6223_v8 = vor.u32 %v7129_v50, %v6222_v42 }
 0x248   :  { %13246 = vst [vmem:[#allocation85_spill] sm:$0xff] %v8292_v57  ;;  %v6611_v4 = vor.u32 %v7224_v31, %v6608_v15 }
 0x249   :  { %13245 = vst [vmem:[#allocation84_spill] sm:$0xff] %v8290_v53  ;;  %v6243_v53 = vor.u32 %v7132_v16, %v6240_v2  ;;  %v6230_v16 = vld [vmem:[%s12841_s0 + $0x240] sm:$0xf]  ;;  %v7131_v2 = vld [vmem:[%s12841_s0 + $0x244] sm:$0xf0] }
 0x24a   :  { %v2545_v36 = vpop.f32.mrf.mxu1  ;;  %7019 = vmatmul.msk.bf16.gmra.mxu3 %vm1417_vm0, %v6611_v4  ;;  %v2165_v48 = vpop.f32.mrf.mxu2 }
 0x24d   :  { %v2778_v35 = vpop.f32.mrf.mxu3 }
 0x24e   :  { %v1925_v41 = vpop.f32.mrf.mxu0  ;;  %v8321_v11 = vadd.f32 %v2778_v35, %v2165_v48  ;;  %v7226_v35 = vld [vmem:[%s12841_s0 + $0x544] sm:$0xf] }
 0x24f   :  { %v8319_v57 = vadd.f32 %v2538_v18, %v1925_v41  ;;  %v6614_v18 = vld [vmem:[%s12841_s0 + $0x540] sm:$0xf] }
 0x250   :  { %13248 = vst [vmem:[#allocation87_spill] sm:$0xff] %v8321_v11 }
 0x251   :  { %13247 = vst [vmem:[#allocation86_spill] sm:$0xff] %v8319_v57  ;;  %1964 = vmatmul.bf16.gmra.mxu0 %v6223_v8  ;;  %v7227_v8 = vld [vmem:[%s12841_s0 + $0x544] sm:$0xf0] }
 0x252   :  { %v2548_v31 = vpop.f32.mrf.mxu1  ;;  %v2167_v42 = vpop.f32.mrf.mxu2 }
 0x255   :  { %6973 = vmatmul.msk.bf16.gmra.mxu1 %vm1417_vm0, %v6243_v53  ;;  %v2780_v4 = vpop.f32.mrf.mxu3  ;;  %v6615_v53 = vor.u32 %v7227_v8, %v6614_v18  ;;  %v6248_v18 = vld [vmem:[%s12841_s0 + $0x268] sm:$0xf0] }
 0x256   :  { %v1927_v15 = vpop.f32.mrf.mxu0  ;;  %v8326_v27 = vadd.f32 %v2780_v4, %v2167_v42  ;;  %v7134_v4 = vld [vmem:[%s12841_s0 + $0x264] sm:$0xf] }
 0x257   :  { %v8324_v50 = vadd.f32 %v2540_v5, %v1927_v15  ;;  %v6616_v5 = vld [vmem:[%s12841_s0 + $0x548] sm:$0xf0]  ;;  %2209 = vmatmul.bf16.gmra.mxu2 %v6615_v53  ;;  %v6231_v15 = vor.u32 %v7131_v2, %v6230_v16 }
 0x258   :  { %13250 = vst [vmem:[#allocation89_spill] sm:$0xff] %v8326_v27  ;;  %v6619_v48 = vor.u32 %v7226_v35, %v6616_v5 }
 0x259   :  { %13249 = vst [vmem:[#allocation88_spill] sm:$0xff] %v8324_v50  ;;  %v6251_v50 = vor.u32 %v7134_v4, %v6248_v18  ;;  %v6238_v4 = vld [vmem:[%s12841_s0 + $0x250] sm:$0xf]  ;;  %v7133_v18 = vld [vmem:[%s12841_s0 + $0x254] sm:$0xf0] }
 0x25a   :  { %v2550_v41 = vpop.f32.mrf.mxu1  ;;  %7020 = vmatmul.msk.bf16.gmra.mxu3 %vm1417_vm0, %v6619_v48  ;;  %v2170_v8 = vpop.f32.mrf.mxu2 }
 0x25d   :  { %v2783_v11 = vpop.f32.mrf.mxu3 }
 0x25e   :  { %v1930_v42 = vpop.f32.mrf.mxu0  ;;  %v8355_v53 = vadd.f32 %v2783_v11, %v2170_v8  ;;  %v7228_v11 = vld [vmem:[%s12841_s0 + $0x554] sm:$0xf] }
 0x25f   :  { %v8353_v27 = vadd.f32 %v2543_v51, %v1930_v42  ;;  %v6622_v51 = vld [vmem:[%s12841_s0 + $0x550] sm:$0xf] }
 0x260   :  { %13252 = vst [vmem:[#allocation91_spill] sm:$0xff] %v8355_v53 }
 0x261   :  { %13251 = vst [vmem:[#allocation90_spill] sm:$0xff] %v8353_v27  ;;  %1969 = vmatmul.bf16.gmra.mxu0 %v6231_v15  ;;  %v7229_v15 = vld [vmem:[%s12841_s0 + $0x554] sm:$0xf0] }
 0x262   :  { %v2553_v35 = vpop.f32.mrf.mxu1  ;;  %v2172_v16 = vpop.f32.mrf.mxu2 }
 0x265   :  { %6974 = vmatmul.msk.bf16.gmra.mxu1 %vm1417_vm0, %v6251_v50  ;;  %v2785_v48 = vpop.f32.mrf.mxu3  ;;  %v6623_v50 = vor.u32 %v7229_v15, %v6622_v51  ;;  %v6256_v51 = vld [vmem:[%s12841_s0 + $0x278] sm:$0xf0] }
 0x266   :  { %v1932_v5 = vpop.f32.mrf.mxu0  ;;  %v8360_v57 = vadd.f32 %v2785_v48, %v2172_v16  ;;  %v7136_v48 = vld [vmem:[%s12841_s0 + $0x274] sm:$0xf] }
 0x267   :  { %v8358_v2 = vadd.f32 %v2545_v36, %v1932_v5  ;;  %v6624_v36 = vld [vmem:[%s12841_s0 + $0x558] sm:$0xf0]  ;;  %2214 = vmatmul.bf16.gmra.mxu2 %v6623_v50  ;;  %v6239_v5 = vor.u32 %v7133_v18, %v6238_v4 }
 0x268   :  { %13254 = vst [vmem:[#allocation93_spill] sm:$0xff] %v8360_v57  ;;  %v6627_v8 = vor.u32 %v7228_v11, %v6624_v36 }
 0x269   :  { %13253 = vst [vmem:[#allocation92_spill] sm:$0xff] %v8358_v2  ;;  %v6259_v2 = vor.u32 %v7136_v48, %v6256_v51  ;;  %v6246_v48 = vld [vmem:[%s12841_s0 + $0x260] sm:$0xf]  ;;  %v7135_v51 = vld [vmem:[%s12841_s0 + $0x264] sm:$0xf0] }
 0x26a   :  { %v2555_v42 = vpop.f32.mrf.mxu1  ;;  %7021 = vmatmul.msk.bf16.gmra.mxu3 %vm1417_vm0, %v6627_v8  ;;  %v2175_v15 = vpop.f32.mrf.mxu2 }
 0x26d   :  { %v2788_v53 = vpop.f32.mrf.mxu3 }
 0x26e   :  { %v1935_v16 = vpop.f32.mrf.mxu0  ;;  %v8389_v50 = vadd.f32 %v2788_v53, %v2175_v15  ;;  %v7230_v53 = vld [vmem:[%s12841_s0 + $0x564] sm:$0xf] }
 0x26f   :  { %v8387_v57 = vadd.f32 %v2548_v31, %v1935_v16  ;;  %v6630_v31 = vld [vmem:[%s12841_s0 + $0x560] sm:$0xf] }
 0x270   :  { %13256 = vst [vmem:[#allocation95_spill] sm:$0xff] %v8389_v50 }
 0x271   :  { %13255 = vst [vmem:[#allocation94_spill] sm:$0xff] %v8387_v57  ;;  %1974 = vmatmul.bf16.gmra.mxu0 %v6239_v5  ;;  %v7231_v5 = vld [vmem:[%s12841_s0 + $0x564] sm:$0xf0] }
 0x272   :  { %v2558_v11 = vpop.f32.mrf.mxu1  ;;  %v2177_v4 = vpop.f32.mrf.mxu2 }
 0x275   :  { %6975 = vmatmul.msk.bf16.gmra.mxu1 %vm1417_vm0, %v6259_v2  ;;  %v2790_v8 = vpop.f32.mrf.mxu3  ;;  %v6631_v2 = vor.u32 %v7231_v5, %v6630_v31  ;;  %v6264_v31 = vld [vmem:[%s12841_s0 + $0x288] sm:$0xf0] }
 0x276   :  { %v1937_v36 = vpop.f32.mrf.mxu0  ;;  %v8394_v27 = vadd.f32 %v2790_v8, %v2177_v4  ;;  %v7138_v8 = vld [vmem:[%s12841_s0 + $0x284] sm:$0xf] }
 0x277   :  { %v8392_v18 = vadd.f32 %v2550_v41, %v1937_v36  ;;  %v6632_v41 = vld [vmem:[%s12841_s0 + $0x568] sm:$0xf0]  ;;  %2219 = vmatmul.bf16.gmra.mxu2 %v6631_v2  ;;  %v6247_v36 = vor.u32 %v7135_v51, %v6246_v48 }
 0x278   :  { %13258 = vst [vmem:[#allocation97_spill] sm:$0xff] %v8394_v27  ;;  %v6635_v15 = vor.u32 %v7230_v53, %v6632_v41 }
 0x279   :  { %13257 = vst [vmem:[#allocation96_spill] sm:$0xff] %v8392_v18  ;;  %v6267_v18 = vor.u32 %v7138_v8, %v6264_v31  ;;  %v6254_v8 = vld [vmem:[%s12841_s0 + $0x270] sm:$0xf]  ;;  %v7137_v31 = vld [vmem:[%s12841_s0 + $0x274] sm:$0xf0] }
 0x27a   :  { %v2560_v16 = vpop.f32.mrf.mxu1  ;;  %7022 = vmatmul.msk.bf16.gmra.mxu3 %vm1417_vm0, %v6635_v15  ;;  %v2180_v5 = vpop.f32.mrf.mxu2 }
 0x27d   :  { %v2793_v50 = vpop.f32.mrf.mxu3 }
 0x27e   :  { %v1940_v4 = vpop.f32.mrf.mxu0  ;;  %v8423_v2 = vadd.f32 %v2793_v50, %v2180_v5  ;;  %v7232_v50 = vld [vmem:[%s12841_s0 + $0x574] sm:$0xf] }
 0x27f   :  { %v8421_v27 = vadd.f32 %v2553_v35, %v1940_v4  ;;  %v6638_v35 = vld [vmem:[%s12841_s0 + $0x570] sm:$0xf] }
 0x280   :  { %13260 = vst [vmem:[#allocation99_spill] sm:$0xff] %v8423_v2 }
 0x281   :  { %13259 = vst [vmem:[#allocation98_spill] sm:$0xff] %v8421_v27  ;;  %1979 = vmatmul.bf16.gmra.mxu0 %v6247_v36  ;;  %v7233_v36 = vld [vmem:[%s12841_s0 + $0x574] sm:$0xf0] }
 0x282   :  { %v2563_v53 = vpop.f32.mrf.mxu1  ;;  %v2182_v48 = vpop.f32.mrf.mxu2 }
 0x285   :  { %6976 = vmatmul.msk.bf16.gmra.mxu1 %vm1417_vm0, %v6267_v18  ;;  %v2795_v15 = vpop.f32.mrf.mxu3  ;;  %v6639_v18 = vor.u32 %v7233_v36, %v6638_v35  ;;  %v6272_v35 = vld [vmem:[%s12841_s0 + $0x298] sm:$0xf0] }
 0x286   :  { %v1942_v41 = vpop.f32.mrf.mxu0  ;;  %v8428_v57 = vadd.f32 %v2795_v15, %v2182_v48  ;;  %v7140_v15 = vld [vmem:[%s12841_s0 + $0x294] sm:$0xf] }
 0x287   :  { %v8426_v51 = vadd.f32 %v2555_v42, %v1942_v41  ;;  %v6640_v42 = vld [vmem:[%s12841_s0 + $0x578] sm:$0xf0]  ;;  %2224 = vmatmul.bf16.gmra.mxu2 %v6639_v18  ;;  %v6255_v41 = vor.u32 %v7137_v31, %v6254_v8 }
 0x288   :  { %13262 = vst [vmem:[#allocation101_spill] sm:$0xff] %v8428_v57  ;;  %v6643_v5 = vor.u32 %v7232_v50, %v6640_v42 }
 0x289   :  { %13261 = vst [vmem:[#allocation100_spill] sm:$0xff] %v8426_v51  ;;  %v6275_v51 = vor.u32 %v7140_v15, %v6272_v35  ;;  %v6262_v15 = vld [vmem:[%s12841_s0 + $0x280] sm:$0xf]  ;;  %v7139_v35 = vld [vmem:[%s12841_s0 + $0x284] sm:$0xf0] }
 0x28a   :  { %v2565_v4 = vpop.f32.mrf.mxu1  ;;  %7023 = vmatmul.msk.bf16.gmra.mxu3 %vm1417_vm0, %v6643_v5  ;;  %v2185_v36 = vpop.f32.mrf.mxu2 }
 0x28d   :  { %v2798_v2 = vpop.f32.mrf.mxu3 }
 0x28e   :  { %v1945_v48 = vpop.f32.mrf.mxu0  ;;  %v8457_v18 = vadd.f32 %v2798_v2, %v2185_v36  ;;  %v7234_v2 = vld [vmem:[%s12841_s0 + $0x584] sm:$0xf] }
 0x28f   :  { %v8455_v57 = vadd.f32 %v2558_v11, %v1945_v48  ;;  %v6646_v11 = vld [vmem:[%s12841_s0 + $0x580] sm:$0xf] }
 0x290   :  { %13264 = vst [vmem:[#allocation103_spill] sm:$0xff] %v8457_v18 }
 0x291   :  { %13263 = vst [vmem:[#allocation102_spill] sm:$0xff] %v8455_v57  ;;  %1984 = vmatmul.bf16.gmra.mxu0 %v6255_v41  ;;  %v7235_v41 = vld [vmem:[%s12841_s0 + $0x584] sm:$0xf0] }
 0x292   :  { %v2568_v50 = vpop.f32.mrf.mxu1  ;;  %v2187_v8 = vpop.f32.mrf.mxu2 }
 0x295   :  { %6977 = vmatmul.msk.bf16.gmra.mxu1 %vm1417_vm0, %v6275_v51  ;;  %v2800_v5 = vpop.f32.mrf.mxu3  ;;  %v6647_v51 = vor.u32 %v7235_v41, %v6646_v11  ;;  %v6280_v11 = vld [vmem:[%s12841_s0 + $0x2a8] sm:$0xf0] }
 0x296   :  { %v1947_v42 = vpop.f32.mrf.mxu0  ;;  %v8462_v27 = vadd.f32 %v2800_v5, %v2187_v8  ;;  %v7142_v5 = vld [vmem:[%s12841_s0 + $0x2a4] sm:$0xf] }
 0x297   :  { %v8460_v31 = vadd.f32 %v2560_v16, %v1947_v42  ;;  %v6648_v16 = vld [vmem:[%s12841_s0 + $0x588] sm:$0xf0]  ;;  %2229 = vmatmul.bf16.gmra.mxu2 %v6647_v51  ;;  %v6263_v42 = vor.u32 %v7139_v35, %v6262_v15 }
 0x298   :  { %13266 = vst [vmem:[#allocation105_spill] sm:$0xff] %v8462_v27  ;;  %v6651_v36 = vor.u32 %v7234_v2, %v6648_v16 }
 0x299   :  { %13265 = vst [vmem:[#allocation104_spill] sm:$0xff] %v8460_v31  ;;  %v6283_v31 = vor.u32 %v7142_v5, %v6280_v11  ;;  %v6270_v5 = vld [vmem:[%s12841_s0 + $0x290] sm:$0xf]  ;;  %v7141_v11 = vld [vmem:[%s12841_s0 + $0x294] sm:$0xf0] }
 0x29a   :  { %v2570_v48 = vpop.f32.mrf.mxu1  ;;  %7024 = vmatmul.msk.bf16.gmra.mxu3 %vm1417_vm0, %v6651_v36  ;;  %v2190_v41 = vpop.f32.mrf.mxu2 }
 0x29d   :  { %v2803_v18 = vpop.f32.mrf.mxu3 }
 0x29e   :  { %v1950_v8 = vpop.f32.mrf.mxu0  ;;  %v8491_v51 = vadd.f32 %v2803_v18, %v2190_v41  ;;  %v7236_v18 = vld [vmem:[%s12841_s0 + $0x594] sm:$0xf] }
 0x29f   :  { %v8489_v27 = vadd.f32 %v2563_v53, %v1950_v8  ;;  %v6654_v53 = vld [vmem:[%s12841_s0 + $0x590] sm:$0xf] }
 0x2a0   :  { %13268 = vst [vmem:[#allocation107_spill] sm:$0xff] %v8491_v51 }
 0x2a1   :  { %13267 = vst [vmem:[#allocation106_spill] sm:$0xff] %v8489_v27  ;;  %1989 = vmatmul.bf16.gmra.mxu0 %v6263_v42  ;;  %v7237_v42 = vld [vmem:[%s12841_s0 + $0x594] sm:$0xf0] }
 0x2a2   :  { %v2573_v2 = vpop.f32.mrf.mxu1  ;;  %v2192_v15 = vpop.f32.mrf.mxu2 }
 0x2a5   :  { %6978 = vmatmul.msk.bf16.gmra.mxu1 %vm1417_vm0, %v6283_v31  ;;  %v2805_v36 = vpop.f32.mrf.mxu3  ;;  %v6655_v31 = vor.u32 %v7237_v42, %v6654_v53  ;;  %v6288_v53 = vld [vmem:[%s12841_s0 + $0x2b8] sm:$0xf0] }
 0x2a6   :  { %v1952_v16 = vpop.f32.mrf.mxu0  ;;  %v8496_v57 = vadd.f32 %v2805_v36, %v2192_v15  ;;  %v7144_v36 = vld [vmem:[%s12841_s0 + $0x2b4] sm:$0xf] }
 0x2a7   :  { %v8494_v35 = vadd.f32 %v2565_v4, %v1952_v16  ;;  %v6656_v4 = vld [vmem:[%s12841_s0 + $0x598] sm:$0xf0]  ;;  %2234 = vmatmul.bf16.gmra.mxu2 %v6655_v31  ;;  %v6271_v16 = vor.u32 %v7141_v11, %v6270_v5 }
 0x2a8   :  { %13270 = vst [vmem:[#allocation109_spill] sm:$0xff] %v8496_v57  ;;  %v6659_v41 = vor.u32 %v7236_v18, %v6656_v4 }
 0x2a9   :  { %13269 = vst [vmem:[#allocation108_spill] sm:$0xff] %v8494_v35  ;;  %v6291_v35 = vor.u32 %v7144_v36, %v6288_v53  ;;  %v6278_v36 = vld [vmem:[%s12841_s0 + $0x2a0] sm:$0xf]  ;;  %v7143_v53 = vld [vmem:[%s12841_s0 + $0x2a4] sm:$0xf0] }
 0x2aa   :  { %v2575_v8 = vpop.f32.mrf.mxu1  ;;  %7025 = vmatmul.msk.bf16.gmra.mxu3 %vm1417_vm0, %v6659_v41  ;;  %v2195_v42 = vpop.f32.mrf.mxu2 }
 0x2ad   :  { %v2808_v51 = vpop.f32.mrf.mxu3 }
 0x2ae   :  { %v1955_v15 = vpop.f32.mrf.mxu0  ;;  %v8525_v31 = vadd.f32 %v2808_v51, %v2195_v42  ;;  %v7238_v51 = vld [vmem:[%s12841_s0 + $0x5a4] sm:$0xf] }
 0x2af   :  { %v8523_v57 = vadd.f32 %v2568_v50, %v1955_v15  ;;  %v6662_v50 = vld [vmem:[%s12841_s0 + $0x5a0] sm:$0xf] }
 0x2b0   :  { %13272 = vst [vmem:[#allocation111_spill] sm:$0xff] %v8525_v31 }
 0x2b1   :  { %13271 = vst [vmem:[#allocation110_spill] sm:$0xff] %v8523_v57  ;;  %1994 = vmatmul.bf16.gmra.mxu0 %v6271_v16  ;;  %v7239_v16 = vld [vmem:[%s12841_s0 + $0x5a4] sm:$0xf0] }
 0x2b2   :  { %v2578_v18 = vpop.f32.mrf.mxu1  ;;  %v2197_v5 = vpop.f32.mrf.mxu2 }
 0x2b5   :  { %6979 = vmatmul.msk.bf16.gmra.mxu1 %vm1417_vm0, %v6291_v35  ;;  %v2810_v41 = vpop.f32.mrf.mxu3  ;;  %v6663_v35 = vor.u32 %v7239_v16, %v6662_v50  ;;  %v6296_v50 = vld [vmem:[%s12841_s0 + $0x2c8] sm:$0xf0] }
 0x2b6   :  { %v1957_v4 = vpop.f32.mrf.mxu0  ;;  %v8530_v27 = vadd.f32 %v2810_v41, %v2197_v5  ;;  %v7146_v41 = vld [vmem:[%s12841_s0 + $0x2c4] sm:$0xf] }
 0x2b7   :  { %v8528_v11 = vadd.f32 %v2570_v48, %v1957_v4  ;;  %v6664_v48 = vld [vmem:[%s12841_s0 + $0x5a8] sm:$0xf0]  ;;  %2239 = vmatmul.bf16.gmra.mxu2 %v6663_v35  ;;  %v6279_v4 = vor.u32 %v7143_v53, %v6278_v36 }
 0x2b8   :  { %13274 = vst [vmem:[#allocation113_spill] sm:$0xff] %v8530_v27  ;;  %v6667_v42 = vor.u32 %v7238_v51, %v6664_v48 }
 0x2b9   :  { %13273 = vst [vmem:[#allocation112_spill] sm:$0xff] %v8528_v11  ;;  %v6299_v11 = vor.u32 %v7146_v41, %v6296_v50  ;;  %v6286_v41 = vld [vmem:[%s12841_s0 + $0x2b0] sm:$0xf]  ;;  %v7145_v50 = vld [vmem:[%s12841_s0 + $0x2b4] sm:$0xf0] }
 0x2ba   :  { %v2580_v15 = vpop.f32.mrf.mxu1  ;;  %7026 = vmatmul.msk.bf16.gmra.mxu3 %vm1417_vm0, %v6667_v42  ;;  %v2200_v16 = vpop.f32.mrf.mxu2 }
 0x2bd   :  { %v2813_v31 = vpop.f32.mrf.mxu3 }
 0x2be   :  { %v1960_v5 = vpop.f32.mrf.mxu0  ;;  %v8559_v35 = vadd.f32 %v2813_v31, %v2200_v16  ;;  %v7240_v31 = vld [vmem:[%s12841_s0 + $0x5b4] sm:$0xf] }
 0x2bf   :  { %v8557_v27 = vadd.f32 %v2573_v2, %v1960_v5  ;;  %v6670_v2 = vld [vmem:[%s12841_s0 + $0x5b0] sm:$0xf] }
 0x2c0   :  { %13276 = vst [vmem:[#allocation115_spill] sm:$0xff] %v8559_v35 }
 0x2c1   :  { %13275 = vst [vmem:[#allocation114_spill] sm:$0xff] %v8557_v27  ;;  %1999 = vmatmul.bf16.gmra.mxu0 %v6279_v4  ;;  %v7241_v4 = vld [vmem:[%s12841_s0 + $0x5b4] sm:$0xf0] }
 0x2c2   :  { %v2583_v51 = vpop.f32.mrf.mxu1  ;;  %v2202_v36 = vpop.f32.mrf.mxu2 }
 0x2c5   :  { %6980 = vmatmul.msk.bf16.gmra.mxu1 %vm1417_vm0, %v6299_v11  ;;  %v2815_v42 = vpop.f32.mrf.mxu3  ;;  %v6671_v11 = vor.u32 %v7241_v4, %v6670_v2  ;;  %v6304_v2 = vld [vmem:[%s12841_s0 + $0x2d8] sm:$0xf0] }
 0x2c6   :  { %v1962_v48 = vpop.f32.mrf.mxu0  ;;  %v8564_v57 = vadd.f32 %v2815_v42, %v2202_v36  ;;  %v7148_v42 = vld [vmem:[%s12841_s0 + $0x2d4] sm:$0xf] }
 0x2c7   :  { %v8562_v53 = vadd.f32 %v2575_v8, %v1962_v48  ;;  %v6672_v8 = vld [vmem:[%s12841_s0 + $0x5b8] sm:$0xf0]  ;;  %2244 = vmatmul.bf16.gmra.mxu2 %v6671_v11  ;;  %v6287_v48 = vor.u32 %v7145_v50, %v6286_v41 }
 0x2c8   :  { %13278 = vst [vmem:[#allocation117_spill] sm:$0xff] %v8564_v57  ;;  %v6675_v16 = vor.u32 %v7240_v31, %v6672_v8 }
 0x2c9   :  { %13277 = vst [vmem:[#allocation116_spill] sm:$0xff] %v8562_v53  ;;  %v6307_v53 = vor.u32 %v7148_v42, %v6304_v2  ;;  %v6294_v42 = vld [vmem:[%s12841_s0 + $0x2c0] sm:$0xf]  ;;  %v7147_v2 = vld [vmem:[%s12841_s0 + $0x2c4] sm:$0xf0] }
 0x2ca   :  { %v2585_v5 = vpop.f32.mrf.mxu1  ;;  %7027 = vmatmul.msk.bf16.gmra.mxu3 %vm1417_vm0, %v6675_v16  ;;  %v2205_v4 = vpop.f32.mrf.mxu2 }
 0x2cd   :  { %v2818_v35 = vpop.f32.mrf.mxu3 }
 0x2ce   :  { %v1965_v36 = vpop.f32.mrf.mxu0  ;;  %v8593_v11 = vadd.f32 %v2818_v35, %v2205_v4  ;;  %v7242_v35 = vld [vmem:[%s12841_s0 + $0x5c4] sm:$0xf] }
 0x2cf   :  { %v8591_v57 = vadd.f32 %v2578_v18, %v1965_v36  ;;  %v6678_v18 = vld [vmem:[%s12841_s0 + $0x5c0] sm:$0xf] }
 0x2d0   :  { %13280 = vst [vmem:[#allocation119_spill] sm:$0xff] %v8593_v11 }
 0x2d1   :  { %13279 = vst [vmem:[#allocation118_spill] sm:$0xff] %v8591_v57  ;;  %2004 = vmatmul.bf16.gmra.mxu0 %v6287_v48  ;;  %v7243_v48 = vld [vmem:[%s12841_s0 + $0x5c4] sm:$0xf0] }
 0x2d2   :  { %v2588_v31 = vpop.f32.mrf.mxu1  ;;  %v2207_v41 = vpop.f32.mrf.mxu2 }
 0x2d5   :  { %6981 = vmatmul.msk.bf16.gmra.mxu1 %vm1417_vm0, %v6307_v53  ;;  %v2820_v16 = vpop.f32.mrf.mxu3  ;;  %v6679_v53 = vor.u32 %v7243_v48, %v6678_v18  ;;  %v6312_v18 = vld [vmem:[%s12841_s0 + $0x2e8] sm:$0xf0] }
 0x2d6   :  { %v1967_v8 = vpop.f32.mrf.mxu0  ;;  %v8598_v27 = vadd.f32 %v2820_v16, %v2207_v41  ;;  %v7150_v16 = vld [vmem:[%s12841_s0 + $0x2e4] sm:$0xf] }
 0x2d7   :  { %v8596_v50 = vadd.f32 %v2580_v15, %v1967_v8  ;;  %v6680_v15 = vld [vmem:[%s12841_s0 + $0x5c8] sm:$0xf0]  ;;  %2249 = vmatmul.bf16.gmra.mxu2 %v6679_v53  ;;  %v6295_v8 = vor.u32 %v7147_v2, %v6294_v42 }
 0x2d8   :  { %13282 = vst [vmem:[#allocation121_spill] sm:$0xff] %v8598_v27  ;;  %v6683_v4 = vor.u32 %v7242_v35, %v6680_v15 }
 0x2d9   :  { %13281 = vst [vmem:[#allocation120_spill] sm:$0xff] %v8596_v50  ;;  %v6315_v50 = vor.u32 %v7150_v16, %v6312_v18  ;;  %v6302_v16 = vld [vmem:[%s12841_s0 + $0x2d0] sm:$0xf]  ;;  %v7149_v18 = vld [vmem:[%s12841_s0 + $0x2d4] sm:$0xf0] }
 0x2da   :  { %v2590_v36 = vpop.f32.mrf.mxu1  ;;  %7028 = vmatmul.msk.bf16.gmra.mxu3 %vm1417_vm0, %v6683_v4  ;;  %v2210_v48 = vpop.f32.mrf.mxu2 }
 0x2dd   :  { %v2823_v11 = vpop.f32.mrf.mxu3 }
 0x2de   :  { %v1970_v41 = vpop.f32.mrf.mxu0  ;;  %v8627_v53 = vadd.f32 %v2823_v11, %v2210_v48  ;;  %v7244_v11 = vld [vmem:[%s12841_s0 + $0x5d4] sm:$0xf] }
 0x2df   :  { %v8625_v27 = vadd.f32 %v2583_v51, %v1970_v41  ;;  %v6686_v51 = vld [vmem:[%s12841_s0 + $0x5d0] sm:$0xf] }
 0x2e0   :  { %13284 = vst [vmem:[#allocation123_spill] sm:$0xff] %v8627_v53 }
 0x2e1   :  { %13283 = vst [vmem:[#allocation122_spill] sm:$0xff] %v8625_v27  ;;  %2009 = vmatmul.bf16.gmra.mxu0 %v6295_v8  ;;  %v7245_v8 = vld [vmem:[%s12841_s0 + $0x5d4] sm:$0xf0] }
 0x2e2   :  { %v2593_v35 = vpop.f32.mrf.mxu1  ;;  %v2212_v42 = vpop.f32.mrf.mxu2 }
 0x2e5   :  { %6982 = vmatmul.msk.bf16.gmra.mxu1 %vm1417_vm0, %v6315_v50  ;;  %v2825_v4 = vpop.f32.mrf.mxu3  ;;  %v6687_v50 = vor.u32 %v7245_v8, %v6686_v51  ;;  %v6320_v51 = vld [vmem:[%s12841_s0 + $0x2f8] sm:$0xf0] }
 0x2e6   :  { %v1972_v15 = vpop.f32.mrf.mxu0  ;;  %v8632_v57 = vadd.f32 %v2825_v4, %v2212_v42  ;;  %v7152_v4 = vld [vmem:[%s12841_s0 + $0x2f4] sm:$0xf] }
 0x2e7   :  { %v8630_v2 = vadd.f32 %v2585_v5, %v1972_v15  ;;  %v6688_v5 = vld [vmem:[%s12841_s0 + $0x5d8] sm:$0xf0]  ;;  %2254 = vmatmul.bf16.gmra.mxu2 %v6687_v50  ;;  %v6303_v15 = vor.u32 %v7149_v18, %v6302_v16 }
 0x2e8   :  { %13286 = vst [vmem:[#allocation125_spill] sm:$0xff] %v8632_v57  ;;  %v6691_v48 = vor.u32 %v7244_v11, %v6688_v5 }
 0x2e9   :  { %13285 = vst [vmem:[#allocation124_spill] sm:$0xff] %v8630_v2  ;;  %v6323_v2 = vor.u32 %v7152_v4, %v6320_v51  ;;  %v6310_v4 = vld [vmem:[%s12841_s0 + $0x2e0] sm:$0xf]  ;;  %v7151_v51 = vld [vmem:[%s12841_s0 + $0x2e4] sm:$0xf0] }
 0x2ea   :  { %v2595_v41 = vpop.f32.mrf.mxu1  ;;  %7029 = vmatmul.msk.bf16.gmra.mxu3 %vm1417_vm0, %v6691_v48  ;;  %v2215_v8 = vpop.f32.mrf.mxu2 }
 0x2ed   :  { %v2828_v53 = vpop.f32.mrf.mxu3 }
 0x2ee   :  { %v1975_v42 = vpop.f32.mrf.mxu0  ;;  %v8661_v50 = vadd.f32 %v2828_v53, %v2215_v8  ;;  %v7246_v53 = vld [vmem:[%s12841_s0 + $0x5e4] sm:$0xf] }
 0x2ef   :  { %v8659_v57 = vadd.f32 %v2588_v31, %v1975_v42  ;;  %v6694_v31 = vld [vmem:[%s12841_s0 + $0x5e0] sm:$0xf] }
 0x2f0   :  { %13288 = vst [vmem:[#allocation127_spill] sm:$0xff] %v8661_v50 }
 0x2f1   :  { %13287 = vst [vmem:[#allocation126_spill] sm:$0xff] %v8659_v57  ;;  %2014 = vmatmul.bf16.gmra.mxu0 %v6303_v15  ;;  %v7247_v15 = vld [vmem:[%s12841_s0 + $0x5e4] sm:$0xf0] }
 0x2f2   :  { %v2598_v11 = vpop.f32.mrf.mxu1  ;;  %v2217_v16 = vpop.f32.mrf.mxu2 }
 0x2f5   :  { %6983 = vmatmul.msk.bf16.gmra.mxu1 %vm1417_vm0, %v6323_v2  ;;  %v2830_v48 = vpop.f32.mrf.mxu3  ;;  %v6695_v2 = vor.u32 %v7247_v15, %v6694_v31  ;;  %v6328_v31 = vld [vmem:[%s12841_s0 + $0x308] sm:$0xf0] }
 0x2f6   :  { %v1977_v5 = vpop.f32.mrf.mxu0  ;;  %v8666_v27 = vadd.f32 %v2830_v48, %v2217_v16  ;;  %v7154_v48 = vld [vmem:[%s12841_s0 + $0x304] sm:$0xf] }
 0x2f7   :  { %v8664_v18 = vadd.f32 %v2590_v36, %v1977_v5  ;;  %v6696_v36 = vld [vmem:[%s12841_s0 + $0x5e8] sm:$0xf0]  ;;  %2259 = vmatmul.bf16.gmra.mxu2 %v6695_v2  ;;  %v6311_v5 = vor.u32 %v7151_v51, %v6310_v4 }
 0x2f8   :  { %13290 = vst [vmem:[#allocation129_spill] sm:$0xff] %v8666_v27  ;;  %v6699_v8 = vor.u32 %v7246_v53, %v6696_v36 }
 0x2f9   :  { %13289 = vst [vmem:[#allocation128_spill] sm:$0xff] %v8664_v18  ;;  %v6331_v18 = vor.u32 %v7154_v48, %v6328_v31  ;;  %v6318_v48 = vld [vmem:[%s12841_s0 + $0x2f0] sm:$0xf]  ;;  %v7153_v31 = vld [vmem:[%s12841_s0 + $0x2f4] sm:$0xf0] }
 0x2fa   :  { %v2600_v42 = vpop.f32.mrf.mxu1  ;;  %7030 = vmatmul.msk.bf16.gmra.mxu3 %vm1417_vm0, %v6699_v8  ;;  %v2220_v15 = vpop.f32.mrf.mxu2 }
 0x2fd   :  { %v2833_v50 = vpop.f32.mrf.mxu3 }
 0x2fe   :  { %v1980_v16 = vpop.f32.mrf.mxu0  ;;  %v8695_v2 = vadd.f32 %v2833_v50, %v2220_v15  ;;  %v7248_v50 = vld [vmem:[%s12841_s0 + $0x5f4] sm:$0xf] }
 0x2ff   :  { %v8693_v27 = vadd.f32 %v2593_v35, %v1980_v16  ;;  %v6702_v35 = vld [vmem:[%s12841_s0 + $0x5f0] sm:$0xf] }
 0x300   :  { %13292 = vst [vmem:[#allocation131_spill] sm:$0xff] %v8695_v2 }
 0x301   :  { %13291 = vst [vmem:[#allocation130_spill] sm:$0xff] %v8693_v27  ;;  %2019 = vmatmul.bf16.gmra.mxu0 %v6311_v5  ;;  %v7249_v5 = vld [vmem:[%s12841_s0 + $0x5f4] sm:$0xf0] }
 0x302   :  { %v2603_v53 = vpop.f32.mrf.mxu1  ;;  %v2222_v4 = vpop.f32.mrf.mxu2 }
 0x305   :  { %6984 = vmatmul.msk.bf16.gmra.mxu1 %vm1417_vm0, %v6331_v18  ;;  %v2835_v8 = vpop.f32.mrf.mxu3  ;;  %v6703_v18 = vor.u32 %v7249_v5, %v6702_v35  ;;  %v6336_v35 = vld [vmem:[%s12841_s0 + $0x318] sm:$0xf0] }
 0x306   :  { %v1982_v36 = vpop.f32.mrf.mxu0  ;;  %v8700_v57 = vadd.f32 %v2835_v8, %v2222_v4  ;;  %v7156_v8 = vld [vmem:[%s12841_s0 + $0x314] sm:$0xf] }
 0x307   :  { %v8698_v51 = vadd.f32 %v2595_v41, %v1982_v36  ;;  %v6704_v41 = vld [vmem:[%s12841_s0 + $0x5f8] sm:$0xf0]  ;;  %2264 = vmatmul.bf16.gmra.mxu2 %v6703_v18  ;;  %v6319_v36 = vor.u32 %v7153_v31, %v6318_v48 }
 0x308   :  { %13294 = vst [vmem:[#allocation133_spill] sm:$0xff] %v8700_v57  ;;  %v6707_v15 = vor.u32 %v7248_v50, %v6704_v41 }
 0x309   :  { %13293 = vst [vmem:[#allocation132_spill] sm:$0xff] %v8698_v51  ;;  %v6339_v51 = vor.u32 %v7156_v8, %v6336_v35  ;;  %v6326_v8 = vld [vmem:[%s12841_s0 + $0x300] sm:$0xf]  ;;  %v7155_v35 = vld [vmem:[%s12841_s0 + $0x304] sm:$0xf0] }
 0x30a   :  { %v2605_v16 = vpop.f32.mrf.mxu1  ;;  %7031 = vmatmul.msk.bf16.gmra.mxu3 %vm1417_vm0, %v6707_v15  ;;  %v2225_v5 = vpop.f32.mrf.mxu2 }
 0x30d   :  { %v2838_v2 = vpop.f32.mrf.mxu3 }
 0x30e   :  { %v1985_v4 = vpop.f32.mrf.mxu0  ;;  %v8729_v18 = vadd.f32 %v2838_v2, %v2225_v5  ;;  %v7250_v2 = vld [vmem:[%s12841_s0 + $0x604] sm:$0xf] }
 0x30f   :  { %v8727_v57 = vadd.f32 %v2598_v11, %v1985_v4  ;;  %v6710_v11 = vld [vmem:[%s12841_s0 + $0x600] sm:$0xf] }
 0x310   :  { %13296 = vst [vmem:[#allocation135_spill] sm:$0xff] %v8729_v18 }
 0x311   :  { %13295 = vst [vmem:[#allocation134_spill] sm:$0xff] %v8727_v57  ;;  %2024 = vmatmul.bf16.gmra.mxu0 %v6319_v36  ;;  %v7251_v36 = vld [vmem:[%s12841_s0 + $0x604] sm:$0xf0] }
 0x312   :  { %v2608_v50 = vpop.f32.mrf.mxu1  ;;  %v2227_v48 = vpop.f32.mrf.mxu2 }
 0x315   :  { %6985 = vmatmul.msk.bf16.gmra.mxu1 %vm1417_vm0, %v6339_v51  ;;  %v2840_v15 = vpop.f32.mrf.mxu3  ;;  %v6711_v51 = vor.u32 %v7251_v36, %v6710_v11  ;;  %v6344_v11 = vld [vmem:[%s12841_s0 + $0x328] sm:$0xf0] }
 0x316   :  { %v1987_v41 = vpop.f32.mrf.mxu0  ;;  %v8734_v27 = vadd.f32 %v2840_v15, %v2227_v48  ;;  %v7158_v15 = vld [vmem:[%s12841_s0 + $0x324] sm:$0xf] }
 0x317   :  { %v8732_v31 = vadd.f32 %v2600_v42, %v1987_v41  ;;  %v6712_v42 = vld [vmem:[%s12841_s0 + $0x608] sm:$0xf0]  ;;  %2269 = vmatmul.bf16.gmra.mxu2 %v6711_v51  ;;  %v6327_v41 = vor.u32 %v7155_v35, %v6326_v8 }
 0x318   :  { %13298 = vst [vmem:[#allocation137_spill] sm:$0xff] %v8734_v27  ;;  %v6715_v5 = vor.u32 %v7250_v2, %v6712_v42 }
 0x319   :  { %13297 = vst [vmem:[#allocation136_spill] sm:$0xff] %v8732_v31  ;;  %v6347_v31 = vor.u32 %v7158_v15, %v6344_v11  ;;  %v6334_v15 = vld [vmem:[%s12841_s0 + $0x310] sm:$0xf]  ;;  %v7157_v11 = vld [vmem:[%s12841_s0 + $0x314] sm:$0xf0] }
 0x31a   :  { %v2610_v4 = vpop.f32.mrf.mxu1  ;;  %7032 = vmatmul.msk.bf16.gmra.mxu3 %vm1417_vm0, %v6715_v5  ;;  %v2230_v36 = vpop.f32.mrf.mxu2 }
 0x31d   :  { %v2843_v18 = vpop.f32.mrf.mxu3 }
 0x31e   :  { %v1990_v48 = vpop.f32.mrf.mxu0  ;;  %v8763_v51 = vadd.f32 %v2843_v18, %v2230_v36  ;;  %v7252_v18 = vld [vmem:[%s12841_s0 + $0x614] sm:$0xf] }
 0x31f   :  { %v8761_v27 = vadd.f32 %v2603_v53, %v1990_v48  ;;  %v6718_v53 = vld [vmem:[%s12841_s0 + $0x610] sm:$0xf] }
 0x320   :  { %13300 = vst [vmem:[#allocation139_spill] sm:$0xff] %v8763_v51 }
 0x321   :  { %13299 = vst [vmem:[#allocation138_spill] sm:$0xff] %v8761_v27  ;;  %2029 = vmatmul.bf16.gmra.mxu0 %v6327_v41  ;;  %v7253_v41 = vld [vmem:[%s12841_s0 + $0x614] sm:$0xf0] }
 0x322   :  { %v2613_v2 = vpop.f32.mrf.mxu1  ;;  %v2232_v8 = vpop.f32.mrf.mxu2 }
 0x325   :  { %6986 = vmatmul.msk.bf16.gmra.mxu1 %vm1417_vm0, %v6347_v31  ;;  %v2845_v5 = vpop.f32.mrf.mxu3  ;;  %v6719_v31 = vor.u32 %v7253_v41, %v6718_v53  ;;  %v6352_v53 = vld [vmem:[%s12841_s0 + $0x338] sm:$0xf0] }
 0x326   :  { %v1992_v42 = vpop.f32.mrf.mxu0  ;;  %v8768_v57 = vadd.f32 %v2845_v5, %v2232_v8  ;;  %v7160_v5 = vld [vmem:[%s12841_s0 + $0x334] sm:$0xf] }
 0x327   :  { %v8766_v35 = vadd.f32 %v2605_v16, %v1992_v42  ;;  %v6720_v16 = vld [vmem:[%s12841_s0 + $0x618] sm:$0xf0]  ;;  %2274 = vmatmul.bf16.gmra.mxu2 %v6719_v31  ;;  %v6335_v42 = vor.u32 %v7157_v11, %v6334_v15 }
 0x328   :  { %13302 = vst [vmem:[#allocation141_spill] sm:$0xff] %v8768_v57  ;;  %v6723_v36 = vor.u32 %v7252_v18, %v6720_v16 }
 0x329   :  { %13301 = vst [vmem:[#allocation140_spill] sm:$0xff] %v8766_v35  ;;  %v6355_v35 = vor.u32 %v7160_v5, %v6352_v53  ;;  %v6342_v5 = vld [vmem:[%s12841_s0 + $0x320] sm:$0xf]  ;;  %v7159_v53 = vld [vmem:[%s12841_s0 + $0x324] sm:$0xf0] }
 0x32a   :  { %v2615_v48 = vpop.f32.mrf.mxu1  ;;  %7033 = vmatmul.msk.bf16.gmra.mxu3 %vm1417_vm0, %v6723_v36  ;;  %v2235_v41 = vpop.f32.mrf.mxu2 }
 0x32d   :  { %v2848_v51 = vpop.f32.mrf.mxu3 }
 0x32e   :  { %v1995_v8 = vpop.f32.mrf.mxu0  ;;  %v8797_v31 = vadd.f32 %v2848_v51, %v2235_v41  ;;  %v7254_v51 = vld [vmem:[%s12841_s0 + $0x624] sm:$0xf] }
 0x32f   :  { %v8795_v57 = vadd.f32 %v2608_v50, %v1995_v8  ;;  %v6726_v50 = vld [vmem:[%s12841_s0 + $0x620] sm:$0xf] }
 0x330   :  { %13304 = vst [vmem:[#allocation143_spill] sm:$0xff] %v8797_v31 }
 0x331   :  { %13303 = vst [vmem:[#allocation142_spill] sm:$0xff] %v8795_v57  ;;  %2034 = vmatmul.bf16.gmra.mxu0 %v6335_v42  ;;  %v7255_v42 = vld [vmem:[%s12841_s0 + $0x624] sm:$0xf0] }
 0x332   :  { %v2618_v18 = vpop.f32.mrf.mxu1  ;;  %v2237_v15 = vpop.f32.mrf.mxu2 }
 0x335   :  { %6987 = vmatmul.msk.bf16.gmra.mxu1 %vm1417_vm0, %v6355_v35  ;;  %v2850_v36 = vpop.f32.mrf.mxu3  ;;  %v6727_v35 = vor.u32 %v7255_v42, %v6726_v50  ;;  %v6360_v50 = vld [vmem:[%s12841_s0 + $0x348] sm:$0xf0] }
 0x336   :  { %v1997_v16 = vpop.f32.mrf.mxu0  ;;  %v8802_v27 = vadd.f32 %v2850_v36, %v2237_v15  ;;  %v7162_v36 = vld [vmem:[%s12841_s0 + $0x344] sm:$0xf] }
 0x337   :  { %v8800_v11 = vadd.f32 %v2610_v4, %v1997_v16  ;;  %v6728_v4 = vld [vmem:[%s12841_s0 + $0x628] sm:$0xf0]  ;;  %2279 = vmatmul.bf16.gmra.mxu2 %v6727_v35  ;;  %v6343_v16 = vor.u32 %v7159_v53, %v6342_v5 }
 0x338   :  { %13306 = vst [vmem:[#allocation145_spill] sm:$0xff] %v8802_v27  ;;  %v6731_v41 = vor.u32 %v7254_v51, %v6728_v4 }
 0x339   :  { %13305 = vst [vmem:[#allocation144_spill] sm:$0xff] %v8800_v11  ;;  %v6363_v11 = vor.u32 %v7162_v36, %v6360_v50  ;;  %v6350_v36 = vld [vmem:[%s12841_s0 + $0x330] sm:$0xf]  ;;  %v7161_v50 = vld [vmem:[%s12841_s0 + $0x334] sm:$0xf0] }
 0x33a   :  { %v2620_v8 = vpop.f32.mrf.mxu1  ;;  %7034 = vmatmul.msk.bf16.gmra.mxu3 %vm1417_vm0, %v6731_v41  ;;  %v2240_v42 = vpop.f32.mrf.mxu2 }
 0x33d   :  { %v2853_v31 = vpop.f32.mrf.mxu3 }
 0x33e   :  { %v2000_v15 = vpop.f32.mrf.mxu0  ;;  %v8831_v35 = vadd.f32 %v2853_v31, %v2240_v42  ;;  %v7256_v31 = vld [vmem:[%s12841_s0 + $0x634] sm:$0xf] }
 0x33f   :  { %v8829_v27 = vadd.f32 %v2613_v2, %v2000_v15  ;;  %v6734_v2 = vld [vmem:[%s12841_s0 + $0x630] sm:$0xf] }
 0x340   :  { %13308 = vst [vmem:[#allocation147_spill] sm:$0xff] %v8831_v35 }
 0x341   :  { %13307 = vst [vmem:[#allocation146_spill] sm:$0xff] %v8829_v27  ;;  %2039 = vmatmul.bf16.gmra.mxu0 %v6343_v16  ;;  %v7257_v16 = vld [vmem:[%s12841_s0 + $0x634] sm:$0xf0] }
 0x342   :  { %v2623_v51 = vpop.f32.mrf.mxu1  ;;  %v2242_v5 = vpop.f32.mrf.mxu2 }
 0x345   :  { %6988 = vmatmul.msk.bf16.gmra.mxu1 %vm1417_vm0, %v6363_v11  ;;  %v2855_v41 = vpop.f32.mrf.mxu3  ;;  %v6735_v11 = vor.u32 %v7257_v16, %v6734_v2  ;;  %v6368_v2 = vld [vmem:[%s12841_s0 + $0x358] sm:$0xf0] }
 0x346   :  { %v2002_v4 = vpop.f32.mrf.mxu0  ;;  %v8836_v57 = vadd.f32 %v2855_v41, %v2242_v5  ;;  %v7164_v41 = vld [vmem:[%s12841_s0 + $0x354] sm:$0xf] }
 0x347   :  { %v8834_v53 = vadd.f32 %v2615_v48, %v2002_v4  ;;  %v6736_v48 = vld [vmem:[%s12841_s0 + $0x638] sm:$0xf0]  ;;  %2284 = vmatmul.bf16.gmra.mxu2 %v6735_v11  ;;  %v6351_v4 = vor.u32 %v7161_v50, %v6350_v36 }
 0x348   :  { %13310 = vst [vmem:[#allocation149_spill] sm:$0xff] %v8836_v57  ;;  %v6739_v42 = vor.u32 %v7256_v31, %v6736_v48 }
 0x349   :  { %13309 = vst [vmem:[#allocation148_spill] sm:$0xff] %v8834_v53  ;;  %v6371_v53 = vor.u32 %v7164_v41, %v6368_v2  ;;  %v6358_v41 = vld [vmem:[%s12841_s0 + $0x340] sm:$0xf]  ;;  %v7163_v2 = vld [vmem:[%s12841_s0 + $0x344] sm:$0xf0] }
 0x34a   :  { %v2625_v15 = vpop.f32.mrf.mxu1  ;;  %7035 = vmatmul.msk.bf16.gmra.mxu3 %vm1417_vm0, %v6739_v42  ;;  %v2245_v16 = vpop.f32.mrf.mxu2 }
 0x34d   :  { %v2858_v35 = vpop.f32.mrf.mxu3 }
 0x34e   :  { %v2005_v5 = vpop.f32.mrf.mxu0  ;;  %v8865_v11 = vadd.f32 %v2858_v35, %v2245_v16  ;;  %v7258_v35 = vld [vmem:[%s12841_s0 + $0x644] sm:$0xf] }
 0x34f   :  { %v8863_v57 = vadd.f32 %v2618_v18, %v2005_v5  ;;  %v6742_v18 = vld [vmem:[%s12841_s0 + $0x640] sm:$0xf] }
 0x350   :  { %13312 = vst [vmem:[#allocation151_spill] sm:$0xff] %v8865_v11 }
 0x351   :  { %13311 = vst [vmem:[#allocation150_spill] sm:$0xff] %v8863_v57  ;;  %2044 = vmatmul.bf16.gmra.mxu0 %v6351_v4  ;;  %v7259_v4 = vld [vmem:[%s12841_s0 + $0x644] sm:$0xf0] }
 0x352   :  { %v2628_v31 = vpop.f32.mrf.mxu1  ;;  %v2247_v36 = vpop.f32.mrf.mxu2 }
 0x355   :  { %6989 = vmatmul.msk.bf16.gmra.mxu1 %vm1417_vm0, %v6371_v53  ;;  %v2860_v42 = vpop.f32.mrf.mxu3  ;;  %v6743_v53 = vor.u32 %v7259_v4, %v6742_v18  ;;  %v6376_v18 = vld [vmem:[%s12841_s0 + $0x368] sm:$0xf0] }
 0x356   :  { %v2007_v48 = vpop.f32.mrf.mxu0  ;;  %v8870_v27 = vadd.f32 %v2860_v42, %v2247_v36  ;;  %v7166_v42 = vld [vmem:[%s12841_s0 + $0x364] sm:$0xf] }
 0x357   :  { %v8868_v50 = vadd.f32 %v2620_v8, %v2007_v48  ;;  %v6744_v8 = vld [vmem:[%s12841_s0 + $0x648] sm:$0xf0]  ;;  %2289 = vmatmul.bf16.gmra.mxu2 %v6743_v53  ;;  %v6359_v48 = vor.u32 %v7163_v2, %v6358_v41 }
 0x358   :  { %13314 = vst [vmem:[#allocation153_spill] sm:$0xff] %v8870_v27  ;;  %v6747_v16 = vor.u32 %v7258_v35, %v6744_v8 }
 0x359   :  { %13313 = vst [vmem:[#allocation152_spill] sm:$0xff] %v8868_v50  ;;  %v6379_v50 = vor.u32 %v7166_v42, %v6376_v18  ;;  %v6366_v18 = vld [vmem:[%s12841_s0 + $0x350] sm:$0xf] }
 0x35a   :  { %v8884_v5 = vpop.f32.mrf.mxu1  ;;  %7036 = vmatmul.msk.bf16.gmra.mxu3 %vm1417_vm0, %v6747_v16  ;;  %v2250_v4 = vpop.f32.mrf.mxu2 }
 0x35d   :  { %v2863_v11 = vpop.f32.mrf.mxu3 }
 0x35e   :  { %v2010_v36 = vpop.f32.mrf.mxu0  ;;  %v8903_v53 = vadd.f32 %v2863_v11, %v2250_v4  ;;  %v7260_v11 = vld [vmem:[%s12841_s0 + $0x654] sm:$0xf]  ;;  %v7165_v4 = vld [vmem:[%s12841_s0 + $0x354] sm:$0xf0] }
 0x35f   :  { %v8899_v27 = vadd.f32 %v2623_v51, %v2010_v36  ;;  %v6750_v51 = vld [vmem:[%s12841_s0 + $0x650] sm:$0xf]  ;;  %v4461_v36 = vmul.f32 %v7505_v13, %v7505_v13 }
 0x360   :  { %13316 = vst [vmem:[#allocation155_spill] sm:$0xff] %v8903_v53  ;;  %v4463_v53 = vmul.f32 %v7522_v25, %v7522_v25 }
 0x361   :  { %13315 = vst [vmem:[#allocation154_spill] sm:$0xff] %v8899_v27  ;;  %2049 = vmatmul.bf16.gmra.mxu0 %v6359_v48  ;;  %v7261_v48 = vld [vmem:[%s12841_s0 + $0x654] sm:$0xf0] }
 0x362   :  { %v8901_v35 = vpop.f32.mrf.mxu1  ;;  %v2252_v41 = vpop.f32.mrf.mxu2 }
 0x365   :  { %6990 = vmatmul.msk.bf16.gmra.mxu1 %vm1417_vm0, %v6379_v50  ;;  %v2865_v16 = vpop.f32.mrf.mxu3  ;;  %v6751_v50 = vor.u32 %v7261_v48, %v6750_v51  ;;  %v4213_v51 = vadd.f32 %v7505_v13, %v7502_v9  ;;  %v6367_v48 = vor.u32 %v7165_v4, %v6366_v18 }
 0x366   :  { %v2012_v8 = vpop.f32.mrf.mxu0  ;;  %v8908_v57 = vadd.f32 %v2865_v16, %v2252_v41  ;;  %v4460_v41 = vmul.f32 %v7502_v9, %v7502_v9  ;;  %v4462_v16 = vmul.f32 %v7519_v21, %v7519_v21 }
 0x367   :  { %v8906_v2 = vadd.f32 %v2625_v15, %v2012_v8  ;;  %v6752_v15 = vld [vmem:[%s12841_s0 + $0x658] sm:$0xf0]  ;;  %2294 = vmatmul.bf16.gmra.mxu2 %v6751_v50 }
 0x368   :  { %13318 = vst [vmem:[#allocation157_spill] sm:$0xff] %v8908_v57  ;;  %v6755_v8 = vor.u32 %v7260_v11, %v6752_v15  ;;  %v4701_v57 = vadd.f32 %v4461_v36, %v4460_v41  ;;  %v7168_v11 = vld [vmem:[%s12841_s0 + $0x374] sm:$0xf]  ;;  %v6384_v50 = vld [vmem:[%s12841_s0 + $0x378] sm:$0xf0]  ;;  %v4464_v36 = vmul.f32 %v7536_v33, %v7536_v33 }
 0x369   :  { %13317 = vst [vmem:[#allocation156_spill] sm:$0xff] %v8906_v2  ;;  %v6387_v41 = vor.u32 %v7168_v11, %v6384_v50 }
 0x36a   :  { %v8924_v42 = vpop.f32.mrf.mxu1  ;;  %7037 = vmatmul.msk.bf16.gmra.mxu3 %vm1417_vm0, %v6755_v8  ;;  %v2255_v15 = vpop.f32.mrf.mxu2  ;;  %v4214_v8 = vadd.f32 %v4213_v51, %v7519_v21  ;;  %v4702_v18 = vadd.f32 %v4701_v57, %v4462_v16  ;;  %v4466_v57 = vmul.f32 %v7553_v45, %v7553_v45  ;;  %v13388_v21 = vld [vmem:[#allocation142_spill] sm:$0xff] }
 0x36c   :  { %v4215_v4 = vadd.f32 %v4214_v8, %v7522_v25  ;;  %v4703_v9 = vadd.f32 %v4702_v18, %v4463_v53  ;;  %v4467_v53 = vmul.f32 %v7556_v49, %v7556_v49 }
 0x36d   :  { %v2868_v13 = vpop.f32.mrf.mxu3 }
 0x36e   :  { %v2015_v2 = vpop.f32.mrf.mxu0  ;;  %v4216_v10 = vadd.f32 %v4215_v4, %v7536_v33  ;;  %v8958_v51 = vadd.f32 %v2868_v13, %v2255_v15  ;;  %v4468_v15 = vmul.f32 %v7576_v60, %v7576_v60 }
 0x36f   :  { %v8948_v27 = vadd.f32 %v2628_v31, %v2015_v2  ;;  %v4704_v31 = vadd.f32 %v4703_v9, %v4464_v36 }
 0x370   :  { %13320 = vst [vmem:[#allocation159_spill] sm:$0xff] %v8958_v51  ;;  %v4217_v2 = vadd.f32 %v4216_v10, %v7539_v37  ;;  %v7263_v10 = vld [vmem:[%s12841_s0 + $0x664] sm:$0xf0] }
 0x371   :  { %13319 = vst [vmem:[#allocation158_spill] sm:$0xff] %v8948_v27  ;;  %2054 = vmatmul.bf16.gmra.mxu0 %v6367_v48  ;;  %v4705_v16 = vadd.f32 %v4704_v31, %v4465_v28  ;;  %v6758_v28 = vld [vmem:[%s12841_s0 + $0x660] sm:$0xf] }
 0x372   :  { %v8955_v1 = vpop.f32.mrf.mxu1  ;;  %v2257_v11 = vpop.f32.mrf.mxu2  ;;  %v4218_v50 = vadd.f32 %v4217_v2, %v7553_v45  ;;  %v6759_v4 = vor.u32 %v7263_v10, %v6758_v28 }
 0x373   :  { %v4706_v9 = vadd.f32 %v4705_v16, %v4466_v57  ;;  %v4469_v57 = vmul.f32 %v7579_v0, %v7579_v0  ;;  %v6374_v16 = vld [vmem:[%s12841_s0 + $0x360] sm:$0xf] }
 0x374   :  { %v4219_v36 = vadd.f32 %v4218_v50, %v7556_v49  ;;  %v4471_v49 = vmul.f32 %v7602_v17, %v7602_v17 }
 0x375   :  { %6991 = vmatmul.msk.bf16.gmra.mxu1 %vm1417_vm0, %v6387_v41  ;;  %v2870_v13 = vpop.f32.mrf.mxu3  ;;  %v6760_v41 = vld [vmem:[%s12841_s0 + $0x668] sm:$0xf0]  ;;  %v4707_v31 = vadd.f32 %v4706_v9, %v4467_v53  ;;  %v4470_v53 = vmul.f32 %v7599_v12, %v7599_v12 }
 0x376   :  { %v2017_v48 = vpop.f32.mrf.mxu0  ;;  %v8972_v18 = vadd.f32 %v2870_v13, %v2257_v11  ;;  %v4220_v50 = vadd.f32 %v4219_v36, %v7576_v60 }
 0x377   :  { %v8968_v8 = vadd.f32 %v8884_v5, %v2017_v48  ;;  %v7262_v5 = vld [vmem:[%s12841_s0 + $0x664] sm:$0xf]  ;;  %v7167_v48 = vld [vmem:[%s12841_s0 + $0x364] sm:$0xf0]  ;;  %2299 = vmatmul.bf16.gmra.mxu2 %v6759_v4  ;;  %v4708_v13 = vadd.f32 %v4707_v31, %v4468_v15  ;;  %v6392_v15 = vld [vmem:[%s12841_s0 + $0x388] sm:$0xf0] }
 0x378   :  { %13322 = vst [vmem:[#allocation161_spill] sm:$0xff] %v8972_v18  ;;  %v6763_v11 = vor.u32 %v7262_v5, %v6760_v41  ;;  %v4221_v9 = vadd.f32 %v4220_v50, %v7579_v0  ;;  %v6375_v28 = vor.u32 %v7167_v48, %v6374_v16  ;;  %v7170_v5 = vld [vmem:[%s12841_s0 + $0x384] sm:$0xf]  ;;  %v4472_v16 = vmul.f32 %v7629_v34, %v7629_v34 }
 0x379   :  { %13321 = vst [vmem:[#allocation160_spill] sm:$0xff] %v8968_v8  ;;  %v4709_v10 = vadd.f32 %v4708_v13, %v4469_v57  ;;  %v4473_v13 = vmul.f32 %v7632_v39, %v7632_v39 }
 0x37a   :  { %v8989_v2 = vpop.f32.mrf.mxu1  ;;  %7038 = vmatmul.msk.bf16.gmra.mxu3 %vm1417_vm0, %v6763_v11  ;;  %v2260_v36 = vpop.f32.mrf.mxu2  ;;  %v4222_v4 = vadd.f32 %v4221_v9, %v7599_v12  ;;  %v6395_v11 = vor.u32 %v7170_v5, %v6392_v15 }
 0x37b   :  { %v4710_v57 = vadd.f32 %v4709_v10, %v4470_v53 }
 0x37c   :  { %v4223_v48 = vadd.f32 %v4222_v4, %v7602_v17 }
 0x37d   :  { %v2873_v31 = vpop.f32.mrf.mxu3  ;;  %v4711_v50 = vadd.f32 %v4710_v57, %v4471_v49  ;;  %v4475_v49 = vmul.f32 %v7662_v59, %v7662_v59  ;;  %v4476_v57 = vmul.f32 %v7689_v14, %v7689_v14 }
 0x37e   :  { %v2020_v45 = vpop.f32.mrf.mxu0  ;;  %v4224_v9 = vadd.f32 %v4223_v48, %v7629_v34  ;;  %v9022_v12 = vadd.f32 %v2873_v31, %v2260_v36  ;;  %v6766_v48 = vld [vmem:[%s12841_s0 + $0x670] sm:$0xf] }
 0x37f   :  { %v9012_v41 = vadd.f32 %v8901_v35, %v2020_v45  ;;  %v4712_v45 = vadd.f32 %v4711_v50, %v4472_v16  ;;  %v4474_v35 = vmul.f32 %v7659_v55, %v7659_v55 }
 0x380   :  { %v4225_v53 = vadd.f32 %v4224_v9, %v7632_v39  ;;  %v6768_v9 = vld [vmem:[%s12841_s0 + $0x678] sm:$0xf0] }
 0x381   :  { %2059 = vmatmul.bf16.gmra.mxu0 %v6375_v28  ;;  %v4713_v28 = vadd.f32 %v4712_v45, %v4473_v13 }
 0x382   :  { %v9019_v0 = vpop.f32.mrf.mxu1  ;;  %v2262_v5 = vpop.f32.mrf.mxu2  ;;  %v4226_v15 = vadd.f32 %v4225_v53, %v7659_v55 }
 0x383   :  { %v4714_v31 = vadd.f32 %v4713_v28, %v4474_v35  ;;  %v4477_v35 = vmul.f32 %v7692_v19, %v7692_v19  ;;  %v6382_v28 = vld [vmem:[%s12841_s0 + $0x370] sm:$0xf] }
 0x384   :  { %v4227_v50 = vadd.f32 %v4226_v15, %v7662_v59  ;;  %v4479_v59 = vmul.f32 %v7722_v43, %v7722_v43 }
 0x385   :  { %6992 = vmatmul.msk.bf16.gmra.mxu1 %vm1417_vm0, %v6395_v11  ;;  %v2875_v36 = vpop.f32.mrf.mxu3  ;;  %v7265_v11 = vld [vmem:[%s12841_s0 + $0x674] sm:$0xf0]  ;;  %v4715_v45 = vadd.f32 %v4714_v31, %v4475_v49  ;;  %v4478_v49 = vmul.f32 %v7719_v38, %v7719_v38 }
 0x386   :  { %v2022_v10 = vpop.f32.mrf.mxu0  ;;  %v9036_v16 = vadd.f32 %v2875_v36, %v2262_v5  ;;  %v6767_v13 = vor.u32 %v7265_v11, %v6766_v48  ;;  %v4228_v15 = vadd.f32 %v4227_v50, %v7689_v14 }
 0x387   :  { %v9032_v4 = vadd.f32 %v8924_v42, %v2022_v10  ;;  %v7264_v42 = vld [vmem:[%s12841_s0 + $0x674] sm:$0xf]  ;;  %v7169_v10 = vld [vmem:[%s12841_s0 + $0x374] sm:$0xf0]  ;;  %v4716_v36 = vadd.f32 %v4715_v45, %v4476_v57  ;;  %v6400_v57 = vld [vmem:[%s12841_s0 + $0x398] sm:$0xf0] }
 0x388   :  { %v6771_v5 = vor.u32 %v7264_v42, %v6768_v9  ;;  %2304 = vmatmul.bf16.gmra.mxu2 %v6767_v13  ;;  %v4229_v31 = vadd.f32 %v4228_v15, %v7692_v19  ;;  %v6383_v48 = vor.u32 %v7169_v10, %v6382_v28  ;;  %v7172_v42 = vld [vmem:[%s12841_s0 + $0x394] sm:$0xf]  ;;  %v4480_v28 = vmul.f32 %v7749_v62, %v7749_v62 }
 0x389   :  { %13323 = vst [vmem:[#allocation162_spill] sm:$0xff] %v9032_v4  ;;  %v4717_v11 = vadd.f32 %v4716_v36, %v4477_v35  ;;  %v4481_v36 = vmul.f32 %v7752_v3, %v7752_v3 }
 0x38a   :  { %v9053_v53 = vpop.f32.mrf.mxu1  ;;  %7039 = vmatmul.msk.bf16.gmra.mxu3 %vm1417_vm0, %v6771_v5  ;;  %v2265_v50 = vpop.f32.mrf.mxu2  ;;  %v4230_v13 = vadd.f32 %v4229_v31, %v7719_v38  ;;  %v6403_v5 = vor.u32 %v7172_v42, %v6400_v57 }
 0x38b   :  { %v4718_v35 = vadd.f32 %v4717_v11, %v4478_v49 }
 0x38c   :  { %v4231_v10 = vadd.f32 %v4230_v13, %v7722_v43  ;;  %v13365_v43 = vld [vmem:[#allocation110_spill] sm:$0xff] }
 0x38d   :  { %v2878_v45 = vpop.f32.mrf.mxu3  ;;  %v4719_v15 = vadd.f32 %v4718_v35, %v4479_v59  ;;  %v4483_v59 = vmul.f32 %v7782_v29, %v7782_v29  ;;  %v4484_v35 = vmul.f32 %v7811_v52, %v7811_v52  ;;  %v4526_v14 = vmul.f32 %v13365_v43, %v13365_v43 }
 0x38e   :  { %v2025_v55 = vpop.f32.mrf.mxu0  ;;  %v4232_v31 = vadd.f32 %v4231_v10, %v7749_v62  ;;  %v9086_v38 = vadd.f32 %v2878_v45, %v2265_v50  ;;  %v6774_v10 = vld [vmem:[%s12841_s0 + $0x680] sm:$0xf] }
 0x38f   :  { %v9076_v9 = vadd.f32 %v8955_v1, %v2025_v55  ;;  %v4720_v55 = vadd.f32 %v4719_v15, %v4480_v28  ;;  %v4482_v1 = vmul.f32 %v7779_v24, %v7779_v24 }
 0x390   :  { %v4233_v49 = vadd.f32 %v4232_v31, %v7752_v3  ;;  %v6776_v31 = vld [vmem:[%s12841_s0 + $0x688] sm:$0xf0] }
 0x391   :  { %13324 = vst [vmem:[#allocation163_spill] sm:$0xff] %v9076_v9  ;;  %2064 = vmatmul.bf16.gmra.mxu0 %v6383_v48  ;;  %v4721_v48 = vadd.f32 %v4720_v55, %v4481_v36 }
 0x392   :  { %v9083_v19 = vpop.f32.mrf.mxu1  ;;  %v2267_v42 = vpop.f32.mrf.mxu2  ;;  %v4234_v57 = vadd.f32 %v4233_v49, %v7779_v24 }
 0x393   :  { %v4722_v45 = vadd.f32 %v4721_v48, %v4482_v1  ;;  %v4485_v1 = vmul.f32 %v7816_v58, %v7816_v58  ;;  %v6390_v48 = vld [vmem:[%s12841_s0 + $0x380] sm:$0xf] }
 0x394   :  { %v4235_v15 = vadd.f32 %v4234_v57, %v7782_v29  ;;  %v4487_v29 = vmul.f32 %v7850_v30, %v7850_v30 }
 0x395   :  { %6993 = vmatmul.msk.bf16.gmra.mxu1 %vm1417_vm0, %v6403_v5  ;;  %v2880_v50 = vpop.f32.mrf.mxu3  ;;  %v7267_v5 = vld [vmem:[%s12841_s0 + $0x684] sm:$0xf0]  ;;  %v4723_v55 = vadd.f32 %v4722_v45, %v4483_v59  ;;  %v4486_v59 = vmul.f32 %v7845_v20, %v7845_v20 }
 0x396   :  { %v2027_v11 = vpop.f32.mrf.mxu0  ;;  %v9100_v28 = vadd.f32 %v2880_v50, %v2267_v42  ;;  %v6775_v36 = vor.u32 %v7267_v5, %v6774_v10  ;;  %v4236_v57 = vadd.f32 %v4235_v15, %v7811_v52 }
 0x397   :  { %v9096_v13 = vadd.f32 %v8989_v2, %v2027_v11  ;;  %v7266_v2 = vld [vmem:[%s12841_s0 + $0x684] sm:$0xf]  ;;  %v7171_v11 = vld [vmem:[%s12841_s0 + $0x384] sm:$0xf0]  ;;  %v4724_v50 = vadd.f32 %v4723_v55, %v4484_v35  ;;  %v6408_v35 = vld [vmem:[%s12841_s0 + $0x3a8] sm:$0xf0] }
 0x398   :  { %v6779_v42 = vor.u32 %v7266_v2, %v6776_v31  ;;  %2309 = vmatmul.bf16.gmra.mxu2 %v6775_v36  ;;  %v4237_v45 = vadd.f32 %v4236_v57, %v7816_v58  ;;  %v6391_v10 = vor.u32 %v7171_v11, %v6390_v48  ;;  %v7174_v2 = vld [vmem:[%s12841_s0 + $0x3a4] sm:$0xf]  ;;  %v4488_v48 = vmul.f32 %v7877_v56, %v7877_v56 }
 0x399   :  { %v4725_v5 = vadd.f32 %v4724_v50, %v4485_v1  ;;  %v4489_v50 = vmul.f32 %v7882_v7, %v7882_v7 }
 0x39a   :  { %v9117_v49 = vpop.f32.mrf.mxu1  ;;  %7040 = vmatmul.msk.bf16.gmra.mxu3 %vm1417_vm0, %v6779_v42  ;;  %v2270_v15 = vpop.f32.mrf.mxu2  ;;  %v4238_v36 = vadd.f32 %v4237_v45, %v7845_v20  ;;  %v6411_v42 = vor.u32 %v7174_v2, %v6408_v35 }
 0x39b   :  { %v4726_v1 = vadd.f32 %v4725_v5, %v4486_v59 }
 0x39c   :  { %v4239_v11 = vadd.f32 %v4238_v36, %v7850_v30 }
 0x39d   :  { %v2883_v55 = vpop.f32.mrf.mxu3  ;;  %v4727_v57 = vadd.f32 %v4726_v1, %v4487_v29  ;;  %v4491_v29 = vmul.f32 %v7916_v63, %v7916_v63  ;;  %v4492_v1 = vmul.f32 %v7945_v40, %v7945_v40 }
 0x39e   :  { %v2030_v24 = vpop.f32.mrf.mxu0  ;;  %v4240_v45 = vadd.f32 %v4239_v11, %v7877_v56  ;;  %v9150_v20 = vadd.f32 %v2883_v55, %v2270_v15  ;;  %v6782_v11 = vld [vmem:[%s12841_s0 + $0x690] sm:$0xf] }
 0x39f   :  { %v9140_v31 = vadd.f32 %v9019_v0, %v2030_v24  ;;  %v4728_v0 = vadd.f32 %v4727_v57, %v4488_v48  ;;  %v4490_v24 = vmul.f32 %v7911_v44, %v7911_v44 }
 0x3a0   :  { %v4241_v59 = vadd.f32 %v4240_v45, %v7882_v7  ;;  %v6784_v45 = vld [vmem:[%s12841_s0 + $0x698] sm:$0xf0] }
 0x3a1   :  { %13325 = vst [vmem:[#allocation164_spill] sm:$0xff] %v9140_v31  ;;  %2069 = vmatmul.bf16.gmra.mxu0 %v6391_v10  ;;  %v4729_v10 = vadd.f32 %v4728_v0, %v4489_v50 }
 0x3a2   :  { %v9147_v58 = vpop.f32.mrf.mxu1  ;;  %v2272_v2 = vpop.f32.mrf.mxu2  ;;  %v4242_v35 = vadd.f32 %v4241_v59, %v7911_v44 }
 0x3a3   :  { %v4730_v55 = vadd.f32 %v4729_v10, %v4490_v24  ;;  %v4493_v24 = vmul.f32 %v7950_v23, %v7950_v23  ;;  %v6398_v10 = vld [vmem:[%s12841_s0 + $0x390] sm:$0xf] }
 0x3a4   :  { %v4243_v57 = vadd.f32 %v4242_v35, %v7916_v63  ;;  %v4495_v63 = vmul.f32 %v7984_v22, %v7984_v22 }
 0x3a5   :  { %6994 = vmatmul.msk.bf16.gmra.mxu1 %vm1417_vm0, %v6411_v42  ;;  %v2885_v15 = vpop.f32.mrf.mxu3  ;;  %v7269_v42 = vld [vmem:[%s12841_s0 + $0x694] sm:$0xf0]  ;;  %v4731_v0 = vadd.f32 %v4730_v55, %v4491_v29  ;;  %v4494_v29 = vmul.f32 %v7979_v61, %v7979_v61 }
 0x3a6   :  { %v2032_v5 = vpop.f32.mrf.mxu0  ;;  %v9164_v48 = vadd.f32 %v2885_v15, %v2272_v2  ;;  %v6783_v50 = vor.u32 %v7269_v42, %v6782_v11  ;;  %v4244_v35 = vadd.f32 %v4243_v57, %v7945_v40  ;;  %v13342_v40 = vld [vmem:[#allocation80_spill] sm:$0xff] }
 0x3a7   :  { %v9160_v36 = vadd.f32 %v9053_v53, %v2032_v5  ;;  %v7268_v53 = vld [vmem:[%s12841_s0 + $0x694] sm:$0xf]  ;;  %v7173_v5 = vld [vmem:[%s12841_s0 + $0x394] sm:$0xf0]  ;;  %v4732_v15 = vadd.f32 %v4731_v0, %v4492_v1  ;;  %v6416_v1 = vld [vmem:[%s12841_s0 + $0x3b8] sm:$0xf0]  ;;  %v4511_v7 = vmul.f32 %v13342_v40, %v13342_v40 }
 0x3a8   :  { %v6787_v2 = vor.u32 %v7268_v53, %v6784_v45  ;;  %2314 = vmatmul.bf16.gmra.mxu2 %v6783_v50  ;;  %v4245_v55 = vadd.f32 %v4244_v35, %v7950_v23  ;;  %v6399_v11 = vor.u32 %v7173_v5, %v6398_v10  ;;  %v7176_v53 = vld [vmem:[%s12841_s0 + $0x3b4] sm:$0xf]  ;;  %v4496_v10 = vmul.f32 %v8013_v32, %v8013_v32 }
 0x3a9   :  { %13326 = vst [vmem:[#allocation165_spill] sm:$0xff] %v9160_v36  ;;  %v4733_v42 = vadd.f32 %v4732_v15, %v4493_v24  ;;  %v4497_v15 = vmul.f32 %v8018_v46, %v8018_v46 }
 0x3aa   :  { %v9181_v59 = vpop.f32.mrf.mxu1  ;;  %7041 = vmatmul.msk.bf16.gmra.mxu3 %vm1417_vm0, %v6787_v2  ;;  %v2275_v57 = vpop.f32.mrf.mxu2  ;;  %v4246_v50 = vadd.f32 %v4245_v55, %v7979_v61  ;;  %v6419_v2 = vor.u32 %v7176_v53, %v6416_v1 }
 0x3ab   :  { %v4734_v24 = vadd.f32 %v4733_v42, %v4494_v29 }
 0x3ac   :  { %v4247_v5 = vadd.f32 %v4246_v50, %v7984_v22 }
 0x3ad   :  { %v2888_v0 = vpop.f32.mrf.mxu3  ;;  %v4735_v35 = vadd.f32 %v4734_v24, %v4495_v63  ;;  %v4499_v63 = vmul.f32 %v8052_v26, %v8052_v26  ;;  %v4500_v24 = vmul.f32 %v8081_v6, %v8081_v6 }
 0x3ae   :  { %v2035_v44 = vpop.f32.mrf.mxu0  ;;  %v4248_v55 = vadd.f32 %v4247_v5, %v8013_v32  ;;  %v9214_v61 = vadd.f32 %v2888_v0, %v2275_v57  ;;  %v6790_v5 = vld [vmem:[%s12841_s0 + $0x6a0] sm:$0xf] }
 0x3af   :  { %v9204_v45 = vadd.f32 %v9083_v19, %v2035_v44  ;;  %v4736_v19 = vadd.f32 %v4735_v35, %v4496_v10  ;;  %v4498_v44 = vmul.f32 %v8047_v54, %v8047_v54 }
 0x3b0   :  { %13328 = vst [vmem:[#allocation167_spill] sm:$0xff] %v9214_v61  ;;  %v4249_v29 = vadd.f32 %v4248_v55, %v8018_v46  ;;  %v6792_v55 = vld [vmem:[%s12841_s0 + $0x6a8] sm:$0xf0] }
 0x3b1   :  { %13327 = vst [vmem:[#allocation166_spill] sm:$0xff] %v9204_v45  ;;  %2074 = vmatmul.bf16.gmra.mxu0 %v6399_v11  ;;  %v4737_v11 = vadd.f32 %v4736_v19, %v4497_v15 }
 0x3b2   :  { %v9211_v23 = vpop.f32.mrf.mxu1  ;;  %v2277_v53 = vpop.f32.mrf.mxu2  ;;  %v4250_v1 = vadd.f32 %v4249_v29, %v8047_v54  ;;  %v13332_v54 = vld [vmem:[#allocation64_spill] sm:$0xff] }
 0x3b3   :  { %v4738_v0 = vadd.f32 %v4737_v11, %v4498_v44  ;;  %v4501_v44 = vmul.f32 %v8086_v47, %v8086_v47  ;;  %v6406_v11 = vld [vmem:[%s12841_s0 + $0x3a0] sm:$0xf]  ;;  %v4503_v46 = vmul.f32 %v13332_v54, %v13332_v54 }
 0x3b4   :  { %v4251_v35 = vadd.f32 %v4250_v1, %v8052_v26 }
 0x3b5   :  { %6995 = vmatmul.msk.bf16.gmra.mxu1 %vm1417_vm0, %v6419_v2  ;;  %v2890_v57 = vpop.f32.mrf.mxu3  ;;  %v7271_v2 = vld [vmem:[%s12841_s0 + $0x6a4] sm:$0xf0]  ;;  %v4739_v19 = vadd.f32 %v4738_v0, %v4499_v63 }
 0x3b6   :  { %v2037_v42 = vpop.f32.mrf.mxu0  ;;  %v9228_v10 = vadd.f32 %v2890_v57, %v2277_v53  ;;  %v6791_v15 = vor.u32 %v7271_v2, %v6790_v5  ;;  %v4252_v1 = vadd.f32 %v4251_v35, %v8081_v6  ;;  %v13331_v5 = vld [vmem:[#allocation62_spill] sm:$0xff] }
 0x3b7   :  { %v9224_v50 = vadd.f32 %v9117_v49, %v2037_v42  ;;  %v7270_v49 = vld [vmem:[%s12841_s0 + $0x6a4] sm:$0xf]  ;;  %v7175_v42 = vld [vmem:[%s12841_s0 + $0x3a4] sm:$0xf0]  ;;  %v4740_v57 = vadd.f32 %v4739_v19, %v4500_v24  ;;  %v4502_v63 = vmul.f32 %v13331_v5, %v13331_v5  ;;  %v6424_v24 = vld [vmem:[%s12841_s0 + $0x3c8] sm:$0xf0] }
 0x3b8   :  { %13330 = vst [vmem:[#allocation169_spill] sm:$0xff] %v9228_v10  ;;  %v6795_v53 = vor.u32 %v7270_v49, %v6792_v55  ;;  %2319 = vmatmul.bf16.gmra.mxu2 %v6791_v15  ;;  %v4253_v0 = vadd.f32 %v4252_v1, %v8086_v47  ;;  %v6407_v2 = vor.u32 %v7175_v42, %v6406_v11  ;;  %v7178_v49 = vld [vmem:[%s12841_s0 + $0x3c4] sm:$0xf]  ;;  %v13334_v47 = vld [vmem:[#allocation68_spill] sm:$0xff] }
 0x3b9   :  { %13329 = vst [vmem:[#allocation168_spill] sm:$0xff] %v9224_v50  ;;  %v4741_v26 = vadd.f32 %v4740_v57, %v4501_v44  ;;  %v13333_v11 = vld [vmem:[#allocation66_spill] sm:$0xff]  ;;  %v6427_v1 = vor.u32 %v7178_v49, %v6424_v24  ;;  %v4505_v6 = vmul.f32 %v13334_v47, %v13334_v47  ;;  %v13336_v49 = vld [vmem:[#allocation72_spill] sm:$0xff] }
 0x3ba   :  { %v9245_v29 = vpop.f32.mrf.mxu1  ;;  %7042 = vmatmul.msk.bf16.gmra.mxu3 %vm1417_vm0, %v6795_v53  ;;  %v2280_v35 = vpop.f32.mrf.mxu2  ;;  %v4254_v15 = vadd.f32 %v4253_v0, %v13331_v5  ;;  %v4504_v42 = vmul.f32 %v13333_v11, %v13333_v11 }
 0x3bb   :  { %v4742_v44 = vadd.f32 %v4741_v26, %v4502_v63 }
 0x3bc   :  { %v4255_v53 = vadd.f32 %v4254_v15, %v13332_v54 }
 0x3bd   :  { %v2893_v19 = vpop.f32.mrf.mxu3  ;;  %v4743_v57 = vadd.f32 %v4742_v44, %v4503_v46  ;;  %v4507_v46 = vmul.f32 %v13336_v49, %v13336_v49 }
 0x3be   :  { %v2040_v32 = vpop.f32.mrf.mxu0  ;;  %v4256_v0 = vadd.f32 %v4255_v53, %v13333_v11  ;;  %v9278_v5 = vadd.f32 %v2893_v19, %v2280_v35 }
 0x3bf   :  { %v9268_v55 = vadd.f32 %v9147_v58, %v2040_v32  ;;  %v4744_v58 = vadd.f32 %v4743_v57, %v4504_v42  ;;  %v13335_v32 = vld [vmem:[#allocation70_spill] sm:$0xff] }
 0x3c0   :  { %v4506_v26 = vmul.f32 %v13335_v32, %v13335_v32  ;;  %v4257_v63 = vadd.f32 %v4256_v0, %v13334_v47  ;;  %v13338_v42 = vld [vmem:[#allocation74_spill] sm:$0xff] }
 0x3c1   :  { %2079 = vmatmul.bf16.gmra.mxu0 %v6407_v2  ;;  %v4745_v2 = vadd.f32 %v4744_v58, %v4505_v6  ;;  %v4508_v57 = vmul.f32 %v13338_v42, %v13338_v42  ;;  %v6798_v6 = vld [vmem:[%s12841_s0 + $0x6b0] sm:$0xf] }
 0x3c2   :  { %v9275_v22 = vpop.f32.mrf.mxu1  ;;  %v2282_v15 = vpop.f32.mrf.mxu2  ;;  %v4258_v44 = vadd.f32 %v4257_v63, %v13335_v32  ;;  %v7177_v32 = vld [vmem:[%s12841_s0 + $0x3b4] sm:$0xf0] }
 0x3c3   :  { %v4746_v19 = vadd.f32 %v4745_v2, %v4506_v26  ;;  %v6800_v26 = vld [vmem:[%s12841_s0 + $0x6b8] sm:$0xf0]  ;;  %v13340_v2 = vld [vmem:[#allocation76_spill] sm:$0xff] }
 0x3c4   :  { %v4259_v0 = vadd.f32 %v4258_v44, %v13336_v49  ;;  %v13341_v49 = vld [vmem:[#allocation78_spill] sm:$0xff] }
 0x3c5   :  { %6996 = vmatmul.msk.bf16.gmra.mxu1 %vm1417_vm0, %v6427_v1  ;;  %v2895_v35 = vpop.f32.mrf.mxu3  ;;  %v7273_v1 = vld [vmem:[%s12841_s0 + $0x6b4] sm:$0xf0]  ;;  %v4747_v63 = vadd.f32 %v4746_v19, %v4507_v46  ;;  %v4510_v46 = vmul.f32 %v13341_v49, %v13341_v49 }
 0x3c6   :  { %v2042_v24 = vpop.f32.mrf.mxu0  ;;  %v9292_v11 = vadd.f32 %v2895_v35, %v2282_v15  ;;  %v6799_v58 = vor.u32 %v7273_v1, %v6798_v6  ;;  %v6414_v35 = vld [vmem:[%s12841_s0 + $0x3b0] sm:$0xf]  ;;  %v4260_v6 = vadd.f32 %v4259_v0, %v13338_v42 }
 0x3c7   :  { %v9288_v53 = vadd.f32 %v9181_v59, %v2042_v24  ;;  %v7272_v59 = vld [vmem:[%s12841_s0 + $0x6b4] sm:$0xf]  ;;  %v4509_v24 = vmul.f32 %v13340_v2, %v13340_v2  ;;  %v4748_v1 = vadd.f32 %v4747_v63, %v4508_v57  ;;  %v6415_v47 = vor.u32 %v7177_v32, %v6414_v35  ;;  %v6432_v57 = vld [vmem:[%s12841_s0 + $0x3d8] sm:$0xf0] }
 0x3c8   :  { %13339 = vst [vmem:[#allocation171_spill] sm:$0xff] %v9292_v11  ;;  %v6803_v44 = vor.u32 %v7272_v59, %v6800_v26  ;;  %2324 = vmatmul.bf16.gmra.mxu2 %v6799_v58  ;;  %v4261_v19 = vadd.f32 %v4260_v6, %v13340_v2  ;;  %v7180_v59 = vld [vmem:[%s12841_s0 + $0x3d4] sm:$0xf] }
 0x3c9   :  { %13337 = vst [vmem:[#allocation170_spill] sm:$0xff] %v9288_v53  ;;  %v4749_v54 = vadd.f32 %v4748_v1, %v4509_v24  ;;  %v13344_v24 = vld [vmem:[#allocation82_spill] sm:$0xff]  ;;  %v6435_v6 = vor.u32 %v7180_v59, %v6432_v57  ;;  %v13345_v2 = vld [vmem:[#allocation84_spill] sm:$0xff] }
 0x3ca   :  { %v9309_v15 = vpop.f32.mrf.mxu1  ;;  %7043 = vmatmul.msk.bf16.gmra.mxu3 %vm1417_vm0, %v6803_v44  ;;  %v2285_v0 = vpop.f32.mrf.mxu2  ;;  %v4262_v58 = vadd.f32 %v4261_v19, %v13341_v49  ;;  %v4512_v35 = vmul.f32 %v13344_v24, %v13344_v24  ;;  %v4513_v42 = vmul.f32 %v13345_v2, %v13345_v2  ;;  %v13348_v59 = vld [vmem:[#allocation88_spill] sm:$0xff] }
 0x3cb   :  { %v4750_v63 = vadd.f32 %v4749_v54, %v4510_v46 }
 0x3cc   :  { %v4263_v44 = vadd.f32 %v4262_v58, %v13342_v40  ;;  %v13353_v40 = vld [vmem:[#allocation94_spill] sm:$0xff] }
 0x3cd   :  { %v2898_v32 = vpop.f32.mrf.mxu3  ;;  %v4751_v1 = vadd.f32 %v4750_v63, %v4511_v7  ;;  %v4515_v7 = vmul.f32 %v13348_v59, %v13348_v59  ;;  %v4518_v52 = vmul.f32 %v13353_v40, %v13353_v40 }
 0x3ce   :  { %v2045_v56 = vpop.f32.mrf.mxu0  ;;  %v4264_v19 = vadd.f32 %v4263_v44, %v13344_v24  ;;  %v9342_v49 = vadd.f32 %v2898_v32, %v2285_v0 }
 0x3cf   :  { %v9332_v26 = vadd.f32 %v9211_v23, %v2045_v56  ;;  %v4752_v56 = vadd.f32 %v4751_v1, %v4512_v35  ;;  %v13347_v23 = vld [vmem:[#allocation86_spill] sm:$0xff] }
 0x3d0   :  { %13346 = vst [vmem:[#allocation173_spill] sm:$0xff] %v9342_v49  ;;  %v4514_v54 = vmul.f32 %v13347_v23, %v13347_v23  ;;  %v4265_v46 = vadd.f32 %v4264_v19, %v13345_v2  ;;  %v13350_v35 = vld [vmem:[#allocation90_spill] sm:$0xff] }
 0x3d1   :  { %13343 = vst [vmem:[#allocation172_spill] sm:$0xff] %v9332_v26  ;;  %2084 = vmatmul.bf16.gmra.mxu0 %v6415_v47  ;;  %v4753_v47 = vadd.f32 %v4752_v56, %v4513_v42  ;;  %v4516_v1 = vmul.f32 %v13350_v35, %v13350_v35  ;;  %v6806_v42 = vld [vmem:[%s12841_s0 + $0x6c0] sm:$0xf] }
 0x3d2   :  { %v9339_v30 = vpop.f32.mrf.mxu1  ;;  %v2287_v58 = vpop.f32.mrf.mxu2  ;;  %v4266_v63 = vadd.f32 %v4265_v46, %v13347_v23 }
 0x3d3   :  { %v4754_v32 = vadd.f32 %v4753_v47, %v4514_v54  ;;  %v6808_v54 = vld [vmem:[%s12841_s0 + $0x6c8] sm:$0xf0]  ;;  %v13352_v47 = vld [vmem:[#allocation92_spill] sm:$0xff] }
 0x3d4   :  { %v4267_v19 = vadd.f32 %v4266_v63, %v13348_v59 }
 0x3d5   :  { %6997 = vmatmul.msk.bf16.gmra.mxu1 %vm1417_vm0, %v6435_v6  ;;  %v2900_v0 = vpop.f32.mrf.mxu3  ;;  %v7275_v6 = vld [vmem:[%s12841_s0 + $0x6c4] sm:$0xf0]  ;;  %v4755_v46 = vadd.f32 %v4754_v32, %v4515_v7 }
 0x3d6   :  { %v2047_v57 = vpop.f32.mrf.mxu0  ;;  %v9356_v24 = vadd.f32 %v2900_v0, %v2287_v58  ;;  %v6807_v56 = vor.u32 %v7275_v6, %v6806_v42  ;;  %v4268_v23 = vadd.f32 %v4267_v19, %v13350_v35  ;;  %v13354_v6 = vld [vmem:[#allocation96_spill] sm:$0xff] }
 0x3d7   :  { %v9352_v44 = vadd.f32 %v9245_v29, %v2047_v57  ;;  %v7274_v29 = vld [vmem:[%s12841_s0 + $0x6c4] sm:$0xf]  ;;  %v4517_v57 = vmul.f32 %v13352_v47, %v13352_v47  ;;  %v4756_v2 = vadd.f32 %v4755_v46, %v4516_v1  ;;  %v4519_v7 = vmul.f32 %v13354_v6, %v13354_v6 }
 0x3d8   :  { %13351 = vst [vmem:[#allocation175_spill] sm:$0xff] %v9356_v24  ;;  %v6811_v0 = vor.u32 %v7274_v29, %v6808_v54  ;;  %2329 = vmatmul.bf16.gmra.mxu2 %v6807_v56  ;;  %v4269_v63 = vadd.f32 %v4268_v23, %v13352_v47  ;;  %v13356_v56 = vld [vmem:[#allocation98_spill] sm:$0xff]  ;;  %v13357_v23 = vld [vmem:[#allocation100_spill] sm:$0xff] }
 0x3d9   :  { %13349 = vst [vmem:[#allocation174_spill] sm:$0xff] %v9352_v44  ;;  %v4757_v42 = vadd.f32 %v4756_v2, %v4517_v57  ;;  %v4520_v54 = vmul.f32 %v13356_v56, %v13356_v56  ;;  %v4521_v2 = vmul.f32 %v13357_v23, %v13357_v23 }
 0x3da   :  { %v9373_v58 = vpop.f32.mrf.mxu1  ;;  %7044 = vmatmul.msk.bf16.gmra.mxu3 %vm1417_vm0, %v6811_v0  ;;  %v2290_v59 = vpop.f32.mrf.mxu2  ;;  %v4270_v3 = vadd.f32 %v4269_v63, %v13353_v40  ;;  %v13360_v40 = vld [vmem:[#allocation104_spill] sm:$0xff] }
 0x3db   :  { %v4758_v1 = vadd.f32 %v4757_v42, %v4518_v52 }
 0x3dc   :  { %v4271_v46 = vadd.f32 %v4270_v3, %v13354_v6  ;;  %v4523_v3 = vmul.f32 %v13360_v40, %v13360_v40 }
 0x3dd   :  { %v2903_v19 = vpop.f32.mrf.mxu3  ;;  %v4759_v0 = vadd.f32 %v4758_v1, %v4519_v7 }
 0x3de   :  { %v2050_v32 = vpop.f32.mrf.mxu0  ;;  %v4272_v47 = vadd.f32 %v4271_v46, %v13356_v56  ;;  %v9394_v35 = vadd.f32 %v2903_v19, %v2290_v59  ;;  %v13362_v19 = vld [vmem:[#allocation106_spill] sm:$0xff] }
 0x3df   :  { %v9384_v29 = vadd.f32 %v9275_v22, %v2050_v32  ;;  %v4760_v63 = vadd.f32 %v4759_v0, %v4520_v54  ;;  %v13359_v22 = vld [vmem:[#allocation102_spill] sm:$0xff]  ;;  %v4524_v54 = vmul.f32 %v13362_v19, %v13362_v19 }
 0x3e0   :  { %13358 = vst [vmem:[#allocation177_spill] sm:$0xff] %v9394_v35  ;;  %v4522_v32 = vmul.f32 %v13359_v22, %v13359_v22  ;;  %v4273_v52 = vadd.f32 %v4272_v47, %v13357_v23  ;;  %v6814_v47 = vld [vmem:[%s12841_s0 + $0x6d0] sm:$0xf] }
 0x3e1   :  { %13355 = vst [vmem:[#allocation176_spill] sm:$0xff] %v9384_v29  ;;  %v4761_v42 = vadd.f32 %v4760_v63, %v4521_v2  ;;  %v7277_v2 = vld [vmem:[%s12841_s0 + $0x6d4] sm:$0xf0] }
 0x3e2   :  { %v9391_v57 = vpop.f32.mrf.mxu1  ;;  %v2292_v1 = vpop.f32.mrf.mxu2  ;;  %v4274_v6 = vadd.f32 %v4273_v52, %v13359_v22  ;;  %v6816_v52 = vld [vmem:[%s12841_s0 + $0x6d8] sm:$0xf0] }
 0x3e3   :  { %v4762_v59 = vadd.f32 %v4761_v42, %v4522_v32  ;;  %v6815_v32 = vor.u32 %v7277_v2, %v6814_v47  ;;  %v13366_v2 = vld [vmem:[#allocation112_spill] sm:$0xff] }
 0x3e4   :  { %v4275_v63 = vadd.f32 %v4274_v6, %v13360_v40  ;;  %v13377_v40 = vld [vmem:[#allocation126_spill] sm:$0xff] }
 0x3e5   :  { %v2905_v46 = vpop.f32.mrf.mxu3  ;;  %v4763_v42 = vadd.f32 %v4762_v59, %v4523_v3  ;;  %v4527_v3 = vmul.f32 %v13366_v2, %v13366_v2  ;;  %v4534_v60 = vmul.f32 %v13377_v40, %v13377_v40 }
 0x3e6   :  { %v2052_v7 = vpop.f32.mrf.mxu0  ;;  %v9407_v0 = vadd.f32 %v2905_v46, %v2292_v1  ;;  %v4276_v23 = vadd.f32 %v4275_v63, %v13362_v19 }
 0x3e7   :  { %v9403_v62 = vadd.f32 %v9309_v15, %v2052_v7  ;;  %v7276_v15 = vld [vmem:[%s12841_s0 + $0x6d4] sm:$0xf]  ;;  %v4764_v56 = vadd.f32 %v4763_v42, %v4524_v54 }
 0x3e8   :  { %13363 = vst [vmem:[#allocation179_spill] sm:$0xff] %v9407_v0  ;;  %v13364_v7 = vld [vmem:[#allocation108_spill] sm:$0xff]  ;;  %v6819_v22 = vor.u32 %v7276_v15, %v6816_v52  ;;  %2334 = vmatmul.bf16.gmra.mxu2 %v6815_v32  ;;  %v13368_v32 = vld [vmem:[#allocation114_spill] sm:$0xff] }
 0x3e9   :  { %13361 = vst [vmem:[#allocation178_spill] sm:$0xff] %v9403_v62  ;;  %v4525_v1 = vmul.f32 %v13364_v7, %v13364_v7  ;;  %v4277_v6 = vadd.f32 %v4276_v23, %v13364_v7  ;;  %v4528_v52 = vmul.f32 %v13368_v32, %v13368_v32  ;;  %v13369_v23 = vld [vmem:[#allocation116_spill] sm:$0xff] }
 0x3ea   :  { %v9424_v46 = vpop.f32.mrf.mxu1  ;;  %7045 = vmatmul.msk.bf16.gmra.mxu3 %vm1417_vm0, %v6819_v22  ;;  %v2295_v39 = vpop.f32.mrf.mxu2 }
 0x3eb   :  { %v4765_v47 = vadd.f32 %v4764_v56, %v4525_v1  ;;  %v4278_v34 = vadd.f32 %v4277_v6, %v13365_v43  ;;  %v4529_v56 = vmul.f32 %v13369_v23, %v13369_v23  ;;  %v13372_v43 = vld [vmem:[#allocation120_spill] sm:$0xff] }
 0x3ed   :  { %v2908_v63 = vpop.f32.mrf.mxu3  ;;  %v4766_v54 = vadd.f32 %v4765_v47, %v4526_v14  ;;  %v4279_v22 = vadd.f32 %v4278_v34, %v13366_v2  ;;  %v4531_v34 = vmul.f32 %v13372_v43, %v13372_v43 }
 0x3ee   :  { %v2055_v59 = vpop.f32.mrf.mxu0  ;;  %v9445_v7 = vadd.f32 %v2908_v63, %v2295_v39  ;;  %v13374_v63 = vld [vmem:[#allocation122_spill] sm:$0xff] }
 0x3ef   :  { %v9435_v15 = vadd.f32 %v9339_v30, %v2055_v59  ;;  %v4767_v42 = vadd.f32 %v4766_v54, %v4527_v3  ;;  %v4280_v17 = vadd.f32 %v4279_v22, %v13368_v32  ;;  %v13371_v30 = vld [vmem:[#allocation118_spill] sm:$0xff] }
 0x3f0   :  { %13370 = vst [vmem:[#allocation181_spill] sm:$0xff] %v9445_v7  ;;  %v4530_v59 = vmul.f32 %v13371_v30, %v13371_v30 }
 0x3f1   :  { %13367 = vst [vmem:[#allocation180_spill] sm:$0xff] %v9435_v15  ;;  %v4768_v6 = vadd.f32 %v4767_v42, %v4528_v52  ;;  %v4281_v14 = vadd.f32 %v4280_v17, %v13369_v23  ;;  %v4532_v52 = vmul.f32 %v13374_v63, %v13374_v63  ;;  %v6822_v17 = vld [vmem:[%s12841_s0 + $0x6e0] sm:$0xf] }
 0x3f2   :  { %v9442_v1 = vpop.f32.mrf.mxu1  ;;  %v2297_v54 = vpop.f32.mrf.mxu2 }
 0x3f3   :  { %v4769_v47 = vadd.f32 %v4768_v6, %v4529_v56  ;;  %v4282_v2 = vadd.f32 %v4281_v14, %v13371_v30  ;;  %v7279_v56 = vld [vmem:[%s12841_s0 + $0x6e4] sm:$0xf0]  ;;  %v6824_v14 = vld [vmem:[%s12841_s0 + $0x6e8] sm:$0xf0] }
 0x3f5   :  { %v2910_v22 = vpop.f32.mrf.mxu3  ;;  %v4770_v39 = vadd.f32 %v4769_v47, %v4530_v59  ;;  %v4283_v6 = vadd.f32 %v4282_v2, %v13372_v43  ;;  %v6823_v59 = vor.u32 %v7279_v56, %v6822_v17  ;;  %v13378_v56 = vld [vmem:[#allocation128_spill] sm:$0xff] }
 0x3f6   :  { %v2057_v3 = vpop.f32.mrf.mxu0  ;;  %v9458_v42 = vadd.f32 %v2910_v22, %v2297_v54 }
 0x3f7   :  { %v9454_v19 = vadd.f32 %v9373_v58, %v2057_v3  ;;  %v7278_v58 = vld [vmem:[%s12841_s0 + $0x6e4] sm:$0xf]  ;;  %v4771_v47 = vadd.f32 %v4770_v39, %v4531_v34  ;;  %v13376_v3 = vld [vmem:[#allocation124_spill] sm:$0xff]  ;;  %v4284_v23 = vadd.f32 %v4283_v6, %v13374_v63  ;;  %v4535_v34 = vmul.f32 %v13378_v56, %v13378_v56 }
 0x3f8   :  { %13375 = vst [vmem:[#allocation183_spill] sm:$0xff] %v9458_v42  ;;  %v4533_v54 = vmul.f32 %v13376_v3, %v13376_v3  ;;  %v6827_v30 = vor.u32 %v7278_v58, %v6824_v14  ;;  %2339 = vmatmul.bf16.gmra.mxu2 %v6823_v59  ;;  %v13380_v59 = vld [vmem:[#allocation130_spill] sm:$0xff] }
 0x3f9   :  { %13373 = vst [vmem:[#allocation182_spill] sm:$0xff] %v9454_v19  ;;  %v4772_v32 = vadd.f32 %v4771_v47, %v4532_v52  ;;  %v4285_v2 = vadd.f32 %v4284_v23, %v13376_v3  ;;  %v4536_v14 = vmul.f32 %v13380_v59, %v13380_v59  ;;  %v13381_v23 = vld [vmem:[#allocation132_spill] sm:$0xff]  ;;  %v13392_v42 = vld [vmem:[#allocation150_spill] sm:$0xff] }
 0x3fa   :  { %v9475_v22 = vpop.f32.mrf.mxu1  ;;  %7046 = vmatmul.msk.bf16.gmra.mxu3 %vm1417_vm0, %v6827_v30  ;;  %v2300_v43 = vpop.f32.mrf.mxu2 }
 0x3fb   :  { %v4773_v17 = vadd.f32 %v4772_v32, %v4533_v54  ;;  %v4286_v37 = vadd.f32 %v4285_v2, %v13377_v40  ;;  %v4537_v32 = vmul.f32 %v13381_v23, %v13381_v23  ;;  %v13384_v40 = vld [vmem:[#allocation136_spill] sm:$0xff] }
 0x3fd   :  { %v2913_v6 = vpop.f32.mrf.mxu3  ;;  %v4774_v52 = vadd.f32 %v4773_v17, %v4534_v60  ;;  %v4287_v30 = vadd.f32 %v4286_v37, %v13378_v56  ;;  %v4539_v37 = vmul.f32 %v13384_v40, %v13384_v40 }
 0x3fe   :  { %v2060_v39 = vpop.f32.mrf.mxu0  ;;  %v9496_v63 = vadd.f32 %v2913_v6, %v2300_v43 }
 0x3ff   :  { %v9486_v58 = vadd.f32 %v9391_v57, %v2060_v39  ;;  %v4775_v47 = vadd.f32 %v4774_v52, %v4535_v34  ;;  %v4288_v3 = vadd.f32 %v4287_v30, %v13380_v59  ;;  %v13383_v57 = vld [vmem:[#allocation134_spill] sm:$0xff] }
 0x400   :  { %13382 = vst [vmem:[#allocation185_spill] sm:$0xff] %v9496_v63  ;;  %v4538_v39 = vmul.f32 %v13383_v57, %v13383_v57  ;;  %v13385_v30 = vld [vmem:[#allocation138_spill] sm:$0xff] }
 0x401   :  { %13379 = vst [vmem:[#allocation184_spill] sm:$0xff] %v9486_v58  ;;  %v4776_v2 = vadd.f32 %v4775_v47, %v4536_v14  ;;  %v4289_v60 = vadd.f32 %v4288_v3, %v13381_v23  ;;  %v4540_v43 = vmul.f32 %v13385_v30, %v13385_v30  ;;  %v6830_v3 = vld [vmem:[%s12841_s0 + $0x6f0] sm:$0xf]  ;;  %v7281_v14 = vld [vmem:[%s12841_s0 + $0x6f4] sm:$0xf0] }
 0x402   :  { %v9493_v54 = vpop.f32.mrf.mxu1  ;;  %v2302_v52 = vpop.f32.mrf.mxu2  ;;  %v7280_v47 = vld [vmem:[%s12841_s0 + $0x6f4] sm:$0xf] }
 0x403   :  { %v4777_v17 = vadd.f32 %v4776_v2, %v4537_v32  ;;  %v4290_v56 = vadd.f32 %v4289_v60, %v13383_v57  ;;  %v6831_v2 = vor.u32 %v7281_v14, %v6830_v3  ;;  %v13387_v60 = vld [vmem:[#allocation140_spill] sm:$0xff] }
 0x404   :  { %v13389_v14 = vld [vmem:[#allocation144_spill] sm:$0xff] }
 0x405   :  { %v2915_v33 = vpop.f32.mrf.mxu3  ;;  %v4778_v25 = vadd.f32 %v4777_v17, %v4538_v39  ;;  %v4291_v32 = vadd.f32 %v4290_v56, %v13384_v40  ;;  %v4541_v17 = vmul.f32 %v13387_v60, %v13387_v60 }
 0x406   :  { %v9503_v34 = vpop.f32.mrf.mxu0  ;;  %v9508_v6 = vadd.f32 %v2915_v33, %v2302_v52  ;;  %v6832_v33 = vld [vmem:[%s12841_s0 + $0x6f8] sm:$0xf0] }
 0x407   :  { %v4779_v39 = vadd.f32 %v4778_v25, %v4539_v37  ;;  %v6835_v57 = vor.u32 %v7280_v47, %v6832_v33  ;;  %v4292_v23 = vadd.f32 %v4291_v32, %v13385_v30  ;;  %v4543_v25 = vmul.f32 %v13389_v14, %v13389_v14 }
 0x408   :  { %13386 = vst [vmem:[#allocation186_spill] sm:$0xff] %v9508_v6  ;;  %2344 = vmatmul.bf16.gmra.mxu2 %v6831_v2  ;;  %v4542_v6 = vmul.f32 %v13388_v21, %v13388_v21  ;;  %v13390_v2 = vld [vmem:[#allocation146_spill] sm:$0xff] }
 0x409   :  { %v4780_v59 = vadd.f32 %v4779_v39, %v4540_v43  ;;  %v4293_v56 = vadd.f32 %v4292_v23, %v13387_v60  ;;  %v4544_v43 = vmul.f32 %v13390_v2, %v13390_v2 }
 0x40a   :  { %v9525_v52 = vpop.f32.mrf.mxu1  ;;  %7047 = vmatmul.msk.bf16.gmra.mxu3 %vm1417_vm0, %v6835_v57  ;;  %v13391_v57 = vld [vmem:[#allocation148_spill] sm:$0xff] }
 0x40b   :  { %v4781_v3 = vadd.f32 %v4780_v59, %v4541_v17  ;;  %v2305_v40 = vpop.f32.mrf.mxu2  ;;  %v4294_v47 = vadd.f32 %v4293_v56, %v13388_v21  ;;  %v4545_v23 = vmul.f32 %v13391_v57, %v13391_v57  ;;  %v4546_v56 = vmul.f32 %v13392_v42, %v13392_v42  ;;  %v13393_v21 = vld [vmem:[#allocation152_spill] sm:$0xff] }
 0x40d   :  { %v2918_v33 = vpop.f32.mrf.mxu3  ;;  %v4782_v32 = vadd.f32 %v4781_v3, %v4542_v6  ;;  %v4295_v39 = vadd.f32 %v4294_v47, %v13389_v14  ;;  %v4547_v47 = vmul.f32 %v13393_v21, %v13393_v21 }
 0x40e   :  { %v9534_v37 = vpop.f32.mrf.mxu0  ;;  %v9545_v60 = vadd.f32 %v2918_v33, %v2305_v40  ;;  %v6838_v33 = vld [vmem:[%s12841_s0 + $0x700] sm:$0xf] }
 0x40f   :  { %v4783_v30 = vadd.f32 %v4782_v32, %v4543_v25  ;;  %v4296_v17 = vadd.f32 %v4295_v39, %v13390_v2  ;;  %v13394_v39 = vld [vmem:[#allocation154_spill] sm:$0xff] }
 0x410   :  { %v4548_v40 = vmul.f32 %v13394_v39, %v13394_v39 }
 0x411   :  { %v4784_v63 = vadd.f32 %v4783_v30, %v4544_v43  ;;  %v4297_v6 = vadd.f32 %v4296_v17, %v13391_v57  ;;  %v7282_v43 = vld [vmem:[%s12841_s0 + $0x704] sm:$0xf] }
 0x412   :  { %v9542_v59 = vpop.f32.mrf.mxu1 }
 0x413   :  { %v4785_v3 = vadd.f32 %v4784_v63, %v4545_v23  ;;  %v2307_v32 = vpop.f32.mrf.mxu2  ;;  %v4298_v14 = vadd.f32 %v4297_v6, %v13392_v42  ;;  %v7283_v63 = vld [vmem:[%s12841_s0 + $0x704] sm:$0xf0]  ;;  %v13396_v6 = vld [vmem:[#allocation156_spill] sm:$0xff] }
 0x414   :  { %v6839_v17 = vor.u32 %v7283_v63, %v6838_v33 }
 0x415   :  { %v2920_v7 = vpop.f32.mrf.mxu3  ;;  %v4786_v0 = vadd.f32 %v4785_v3, %v4546_v56  ;;  %v4299_v23 = vadd.f32 %v4298_v14, %v13393_v21  ;;  %v4549_v3 = vmul.f32 %v13396_v6, %v13396_v6 }
 0x416   :  { %v9552_v25 = vpop.f32.mrf.mxu0  ;;  %v9557_v30 = vadd.f32 %v2920_v7, %v2307_v32  ;;  %v6840_v7 = vld [vmem:[%s12841_s0 + $0x708] sm:$0xf0] }
 0x417   :  { %v4787_v56 = vadd.f32 %v4786_v0, %v4547_v47  ;;  %v6843_v42 = vor.u32 %v7282_v43, %v6840_v7  ;;  %v4300_v57 = vadd.f32 %v4299_v23, %v13394_v39  ;;  %v4551_v0 = vmul.f32 %v8968_v8, %v8968_v8 }
 0x418   :  { %13395 = vst [vmem:[#allocation152_spill] sm:$0xff] %v9557_v30  ;;  %2349 = vmatmul.bf16.gmra.mxu2 %v6839_v17  ;;  %v4550_v30 = vmul.f32 %v8948_v27, %v8948_v27 }
 0x419   :  { %v4788_v2 = vadd.f32 %v4787_v56, %v4548_v40  ;;  %v4301_v14 = vadd.f32 %v4300_v57, %v13396_v6  ;;  %v4552_v40 = vmul.f32 %v9012_v41, %v9012_v41 }
 0x41a   :  { %v9574_v32 = vpop.f32.mrf.mxu1  ;;  %7048 = vmatmul.msk.bf16.gmra.mxu3 %vm1417_vm0, %v6843_v42  ;;  %v4553_v42 = vmul.f32 %v9032_v4, %v9032_v4 }
 0x41b   :  { %v4789_v33 = vadd.f32 %v4788_v2, %v4549_v3  ;;  %v2310_v63 = vpop.f32.mrf.mxu2  ;;  %v4302_v43 = vadd.f32 %v4301_v14, %v8948_v27  ;;  %v4554_v14 = vmul.f32 %v9076_v9, %v9076_v9 }
 0x41d   :  { %v2923_v7 = vpop.f32.mrf.mxu3  ;;  %v4790_v23 = vadd.f32 %v4789_v33, %v4550_v30  ;;  %v4303_v17 = vadd.f32 %v4302_v43, %v8968_v8  ;;  %v4555_v43 = vmul.f32 %v9096_v13, %v9096_v13 }
 0x41e   :  { %v9583_v47 = vpop.f32.mrf.mxu0  ;;  %v9594_v3 = vadd.f32 %v2923_v7, %v2310_v63  ;;  %v4556_v63 = vmul.f32 %v9140_v31, %v9140_v31 }
 0x41f   :  { %v4791_v56 = vadd.f32 %v4790_v23, %v4551_v0  ;;  %v4304_v57 = vadd.f32 %v4303_v17, %v9012_v41  ;;  %v7284_v17 = vld [vmem:[%s12841_s0 + $0x714] sm:$0xf] }
 0x421   :  { %v4792_v6 = vadd.f32 %v4791_v56, %v4552_v40  ;;  %v4305_v30 = vadd.f32 %v4304_v57, %v9032_v4  ;;  %v6846_v40 = vld [vmem:[%s12841_s0 + $0x710] sm:$0xf]  ;;  %v4558_v4 = vmul.f32 %v9204_v45, %v9204_v45 }
 0x422   :  { %v9591_v2 = vpop.f32.mrf.mxu1 }
 0x423   :  { %v4793_v33 = vadd.f32 %v4792_v6, %v4553_v42  ;;  %v2312_v23 = vpop.f32.mrf.mxu2  ;;  %v4306_v8 = vadd.f32 %v4305_v30, %v9076_v9  ;;  %v7285_v6 = vld [vmem:[%s12841_s0 + $0x714] sm:$0xf0] }
 0x424   :  { %v6847_v42 = vor.u32 %v7285_v6, %v6846_v40 }
 0x425   :  { %v2925_v27 = vpop.f32.mrf.mxu3  ;;  %v4794_v39 = vadd.f32 %v4793_v33, %v4554_v14  ;;  %v4307_v56 = vadd.f32 %v4306_v8, %v9096_v13  ;;  %v4557_v14 = vmul.f32 %v9160_v36, %v9160_v36 }
 0x426   :  { %v9601_v0 = vpop.f32.mrf.mxu0  ;;  %v9606_v7 = vadd.f32 %v2925_v27, %v2312_v23  ;;  %v6848_v27 = vld [vmem:[%s12841_s0 + $0x718] sm:$0xf0] }
 0x427   :  { %v4795_v57 = vadd.f32 %v4794_v39, %v4555_v43  ;;  %v6851_v33 = vor.u32 %v7284_v17, %v6848_v27  ;;  %v4308_v23 = vadd.f32 %v4307_v56, %v9140_v31  ;;  %v4559_v39 = vmul.f32 %v9224_v50, %v9224_v50 }
 0x428   :  { %2354 = vmatmul.bf16.gmra.mxu2 %v6847_v42 }
 0x429   :  { %v4796_v9 = vadd.f32 %v4795_v57, %v4556_v63  ;;  %v4309_v8 = vadd.f32 %v4308_v23, %v9160_v36  ;;  %v4560_v63 = vmul.f32 %v9268_v55, %v9268_v55 }
 0x42a   :  { %v9623_v30 = vpop.f32.mrf.mxu1  ;;  %7049 = vmatmul.msk.bf16.gmra.mxu3 %vm1417_vm0, %v6851_v33  ;;  %v4561_v33 = vmul.f32 %v9288_v53, %v9288_v53 }
 0x42b   :  { %v4797_v40 = vadd.f32 %v4796_v9, %v4557_v14  ;;  %v2315_v6 = vpop.f32.mrf.mxu2  ;;  %v4310_v17 = vadd.f32 %v4309_v8, %v9204_v45  ;;  %v4562_v8 = vmul.f32 %v9332_v26, %v9332_v26 }
 0x42d   :  { %v2928_v27 = vpop.f32.mrf.mxu3  ;;  %v4798_v56 = vadd.f32 %v4797_v40, %v4558_v4  ;;  %v4311_v42 = vadd.f32 %v4310_v17, %v9224_v50  ;;  %v4563_v17 = vmul.f32 %v9352_v44, %v9352_v44 }
 0x42e   :  { %v9632_v43 = vpop.f32.mrf.mxu0  ;;  %v9643_v23 = vadd.f32 %v2928_v27, %v2315_v6  ;;  %v4564_v6 = vmul.f32 %v9384_v29, %v9384_v29 }
 0x42f   :  { %v4799_v57 = vadd.f32 %v4798_v56, %v4559_v39  ;;  %v4312_v14 = vadd.f32 %v4311_v42, %v9268_v55  ;;  %v7286_v42 = vld [vmem:[%s12841_s0 + $0x724] sm:$0xf] }
 0x430   :  { %13397 = vst [vmem:[#allocation187_spill] sm:$0xff] %v9643_v23 }
 0x431   :  { %v4800_v36 = vadd.f32 %v4799_v57, %v4560_v63  ;;  %v4313_v4 = vadd.f32 %v4312_v14, %v9288_v53  ;;  %v6854_v63 = vld [vmem:[%s12841_s0 + $0x720] sm:$0xf]  ;;  %v4566_v53 = vmul.f32 %v9435_v15, %v9435_v15 }
 0x432   :  { %v9640_v9 = vpop.f32.mrf.mxu1 }
 0x433   :  { %v4801_v40 = vadd.f32 %v4800_v36, %v4561_v33  ;;  %v2317_v56 = vpop.f32.mrf.mxu2  ;;  %v4314_v50 = vadd.f32 %v4313_v4, %v9332_v26  ;;  %v7287_v36 = vld [vmem:[%s12841_s0 + $0x724] sm:$0xf0] }
 0x434   :  { %v6855_v33 = vor.u32 %v7287_v36, %v6854_v63 }
 0x435   :  { %v2930_v45 = vpop.f32.mrf.mxu3  ;;  %v4802_v31 = vadd.f32 %v4801_v40, %v4562_v8  ;;  %v4315_v57 = vadd.f32 %v4314_v50, %v9352_v44  ;;  %v4565_v8 = vmul.f32 %v9403_v62, %v9403_v62  ;;  %v13480_v44 = vld [vmem:[#allocation157_spill] sm:$0xff] }
 0x436   :  { %v9650_v39 = vpop.f32.mrf.mxu0  ;;  %v9655_v27 = vadd.f32 %v2930_v45, %v2317_v56  ;;  %v6856_v45 = vld [vmem:[%s12841_s0 + $0x728] sm:$0xf0] }
 0x437   :  { %v4803_v14 = vadd.f32 %v4802_v31, %v4563_v17  ;;  %v6859_v40 = vor.u32 %v7286_v42, %v6856_v45  ;;  %v4316_v56 = vadd.f32 %v4315_v57, %v9384_v29  ;;  %v4567_v31 = vmul.f32 %v9454_v19, %v9454_v19 }
 0x438   :  { %2359 = vmatmul.bf16.gmra.mxu2 %v6855_v33  ;;  %v9683_v17 = vadd.f32 %v9424_v46, %v9503_v34  ;;  %v4568_v45 = vmul.f32 %v9486_v58, %v9486_v58 }
 0x439   :  { %v4804_v26 = vadd.f32 %v4803_v14, %v4564_v6  ;;  %v4317_v50 = vadd.f32 %v4316_v56, %v9403_v62  ;;  %v9690_v14 = vadd.f32 %v9442_v1, %v9534_v37  ;;  %v9698_v56 = vadd.f32 %v9475_v22, %v9552_v25  ;;  %v13471_v62 = vld [vmem:[#allocation141_spill] sm:$0xff] }
 0x43a   :  { %v9672_v4 = vpop.f32.mrf.mxu1  ;;  %7050 = vmatmul.msk.bf16.gmra.mxu3 %vm1417_vm0, %v6859_v40  ;;  %13398 = vst [vmem:[#allocation188_spill] sm:$0xff] %v9683_v17  ;;  %v4569_v46 = vmul.f32 %v9683_v17, %v9683_v17  ;;  %v9705_v37 = vadd.f32 %v9493_v54, %v9583_v47  ;;  %v9712_v22 = vadd.f32 %v9525_v52, %v9601_v0  ;;  %v6862_v54 = vld [vmem:[%s12841_s0 + $0x730] sm:$0xf]  ;;  %v7289_v47 = vld [vmem:[%s12841_s0 + $0x734] sm:$0xf0] }
 0x43b   :  { %v4805_v63 = vadd.f32 %v4804_v26, %v4565_v8  ;;  %v2320_v42 = vpop.f32.mrf.mxu2  ;;  %v4318_v57 = vadd.f32 %v4317_v50, %v9435_v15  ;;  %13399 = vst [vmem:[#allocation189_spill] sm:$0xff] %v9690_v14  ;;  %v4570_v50 = vmul.f32 %v9690_v14, %v9690_v14 }
 0x43c   :  { %13400 = vst [vmem:[#allocation190_spill] sm:$0xff] %v9698_v56  ;;  %v4572_v0 = vmul.f32 %v9705_v37, %v9705_v37 }
 0x43d   :  { %v2933_v6 = vpop.f32.mrf.mxu3  ;;  %v4806_v33 = vadd.f32 %v4805_v63, %v4566_v53  ;;  %v4319_v26 = vadd.f32 %v4318_v57, %v9454_v19  ;;  %13401 = vst [vmem:[#allocation191_spill] sm:$0xff] %v9705_v37  ;;  %v13463_v19 = vld [vmem:[#allocation125_spill] sm:$0xff] }
 0x43e   :  { %v2080_v36 = vpop.f32.mrf.mxu0  ;;  %13402 = vst [vmem:[#allocation192_spill] sm:$0xff] %v9712_v22  ;;  %v9714_v25 = vadd.f32 %v2933_v6, %v2320_v42  ;;  %v9732_v42 = vadd.f32 %v9542_v59, %v9632_v43  ;;  %v6863_v6 = vor.u32 %v7289_v47, %v6862_v54 }
 0x43f   :  { %v4807_v8 = vadd.f32 %v4806_v33, %v4567_v31  ;;  %v4320_v40 = vadd.f32 %v4319_v26, %v9486_v58  ;;  %v4571_v26 = vmul.f32 %v9698_v56, %v9698_v56 }
 0x440   :  { %13403 = vst [vmem:[#allocation193_spill] sm:$0xff] %v9714_v25  ;;  %v4574_v54 = vmul.f32 %v9732_v42, %v9732_v42 }
 0x441   :  { %v4808_v53 = vadd.f32 %v4807_v8, %v4568_v45  ;;  %v4321_v1 = vadd.f32 %v4320_v40, %v9683_v17  ;;  %13404 = vst [vmem:[#allocation194_spill] sm:$0xff] %v9732_v42 }
 0x442   :  { %v2703_v34 = vpop.f32.mrf.mxu1 }
 0x443   :  { %v4809_v63 = vadd.f32 %v4808_v53, %v4569_v46  ;;  %v2322_v57 = vpop.f32.mrf.mxu2  ;;  %v4322_v33 = vadd.f32 %v4321_v1, %v9690_v14  ;;  %v7288_v46 = vld [vmem:[%s12841_s0 + $0x734] sm:$0xf]  ;;  %v6864_v53 = vld [vmem:[%s12841_s0 + $0x738] sm:$0xf0]  ;;  %v13446_v14 = vld [vmem:[#allocation91_spill] sm:$0xff] }
 0x444   :  { %v6867_v1 = vor.u32 %v7288_v46, %v6864_v53  ;;  %v4612_v17 = vmul.f32 %v13446_v14, %v13446_v14 }
 0x445   :  { %v2935_v45 = vpop.f32.mrf.mxu3  ;;  %v4810_v8 = vadd.f32 %v4809_v63, %v4570_v50  ;;  %v4323_v52 = vadd.f32 %v4322_v33, %v9698_v56  ;;  %v4573_v33 = vmul.f32 %v9712_v22, %v9712_v22 }
 0x446   :  { %v2082_v31 = vpop.f32.mrf.mxu0  ;;  %v9716_v40 = vadd.f32 %v2935_v45, %v2322_v57  ;;  %v9742_v45 = vadd.f32 %v9574_v32, %v9650_v39 }
 0x447   :  { %v4811_v63 = vadd.f32 %v4810_v8, %v4571_v26  ;;  %v4324_v57 = vadd.f32 %v4323_v52, %v9705_v37  ;;  %v9749_v26 = vadd.f32 %v9591_v2, %v2080_v36  ;;  %v9755_v39 = vadd.f32 %v9623_v30, %v2082_v31 }
 0x448   :  { %13405 = vst [vmem:[#allocation195_spill] sm:$0xff] %v9742_v45  ;;  %2364 = vmatmul.bf16.gmra.mxu2 %v6863_v6  ;;  %v4575_v32 = vmul.f32 %v9742_v45, %v9742_v45 }
 0x449   :  { %v4812_v59 = vadd.f32 %v4811_v63, %v4572_v0  ;;  %v4325_v43 = vadd.f32 %v4324_v57, %v9712_v22  ;;  %13406 = vst [vmem:[#allocation196_spill] sm:$0xff] %v9749_v26  ;;  %v13441_v22 = vld [vmem:[#allocation81_spill] sm:$0xff] }
 0x44a   :  { %v2705_v50 = vpop.f32.mrf.mxu1  ;;  %7051 = vmatmul.msk.bf16.gmra.mxu3 %vm1417_vm0, %v6867_v1  ;;  %13407 = vst [vmem:[#allocation197_spill] sm:$0xff] %v9755_v39  ;;  %v4576_v1 = vmul.f32 %v9749_v26, %v9749_v26 }
 0x44b   :  { %v2325_v47 = vpop.f32.mrf.mxu2  ;;  %v4813_v46 = vadd.f32 %v4812_v59, %v4573_v33  ;;  %v4326_v52 = vadd.f32 %v4325_v43, %v9732_v42  ;;  %v4577_v33 = vmul.f32 %v9755_v39, %v9755_v39  ;;  %v13409_v43 = vld [vmem:[#allocation26_spill] sm:$0xff] }
 0x44d   :  { %v2938_v0 = vpop.f32.mrf.mxu3  ;;  %v4814_v6 = vadd.f32 %v4813_v46, %v4574_v54  ;;  %v4327_v53 = vadd.f32 %v4326_v52, %v9742_v45  ;;  %v9770_v54 = vadd.f32 %v2703_v34, %v13409_v43  ;;  %v6870_v34 = vld [vmem:[%s12841_s0 + $0x740] sm:$0xf]  ;;  %v13433_v45 = vld [vmem:[#allocation65_spill] sm:$0xff] }
 0x44e   :  { %v2085_v8 = vpop.f32.mrf.mxu0 }
 0x44f   :  { %v9761_v2 = vadd.f32 %v9640_v9, %v2085_v8  ;;  %v4815_v63 = vadd.f32 %v4814_v6, %v4575_v32  ;;  %v4328_v57 = vadd.f32 %v4327_v53, %v9749_v26  ;;  %13410 = vst [vmem:[#allocation26_spill] sm:$0xff] %v9770_v54  ;;  %v9776_v6 = vadd.f32 %v2938_v0, %v2325_v47 }
 0x451   :  { %13408 = vst [vmem:[#allocation198_spill] sm:$0xff] %v9761_v2  ;;  %v4816_v59 = vadd.f32 %v4815_v63, %v4576_v1  ;;  %v4329_v30 = vadd.f32 %v4328_v57, %v9755_v39  ;;  %v4578_v31 = vmul.f32 %v9761_v2, %v9761_v2  ;;  %v13412_v1 = vld [vmem:[#allocation28_spill] sm:$0xff]  ;;  %v13425_v39 = vld [vmem:[#allocation49_spill] sm:$0xff] }
 0x452   :  { %v2708_v36 = vpop.f32.mrf.mxu1  ;;  %v9779_v63 = vadd.f32 %v2705_v50, %v13412_v1 }
 0x453   :  { %v2327_v52 = vpop.f32.mrf.mxu2  ;;  %v4817_v9 = vadd.f32 %v4816_v59, %v4577_v33  ;;  %v4330_v8 = vadd.f32 %v4329_v30, %v9761_v2  ;;  %v7291_v33 = vld [vmem:[%s12841_s0 + $0x744] sm:$0xf0]  ;;  %v6872_v30 = vld [vmem:[%s12841_s0 + $0x748] sm:$0xf0] }
 0x454   :  { %13413 = vst [vmem:[#allocation28_spill] sm:$0xff] %v9779_v63  ;;  %v6871_v59 = vor.u32 %v7291_v33, %v6870_v34  ;;  %v13416_v33 = vld [vmem:[#allocation32_spill] sm:$0xff] }
 0x455   :  { %v2940_v53 = vpop.f32.mrf.mxu3  ;;  %v4818_v47 = vadd.f32 %v4817_v9, %v4578_v31 }
 0x456   :  { %v2087_v46 = vpop.f32.mrf.mxu0  ;;  %v9781_v57 = vadd.f32 %v2940_v53, %v2327_v52  ;;  %v4580_v52 = vmul.f32 %v9770_v54, %v9770_v54  ;;  %v13414_v53 = vld [vmem:[#allocation30_spill] sm:$0xff] }
 0x457   :  { %v9774_v32 = vadd.f32 %v9672_v4, %v2087_v46  ;;  %v7290_v4 = vld [vmem:[%s12841_s0 + $0x744] sm:$0xf]  ;;  %v9801_v1 = vadd.f32 %v2708_v36, %v13414_v53 }
 0x458   :  { %v6875_v46 = vor.u32 %v7290_v4, %v6872_v30  ;;  %2369 = vmatmul.bf16.gmra.mxu2 %v6871_v59 }
 0x459   :  { %13411 = vst [vmem:[#allocation199_spill] sm:$0xff] %v9774_v32  ;;  %v4331_v0 = vadd.f32 %v4330_v8, %v9774_v32  ;;  %v4579_v50 = vmul.f32 %v9774_v32, %v9774_v32  ;;  %v4581_v8 = vmul.f32 %v9779_v63, %v9779_v63  ;;  %v4582_v36 = vmul.f32 %v9801_v1, %v9801_v1 }
 0x45a   :  { %v2710_v43 = vpop.f32.mrf.mxu1  ;;  %13415 = vst [vmem:[#allocation30_spill] sm:$0xff] %v9801_v1  ;;  %7052 = vmatmul.msk.bf16.gmra.mxu3 %vm1417_vm0, %v6875_v46 }
 0x45b   :  { %v4332_v31 = vadd.f32 %v4331_v0, %v9770_v54  ;;  %v4819_v9 = vadd.f32 %v4818_v47, %v4579_v50  ;;  %v9808_v32 = vadd.f32 %v2710_v43, %v13416_v33  ;;  %v2330_v30 = vpop.f32.mrf.mxu2  ;;  %v13419_v33 = vld [vmem:[#allocation37_spill] sm:$0xff] }
 0x45d   :  { %v4820_v34 = vadd.f32 %v4819_v9, %v4580_v52  ;;  %13417 = vst [vmem:[#allocation32_spill] sm:$0xff] %v9808_v32  ;;  %v4333_v4 = vadd.f32 %v4332_v31, %v9779_v63  ;;  %v2943_v47 = vpop.f32.mrf.mxu3  ;;  %v4583_v59 = vmul.f32 %v9808_v32, %v9808_v32  ;;  %v13418_v52 = vld [vmem:[#allocation35_spill] sm:$0xff]  ;;  %v4585_v63 = vmul.f32 %v13419_v33, %v13419_v33 }
 0x45e   :  { %v4584_v43 = vmul.f32 %v13418_v52, %v13418_v52 }
 0x45f   :  { %v4334_v53 = vadd.f32 %v4333_v4, %v9801_v1  ;;  %v4821_v0 = vadd.f32 %v4820_v34, %v4581_v8  ;;  %v13420_v34 = vld [vmem:[#allocation39_spill] sm:$0xff] }
 0x461   :  { %v4335_v50 = vadd.f32 %v4334_v53, %v9808_v32  ;;  %v4822_v46 = vadd.f32 %v4821_v0, %v4582_v36  ;;  %v4586_v53 = vmul.f32 %v13420_v34, %v13420_v34  ;;  %v9826_v36 = vadd.f32 %v2943_v47, %v2330_v30 }
 0x463   :  { %v4336_v9 = vadd.f32 %v4335_v50, %v13418_v52  ;;  %v4823_v31 = vadd.f32 %v4822_v46, %v4583_v59  ;;  %v2332_v8 = vpop.f32.mrf.mxu2  ;;  %v6878_v50 = vld [vmem:[%s12841_s0 + $0x750] sm:$0xf]  ;;  %v7293_v59 = vld [vmem:[%s12841_s0 + $0x754] sm:$0xf0]  ;;  %v7292_v46 = vld [vmem:[%s12841_s0 + $0x754] sm:$0xf] }
 0x464   :  { %v6879_v47 = vor.u32 %v7293_v59, %v6878_v50  ;;  %v13424_v50 = vld [vmem:[#allocation47_spill] sm:$0xff] }
 0x465   :  { %v4337_v54 = vadd.f32 %v4336_v9, %v13419_v33  ;;  %v4824_v4 = vadd.f32 %v4823_v31, %v4584_v43  ;;  %v2945_v0 = vpop.f32.mrf.mxu3  ;;  %v13421_v43 = vld [vmem:[#allocation41_spill] sm:$0xff]  ;;  %v4590_v59 = vmul.f32 %v13424_v50, %v13424_v50 }
 0x466   :  { %v9828_v2 = vadd.f32 %v2945_v0, %v2332_v8  ;;  %v6880_v9 = vld [vmem:[%s12841_s0 + $0x758] sm:$0xf0] }
 0x467   :  { %v4338_v1 = vadd.f32 %v4337_v54, %v13420_v34  ;;  %v4825_v32 = vadd.f32 %v4824_v4, %v4585_v63  ;;  %v4587_v54 = vmul.f32 %v13421_v43, %v13421_v43  ;;  %v6883_v31 = vor.u32 %v7292_v46, %v6880_v9  ;;  %v13422_v4 = vld [vmem:[#allocation43_spill] sm:$0xff]  ;;  %v13423_v33 = vld [vmem:[#allocation45_spill] sm:$0xff] }
 0x468   :  { %v4588_v8 = vmul.f32 %v13422_v4, %v13422_v4  ;;  %2374 = vmatmul.bf16.gmra.mxu2 %v6879_v47  ;;  %v4589_v52 = vmul.f32 %v13423_v33, %v13423_v33  ;;  %v13426_v47 = vld [vmem:[#allocation51_spill] sm:$0xff] }
 0x469   :  { %v4339_v63 = vadd.f32 %v4338_v1, %v13421_v43  ;;  %v4826_v30 = vadd.f32 %v4825_v32, %v4586_v53 }
 0x46a   :  { %7053 = vmatmul.msk.bf16.gmra.mxu3 %vm1417_vm0, %v6883_v31  ;;  %v4592_v31 = vmul.f32 %v13426_v47, %v13426_v47 }
 0x46b   :  { %v4340_v0 = vadd.f32 %v4339_v63, %v13422_v4  ;;  %v4827_v34 = vadd.f32 %v4826_v30, %v4587_v54  ;;  %v2335_v53 = vpop.f32.mrf.mxu2  ;;  %v4591_v54 = vmul.f32 %v13425_v39, %v13425_v39 }
 0x46d   :  { %v4341_v32 = vadd.f32 %v4340_v0, %v13423_v33  ;;  %v4828_v1 = vadd.f32 %v4827_v34, %v4588_v8  ;;  %v2948_v43 = vpop.f32.mrf.mxu3  ;;  %v13427_v8 = vld [vmem:[#allocation53_spill] sm:$0xff] }
 0x46e   :  { %v4593_v33 = vmul.f32 %v13427_v8, %v13427_v8 }
 0x46f   :  { %v4342_v46 = vadd.f32 %v4341_v32, %v13424_v50  ;;  %v4829_v9 = vadd.f32 %v4828_v1, %v4589_v52  ;;  %v13428_v1 = vld [vmem:[#allocation55_spill] sm:$0xff] }
 0x470   :  { %v4594_v50 = vmul.f32 %v13428_v1, %v13428_v1 }
 0x471   :  { %v4343_v63 = vadd.f32 %v4342_v46, %v13425_v39  ;;  %v4830_v30 = vadd.f32 %v4829_v9, %v4590_v59  ;;  %v9867_v59 = vadd.f32 %v2948_v43, %v2335_v53 }
 0x473   :  { %v4344_v0 = vadd.f32 %v4343_v63, %v13426_v47  ;;  %v4831_v34 = vadd.f32 %v4830_v30, %v4591_v54  ;;  %v2337_v52 = vpop.f32.mrf.mxu2  ;;  %v6886_v54 = vld [vmem:[%s12841_s0 + $0x760] sm:$0xf]  ;;  %v7295_v63 = vld [vmem:[%s12841_s0 + $0x764] sm:$0xf0]  ;;  %v7294_v30 = vld [vmem:[%s12841_s0 + $0x764] sm:$0xf] }
 0x474   :  { %v6887_v53 = vor.u32 %v7295_v63, %v6886_v54  ;;  %v13432_v54 = vld [vmem:[#allocation63_spill] sm:$0xff] }
 0x475   :  { %v4345_v4 = vadd.f32 %v4344_v0, %v13427_v8  ;;  %v4832_v32 = vadd.f32 %v4831_v34, %v4592_v31  ;;  %v2950_v9 = vpop.f32.mrf.mxu3  ;;  %v13429_v31 = vld [vmem:[#allocation57_spill] sm:$0xff]  ;;  %v6888_v0 = vld [vmem:[%s12841_s0 + $0x768] sm:$0xf0]  ;;  %v4598_v63 = vmul.f32 %v13432_v54, %v13432_v54 }
 0x476   :  { %v9869_v39 = vadd.f32 %v2950_v9, %v2337_v52  ;;  %v6891_v34 = vor.u32 %v7294_v30, %v6888_v0  ;;  %v13431_v8 = vld [vmem:[#allocation61_spill] sm:$0xff] }
 0x477   :  { %v4346_v26 = vadd.f32 %v4345_v4, %v13428_v1  ;;  %v4833_v46 = vadd.f32 %v4832_v32, %v4593_v33  ;;  %v4595_v33 = vmul.f32 %v13429_v31, %v13429_v31  ;;  %v13430_v32 = vld [vmem:[#allocation59_spill] sm:$0xff]  ;;  %v4597_v47 = vmul.f32 %v13431_v8, %v13431_v8 }
 0x478   :  { %v4596_v52 = vmul.f32 %v13430_v32, %v13430_v32  ;;  %2379 = vmatmul.bf16.gmra.mxu2 %v6887_v53  ;;  %v13434_v53 = vld [vmem:[#allocation67_spill] sm:$0xff] }
 0x479   :  { %v4347_v43 = vadd.f32 %v4346_v26, %v13429_v31  ;;  %v4834_v4 = vadd.f32 %v4833_v46, %v4594_v50 }
 0x47a   :  { %7054 = vmatmul.msk.bf16.gmra.mxu3 %vm1417_vm0, %v6891_v34  ;;  %v4600_v34 = vmul.f32 %v13434_v53, %v13434_v53 }
 0x47b   :  { %v4348_v9 = vadd.f32 %v4347_v43, %v13430_v32  ;;  %v4835_v1 = vadd.f32 %v4834_v4, %v4595_v33  ;;  %v2340_v46 = vpop.f32.mrf.mxu2  ;;  %v4599_v33 = vmul.f32 %v13433_v45, %v13433_v45 }
 0x47d   :  { %v4349_v26 = vadd.f32 %v4348_v9, %v13431_v8  ;;  %v4836_v50 = vadd.f32 %v4835_v1, %v4596_v52  ;;  %v2953_v31 = vpop.f32.mrf.mxu3  ;;  %v13435_v52 = vld [vmem:[#allocation69_spill] sm:$0xff] }
 0x47e   :  { %v4601_v8 = vmul.f32 %v13435_v52, %v13435_v52 }
 0x47f   :  { %v4350_v30 = vadd.f32 %v4349_v26, %v13432_v54  ;;  %v4837_v0 = vadd.f32 %v4836_v50, %v4597_v47  ;;  %v13436_v50 = vld [vmem:[#allocation71_spill] sm:$0xff] }
 0x480   :  { %v4602_v54 = vmul.f32 %v13436_v50, %v13436_v50 }
 0x481   :  { %v4351_v43 = vadd.f32 %v4350_v30, %v13433_v45  ;;  %v4838_v4 = vadd.f32 %v4837_v0, %v4598_v63  ;;  %v9908_v63 = vadd.f32 %v2953_v31, %v2340_v46 }
 0x483   :  { %v4352_v9 = vadd.f32 %v4351_v43, %v13434_v53  ;;  %v4839_v1 = vadd.f32 %v4838_v4, %v4599_v33  ;;  %v2342_v47 = vpop.f32.mrf.mxu2  ;;  %v6894_v33 = vld [vmem:[%s12841_s0 + $0x770] sm:$0xf]  ;;  %v7297_v43 = vld [vmem:[%s12841_s0 + $0x774] sm:$0xf0]  ;;  %v7296_v4 = vld [vmem:[%s12841_s0 + $0x774] sm:$0xf] }
 0x484   :  { %v6895_v46 = vor.u32 %v7297_v43, %v6894_v33  ;;  %v13440_v33 = vld [vmem:[#allocation79_spill] sm:$0xff] }
 0x485   :  { %v4353_v32 = vadd.f32 %v4352_v9, %v13435_v52  ;;  %v4840_v26 = vadd.f32 %v4839_v1, %v4600_v34  ;;  %v2955_v0 = vpop.f32.mrf.mxu3  ;;  %v13437_v34 = vld [vmem:[#allocation73_spill] sm:$0xff]  ;;  %v4606_v43 = vmul.f32 %v13440_v33, %v13440_v33 }
 0x486   :  { %v9910_v45 = vadd.f32 %v2955_v0, %v2342_v47  ;;  %v6896_v9 = vld [vmem:[%s12841_s0 + $0x778] sm:$0xf0] }
 0x487   :  { %v4354_v42 = vadd.f32 %v4353_v32, %v13436_v50  ;;  %v4841_v30 = vadd.f32 %v4840_v26, %v4601_v8  ;;  %v4603_v8 = vmul.f32 %v13437_v34, %v13437_v34  ;;  %v6899_v1 = vor.u32 %v7296_v4, %v6896_v9  ;;  %v13438_v26 = vld [vmem:[#allocation75_spill] sm:$0xff]  ;;  %v13439_v52 = vld [vmem:[#allocation77_spill] sm:$0xff] }
 0x488   :  { %v4604_v47 = vmul.f32 %v13438_v26, %v13438_v26  ;;  %2384 = vmatmul.bf16.gmra.mxu2 %v6895_v46  ;;  %v4605_v53 = vmul.f32 %v13439_v52, %v13439_v52  ;;  %v13442_v46 = vld [vmem:[#allocation83_spill] sm:$0xff] }
 0x489   :  { %v4355_v31 = vadd.f32 %v4354_v42, %v13437_v34  ;;  %v4842_v32 = vadd.f32 %v4841_v30, %v4602_v54 }
 0x48a   :  { %7055 = vmatmul.msk.bf16.gmra.mxu3 %vm1417_vm0, %v6899_v1  ;;  %v4608_v1 = vmul.f32 %v13442_v46, %v13442_v46 }
 0x48b   :  { %v4356_v0 = vadd.f32 %v4355_v31, %v13438_v26  ;;  %v4843_v50 = vadd.f32 %v4842_v32, %v4603_v8  ;;  %v2345_v30 = vpop.f32.mrf.mxu2  ;;  %v4607_v8 = vmul.f32 %v13441_v22, %v13441_v22 }
 0x48d   :  { %v4357_v42 = vadd.f32 %v4356_v0, %v13439_v52  ;;  %v4844_v54 = vadd.f32 %v4843_v50, %v4604_v47  ;;  %v2958_v34 = vpop.f32.mrf.mxu3  ;;  %v13443_v47 = vld [vmem:[#allocation85_spill] sm:$0xff] }
 0x48e   :  { %v4609_v52 = vmul.f32 %v13443_v47, %v13443_v47 }
 0x48f   :  { %v4358_v4 = vadd.f32 %v4357_v42, %v13440_v33  ;;  %v4845_v9 = vadd.f32 %v4844_v54, %v4605_v53  ;;  %v13444_v53 = vld [vmem:[#allocation87_spill] sm:$0xff] }
 0x490   :  { %v4610_v54 = vmul.f32 %v13444_v53, %v13444_v53 }
 0x491   :  { %v4359_v31 = vadd.f32 %v4358_v4, %v13441_v22  ;;  %v4846_v32 = vadd.f32 %v4845_v9, %v4606_v43  ;;  %v258_v43 = vld [vmem:[%s12841_s0 + $0x780] sm:$0xff]  ;;  %v9952_v22 = vadd.f32 %v2958_v34, %v2345_v30 }
 0x493   :  { %v4360_v0 = vadd.f32 %v4359_v31, %v13442_v46  ;;  %v4847_v50 = vadd.f32 %v4846_v32, %v4607_v8  ;;  %v2347_v33 = vpop.f32.mrf.mxu2  ;;  %v998_v31 = vunpack.c.l.b16 %v258_v43  ;;  %v999_v46 = vunpack.c.h.b16 %v258_v43 }
 0x495   :  { %v4361_v26 = vadd.f32 %v4360_v0, %v13443_v47  ;;  %v4848_v42 = vadd.f32 %v4847_v50, %v4608_v1  ;;  %v2960_v8 = vpop.f32.mrf.mxu3  ;;  %v13445_v0 = vld [vmem:[#allocation89_spill] sm:$0xff]  ;;  %v1240_v37 = vpack.c.b16 %v998_v31, %v998_v31  ;;  %v1241_v56 = vpack.c.b16 %v999_v46, %v999_v46 }
 0x496   :  { %v9954_v32 = vadd.f32 %v2960_v8, %v2347_v33  ;;  %v4611_v1 = vmul.f32 %v13445_v0, %v13445_v0  ;;  %v13449_v31 = vld [vmem:[#allocation97_spill] sm:$0xff] }
 0x497   :  { %v4362_v4 = vadd.f32 %v4361_v26, %v13444_v53  ;;  %v4849_v9 = vadd.f32 %v4848_v42, %v4609_v52  ;;  %v13447_v26 = vld [vmem:[#allocation93_spill] sm:$0xff] }
 0x498   :  { %2389 = vmatmul.bf16.gmra.mxu2 %v1240_v37  ;;  %v4613_v30 = vmul.f32 %v13447_v26, %v13447_v26  ;;  %v13455_v53 = vld [vmem:[#allocation109_spill] sm:$0xff] }
 0x499   :  { %v4363_v50 = vadd.f32 %v4362_v4, %v13445_v0  ;;  %v4850_v47 = vadd.f32 %v4849_v9, %v4610_v54  ;;  %v13448_v4 = vld [vmem:[#allocation95_spill] sm:$0xff] }
 0x49a   :  { %7056 = vmatmul.msk.bf16.gmra.mxu3 %vm1417_vm0, %v1241_v56  ;;  %v4614_v54 = vmul.f32 %v13448_v4, %v13448_v4 }
 0x49b   :  { %v4364_v52 = vadd.f32 %v4363_v50, %v13446_v14  ;;  %v4851_v34 = vadd.f32 %v4850_v47, %v4611_v1  ;;  %v2350_v43 = vpop.f32.mrf.mxu2  ;;  %v4615_v47 = vmul.f32 %v13449_v31, %v13449_v31  ;;  %v13450_v1 = vld [vmem:[#allocation99_spill] sm:$0xff] }
 0x49c   :  { %v4616_v50 = vmul.f32 %v13450_v1, %v13450_v1 }
 0x49d   :  { %v4365_v33 = vadd.f32 %v4364_v52, %v13447_v26  ;;  %v4852_v42 = vadd.f32 %v4851_v34, %v4612_v17  ;;  %v2963_v8 = vpop.f32.mrf.mxu3  ;;  %v13451_v34 = vld [vmem:[#allocation101_spill] sm:$0xff] }
 0x49e   :  { %v4617_v26 = vmul.f32 %v13451_v34, %v13451_v34 }
 0x49f   :  { %v4366_v46 = vadd.f32 %v4365_v33, %v13448_v4  ;;  %v4853_v9 = vadd.f32 %v4852_v42, %v4613_v30  ;;  %v13452_v42 = vld [vmem:[#allocation103_spill] sm:$0xff] }
 0x4a0   :  { %v4618_v4 = vmul.f32 %v13452_v42, %v13452_v42 }
 0x4a1   :  { %v4367_v37 = vadd.f32 %v4366_v46, %v13449_v31  ;;  %v4854_v56 = vadd.f32 %v4853_v9, %v4614_v54  ;;  %v9981_v54 = vadd.f32 %v2963_v8, %v2350_v43 }
 0x4a3   :  { %v4368_v52 = vadd.f32 %v4367_v37, %v13450_v1  ;;  %v4855_v17 = vadd.f32 %v4854_v56, %v4615_v47  ;;  %v2352_v30 = vpop.f32.mrf.mxu2  ;;  %v13453_v37 = vld [vmem:[#allocation105_spill] sm:$0xff] }
 0x4a4   :  { %v4619_v47 = vmul.f32 %v13453_v37, %v13453_v37 }
 0x4a5   :  { %v4369_v14 = vadd.f32 %v4368_v52, %v13451_v34  ;;  %v4856_v33 = vadd.f32 %v4855_v17, %v4616_v50  ;;  %v2965_v9 = vpop.f32.mrf.mxu3  ;;  %v13454_v52 = vld [vmem:[#allocation107_spill] sm:$0xff] }
 0x4a6   :  { %v9983_v31 = vadd.f32 %v2965_v9, %v2352_v30  ;;  %v4620_v50 = vmul.f32 %v13454_v52, %v13454_v52 }
 0x4a7   :  { %v4370_v0 = vadd.f32 %v4369_v14, %v13452_v42  ;;  %v4857_v46 = vadd.f32 %v4856_v33, %v4617_v26  ;;  %v4621_v14 = vmul.f32 %v13455_v53, %v13455_v53  ;;  %v13456_v33 = vld [vmem:[#allocation111_spill] sm:$0xff] }
 0x4a8   :  { %v4622_v30 = vmul.f32 %v13456_v33, %v13456_v33 }
 0x4a9   :  { %v4371_v56 = vadd.f32 %v4370_v0, %v13453_v37  ;;  %v4858_v1 = vadd.f32 %v4857_v46, %v4618_v4  ;;  %v13457_v46 = vld [vmem:[#allocation113_spill] sm:$0xff] }
 0x4aa   :  { %v4623_v37 = vmul.f32 %v13457_v46, %v13457_v46 }
 0x4ab   :  { %v4372_v17 = vadd.f32 %v4371_v56, %v13454_v52  ;;  %v4859_v34 = vadd.f32 %v4858_v1, %v4619_v47  ;;  %v2355_v8 = vpop.f32.mrf.mxu2  ;;  %v13458_v47 = vld [vmem:[#allocation115_spill] sm:$0xff] }
 0x4ac   :  { %v4624_v52 = vmul.f32 %v13458_v47, %v13458_v47 }
 0x4ad   :  { %v4373_v26 = vadd.f32 %v4372_v17, %v13455_v53  ;;  %v4860_v43 = vadd.f32 %v4859_v34, %v4620_v50  ;;  %v2968_v4 = vpop.f32.mrf.mxu3  ;;  %v13459_v50 = vld [vmem:[#allocation117_spill] sm:$0xff] }
 0x4ae   :  { %v4625_v53 = vmul.f32 %v13459_v50, %v13459_v50 }
 0x4af   :  { %v4374_v9 = vadd.f32 %v4373_v26, %v13456_v33  ;;  %v4861_v0 = vadd.f32 %v4860_v43, %v4621_v14  ;;  %v13460_v43 = vld [vmem:[#allocation119_spill] sm:$0xff] }
 0x4b0   :  { %v4626_v33 = vmul.f32 %v13460_v43, %v13460_v43 }
 0x4b1   :  { %v4375_v56 = vadd.f32 %v4374_v9, %v13457_v46  ;;  %v4862_v1 = vadd.f32 %v4861_v0, %v4622_v30  ;;  %v10009_v30 = vadd.f32 %v2968_v4, %v2355_v8 }
 0x4b3   :  { %v4376_v17 = vadd.f32 %v4375_v56, %v13458_v47  ;;  %v4863_v34 = vadd.f32 %v4862_v1, %v4623_v37  ;;  %v2357_v14 = vpop.f32.mrf.mxu2  ;;  %v13461_v56 = vld [vmem:[#allocation121_spill] sm:$0xff] }
 0x4b4   :  { %v4627_v37 = vmul.f32 %v13461_v56, %v13461_v56 }
 0x4b5   :  { %v4377_v42 = vadd.f32 %v4376_v17, %v13459_v50  ;;  %v4864_v26 = vadd.f32 %v4863_v34, %v4624_v52  ;;  %v2970_v0 = vpop.f32.mrf.mxu3  ;;  %v13462_v17 = vld [vmem:[#allocation123_spill] sm:$0xff] }
 0x4b6   :  { %v10011_v46 = vadd.f32 %v2970_v0, %v2357_v14  ;;  %v4628_v52 = vmul.f32 %v13462_v17, %v13462_v17 }
 0x4b7   :  { %v4378_v58 = vadd.f32 %v4377_v42, %v13460_v43  ;;  %v4865_v9 = vadd.f32 %v4864_v26, %v4625_v53  ;;  %v4629_v53 = vmul.f32 %v13463_v19, %v13463_v19  ;;  %v13464_v26 = vld [vmem:[#allocation127_spill] sm:$0xff] }
 0x4b8   :  { %v4630_v14 = vmul.f32 %v13464_v26, %v13464_v26 }
 0x4b9   :  { %v4379_v1 = vadd.f32 %v4378_v58, %v13461_v56  ;;  %v4866_v47 = vadd.f32 %v4865_v9, %v4626_v33  ;;  %v13465_v9 = vld [vmem:[#allocation129_spill] sm:$0xff] }
 0x4ba   :  { %v4631_v56 = vmul.f32 %v13465_v9, %v13465_v9 }
 0x4bb   :  { %v4867_v34 = vadd.f32 %v4866_v47, %v4627_v37  ;;  %v4380_v50 = vadd.f32 %v4379_v1, %v13462_v17  ;;  %v2360_v4 = vpop.f32.mrf.mxu2  ;;  %v13466_v1 = vld [vmem:[#allocation131_spill] sm:$0xff] }
 0x4bc   :  { %v4632_v17 = vmul.f32 %v13466_v1, %v13466_v1 }
 0x4bd   :  { %v4381_v42 = vadd.f32 %v4380_v50, %v13463_v19  ;;  %v4868_v8 = vadd.f32 %v4867_v34, %v4628_v52  ;;  %v2973_v33 = vpop.f32.mrf.mxu3  ;;  %v13467_v34 = vld [vmem:[#allocation133_spill] sm:$0xff] }
 0x4be   :  { %v4633_v19 = vmul.f32 %v13467_v34, %v13467_v34 }
 0x4bf   :  { %v4382_v0 = vadd.f32 %v4381_v42, %v13464_v26  ;;  %v4869_v58 = vadd.f32 %v4868_v8, %v4629_v53  ;;  %v13468_v8 = vld [vmem:[#allocation135_spill] sm:$0xff] }
 0x4c0   :  { %v4634_v26 = vmul.f32 %v13468_v8, %v13468_v8 }
 0x4c1   :  { %v4383_v47 = vadd.f32 %v4382_v0, %v13465_v9  ;;  %v4870_v37 = vadd.f32 %v4869_v58, %v4630_v14  ;;  %v10037_v14 = vadd.f32 %v2973_v33, %v2360_v4 }
 0x4c3   :  { %v4384_v50 = vadd.f32 %v4383_v47, %v13466_v1  ;;  %v4871_v52 = vadd.f32 %v4870_v37, %v4631_v56  ;;  %v2362_v53 = vpop.f32.mrf.mxu2  ;;  %v13469_v47 = vld [vmem:[#allocation137_spill] sm:$0xff] }
 0x4c4   :  { %v4635_v56 = vmul.f32 %v13469_v47, %v13469_v47 }
 0x4c5   :  { %v4385_v43 = vadd.f32 %v4384_v50, %v13467_v34  ;;  %v4872_v42 = vadd.f32 %v4871_v52, %v4632_v17  ;;  %v2975_v58 = vpop.f32.mrf.mxu3  ;;  %v13470_v50 = vld [vmem:[#allocation139_spill] sm:$0xff] }
 0x4c6   :  { %v10039_v9 = vadd.f32 %v2975_v58, %v2362_v53  ;;  %v4636_v17 = vmul.f32 %v13470_v50, %v13470_v50 }
 0x4c7   :  { %v4386_v15 = vadd.f32 %v4385_v43, %v13468_v8  ;;  %v4873_v0 = vadd.f32 %v4872_v42, %v4633_v19  ;;  %v4637_v19 = vmul.f32 %v13471_v62, %v13471_v62  ;;  %v13472_v42 = vld [vmem:[#allocation143_spill] sm:$0xff] }
 0x4c8   :  { %v4638_v53 = vmul.f32 %v13472_v42, %v13472_v42 }
 0x4c9   :  { %v4387_v37 = vadd.f32 %v4386_v15, %v13469_v47  ;;  %v4874_v1 = vadd.f32 %v4873_v0, %v4634_v26  ;;  %v13473_v0 = vld [vmem:[#allocation145_spill] sm:$0xff] }
 0x4ca   :  { %v4639_v47 = vmul.f32 %v13473_v0, %v13473_v0 }
 0x4cb   :  { %v4388_v52 = vadd.f32 %v4387_v37, %v13470_v50  ;;  %v4875_v34 = vadd.f32 %v4874_v1, %v4635_v56  ;;  %v2365_v33 = vpop.f32.mrf.mxu2  ;;  %v13474_v56 = vld [vmem:[#allocation147_spill] sm:$0xff] }
 0x4cc   :  { %v4640_v50 = vmul.f32 %v13474_v56, %v13474_v56 }
 0x4cd   :  { %v4389_v43 = vadd.f32 %v4388_v52, %v13471_v62  ;;  %v4876_v4 = vadd.f32 %v4875_v34, %v4636_v17  ;;  %v2978_v26 = vpop.f32.mrf.mxu3  ;;  %v13475_v17 = vld [vmem:[#allocation149_spill] sm:$0xff] }
 0x4ce   :  { %v4641_v62 = vmul.f32 %v13475_v17, %v13475_v17 }
 0x4cf   :  { %v4390_v58 = vadd.f32 %v4389_v43, %v13472_v42  ;;  %v4877_v15 = vadd.f32 %v4876_v4, %v4637_v19  ;;  %v13476_v4 = vld [vmem:[#allocation151_spill] sm:$0xff] }
 0x4d0   :  { %v4642_v42 = vmul.f32 %v13476_v4, %v13476_v4 }
 0x4d1   :  { %v4391_v37 = vadd.f32 %v4390_v58, %v13473_v0  ;;  %v4878_v1 = vadd.f32 %v4877_v15, %v4638_v53  ;;  %v10065_v53 = vadd.f32 %v2978_v26, %v2365_v33 }
 0x4d3   :  { %v4392_v52 = vadd.f32 %v4391_v37, %v13474_v56  ;;  %v4879_v34 = vadd.f32 %v4878_v1, %v4639_v47  ;;  %v2367_v19 = vpop.f32.mrf.mxu2  ;;  %v13478_v37 = vld [vmem:[#allocation153_spill] sm:$0xff] }
 0x4d4   :  { %v4643_v47 = vmul.f32 %v13478_v37, %v13478_v37 }
 0x4d5   :  { %v4393_v8 = vadd.f32 %v4392_v52, %v13475_v17  ;;  %v4880_v43 = vadd.f32 %v4879_v34, %v4640_v50  ;;  %v2980_v15 = vpop.f32.mrf.mxu3  ;;  %v13479_v52 = vld [vmem:[#allocation155_spill] sm:$0xff] }
 0x4d6   :  { %v10067_v0 = vadd.f32 %v2980_v15, %v2367_v19  ;;  %v4644_v50 = vmul.f32 %v13479_v52, %v13479_v52 }
 0x4d7   :  { %v4394_v29 = vadd.f32 %v4393_v8, %v13476_v4  ;;  %v4881_v58 = vadd.f32 %v4880_v43, %v4641_v62  ;;  %v4645_v62 = vmul.f32 %v13480_v44, %v13480_v44  ;;  %v4646_v43 = vmul.f32 %v8958_v51, %v8958_v51 }
 0x4d8   :  { %13477 = vst [vmem:[#allocation151_spill] sm:$0xff] %v10067_v0 }
 0x4d9   :  { %v4395_v1 = vadd.f32 %v4394_v29, %v13478_v37  ;;  %v4882_v56 = vadd.f32 %v4881_v58, %v4642_v42  ;;  %v4647_v58 = vmul.f32 %v8972_v18, %v8972_v18 }
 0x4db   :  { %v4396_v34 = vadd.f32 %v4395_v1, %v13479_v52  ;;  %v4883_v17 = vadd.f32 %v4882_v56, %v4643_v47  ;;  %v2370_v26 = vpop.f32.mrf.mxu2  ;;  %v4648_v47 = vmul.f32 %v9022_v12, %v9022_v12 }
 0x4dd   :  { %v4397_v8 = vadd.f32 %v4396_v34, %v13480_v44  ;;  %v4884_v33 = vadd.f32 %v4883_v17, %v4644_v50  ;;  %v2983_v42 = vpop.f32.mrf.mxu3  ;;  %v4649_v50 = vmul.f32 %v9036_v16, %v9036_v16 }
 0x4df   :  { %v4398_v19 = vadd.f32 %v4397_v8, %v8958_v51  ;;  %v4885_v29 = vadd.f32 %v4884_v33, %v4645_v62  ;;  %v4650_v33 = vmul.f32 %v9086_v38, %v9086_v38 }
 0x4e1   :  { %v4399_v15 = vadd.f32 %v4398_v19, %v8972_v18  ;;  %v4886_v56 = vadd.f32 %v4885_v29, %v4646_v43  ;;  %v10093_v43 = vadd.f32 %v2983_v42, %v2370_v26 }
 0x4e3   :  { %v4400_v1 = vadd.f32 %v4399_v15, %v9022_v12  ;;  %v4887_v17 = vadd.f32 %v4886_v56, %v4647_v58  ;;  %v2372_v62 = vpop.f32.mrf.mxu2  ;;  %13481 = vst [vmem:[#allocation153_spill] sm:$0xff] %v10093_v43  ;;  %v4651_v58 = vmul.f32 %v9100_v28, %v9100_v28 }
 0x4e5   :  { %v4401_v34 = vadd.f32 %v4400_v1, %v9036_v16  ;;  %v4888_v8 = vadd.f32 %v4887_v17, %v4648_v47  ;;  %v2985_v29 = vpop.f32.mrf.mxu3  ;;  %v4652_v47 = vmul.f32 %v9150_v20, %v9150_v20 }
 0x4e6   :  { %v10095_v18 = vadd.f32 %v2985_v29, %v2372_v62 }
 0x4e7   :  { %v4402_v51 = vadd.f32 %v4401_v34, %v9086_v38  ;;  %v4889_v19 = vadd.f32 %v4888_v8, %v4649_v50  ;;  %v4653_v50 = vmul.f32 %v9164_v48, %v9164_v48  ;;  %v4654_v8 = vmul.f32 %v9214_v61, %v9214_v61 }
 0x4e8   :  { %13482 = vst [vmem:[#allocation155_spill] sm:$0xff] %v10095_v18 }
 0x4e9   :  { %v4403_v15 = vadd.f32 %v4402_v51, %v9100_v28  ;;  %v4890_v56 = vadd.f32 %v4889_v19, %v4650_v33  ;;  %v4655_v19 = vmul.f32 %v9228_v10, %v9228_v10 }
 0x4eb   :  { %v4404_v1 = vadd.f32 %v4403_v15, %v9150_v20  ;;  %v4891_v17 = vadd.f32 %v4890_v56, %v4651_v58  ;;  %v2375_v34 = vpop.f32.mrf.mxu2  ;;  %v4656_v15 = vmul.f32 %v9278_v5, %v9278_v5 }
 0x4ed   :  { %v4405_v26 = vadd.f32 %v4404_v1, %v9164_v48  ;;  %v4892_v42 = vadd.f32 %v4891_v17, %v4652_v47  ;;  %v2988_v33 = vpop.f32.mrf.mxu3  ;;  %v4657_v1 = vmul.f32 %v9292_v11, %v9292_v11 }
 0x4ef   :  { %v4406_v62 = vadd.f32 %v4405_v26, %v9214_v61  ;;  %v4893_v51 = vadd.f32 %v4892_v42, %v4653_v50  ;;  %v4658_v42 = vmul.f32 %v9342_v49, %v9342_v49 }
 0x4f1   :  { %v4407_v29 = vadd.f32 %v4406_v62, %v9228_v10  ;;  %v4894_v58 = vadd.f32 %v4893_v51, %v4654_v8  ;;  %v10121_v8 = vadd.f32 %v2988_v33, %v2375_v34 }
 0x4f3   :  { %v4408_v56 = vadd.f32 %v4407_v29, %v9278_v5  ;;  %v4895_v47 = vadd.f32 %v4894_v58, %v4655_v19  ;;  %v2377_v50 = vpop.f32.mrf.mxu2  ;;  %13483 = vst [vmem:[#allocation157_spill] sm:$0xff] %v10121_v8  ;;  %v4659_v19 = vmul.f32 %v9356_v24, %v9356_v24 }
 0x4f5   :  { %v4409_v17 = vadd.f32 %v4408_v56, %v9292_v11  ;;  %v4896_v26 = vadd.f32 %v4895_v47, %v4656_v15  ;;  %v2990_v51 = vpop.f32.mrf.mxu3  ;;  %v4660_v15 = vmul.f32 %v9394_v35, %v9394_v35  ;;  %v13485_v11 = vld [vmem:[#allocation179_spill] sm:$0xff] }
 0x4f6   :  { %v10123_v10 = vadd.f32 %v2990_v51, %v2377_v50 }
 0x4f7   :  { %v4410_v61 = vadd.f32 %v4409_v17, %v9342_v49  ;;  %v4897_v62 = vadd.f32 %v4896_v26, %v4657_v1  ;;  %v4661_v1 = vmul.f32 %v13485_v11, %v13485_v11  ;;  %v13486_v26 = vld [vmem:[#allocation181_spill] sm:$0xff] }
 0x4f8   :  { %13484 = vst [vmem:[#allocation200_spill] sm:$0xff] %v10123_v10  ;;  %v4662_v50 = vmul.f32 %v13486_v26, %v13486_v26 }
 0x4f9   :  { %v4411_v29 = vadd.f32 %v4410_v61, %v9356_v24  ;;  %v4898_v58 = vadd.f32 %v4897_v62, %v4658_v42  ;;  %v13487_v62 = vld [vmem:[#allocation183_spill] sm:$0xff] }
 0x4fa   :  { %v4663_v24 = vmul.f32 %v13487_v62, %v13487_v62 }
 0x4fb   :  { %v4412_v56 = vadd.f32 %v4411_v29, %v9394_v35  ;;  %v4899_v47 = vadd.f32 %v4898_v58, %v4659_v19  ;;  %v2380_v17 = vpop.f32.mrf.mxu2  ;;  %v13488_v58 = vld [vmem:[#allocation185_spill] sm:$0xff] }
 0x4fc   :  { %v4664_v35 = vmul.f32 %v13488_v58, %v13488_v58 }
 0x4fd   :  { %v4413_v34 = vadd.f32 %v4412_v56, %v13485_v11  ;;  %v4900_v33 = vadd.f32 %v4899_v47, %v4660_v15  ;;  %v2993_v42 = vpop.f32.mrf.mxu3  ;;  %v13489_v47 = vld [vmem:[#allocation186_spill] sm:$0xff] }
 0x4fe   :  { %v4665_v11 = vmul.f32 %v13489_v47, %v13489_v47 }
 0x4ff   :  { %v4414_v51 = vadd.f32 %v4413_v34, %v13486_v26  ;;  %v4901_v61 = vadd.f32 %v4900_v33, %v4661_v1  ;;  %v4666_v33 = vmul.f32 %v9545_v60, %v9545_v60 }
 0x501   :  { %v4415_v29 = vadd.f32 %v4414_v51, %v13487_v62  ;;  %v4902_v19 = vadd.f32 %v4901_v61, %v4662_v50  ;;  %v10149_v50 = vadd.f32 %v2993_v42, %v2380_v17 }
 0x503   :  { %v4416_v56 = vadd.f32 %v4415_v29, %v13488_v58  ;;  %v4903_v15 = vadd.f32 %v4902_v19, %v4663_v24  ;;  %v2382_v1 = vpop.f32.mrf.mxu2  ;;  %13490 = vst [vmem:[#allocation186_spill] sm:$0xff] %v10149_v50  ;;  %v13492_v29 = vld [vmem:[#allocation152_spill] sm:$0xff] }
 0x504   :  { %v4667_v24 = vmul.f32 %v13492_v29, %v13492_v29 }
 0x505   :  { %v4417_v49 = vadd.f32 %v4416_v56, %v13489_v47  ;;  %v4904_v34 = vadd.f32 %v4903_v15, %v4664_v35  ;;  %v2995_v61 = vpop.f32.mrf.mxu3  ;;  %v4668_v35 = vmul.f32 %v9594_v3, %v9594_v3 }
 0x506   :  { %v10151_v62 = vadd.f32 %v2995_v61, %v2382_v1 }
 0x507   :  { %v4418_v26 = vadd.f32 %v4417_v49, %v9545_v60  ;;  %v4905_v51 = vadd.f32 %v4904_v34, %v4665_v11  ;;  %v4669_v11 = vmul.f32 %v9606_v7, %v9606_v7  ;;  %v4670_v34 = vmul.f32 %v9643_v23, %v9643_v23 }
 0x508   :  { %13491 = vst [vmem:[#allocation201_spill] sm:$0xff] %v10151_v62 }
 0x509   :  { %v4419_v19 = vadd.f32 %v4418_v26, %v13492_v29  ;;  %v4906_v58 = vadd.f32 %v4905_v51, %v4666_v33  ;;  %v4671_v51 = vmul.f32 %v9655_v27, %v9655_v27 }
 0x50b   :  { %v4420_v56 = vadd.f32 %v4419_v19, %v9594_v3  ;;  %v4907_v15 = vadd.f32 %v4906_v58, %v4667_v24  ;;  %v2385_v42 = vpop.f32.mrf.mxu2  ;;  %v4672_v19 = vmul.f32 %v9714_v25, %v9714_v25 }
 0x50d   :  { %v4421_v49 = vadd.f32 %v4420_v56, %v9606_v7  ;;  %v4908_v17 = vadd.f32 %v4907_v15, %v4668_v35  ;;  %v2998_v33 = vpop.f32.mrf.mxu3 }
 0x50f   :  { %v4422_v1 = vadd.f32 %v4421_v49, %v9643_v23  ;;  %v4909_v26 = vadd.f32 %v4908_v17, %v4669_v11  ;;  %v4673_v49 = vmul.f32 %v9716_v40, %v9716_v40 }
 0x511   :  { %v4423_v61 = vadd.f32 %v4422_v1, %v9655_v27  ;;  %v4910_v58 = vadd.f32 %v4909_v26, %v4670_v34  ;;  %v4674_v1 = vmul.f32 %v9776_v6, %v9776_v6  ;;  %v10177_v34 = vadd.f32 %v2998_v33, %v2385_v42 }
 0x512   :  { %v4677_v42 = vmul.f32 %v9828_v2, %v9828_v2 }
 0x513   :  { %v4424_v24 = vadd.f32 %v4423_v61, %v9714_v25  ;;  %v4911_v35 = vadd.f32 %v4910_v58, %v4671_v51  ;;  %v2387_v11 = vpop.f32.mrf.mxu2  ;;  %13493 = vst [vmem:[#allocation152_spill] sm:$0xff] %v10177_v34  ;;  %v4675_v58 = vmul.f32 %v9781_v57, %v9781_v57 }
 0x515   :  { %v4912_v56 = vadd.f32 %v4911_v35, %v4672_v19  ;;  %v4425_v15 = vadd.f32 %v4424_v24, %v9716_v40  ;;  %v3000_v26 = vpop.f32.mrf.mxu3  ;;  %v4676_v35 = vmul.f32 %v9826_v36, %v9826_v36 }
 0x516   :  { %v10179_v61 = vadd.f32 %v3000_v26, %v2387_v11  ;;  %v4679_v26 = vmul.f32 %v9869_v39, %v9869_v39 }
 0x517   :  { %v4913_v17 = vadd.f32 %v4912_v56, %v4673_v49  ;;  %v4426_v23 = vadd.f32 %v4425_v15, %v9776_v6 }
 0x518   :  { %13494 = vst [vmem:[#allocation202_spill] sm:$0xff] %v10179_v61 }
 0x519   :  { %v4914_v25 = vadd.f32 %v4913_v17, %v4674_v1  ;;  %v4427_v51 = vadd.f32 %v4426_v23, %v9781_v57  ;;  %v4678_v23 = vmul.f32 %v9867_v59, %v9867_v59 }
 0x51b   :  { %v4915_v24 = vadd.f32 %v4914_v25, %v4675_v58  ;;  %v4428_v19 = vadd.f32 %v4427_v51, %v9826_v36  ;;  %v2390_v33 = vpop.f32.mrf.mxu2 }
 0x51d   :  { %v4916_v56 = vadd.f32 %v4915_v24, %v4676_v35  ;;  %v4429_v15 = vadd.f32 %v4428_v19, %v9828_v2  ;;  %v3003_v17 = vpop.f32.mrf.mxu3  ;;  %v4680_v24 = vmul.f32 %v9908_v63, %v9908_v63 }
 0x51f   :  { %v4917_v49 = vadd.f32 %v4916_v56, %v4677_v42  ;;  %v4430_v11 = vadd.f32 %v4429_v15, %v9867_v59  ;;  %v4681_v56 = vmul.f32 %v9910_v45, %v9910_v45 }
 0x521   :  { %v4918_v25 = vadd.f32 %v4917_v49, %v4678_v23  ;;  %v4431_v1 = vadd.f32 %v4430_v11, %v9869_v39  ;;  %v4682_v11 = vmul.f32 %v9952_v22, %v9952_v22  ;;  %v10205_v23 = vadd.f32 %v3003_v17, %v2390_v33 }
 0x522   :  { %v4685_v33 = vmul.f32 %v9983_v31, %v9983_v31 }
 0x523   :  { %v4919_v51 = vadd.f32 %v4918_v25, %v4679_v26  ;;  %v4432_v58 = vadd.f32 %v4431_v1, %v9908_v63  ;;  %v2392_v15 = vpop.f32.mrf.mxu2  ;;  %13495 = vst [vmem:[#allocation203_spill] sm:$0xff] %v10205_v23 }
 0x525   :  { %v4920_v19 = vadd.f32 %v4919_v51, %v4680_v24  ;;  %v4433_v35 = vadd.f32 %v4432_v58, %v9910_v45  ;;  %v3005_v25 = vpop.f32.mrf.mxu3  ;;  %v4683_v51 = vmul.f32 %v9954_v32, %v9954_v32 }
 0x526   :  { %v4687_v25 = vmul.f32 %v10011_v46, %v10011_v46 }
 0x527   :  { %v4921_v42 = vadd.f32 %v4920_v19, %v4681_v56  ;;  %v4434_v49 = vadd.f32 %v4433_v35, %v9952_v22  ;;  %v4684_v19 = vmul.f32 %v9981_v54, %v9981_v54 }
 0x529   :  { %v4922_v1 = vadd.f32 %v4921_v42, %v4682_v11  ;;  %v4435_v26 = vadd.f32 %v4434_v49, %v9954_v32  ;;  %v4686_v42 = vmul.f32 %v10009_v30, %v10009_v30 }
 0x52b   :  { %v4923_v58 = vadd.f32 %v4922_v1, %v4683_v51  ;;  %v4436_v24 = vadd.f32 %v4435_v26, %v9981_v54  ;;  %v4688_v51 = vmul.f32 %v10037_v14, %v10037_v14 }
 0x52d   :  { %v4924_v56 = vadd.f32 %v4923_v58, %v4684_v19  ;;  %v4437_v35 = vadd.f32 %v4436_v24, %v9983_v31  ;;  %v3007_v58 = vlaneseq }
 0x52f   :  { %v4925_v17 = vadd.f32 %v4924_v56, %v4685_v33  ;;  %v4438_v15 = vadd.f32 %v4437_v35, %v10009_v30  ;;  %v4689_v56 = vmul.f32 %v10039_v9, %v10039_v9 }
 0x531   :  { %v4926_v49 = vadd.f32 %v4925_v17, %v4686_v42  ;;  %v4439_v11 = vadd.f32 %v4438_v15, %v10011_v46  ;;  %v4690_v17 = vmul.f32 %v10065_v53, %v10065_v53  ;;  %v3008_v15 = vshrl.u32 %v3007_v58, 7 }
 0x532   :  { %v4694_v58 = vmul.f32 %v10121_v8, %v10121_v8 }
 0x533   :  { %v4927_v1 = vadd.f32 %v4926_v49, %v4687_v25  ;;  %v4440_v26 = vadd.f32 %v4439_v11, %v10037_v14  ;;  %v4691_v11 = vmul.f32 %v10067_v0, %v10067_v0 }
 0x535   :  { %v4928_v24 = vadd.f32 %v4927_v1, %v4688_v51  ;;  %v4441_v19 = vadd.f32 %v4440_v26, %v10039_v9  ;;  %v4692_v26 = vmul.f32 %v10093_v43, %v10093_v43  ;;  %v3248_v51 = vadd.s32 1920, %v3008_v15 }
 0x536   :  { %v7319_v15 = vmov 0.0  }
 0x537   :  { %v4929_v35 = vadd.f32 %v4928_v24, %v4689_v56  ;;  %v4442_v33 = vadd.f32 %v4441_v19, %v10065_v53  ;;  %v4693_v56 = vmul.f32 %v10095_v18, %v10095_v18  ;;  %vm3489_vm1 = vcmp.lt.s32.totalorder %v3248_v51, 1922 }
 0x538   :  { %v4697_v51 = vmul.f32 %v10151_v62, %v10151_v62 }
 0x539   :  { %v4930_v42 = vadd.f32 %v4929_v35, %v4690_v17  ;;  %v4443_v49 = vadd.f32 %v4442_v33, %v10067_v0 }
 0x53b   :  { %v4931_v25 = vadd.f32 %v4930_v42, %v4691_v11  ;;  %v4444_v1 = vadd.f32 %v4443_v49, %v10093_v43  ;;  %v4695_v49 = vmul.f32 %v10123_v10, %v10123_v10  ;;  %v7057_v11 = vsel %vm3489_vm1, 1.0, %v7319_v15 }
 0x53d   :  { %v4932_v24 = vadd.f32 %v4931_v25, %v4692_v26  ;;  %v4445_v19 = vadd.f32 %v4444_v1, %v10095_v18  ;;  %v4696_v26 = vmul.f32 %v10149_v50, %v10149_v50 }
 0x53f   :  { %v4933_v35 = vadd.f32 %v4932_v24, %v4693_v56  ;;  %v4446_v33 = vadd.f32 %v4445_v19, %v10121_v8  ;;  %v4212_v19 = vmul.f32 %v7057_v11, %v10205_v23 }
 0x541   :  { %v4934_v17 = vadd.f32 %v4933_v35, %v4694_v58  ;;  %v4447_v42 = vadd.f32 %v4446_v33, %v10123_v10  ;;  %v4698_v35 = vmul.f32 %v10177_v34, %v10177_v34 }
 0x543   :  { %v4935_v25 = vadd.f32 %v4934_v17, %v4695_v49  ;;  %v4448_v1 = vadd.f32 %v4447_v42, %v10149_v50  ;;  %v4699_v42 = vmul.f32 %v10179_v61, %v10179_v61  ;;  %v4700_v49 = vmul.f32 %v4212_v19, %v4212_v19 }
 0x545   :  { %v4936_v18 = vadd.f32 %v4935_v25, %v4696_v26  ;;  %v4449_v24 = vadd.f32 %v4448_v1, %v10151_v62 }
 0x547   :  { %v4937_v56 = vadd.f32 %v4936_v18, %v4697_v51  ;;  %v4450_v58 = vadd.f32 %v4449_v24, %v10177_v34 }
 0x549   :  { %v4938_v33 = vadd.f32 %v4937_v56, %v4698_v35  ;;  %v4451_v17 = vadd.f32 %v4450_v58, %v10179_v61 }
 0x54b   :  { %v4939_v15 = vadd.f32 %v4938_v33, %v4699_v42  ;;  %v4452_v25 = vadd.f32 %v4451_v17, %v4212_v19 }
 0x54d   :  { %v4453_v1 = vrot.slane %v4452_v25, 4  ;;  %v4940_v26 = vadd.f32 %v4939_v15, %v4700_v49 }
 0x54f   :  { %v4454_v62 = vadd.f32 %v4453_v1, %v4452_v25  ;;  %v4941_v50 = vrot.slane %v4940_v26, 4  ;;  %v13497_v25 = vld [vmem:[#allocation3_spill] sm:$0xff] }
 0x551   :  { %v4455_v11 = vrot.slane %v4454_v62, 2  ;;  %v4942_v18 = vadd.f32 %v4941_v50, %v4940_v26  ;;  %v13498_v26 = vld [vmem:[#allocation4_spill] sm:$0xff] }
 0x553   :  { %v4456_v51 = vadd.f32 %v4455_v11, %v4454_v62  ;;  %v4943_v24 = vrot.slane %v4942_v18, 2  ;;  %v4950_v62 = vld [vmem:[%s12842_s2] sm:$0x1] }
 0x555   :  { %v4457_v23 = vrot.slane %v4456_v51, 1  ;;  %v4944_v10 = vadd.f32 %v4943_v24, %v4942_v18  ;;  %v13499_v18 = vld [vmem:[#allocation5_spill] sm:$0xff]  ;;  %v13500_v24 = vld [vmem:[#allocation6_spill] sm:$0xff] }
 0x557   :  { %v4458_v34 = vadd.f32 %v4457_v23, %v4456_v51  ;;  %v4945_v56 = vrot.slane %v4944_v10, 1 }
 0x559   :  { %v4459_v35 = vmul.f32 0.0005202914, %v4458_v34  ;;  %v4946_v58 = vadd.f32 %v4945_v56, %v4944_v10 }
 0x55b   :  { %v4947_v8 = vmul.f32 0.0005202914, %v4946_v58  ;;  %v4948_v43 = vmul.f32 %v4459_v35, %v4459_v35 }
 0x55d   :  { %v4949_v61 = vsub.f32 %v4947_v8, %v4948_v43  ;;  %v10267_v43 = vld [vmem:[%s12843_s3] sm:$0x1] }
 0x55f   :  { %v4951_v0 = vadd.f32 1e-05, %v4949_v61  ;;  %v13517_v61 = vld [vmem:[#allocation118_spill] sm:$0xff] }
 0x561   :  { %7317 = vrsqrt.f32 %v4951_v0  ;;  %vm4958_vm3 = vweird.f32 %v4951_v0 }
 0x567   :  { %v7318_v19 = vpop.eup %7317 }
 0x568   :  { %v4953_v33 = vmul.f32 %v7318_v19, %v4951_v0  ;;  %vm4959_vm2 = vweird.f32 %v7318_v19  ;;  %v13496_v0 = vld [vmem:[#allocation2_spill] sm:$0xff] }
 0x569   :  { %vm4960_vm4 = vmor %vm4958_vm3, %vm4959_vm2 }
 0x56a   :  { %v4954_v17 = vmul.f32 %v7318_v19, %v4953_v33 }
 0x56c   :  { %v4955_v42 = vmul.f32 0.5, %v4954_v17  ;;  %v13503_v17 = vld [vmem:[#allocation9_spill] sm:$0xff] }
 0x56e   :  { %v4956_v49 = vsub.f32 1.5, %v4955_v42 }
 0x570   :  { %v4957_v15 = vmul.f32 %v7318_v19, %v4956_v49  ;;  %v13505_v49 = vld [vmem:[#allocation10_spill] sm:$0xff] }
 0x572   :  { %v4961_v50 = vsel %vm4960_vm4, %v7318_v19, %v4957_v15  ;;  %v13502_v19 = vld [vmem:[#allocation8_spill] sm:$0xff] }
 0x573   :  { %v4962_v10 = vmul.f32 %v4961_v50, %v4950_v62  ;;  %v13507_v62 = vld [vmem:[#allocation104_spill] sm:$0xff] }
 0x575   :  { %v10262_v34 = vmul.f32 %v4962_v10, %v4459_v35  ;;  %v10269_v8 = vperm.slane %v4962_v10, 0  ;;  %v13501_v35 = vld [vmem:[#allocation7_spill] sm:$0xff]  ;;  %v13508_v10 = vld [vmem:[#allocation106_spill] sm:$0xff] }
 0x577   :  { %v10275_v23 = vmul.f32 %v10269_v8, %v13496_v0  ;;  %v10279_v1 = vmul.f32 %v10269_v8, %v13497_v25  ;;  %v10283_v11 = vmul.f32 %v10269_v8, %v13498_v26  ;;  %v10287_v51 = vmul.f32 %v10269_v8, %v13499_v18  ;;  %v13509_v25 = vld [vmem:[#allocation108_spill] sm:$0xff]  ;;  %v13510_v18 = vld [vmem:[#allocation110_spill] sm:$0xff] }
 0x578   :  { %v10291_v56 = vmul.f32 %v10269_v8, %v13500_v24  ;;  %v10295_v58 = vmul.f32 %v10269_v8, %v13501_v35  ;;  %v10299_v33 = vmul.f32 %v10269_v8, %v13502_v19  ;;  %v10303_v42 = vmul.f32 %v10269_v8, %v13503_v17  ;;  %v13511_v35 = vld [vmem:[#allocation112_spill] sm:$0xff]  ;;  %v13513_v17 = vld [vmem:[#allocation114_spill] sm:$0xff] }
 0x579   :  { %v10307_v15 = vmul.f32 %v10269_v8, %v13505_v49  ;;  %v10311_v50 = vmul.f32 %v10269_v8, %v13507_v62  ;;  %v10315_v0 = vmul.f32 %v10269_v8, %v13508_v10  ;;  %v10319_v26 = vmul.f32 %v10269_v8, %v13509_v25  ;;  %v13515_v62 = vld [vmem:[#allocation116_spill] sm:$0xff] }
 0x57a   :  { %13504 = vst [vmem:[#allocation2_spill] sm:$0xff] %v10303_v42  ;;  %v10323_v24 = vmul.f32 %v10269_v8, %v13510_v18  ;;  %v10327_v19 = vmul.f32 %v10269_v8, %v13511_v35  ;;  %v10331_v49 = vmul.f32 %v10269_v8, %v13513_v17  ;;  %v10335_v10 = vmul.f32 %v10269_v8, %v13515_v62  ;;  %v13521_v42 = vld [vmem:[#allocation122_spill] sm:$0xff] }
 0x57b   :  { %13506 = vst [vmem:[#allocation3_spill] sm:$0xff] %v10307_v15  ;;  %v10339_v25 = vmul.f32 %v10269_v8, %v13517_v61  ;;  %v13519_v15 = vld [vmem:[#allocation120_spill] sm:$0xff]  ;;  %v10347_v35 = vmul.f32 %v10269_v8, %v13521_v42 }
 0x57c   :  { %13512 = vst [vmem:[#allocation4_spill] sm:$0xff] %v10327_v19  ;;  %v10343_v18 = vmul.f32 %v10269_v8, %v13519_v15  ;;  %v13523_v19 = vld [vmem:[#allocation124_spill] sm:$0xff] }
 0x57d   :  { %13514 = vst [vmem:[#allocation5_spill] sm:$0xff] %v10331_v49  ;;  %v10351_v17 = vmul.f32 %v10269_v8, %v13523_v19  ;;  %v13525_v49 = vld [vmem:[#allocation126_spill] sm:$0xff] }
 0x57e   :  { %13516 = vst [vmem:[#allocation6_spill] sm:$0xff] %v10335_v10  ;;  %v10355_v62 = vmul.f32 %v10269_v8, %v13525_v49  ;;  %v13527_v10 = vld [vmem:[#allocation128_spill] sm:$0xff] }
 0x57f   :  { %13518 = vst [vmem:[#allocation7_spill] sm:$0xff] %v10339_v25  ;;  %v10359_v61 = vmul.f32 %v10269_v8, %v13527_v10  ;;  %v13529_v25 = vld [vmem:[#allocation130_spill] sm:$0xff] }
 0x580   :  { %13520 = vst [vmem:[#allocation8_spill] sm:$0xff] %v10343_v18  ;;  %v10363_v15 = vmul.f32 %v10269_v8, %v13529_v25  ;;  %v13531_v18 = vld [vmem:[#allocation132_spill] sm:$0xff] }
 0x581   :  { %13522 = vst [vmem:[#allocation9_spill] sm:$0xff] %v10347_v35  ;;  %v10367_v42 = vmul.f32 %v10269_v8, %v13531_v18  ;;  %v13533_v35 = vld [vmem:[#allocation134_spill] sm:$0xff] }
 0x582   :  { %13524 = vst [vmem:[#allocation10_spill] sm:$0xff] %v10351_v17  ;;  %v10371_v19 = vmul.f32 %v10269_v8, %v13533_v35  ;;  %v13535_v17 = vld [vmem:[#allocation136_spill] sm:$0xff] }
 0x583   :  { %13526 = vst [vmem:[#allocation104_spill] sm:$0xff] %v10355_v62  ;;  %v10375_v49 = vmul.f32 %v10269_v8, %v13535_v17  ;;  %v13537_v62 = vld [vmem:[#allocation138_spill] sm:$0xff] }
 0x584   :  { %13528 = vst [vmem:[#allocation106_spill] sm:$0xff] %v10359_v61  ;;  %v10379_v10 = vmul.f32 %v10269_v8, %v13537_v62  ;;  %v13539_v61 = vld [vmem:[#allocation140_spill] sm:$0xff] }
 0x585   :  { %13530 = vst [vmem:[#allocation108_spill] sm:$0xff] %v10363_v15  ;;  %v10383_v25 = vmul.f32 %v10269_v8, %v13539_v61  ;;  %v13540_v15 = vld [vmem:[#allocation142_spill] sm:$0xff] }
 0x586   :  { %13532 = vst [vmem:[#allocation110_spill] sm:$0xff] %v10367_v42  ;;  %v10387_v18 = vmul.f32 %v10269_v8, %v13540_v15  ;;  %v13542_v42 = vld [vmem:[#allocation144_spill] sm:$0xff]  ;;  %v10407_v15 = vmul.f32 %v10269_v8, %v13393_v21  ;;  %v10427_v21 = vmul.f32 %v10269_v8, %v9012_v41 }
 0x587   :  { %13534 = vst [vmem:[#allocation112_spill] sm:$0xff] %v10371_v19  ;;  %v10391_v35 = vmul.f32 %v10269_v8, %v13542_v42  ;;  %v13544_v19 = vld [vmem:[#allocation146_spill] sm:$0xff] }
 0x588   :  { %13536 = vst [vmem:[#allocation114_spill] sm:$0xff] %v10375_v49  ;;  %v10395_v17 = vmul.f32 %v10269_v8, %v13544_v19  ;;  %v13546_v49 = vld [vmem:[#allocation148_spill] sm:$0xff] }
 0x589   :  { %13538 = vst [vmem:[#allocation116_spill] sm:$0xff] %v10379_v10  ;;  %v10399_v62 = vmul.f32 %v10269_v8, %v13546_v49  ;;  %v13548_v10 = vld [vmem:[#allocation150_spill] sm:$0xff] }
 0x58a   :  { %13541 = vst [vmem:[#allocation118_spill] sm:$0xff] %v10387_v18  ;;  %v10403_v61 = vmul.f32 %v10269_v8, %v13548_v10  ;;  %v13550_v18 = vld [vmem:[#allocation154_spill] sm:$0xff] }
 0x58b   :  { %13543 = vst [vmem:[#allocation120_spill] sm:$0xff] %v10391_v35  ;;  %v10411_v42 = vmul.f32 %v10269_v8, %v13550_v18  ;;  %v13552_v35 = vld [vmem:[#allocation156_spill] sm:$0xff] }
 0x58c   :  { %13545 = vst [vmem:[#allocation122_spill] sm:$0xff] %v10395_v17  ;;  %v10415_v19 = vmul.f32 %v10269_v8, %v13552_v35  ;;  %v13553_v17 = vld [vmem:[#allocation158_spill] sm:$0xff] }
 0x58d   :  { %13547 = vst [vmem:[#allocation124_spill] sm:$0xff] %v10399_v62  ;;  %v10419_v49 = vmul.f32 %v10269_v8, %v13553_v17  ;;  %v13555_v62 = vld [vmem:[#allocation160_spill] sm:$0xff]  ;;  %v10439_v17 = vmul.f32 %v10269_v8, %v9096_v13  ;;  %v10459_v13 = vmul.f32 %v10269_v8, %v9268_v55 }
 0x58e   :  { %13549 = vst [vmem:[#allocation126_spill] sm:$0xff] %v10407_v15  ;;  %v10423_v10 = vmul.f32 %v10269_v8, %v13555_v62  ;;  %v13558_v15 = vld [vmem:[#allocation162_spill] sm:$0xff] }
 0x58f   :  { %13551 = vst [vmem:[#allocation128_spill] sm:$0xff] %v10411_v42  ;;  %v10431_v18 = vmul.f32 %v10269_v8, %v13558_v15  ;;  %v13560_v42 = vld [vmem:[#allocation163_spill] sm:$0xff] }
 0x590   :  { %13554 = vst [vmem:[#allocation130_spill] sm:$0xff] %v10419_v49  ;;  %v10435_v35 = vmul.f32 %v10269_v8, %v13560_v42  ;;  %v13562_v49 = vld [vmem:[#allocation164_spill] sm:$0xff] }
 0x591   :  { %13556 = vst [vmem:[#allocation132_spill] sm:$0xff] %v10423_v10  ;;  %v10443_v62 = vmul.f32 %v10269_v8, %v13562_v49  ;;  %v13564_v10 = vld [vmem:[#allocation165_spill] sm:$0xff] }
 0x592   :  { %13557 = vst [vmem:[#allocation134_spill] sm:$0xff] %v10427_v21  ;;  %v10447_v41 = vmul.f32 %v10269_v8, %v13564_v10  ;;  %v13566_v21 = vld [vmem:[#allocation166_spill] sm:$0xff] }
 0x593   :  { %13559 = vst [vmem:[#allocation136_spill] sm:$0xff] %v10431_v18  ;;  %v10451_v15 = vmul.f32 %v10269_v8, %v13566_v21  ;;  %v13568_v18 = vld [vmem:[#allocation168_spill] sm:$0xff] }
 0x594   :  { %13561 = vst [vmem:[#allocation138_spill] sm:$0xff] %v10439_v17  ;;  %v10455_v42 = vmul.f32 %v10269_v8, %v13568_v18  ;;  %v13571_v17 = vld [vmem:[#allocation170_spill] sm:$0xff] }
 0x595   :  { %13563 = vst [vmem:[#allocation140_spill] sm:$0xff] %v10443_v62  ;;  %v10463_v49 = vmul.f32 %v10269_v8, %v13571_v17  ;;  %v13573_v62 = vld [vmem:[#allocation172_spill] sm:$0xff] }
 0x596   :  { %13565 = vst [vmem:[#allocation142_spill] sm:$0xff] %v10447_v41  ;;  %v10467_v10 = vmul.f32 %v10269_v8, %v13573_v62  ;;  %v13575_v41 = vld [vmem:[#allocation174_spill] sm:$0xff] }
 0x597   :  { %13567 = vst [vmem:[#allocation144_spill] sm:$0xff] %v10451_v15  ;;  %v10471_v21 = vmul.f32 %v10269_v8, %v13575_v41  ;;  %v13577_v15 = vld [vmem:[#allocation176_spill] sm:$0xff] }
 0x598   :  { %13569 = vst [vmem:[#allocation146_spill] sm:$0xff] %v10455_v42  ;;  %v10475_v18 = vmul.f32 %v10269_v8, %v13577_v15  ;;  %v13579_v42 = vld [vmem:[#allocation178_spill] sm:$0xff] }
 0x599   :  { %13570 = vst [vmem:[#allocation148_spill] sm:$0xff] %v10459_v13  ;;  %v10479_v55 = vmul.f32 %v10269_v8, %v13579_v42  ;;  %v13581_v13 = vld [vmem:[#allocation180_spill] sm:$0xff] }
 0x59a   :  { %13572 = vst [vmem:[#allocation150_spill] sm:$0xff] %v10463_v49  ;;  %v10483_v17 = vmul.f32 %v10269_v8, %v13581_v13  ;;  %v13583_v49 = vld [vmem:[#allocation182_spill] sm:$0xff] }
 0x59b   :  { %13574 = vst [vmem:[#allocation154_spill] sm:$0xff] %v10467_v10  ;;  %v10487_v62 = vmul.f32 %v10269_v8, %v13583_v49  ;;  %v13585_v10 = vld [vmem:[#allocation184_spill] sm:$0xff] }
 0x59c   :  { %13576 = vst [vmem:[#allocation156_spill] sm:$0xff] %v10471_v21  ;;  %v10491_v41 = vmul.f32 %v10269_v8, %v13585_v10  ;;  %v13587_v21 = vld [vmem:[#allocation188_spill] sm:$0xff] }
 0x59d   :  { %13578 = vst [vmem:[#allocation158_spill] sm:$0xff] %v10475_v18  ;;  %v10495_v15 = vmul.f32 %v10269_v8, %v13587_v21  ;;  %v13589_v18 = vld [vmem:[#allocation189_spill] sm:$0xff] }
 0x59e   :  { %13580 = vst [vmem:[#allocation160_spill] sm:$0xff] %v10479_v55  ;;  %v10499_v42 = vmul.f32 %v10269_v8, %v13589_v18  ;;  %v13591_v55 = vld [vmem:[#allocation190_spill] sm:$0xff] }
 0x59f   :  { %13582 = vst [vmem:[#allocation162_spill] sm:$0xff] %v10483_v17  ;;  %v10503_v13 = vmul.f32 %v10269_v8, %v13591_v55  ;;  %v13593_v17 = vld [vmem:[#allocation191_spill] sm:$0xff] }
 0x5a0   :  { %13584 = vst [vmem:[#allocation163_spill] sm:$0xff] %v10487_v62  ;;  %v10507_v49 = vmul.f32 %v10269_v8, %v13593_v17  ;;  %v13595_v62 = vld [vmem:[#allocation192_spill] sm:$0xff] }
 0x5a1   :  { %13586 = vst [vmem:[#allocation164_spill] sm:$0xff] %v10491_v41  ;;  %v10511_v10 = vmul.f32 %v10269_v8, %v13595_v62  ;;  %v13597_v41 = vld [vmem:[#allocation194_spill] sm:$0xff] }
 0x5a2   :  { %13588 = vst [vmem:[#allocation165_spill] sm:$0xff] %v10495_v15  ;;  %v10515_v21 = vmul.f32 %v10269_v8, %v13597_v41  ;;  %v13599_v15 = vld [vmem:[#allocation195_spill] sm:$0xff] }
 0x5a3   :  { %13590 = vst [vmem:[#allocation166_spill] sm:$0xff] %v10499_v42  ;;  %v10519_v18 = vmul.f32 %v10269_v8, %v13599_v15  ;;  %v13601_v42 = vld [vmem:[#allocation196_spill] sm:$0xff] }
 0x5a4   :  { %13592 = vst [vmem:[#allocation168_spill] sm:$0xff] %v10503_v13  ;;  %v10523_v55 = vmul.f32 %v10269_v8, %v13601_v42  ;;  %v13603_v13 = vld [vmem:[#allocation197_spill] sm:$0xff] }
 0x5a5   :  { %13594 = vst [vmem:[#allocation170_spill] sm:$0xff] %v10507_v49  ;;  %v10527_v17 = vmul.f32 %v10269_v8, %v13603_v13  ;;  %v13605_v49 = vld [vmem:[#allocation198_spill] sm:$0xff] }
 0x5a6   :  { %13596 = vst [vmem:[#allocation172_spill] sm:$0xff] %v10511_v10  ;;  %v10531_v62 = vmul.f32 %v10269_v8, %v13605_v49  ;;  %v13607_v10 = vld [vmem:[#allocation199_spill] sm:$0xff] }
 0x5a7   :  { %13598 = vst [vmem:[#allocation174_spill] sm:$0xff] %v10515_v21  ;;  %v10535_v41 = vmul.f32 %v10269_v8, %v13607_v10  ;;  %v13609_v21 = vld [vmem:[#allocation26_spill] sm:$0xff] }
 0x5a8   :  { %13600 = vst [vmem:[#allocation176_spill] sm:$0xff] %v10519_v18  ;;  %v10539_v15 = vmul.f32 %v10269_v8, %v13609_v21  ;;  %v13611_v18 = vld [vmem:[#allocation28_spill] sm:$0xff] }
 0x5a9   :  { %13602 = vst [vmem:[#allocation178_spill] sm:$0xff] %v10523_v55  ;;  %v10543_v42 = vmul.f32 %v10269_v8, %v13611_v18  ;;  %v13613_v55 = vld [vmem:[#allocation30_spill] sm:$0xff] }
 0x5aa   :  { %13604 = vst [vmem:[#allocation180_spill] sm:$0xff] %v10527_v17  ;;  %v10547_v13 = vmul.f32 %v10269_v8, %v13613_v55  ;;  %v13615_v17 = vld [vmem:[#allocation32_spill] sm:$0xff] }
 0x5ab   :  { %13606 = vst [vmem:[#allocation182_spill] sm:$0xff] %v10531_v62  ;;  %v10551_v49 = vmul.f32 %v10269_v8, %v13615_v17  ;;  %v13617_v62 = vld [vmem:[#allocation35_spill] sm:$0xff] }
 0x5ac   :  { %13608 = vst [vmem:[#allocation184_spill] sm:$0xff] %v10535_v41  ;;  %v10555_v10 = vmul.f32 %v10269_v8, %v13617_v62  ;;  %v13619_v41 = vld [vmem:[#allocation37_spill] sm:$0xff] }
 0x5ad   :  { %13610 = vst [vmem:[#allocation188_spill] sm:$0xff] %v10539_v15  ;;  %v10559_v21 = vmul.f32 %v10269_v8, %v13619_v41  ;;  %v13621_v15 = vld [vmem:[#allocation39_spill] sm:$0xff] }
 0x5ae   :  { %13612 = vst [vmem:[#allocation189_spill] sm:$0xff] %v10543_v42  ;;  %v10563_v18 = vmul.f32 %v10269_v8, %v13621_v15  ;;  %v13623_v42 = vld [vmem:[#allocation41_spill] sm:$0xff] }
 0x5af   :  { %13614 = vst [vmem:[#allocation190_spill] sm:$0xff] %v10547_v13  ;;  %v10567_v55 = vmul.f32 %v10269_v8, %v13623_v42  ;;  %v13625_v13 = vld [vmem:[#allocation43_spill] sm:$0xff] }
 0x5b0   :  { %13616 = vst [vmem:[#allocation191_spill] sm:$0xff] %v10551_v49  ;;  %v10571_v17 = vmul.f32 %v10269_v8, %v13625_v13  ;;  %v13627_v49 = vld [vmem:[#allocation45_spill] sm:$0xff] }
 0x5b1   :  { %13618 = vst [vmem:[#allocation192_spill] sm:$0xff] %v10555_v10  ;;  %v10575_v62 = vmul.f32 %v10269_v8, %v13627_v49  ;;  %v13629_v10 = vld [vmem:[#allocation47_spill] sm:$0xff] }
 0x5b2   :  { %13620 = vst [vmem:[#allocation194_spill] sm:$0xff] %v10559_v21  ;;  %v10579_v41 = vmul.f32 %v10269_v8, %v13629_v10  ;;  %v13631_v21 = vld [vmem:[#allocation49_spill] sm:$0xff] }
 0x5b3   :  { %13622 = vst [vmem:[#allocation195_spill] sm:$0xff] %v10563_v18  ;;  %v10583_v15 = vmul.f32 %v10269_v8, %v13631_v21  ;;  %v13633_v18 = vld [vmem:[#allocation51_spill] sm:$0xff] }
 0x5b4   :  { %13624 = vst [vmem:[#allocation196_spill] sm:$0xff] %v10567_v55  ;;  %v10587_v42 = vmul.f32 %v10269_v8, %v13633_v18  ;;  %v13635_v55 = vld [vmem:[#allocation53_spill] sm:$0xff] }
 0x5b5   :  { %13626 = vst [vmem:[#allocation197_spill] sm:$0xff] %v10571_v17  ;;  %v10591_v13 = vmul.f32 %v10269_v8, %v13635_v55  ;;  %v13637_v17 = vld [vmem:[#allocation55_spill] sm:$0xff] }
 0x5b6   :  { %13628 = vst [vmem:[#allocation198_spill] sm:$0xff] %v10575_v62  ;;  %v10595_v49 = vmul.f32 %v10269_v8, %v13637_v17  ;;  %v13639_v62 = vld [vmem:[#allocation57_spill] sm:$0xff] }
 0x5b7   :  { %13630 = vst [vmem:[#allocation199_spill] sm:$0xff] %v10579_v41  ;;  %v10599_v10 = vmul.f32 %v10269_v8, %v13639_v62  ;;  %v13641_v41 = vld [vmem:[#allocation59_spill] sm:$0xff] }
 0x5b8   :  { %13632 = vst [vmem:[#allocation26_spill] sm:$0xff] %v10583_v15  ;;  %v10603_v21 = vmul.f32 %v10269_v8, %v13641_v41  ;;  %v13643_v15 = vld [vmem:[#allocation61_spill] sm:$0xff] }
 0x5b9   :  { %13634 = vst [vmem:[#allocation28_spill] sm:$0xff] %v10587_v42  ;;  %v10607_v18 = vmul.f32 %v10269_v8, %v13643_v15  ;;  %v13645_v42 = vld [vmem:[#allocation63_spill] sm:$0xff] }
 0x5ba   :  { %13636 = vst [vmem:[#allocation30_spill] sm:$0xff] %v10591_v13  ;;  %v10611_v55 = vmul.f32 %v10269_v8, %v13645_v42  ;;  %v13647_v13 = vld [vmem:[#allocation65_spill] sm:$0xff] }
 0x5bb   :  { %13638 = vst [vmem:[#allocation32_spill] sm:$0xff] %v10595_v49  ;;  %v10615_v17 = vmul.f32 %v10269_v8, %v13647_v13  ;;  %v13649_v49 = vld [vmem:[#allocation67_spill] sm:$0xff] }
 0x5bc   :  { %13640 = vst [vmem:[#allocation35_spill] sm:$0xff] %v10599_v10  ;;  %v10619_v62 = vmul.f32 %v10269_v8, %v13649_v49  ;;  %v13651_v10 = vld [vmem:[#allocation69_spill] sm:$0xff] }
 0x5bd   :  { %13642 = vst [vmem:[#allocation37_spill] sm:$0xff] %v10603_v21  ;;  %v10623_v41 = vmul.f32 %v10269_v8, %v13651_v10  ;;  %v13653_v21 = vld [vmem:[#allocation71_spill] sm:$0xff] }
 0x5be   :  { %13644 = vst [vmem:[#allocation39_spill] sm:$0xff] %v10607_v18  ;;  %v10627_v15 = vmul.f32 %v10269_v8, %v13653_v21  ;;  %v13655_v18 = vld [vmem:[#allocation73_spill] sm:$0xff] }
 0x5bf   :  { %13646 = vst [vmem:[#allocation41_spill] sm:$0xff] %v10611_v55  ;;  %v10631_v42 = vmul.f32 %v10269_v8, %v13655_v18  ;;  %v13657_v55 = vld [vmem:[#allocation75_spill] sm:$0xff] }
 0x5c0   :  { %13648 = vst [vmem:[#allocation43_spill] sm:$0xff] %v10615_v17  ;;  %v10635_v13 = vmul.f32 %v10269_v8, %v13657_v55  ;;  %v13659_v17 = vld [vmem:[#allocation77_spill] sm:$0xff] }
 0x5c1   :  { %13650 = vst [vmem:[#allocation45_spill] sm:$0xff] %v10619_v62  ;;  %v10639_v49 = vmul.f32 %v10269_v8, %v13659_v17  ;;  %v13661_v62 = vld [vmem:[#allocation79_spill] sm:$0xff] }
 0x5c2   :  { %13652 = vst [vmem:[#allocation47_spill] sm:$0xff] %v10623_v41  ;;  %v10643_v10 = vmul.f32 %v10269_v8, %v13661_v62  ;;  %v13663_v41 = vld [vmem:[#allocation81_spill] sm:$0xff] }
 0x5c3   :  { %13654 = vst [vmem:[#allocation49_spill] sm:$0xff] %v10627_v15  ;;  %v10647_v21 = vmul.f32 %v10269_v8, %v13663_v41  ;;  %v13665_v15 = vld [vmem:[#allocation83_spill] sm:$0xff] }
 0x5c4   :  { %13656 = vst [vmem:[#allocation51_spill] sm:$0xff] %v10631_v42  ;;  %v10651_v18 = vmul.f32 %v10269_v8, %v13665_v15  ;;  %v13667_v42 = vld [vmem:[#allocation85_spill] sm:$0xff] }
 0x5c5   :  { %13658 = vst [vmem:[#allocation53_spill] sm:$0xff] %v10635_v13  ;;  %v10655_v55 = vmul.f32 %v10269_v8, %v13667_v42  ;;  %v13669_v13 = vld [vmem:[#allocation87_spill] sm:$0xff] }
 0x5c6   :  { %13660 = vst [vmem:[#allocation55_spill] sm:$0xff] %v10639_v49  ;;  %v10659_v17 = vmul.f32 %v10269_v8, %v13669_v13  ;;  %v13671_v49 = vld [vmem:[#allocation89_spill] sm:$0xff] }
 0x5c7   :  { %13662 = vst [vmem:[#allocation57_spill] sm:$0xff] %v10643_v10  ;;  %v10663_v62 = vmul.f32 %v10269_v8, %v13671_v49  ;;  %v13673_v10 = vld [vmem:[#allocation91_spill] sm:$0xff] }
 0x5c8   :  { %13664 = vst [vmem:[#allocation59_spill] sm:$0xff] %v10647_v21  ;;  %v10667_v41 = vmul.f32 %v10269_v8, %v13673_v10  ;;  %v13675_v21 = vld [vmem:[#allocation93_spill] sm:$0xff] }
 0x5c9   :  { %13666 = vst [vmem:[#allocation61_spill] sm:$0xff] %v10651_v18  ;;  %v10671_v15 = vmul.f32 %v10269_v8, %v13675_v21  ;;  %v13677_v18 = vld [vmem:[#allocation95_spill] sm:$0xff] }
 0x5ca   :  { %13668 = vst [vmem:[#allocation63_spill] sm:$0xff] %v10655_v55  ;;  %v10675_v42 = vmul.f32 %v10269_v8, %v13677_v18  ;;  %v13679_v55 = vld [vmem:[#allocation97_spill] sm:$0xff] }
 0x5cb   :  { %13670 = vst [vmem:[#allocation65_spill] sm:$0xff] %v10659_v17  ;;  %v10679_v13 = vmul.f32 %v10269_v8, %v13679_v55  ;;  %v13681_v17 = vld [vmem:[#allocation99_spill] sm:$0xff] }
 0x5cc   :  { %13672 = vst [vmem:[#allocation67_spill] sm:$0xff] %v10663_v62  ;;  %v10683_v49 = vmul.f32 %v10269_v8, %v13681_v17  ;;  %v13683_v62 = vld [vmem:[#allocation101_spill] sm:$0xff] }
 0x5cd   :  { %13674 = vst [vmem:[#allocation69_spill] sm:$0xff] %v10667_v41  ;;  %v10687_v10 = vmul.f32 %v10269_v8, %v13683_v62  ;;  %v13685_v41 = vld [vmem:[#allocation103_spill] sm:$0xff] }
 0x5ce   :  { %13676 = vst [vmem:[#allocation71_spill] sm:$0xff] %v10671_v15  ;;  %v10691_v21 = vmul.f32 %v10269_v8, %v13685_v41  ;;  %v13687_v15 = vld [vmem:[#allocation105_spill] sm:$0xff] }
 0x5cf   :  { %13678 = vst [vmem:[#allocation73_spill] sm:$0xff] %v10675_v42  ;;  %v10695_v18 = vmul.f32 %v10269_v8, %v13687_v15  ;;  %v13689_v42 = vld [vmem:[#allocation107_spill] sm:$0xff] }
 0x5d0   :  { %13680 = vst [vmem:[#allocation75_spill] sm:$0xff] %v10679_v13  ;;  %v10699_v55 = vmul.f32 %v10269_v8, %v13689_v42  ;;  %v13691_v13 = vld [vmem:[#allocation109_spill] sm:$0xff] }
 0x5d1   :  { %13682 = vst [vmem:[#allocation77_spill] sm:$0xff] %v10683_v49  ;;  %v10703_v17 = vmul.f32 %v10269_v8, %v13691_v13  ;;  %v13693_v49 = vld [vmem:[#allocation111_spill] sm:$0xff] }
 0x5d2   :  { %13684 = vst [vmem:[#allocation79_spill] sm:$0xff] %v10687_v10  ;;  %v10707_v62 = vmul.f32 %v10269_v8, %v13693_v49  ;;  %v13695_v10 = vld [vmem:[#allocation113_spill] sm:$0xff] }
 0x5d3   :  { %13686 = vst [vmem:[#allocation81_spill] sm:$0xff] %v10691_v21  ;;  %v10711_v41 = vmul.f32 %v10269_v8, %v13695_v10  ;;  %v13697_v21 = vld [vmem:[#allocation115_spill] sm:$0xff] }
 0x5d4   :  { %13688 = vst [vmem:[#allocation83_spill] sm:$0xff] %v10695_v18  ;;  %v10715_v15 = vmul.f32 %v10269_v8, %v13697_v21  ;;  %v13699_v18 = vld [vmem:[#allocation117_spill] sm:$0xff] }
 0x5d5   :  { %13690 = vst [vmem:[#allocation85_spill] sm:$0xff] %v10699_v55  ;;  %v10719_v42 = vmul.f32 %v10269_v8, %v13699_v18  ;;  %v13701_v55 = vld [vmem:[#allocation119_spill] sm:$0xff] }
 0x5d6   :  { %13692 = vst [vmem:[#allocation87_spill] sm:$0xff] %v10703_v17  ;;  %v10723_v13 = vmul.f32 %v10269_v8, %v13701_v55  ;;  %v13703_v17 = vld [vmem:[#allocation121_spill] sm:$0xff] }
 0x5d7   :  { %13694 = vst [vmem:[#allocation89_spill] sm:$0xff] %v10707_v62  ;;  %v10727_v49 = vmul.f32 %v10269_v8, %v13703_v17  ;;  %v13705_v62 = vld [vmem:[#allocation123_spill] sm:$0xff] }
 0x5d8   :  { %13696 = vst [vmem:[#allocation91_spill] sm:$0xff] %v10711_v41  ;;  %v10731_v10 = vmul.f32 %v10269_v8, %v13705_v62  ;;  %v13707_v41 = vld [vmem:[#allocation125_spill] sm:$0xff] }
 0x5d9   :  { %13698 = vst [vmem:[#allocation93_spill] sm:$0xff] %v10715_v15  ;;  %v10735_v21 = vmul.f32 %v10269_v8, %v13707_v41  ;;  %v13709_v15 = vld [vmem:[#allocation127_spill] sm:$0xff] }
 0x5da   :  { %13700 = vst [vmem:[#allocation95_spill] sm:$0xff] %v10719_v42  ;;  %v10739_v18 = vmul.f32 %v10269_v8, %v13709_v15  ;;  %v13711_v42 = vld [vmem:[#allocation129_spill] sm:$0xff] }
 0x5db   :  { %13702 = vst [vmem:[#allocation97_spill] sm:$0xff] %v10723_v13  ;;  %v10743_v55 = vmul.f32 %v10269_v8, %v13711_v42  ;;  %v13713_v13 = vld [vmem:[#allocation131_spill] sm:$0xff] }
 0x5dc   :  { %13704 = vst [vmem:[#allocation99_spill] sm:$0xff] %v10727_v49  ;;  %v10747_v17 = vmul.f32 %v10269_v8, %v13713_v13  ;;  %v13715_v49 = vld [vmem:[#allocation133_spill] sm:$0xff] }
 0x5dd   :  { %13706 = vst [vmem:[#allocation101_spill] sm:$0xff] %v10731_v10  ;;  %v10751_v62 = vmul.f32 %v10269_v8, %v13715_v49  ;;  %v13717_v10 = vld [vmem:[#allocation135_spill] sm:$0xff] }
 0x5de   :  { %13708 = vst [vmem:[#allocation103_spill] sm:$0xff] %v10735_v21  ;;  %v10755_v41 = vmul.f32 %v10269_v8, %v13717_v10  ;;  %v13719_v21 = vld [vmem:[#allocation137_spill] sm:$0xff] }
 0x5df   :  { %13710 = vst [vmem:[#allocation105_spill] sm:$0xff] %v10739_v18  ;;  %v10759_v15 = vmul.f32 %v10269_v8, %v13719_v21  ;;  %v13721_v18 = vld [vmem:[#allocation139_spill] sm:$0xff] }
 0x5e0   :  { %13712 = vst [vmem:[#allocation107_spill] sm:$0xff] %v10743_v55  ;;  %v10763_v42 = vmul.f32 %v10269_v8, %v13721_v18  ;;  %v13722_v55 = vld [vmem:[#allocation141_spill] sm:$0xff] }
 0x5e1   :  { %13714 = vst [vmem:[#allocation109_spill] sm:$0xff] %v10747_v17  ;;  %v10767_v13 = vmul.f32 %v10269_v8, %v13722_v55  ;;  %v13723_v17 = vld [vmem:[#allocation143_spill] sm:$0xff]  ;;  %v10787_v55 = vmul.f32 %v10269_v8, %v13476_v4 }
 0x5e2   :  { %13716 = vst [vmem:[#allocation111_spill] sm:$0xff] %v10751_v62  ;;  %v10771_v49 = vmul.f32 %v10269_v8, %v13723_v17  ;;  %v13724_v62 = vld [vmem:[#allocation145_spill] sm:$0xff]  ;;  %v10791_v17 = vmul.f32 %v10269_v8, %v13478_v37  ;;  %v10811_v37 = vmul.f32 %v10269_v8, %v9022_v12  ;;  %v10831_v12 = vmul.f32 %v10269_v8, %v9164_v48 }
 0x5e3   :  { %13718 = vst [vmem:[#allocation113_spill] sm:$0xff] %v10755_v41  ;;  %v10775_v10 = vmul.f32 %v10269_v8, %v13724_v62  ;;  %v13725_v41 = vld [vmem:[#allocation147_spill] sm:$0xff]  ;;  %v10795_v62 = vmul.f32 %v10269_v8, %v13479_v52  ;;  %v10815_v52 = vmul.f32 %v10269_v8, %v9036_v16 }
 0x5e4   :  { %13720 = vst [vmem:[#allocation115_spill] sm:$0xff] %v10759_v15  ;;  %v10779_v21 = vmul.f32 %v10269_v8, %v13725_v41  ;;  %v13727_v15 = vld [vmem:[#allocation149_spill] sm:$0xff]  ;;  %v10799_v41 = vmul.f32 %v10269_v8, %v13480_v44  ;;  %v10819_v44 = vmul.f32 %v10269_v8, %v9086_v38 }
 0x5e5   :  { %v10783_v18 = vmul.f32 %v10269_v8, %v13727_v15  ;;  %13731 = vst [vmem:[#allocation121_spill] sm:$0xff] %v10811_v37  ;;  %v13736_v37 = vld [vmem:[#allocation167_spill] sm:$0xff] }
 0x5e6   :  { %13726 = vst [vmem:[#allocation117_spill] sm:$0xff] %v10779_v21  ;;  %v13729_v21 = vld [vmem:[#allocation159_spill] sm:$0xff]  ;;  %v10835_v16 = vmul.f32 %v10269_v8, %v13736_v37 }
 0x5e7   :  { %13728 = vst [vmem:[#allocation119_spill] sm:$0xff] %v10783_v18  ;;  %v10803_v15 = vmul.f32 %v10269_v8, %v13729_v21  ;;  %v13730_v18 = vld [vmem:[#allocation161_spill] sm:$0xff]  ;;  %v10823_v21 = vmul.f32 %v10269_v8, %v9100_v28  ;;  %v10843_v28 = vmul.f32 %v10269_v8, %v9278_v5 }
 0x5e8   :  { %v10807_v4 = vmul.f32 %v10269_v8, %v13730_v18  ;;  %13732 = vst [vmem:[#allocation123_spill] sm:$0xff] %v10815_v52  ;;  %v10827_v18 = vmul.f32 %v10269_v8, %v9150_v20  ;;  %v13738_v52 = vld [vmem:[#allocation169_spill] sm:$0xff] }
 0x5e9   :  { %13733 = vst [vmem:[#allocation125_spill] sm:$0xff] %v10823_v21  ;;  %v10839_v38 = vmul.f32 %v10269_v8, %v13738_v52  ;;  %v13741_v21 = vld [vmem:[#allocation171_spill] sm:$0xff] }
 0x5ea   :  { %13734 = vst [vmem:[#allocation127_spill] sm:$0xff] %v10827_v18  ;;  %v10847_v20 = vmul.f32 %v10269_v8, %v13741_v21  ;;  %v13743_v18 = vld [vmem:[#allocation173_spill] sm:$0xff] }
 0x5eb   :  { %13735 = vst [vmem:[#allocation129_spill] sm:$0xff] %v10831_v12  ;;  %v10851_v48 = vmul.f32 %v10269_v8, %v13743_v18  ;;  %v13745_v12 = vld [vmem:[#allocation175_spill] sm:$0xff] }
 0x5ec   :  { %13737 = vst [vmem:[#allocation131_spill] sm:$0xff] %v10835_v16  ;;  %v10855_v37 = vmul.f32 %v10269_v8, %v13745_v12  ;;  %v13746_v16 = vld [vmem:[#allocation177_spill] sm:$0xff] }
 0x5ed   :  { %13739 = vst [vmem:[#allocation133_spill] sm:$0xff] %v10839_v38  ;;  %v10859_v52 = vmul.f32 %v10269_v8, %v13746_v16  ;;  %v13747_v38 = vld [vmem:[#allocation179_spill] sm:$0xff]  ;;  %v10879_v16 = vmul.f32 %v10269_v8, %v13489_v47 }
 0x5ee   :  { %13740 = vst [vmem:[#allocation135_spill] sm:$0xff] %v10843_v28  ;;  %v10863_v5 = vmul.f32 %v10269_v8, %v13747_v38  ;;  %v13748_v28 = vld [vmem:[#allocation181_spill] sm:$0xff]  ;;  %v10883_v38 = vmul.f32 %v10269_v8, %v9545_v60  ;;  %v10903_v60 = vmul.f32 %v10269_v8, %v9655_v27  ;;  %v10923_v27 = vmul.f32 %v10269_v8, %v9826_v36 }
 0x5ef   :  { %13742 = vst [vmem:[#allocation137_spill] sm:$0xff] %v10847_v20  ;;  %v10867_v21 = vmul.f32 %v10269_v8, %v13748_v28  ;;  %v13749_v20 = vld [vmem:[#allocation183_spill] sm:$0xff]  ;;  %v10887_v28 = vmul.f32 %v10269_v8, %v13492_v29  ;;  %v10943_v36 = vmul.f32 %v10269_v8, %v9910_v45  ;;  %v10963_v45 = vmul.f32 %v10269_v8, %v10009_v30 }
 0x5f0   :  { %13744 = vst [vmem:[#allocation139_spill] sm:$0xff] %v10851_v48  ;;  %v10871_v18 = vmul.f32 %v10269_v8, %v13749_v20  ;;  %v13750_v48 = vld [vmem:[#allocation185_spill] sm:$0xff]  ;;  %v10891_v20 = vmul.f32 %v10269_v8, %v9594_v3  ;;  %v10911_v3 = vmul.f32 %v10269_v8, %v9716_v40  ;;  %v10931_v40 = vmul.f32 %v10269_v8, %v9867_v59 }
 0x5f1   :  { %v10875_v12 = vmul.f32 %v10269_v8, %v13750_v48  ;;  %13752 = vst [vmem:[#allocation143_spill] sm:$0xff] %v10883_v38  ;;  %v10895_v48 = vmul.f32 %v10269_v8, %v9606_v7  ;;  %v13754_v38 = vld [vmem:[#allocation193_spill] sm:$0xff]  ;;  %v10915_v7 = vmul.f32 %v10269_v8, %v9776_v6  ;;  %v10935_v6 = vmul.f32 %v10269_v8, %v9869_v39 }
 0x5f2   :  { %v10907_v29 = vmul.f32 %v10269_v8, %v13754_v38  ;;  %v10927_v38 = vmul.f32 %v10269_v8, %v9828_v2  ;;  %v10947_v2 = vmul.f32 %v10269_v8, %v9952_v22  ;;  %v10951_v59 = vmul.f32 %v10269_v8, %v9954_v32  ;;  %13756 = vst [vmem:[#allocation147_spill] sm:$0xff] %v10963_v45  ;;  %v13761_v45 = vld [vmem:[#allocation151_spill] sm:$0xff] }
 0x5f3   :  { %13751 = vst [vmem:[#allocation141_spill] sm:$0xff] %v10875_v12  ;;  %v13753_v12 = vld [vmem:[#allocation187_spill] sm:$0xff]  ;;  %v10955_v39 = vmul.f32 %v10269_v8, %v9981_v54  ;;  %v10967_v22 = vmul.f32 %v10269_v8, %v10011_v46  ;;  %v10971_v32 = vmul.f32 %v10269_v8, %v10037_v14  ;;  %v13759_v54 = vsub.f32 %v10267_v43, %v10262_v34  ;;  %v13767_v43 = vld [vmem:[#allocation157_spill] sm:$0xff] }
 0x5f4   :  { %v10899_v47 = vmul.f32 %v10269_v8, %v13753_v12  ;;  %v10919_v12 = vmul.f32 %v10269_v8, %v9781_v57  ;;  %v10939_v57 = vmul.f32 %v10269_v8, %v9908_v63  ;;  %v10959_v63 = vmul.f32 %v10269_v8, %v9983_v31 }
 0x5f5   :  { %13755 = vst [vmem:[#allocation145_spill] sm:$0xff] %v10955_v39  ;;  %v10976_v39 = vperm.slane %v13759_v54, 0  ;;  %v10980_v31 = vmul.f32 %v10269_v8, %v10039_v9  ;;  %v10984_v30 = vmul.f32 %v10269_v8, %v10065_v53  ;;  %v10988_v46 = vmul.f32 %v10269_v8, %v13761_v45  ;;  %v13769_v54 = vld [vmem:[#allocation200_spill] sm:$0xff] }
 0x5f6   :  { %13757 = vst [vmem:[#allocation149_spill] sm:$0xff] %v10967_v22  ;;  %v13763_v22 = vld [vmem:[#allocation153_spill] sm:$0xff]  ;;  %v11000_v9 = vmul.f32 %v10269_v8, %v13767_v43  ;;  %v11004_v53 = vmul.f32 %v10269_v8, %v13769_v54 }
 0x5f7   :  { %13758 = vst [vmem:[#allocation159_spill] sm:$0xff] %v10971_v32  ;;  %v10992_v14 = vmul.f32 %v10269_v8, %v13763_v22  ;;  %v13765_v32 = vld [vmem:[#allocation155_spill] sm:$0xff] }
 0x5f8   :  { %13760 = vst [vmem:[#allocation161_spill] sm:$0xff] %v10984_v30  ;;  %v10996_v34 = vmul.f32 %v10269_v8, %v13765_v32  ;;  %v13770_v30 = vld [vmem:[#allocation186_spill] sm:$0xff] }
 0x5f9   :  { %13762 = vst [vmem:[#allocation167_spill] sm:$0xff] %v10988_v46  ;;  %v11008_v45 = vmul.f32 %v10269_v8, %v13770_v30  ;;  %v13771_v46 = vld [vmem:[#allocation201_spill] sm:$0xff]  ;;  %v11028_v30 = vadd.f32 %v10976_v39, %v10275_v23  ;;  %v11048_v23 = vadd.f32 %v10976_v39, %v10295_v58  ;;  %v11068_v58 = vadd.f32 %v10976_v39, %v10323_v24 }
 0x5fa   :  { %13764 = vst [vmem:[#allocation169_spill] sm:$0xff] %v10992_v14  ;;  %v11012_v22 = vmul.f32 %v10269_v8, %v13771_v46  ;;  %v13772_v14 = vld [vmem:[#allocation152_spill] sm:$0xff]  ;;  %v11032_v46 = vadd.f32 %v10976_v39, %v10279_v1  ;;  %v11052_v1 = vadd.f32 %v10976_v39, %v10299_v33 }
 0x5fb   :  { %13766 = vst [vmem:[#allocation171_spill] sm:$0xff] %v10996_v34  ;;  %v11016_v32 = vmul.f32 %v10269_v8, %v13772_v14  ;;  %v13773_v34 = vld [vmem:[#allocation202_spill] sm:$0xff]  ;;  %v11036_v14 = vadd.f32 %v10976_v39, %v10283_v11  ;;  %v11056_v11 = vadd.f32 %v10976_v39, %v10311_v50 }
 0x5fc   :  { %13768 = vst [vmem:[#allocation173_spill] sm:$0xff] %v11000_v9  ;;  %v11020_v43 = vmul.f32 %v10269_v8, %v13773_v34  ;;  %v13774_v9 = vld [vmem:[#allocation203_spill] sm:$0xff]  ;;  %v11040_v34 = vadd.f32 %v10976_v39, %v10287_v51  ;;  %v11060_v51 = vadd.f32 %v10976_v39, %v10315_v0 }
 0x5fd   :  { %v11024_v54 = vmul.f32 %v10269_v8, %v13774_v9  ;;  %v11044_v9 = vadd.f32 %v10976_v39, %v10291_v56  ;;  %13775 = vst [vmem:[#allocation175_spill] sm:$0xff] %v11048_v23  ;;  %v11064_v56 = vadd.f32 %v10976_v39, %v10319_v26  ;;  %v13781_v23 = vld [vmem:[#allocation4_spill] sm:$0xff] }
 0x5fe   :  { %13776 = vst [vmem:[#allocation177_spill] sm:$0xff] %v11052_v1  ;;  %v11072_v33 = vadd.f32 %v10976_v39, %v13781_v23  ;;  %v13783_v1 = vld [vmem:[#allocation5_spill] sm:$0xff] }
 0x5ff   :  { %13777 = vst [vmem:[#allocation179_spill] sm:$0xff] %v11056_v11  ;;  %v11076_v50 = vadd.f32 %v10976_v39, %v13783_v1  ;;  %v13785_v11 = vld [vmem:[#allocation6_spill] sm:$0xff] }
 0x600   :  { %13778 = vst [vmem:[#allocation181_spill] sm:$0xff] %v11060_v51  ;;  %v11080_v0 = vadd.f32 %v10976_v39, %v13785_v11  ;;  %v13787_v51 = vld [vmem:[#allocation7_spill] sm:$0xff] }
 0x601   :  { %13779 = vst [vmem:[#allocation183_spill] sm:$0xff] %v11064_v56  ;;  %v11084_v26 = vadd.f32 %v10976_v39, %v13787_v51  ;;  %v13789_v56 = vld [vmem:[#allocation8_spill] sm:$0xff] }
 0x602   :  { %13780 = vst [vmem:[#allocation185_spill] sm:$0xff] %v11068_v58  ;;  %v11088_v24 = vadd.f32 %v10976_v39, %v13789_v56  ;;  %v13791_v58 = vld [vmem:[#allocation9_spill] sm:$0xff] }
 0x603   :  { %13782 = vst [vmem:[#allocation187_spill] sm:$0xff] %v11072_v33  ;;  %v11092_v23 = vadd.f32 %v10976_v39, %v13791_v58  ;;  %v13793_v33 = vld [vmem:[#allocation10_spill] sm:$0xff] }
 0x604   :  { %13784 = vst [vmem:[#allocation193_spill] sm:$0xff] %v11076_v50  ;;  %v11096_v1 = vadd.f32 %v10976_v39, %v13793_v33  ;;  %v13795_v50 = vld [vmem:[#allocation104_spill] sm:$0xff] }
 0x605   :  { %13786 = vst [vmem:[#allocation151_spill] sm:$0xff] %v11080_v0  ;;  %v11100_v11 = vadd.f32 %v10976_v39, %v13795_v50  ;;  %v13797_v0 = vld [vmem:[#allocation106_spill] sm:$0xff] }
 0x606   :  { %13788 = vst [vmem:[#allocation153_spill] sm:$0xff] %v11084_v26  ;;  %v11104_v51 = vadd.f32 %v10976_v39, %v13797_v0  ;;  %v13798_v26 = vld [vmem:[#allocation108_spill] sm:$0xff] }
 0x607   :  { %13790 = vst [vmem:[#allocation155_spill] sm:$0xff] %v11088_v24  ;;  %v11108_v56 = vadd.f32 %v10976_v39, %v13798_v26  ;;  %v13800_v24 = vld [vmem:[#allocation110_spill] sm:$0xff]  ;;  %v11128_v26 = vadd.f32 %v10976_v39, %v10383_v25  ;;  %v11148_v25 = vadd.f32 %v10976_v39, %v10403_v61 }
 0x608   :  { %13792 = vst [vmem:[#allocation157_spill] sm:$0xff] %v11092_v23  ;;  %v11112_v58 = vadd.f32 %v10976_v39, %v13800_v24  ;;  %v13802_v23 = vld [vmem:[#allocation112_spill] sm:$0xff] }
 0x609   :  { %13794 = vst [vmem:[#allocation200_spill] sm:$0xff] %v11096_v1  ;;  %v11116_v33 = vadd.f32 %v10976_v39, %v13802_v23  ;;  %v13804_v1 = vld [vmem:[#allocation114_spill] sm:$0xff] }
 0x60a   :  { %13796 = vst [vmem:[#allocation186_spill] sm:$0xff] %v11100_v11  ;;  %v11120_v50 = vadd.f32 %v10976_v39, %v13804_v1  ;;  %v13806_v11 = vld [vmem:[#allocation116_spill] sm:$0xff] }
 0x60b   :  { %13799 = vst [vmem:[#allocation201_spill] sm:$0xff] %v11108_v56  ;;  %v11124_v0 = vadd.f32 %v10976_v39, %v13806_v11  ;;  %v13808_v56 = vld [vmem:[#allocation118_spill] sm:$0xff] }
 0x60c   :  { %13801 = vst [vmem:[#allocation152_spill] sm:$0xff] %v11112_v58  ;;  %v11132_v24 = vadd.f32 %v10976_v39, %v13808_v56  ;;  %v13810_v58 = vld [vmem:[#allocation120_spill] sm:$0xff] }
 0x60d   :  { %13803 = vst [vmem:[#allocation202_spill] sm:$0xff] %v11116_v33  ;;  %v11136_v23 = vadd.f32 %v10976_v39, %v13810_v58  ;;  %v13811_v33 = vld [vmem:[#allocation122_spill] sm:$0xff] }
 0x60e   :  { %13805 = vst [vmem:[#allocation203_spill] sm:$0xff] %v11120_v50  ;;  %v11140_v1 = vadd.f32 %v10976_v39, %v13811_v33  ;;  %v13813_v50 = vld [vmem:[#allocation124_spill] sm:$0xff]  ;;  %v11160_v33 = vadd.f32 %v10976_v39, %v10415_v19  ;;  %v11180_v19 = vadd.f32 %v10976_v39, %v10435_v35 }
 0x60f   :  { %13807 = vst [vmem:[#allocation4_spill] sm:$0xff] %v11128_v26  ;;  %v11144_v11 = vadd.f32 %v10976_v39, %v13813_v50  ;;  %v13816_v26 = vld [vmem:[#allocation126_spill] sm:$0xff] }
 0x610   :  { %13809 = vst [vmem:[#allocation5_spill] sm:$0xff] %v11132_v24  ;;  %v11152_v56 = vadd.f32 %v10976_v39, %v13816_v26  ;;  %v13818_v24 = vld [vmem:[#allocation128_spill] sm:$0xff] }
 0x611   :  { %13812 = vst [vmem:[#allocation6_spill] sm:$0xff] %v11140_v1  ;;  %v11156_v58 = vadd.f32 %v10976_v39, %v13818_v24  ;;  %v13820_v1 = vld [vmem:[#allocation130_spill] sm:$0xff] }
 0x612   :  { %13814 = vst [vmem:[#allocation7_spill] sm:$0xff] %v11144_v11  ;;  %v11164_v50 = vadd.f32 %v10976_v39, %v13820_v1  ;;  %v13822_v11 = vld [vmem:[#allocation132_spill] sm:$0xff] }
 0x613   :  { %13815 = vst [vmem:[#allocation8_spill] sm:$0xff] %v11148_v25  ;;  %v11168_v61 = vadd.f32 %v10976_v39, %v13822_v11  ;;  %v13824_v25 = vld [vmem:[#allocation134_spill] sm:$0xff] }
 0x614   :  { %13817 = vst [vmem:[#allocation9_spill] sm:$0xff] %v11152_v56  ;;  %v11172_v26 = vadd.f32 %v10976_v39, %v13824_v25  ;;  %v13826_v56 = vld [vmem:[#allocation136_spill] sm:$0xff] }
 0x615   :  { %13819 = vst [vmem:[#allocation10_spill] sm:$0xff] %v11160_v33  ;;  %v11176_v24 = vadd.f32 %v10976_v39, %v13826_v56  ;;  %v13829_v33 = vld [vmem:[#allocation138_spill] sm:$0xff] }
 0x616   :  { %13821 = vst [vmem:[#allocation104_spill] sm:$0xff] %v11164_v50  ;;  %v11184_v1 = vadd.f32 %v10976_v39, %v13829_v33  ;;  %v13831_v50 = vld [vmem:[#allocation140_spill] sm:$0xff] }
 0x617   :  { %13823 = vst [vmem:[#allocation106_spill] sm:$0xff] %v11168_v61  ;;  %v11188_v11 = vadd.f32 %v10976_v39, %v13831_v50  ;;  %v13833_v61 = vld [vmem:[#allocation142_spill] sm:$0xff] }
 0x618   :  { %13825 = vst [vmem:[#allocation108_spill] sm:$0xff] %v11172_v26  ;;  %v11192_v25 = vadd.f32 %v10976_v39, %v13833_v61  ;;  %v13835_v26 = vld [vmem:[#allocation144_spill] sm:$0xff] }
 0x619   :  { %13827 = vst [vmem:[#allocation110_spill] sm:$0xff] %v11176_v24  ;;  %v11196_v56 = vadd.f32 %v10976_v39, %v13835_v26  ;;  %v13837_v24 = vld [vmem:[#allocation146_spill] sm:$0xff] }
 0x61a   :  { %13828 = vst [vmem:[#allocation112_spill] sm:$0xff] %v11180_v19  ;;  %v11200_v35 = vadd.f32 %v10976_v39, %v13837_v24  ;;  %v13839_v19 = vld [vmem:[#allocation148_spill] sm:$0xff] }
 0x61b   :  { %13830 = vst [vmem:[#allocation114_spill] sm:$0xff] %v11184_v1  ;;  %v11204_v33 = vadd.f32 %v10976_v39, %v13839_v19  ;;  %v13841_v1 = vld [vmem:[#allocation150_spill] sm:$0xff] }
 0x61c   :  { %13832 = vst [vmem:[#allocation116_spill] sm:$0xff] %v11188_v11  ;;  %v11208_v50 = vadd.f32 %v10976_v39, %v13841_v1  ;;  %v13843_v11 = vld [vmem:[#allocation154_spill] sm:$0xff] }
 0x61d   :  { %13834 = vst [vmem:[#allocation118_spill] sm:$0xff] %v11192_v25  ;;  %v11212_v61 = vadd.f32 %v10976_v39, %v13843_v11  ;;  %v13845_v25 = vld [vmem:[#allocation156_spill] sm:$0xff] }
 0x61e   :  { %13836 = vst [vmem:[#allocation120_spill] sm:$0xff] %v11196_v56  ;;  %v11216_v26 = vadd.f32 %v10976_v39, %v13845_v25  ;;  %v13847_v56 = vld [vmem:[#allocation158_spill] sm:$0xff] }
 0x61f   :  { %13838 = vst [vmem:[#allocation122_spill] sm:$0xff] %v11200_v35  ;;  %v11220_v24 = vadd.f32 %v10976_v39, %v13847_v56  ;;  %v13849_v35 = vld [vmem:[#allocation160_spill] sm:$0xff] }
 0x620   :  { %13840 = vst [vmem:[#allocation124_spill] sm:$0xff] %v11204_v33  ;;  %v11224_v19 = vadd.f32 %v10976_v39, %v13849_v35  ;;  %v13851_v33 = vld [vmem:[#allocation162_spill] sm:$0xff] }
 0x621   :  { %13842 = vst [vmem:[#allocation126_spill] sm:$0xff] %v11208_v50  ;;  %v11228_v1 = vadd.f32 %v10976_v39, %v13851_v33  ;;  %v13853_v50 = vld [vmem:[#allocation163_spill] sm:$0xff] }
 0x622   :  { %13844 = vst [vmem:[#allocation128_spill] sm:$0xff] %v11212_v61  ;;  %v11232_v11 = vadd.f32 %v10976_v39, %v13853_v50  ;;  %v13855_v61 = vld [vmem:[#allocation164_spill] sm:$0xff] }
 0x623   :  { %13846 = vst [vmem:[#allocation130_spill] sm:$0xff] %v11216_v26  ;;  %v11236_v25 = vadd.f32 %v10976_v39, %v13855_v61  ;;  %v13857_v26 = vld [vmem:[#allocation165_spill] sm:$0xff] }
 0x624   :  { %13848 = vst [vmem:[#allocation132_spill] sm:$0xff] %v11220_v24  ;;  %v11240_v56 = vadd.f32 %v10976_v39, %v13857_v26  ;;  %v13859_v24 = vld [vmem:[#allocation166_spill] sm:$0xff] }
 0x625   :  { %13850 = vst [vmem:[#allocation134_spill] sm:$0xff] %v11224_v19  ;;  %v11244_v35 = vadd.f32 %v10976_v39, %v13859_v24  ;;  %v13861_v19 = vld [vmem:[#allocation168_spill] sm:$0xff] }
 0x626   :  { %13852 = vst [vmem:[#allocation136_spill] sm:$0xff] %v11228_v1  ;;  %v11248_v33 = vadd.f32 %v10976_v39, %v13861_v19  ;;  %v13863_v1 = vld [vmem:[#allocation170_spill] sm:$0xff] }
 0x627   :  { %13854 = vst [vmem:[#allocation138_spill] sm:$0xff] %v11232_v11  ;;  %v11252_v50 = vadd.f32 %v10976_v39, %v13863_v1  ;;  %v13865_v11 = vld [vmem:[#allocation172_spill] sm:$0xff] }
 0x628   :  { %13856 = vst [vmem:[#allocation140_spill] sm:$0xff] %v11236_v25  ;;  %v11256_v61 = vadd.f32 %v10976_v39, %v13865_v11  ;;  %v13867_v25 = vld [vmem:[#allocation174_spill] sm:$0xff] }
 0x629   :  { %13858 = vst [vmem:[#allocation142_spill] sm:$0xff] %v11240_v56  ;;  %v11260_v26 = vadd.f32 %v10976_v39, %v13867_v25  ;;  %v13869_v56 = vld [vmem:[#allocation176_spill] sm:$0xff] }
 0x62a   :  { %13860 = vst [vmem:[#allocation144_spill] sm:$0xff] %v11244_v35  ;;  %v11264_v24 = vadd.f32 %v10976_v39, %v13869_v56  ;;  %v13871_v35 = vld [vmem:[#allocation178_spill] sm:$0xff] }
 0x62b   :  { %13862 = vst [vmem:[#allocation146_spill] sm:$0xff] %v11248_v33  ;;  %v11268_v19 = vadd.f32 %v10976_v39, %v13871_v35  ;;  %v13873_v33 = vld [vmem:[#allocation180_spill] sm:$0xff] }
 0x62c   :  { %13864 = vst [vmem:[#allocation148_spill] sm:$0xff] %v11252_v50  ;;  %v11272_v1 = vadd.f32 %v10976_v39, %v13873_v33  ;;  %v13875_v50 = vld [vmem:[#allocation182_spill] sm:$0xff] }
 0x62d   :  { %13866 = vst [vmem:[#allocation150_spill] sm:$0xff] %v11256_v61  ;;  %v11276_v11 = vadd.f32 %v10976_v39, %v13875_v50  ;;  %v13877_v61 = vld [vmem:[#allocation184_spill] sm:$0xff] }
 0x62e   :  { %13868 = vst [vmem:[#allocation154_spill] sm:$0xff] %v11260_v26  ;;  %v11280_v25 = vadd.f32 %v10976_v39, %v13877_v61  ;;  %v13879_v26 = vld [vmem:[#allocation188_spill] sm:$0xff] }
 0x62f   :  { %13870 = vst [vmem:[#allocation156_spill] sm:$0xff] %v11264_v24  ;;  %v11284_v56 = vadd.f32 %v10976_v39, %v13879_v26  ;;  %v13881_v24 = vld [vmem:[#allocation189_spill] sm:$0xff] }
 0x630   :  { %13872 = vst [vmem:[#allocation158_spill] sm:$0xff] %v11268_v19  ;;  %v11288_v35 = vadd.f32 %v10976_v39, %v13881_v24  ;;  %v13883_v19 = vld [vmem:[#allocation190_spill] sm:$0xff] }
 0x631   :  { %13874 = vst [vmem:[#allocation160_spill] sm:$0xff] %v11272_v1  ;;  %v11292_v33 = vadd.f32 %v10976_v39, %v13883_v19  ;;  %v13885_v1 = vld [vmem:[#allocation191_spill] sm:$0xff] }
 0x632   :  { %13876 = vst [vmem:[#allocation162_spill] sm:$0xff] %v11276_v11  ;;  %v11296_v50 = vadd.f32 %v10976_v39, %v13885_v1  ;;  %v13887_v11 = vld [vmem:[#allocation192_spill] sm:$0xff] }
 0x633   :  { %13878 = vst [vmem:[#allocation163_spill] sm:$0xff] %v11280_v25  ;;  %v11300_v61 = vadd.f32 %v10976_v39, %v13887_v11  ;;  %v13889_v25 = vld [vmem:[#allocation194_spill] sm:$0xff] }
 0x634   :  { %13880 = vst [vmem:[#allocation164_spill] sm:$0xff] %v11284_v56  ;;  %v11304_v26 = vadd.f32 %v10976_v39, %v13889_v25  ;;  %v13891_v56 = vld [vmem:[#allocation195_spill] sm:$0xff] }
 0x635   :  { %13882 = vst [vmem:[#allocation165_spill] sm:$0xff] %v11288_v35  ;;  %v11308_v24 = vadd.f32 %v10976_v39, %v13891_v56  ;;  %v13893_v35 = vld [vmem:[#allocation196_spill] sm:$0xff] }
 0x636   :  { %13884 = vst [vmem:[#allocation166_spill] sm:$0xff] %v11292_v33  ;;  %v11312_v19 = vadd.f32 %v10976_v39, %v13893_v35  ;;  %v13895_v33 = vld [vmem:[#allocation197_spill] sm:$0xff] }
 0x637   :  { %13886 = vst [vmem:[#allocation168_spill] sm:$0xff] %v11296_v50  ;;  %v11316_v1 = vadd.f32 %v10976_v39, %v13895_v33  ;;  %v13897_v50 = vld [vmem:[#allocation198_spill] sm:$0xff] }
 0x638   :  { %13888 = vst [vmem:[#allocation170_spill] sm:$0xff] %v11300_v61  ;;  %v11320_v11 = vadd.f32 %v10976_v39, %v13897_v50  ;;  %v13899_v61 = vld [vmem:[#allocation199_spill] sm:$0xff] }
 0x639   :  { %13890 = vst [vmem:[#allocation172_spill] sm:$0xff] %v11304_v26  ;;  %v11324_v25 = vadd.f32 %v10976_v39, %v13899_v61  ;;  %v13901_v26 = vld [vmem:[#allocation26_spill] sm:$0xff] }
 0x63a   :  { %13892 = vst [vmem:[#allocation174_spill] sm:$0xff] %v11308_v24  ;;  %v11328_v56 = vadd.f32 %v10976_v39, %v13901_v26  ;;  %v13903_v24 = vld [vmem:[#allocation28_spill] sm:$0xff] }
 0x63b   :  { %13894 = vst [vmem:[#allocation176_spill] sm:$0xff] %v11312_v19  ;;  %v11332_v35 = vadd.f32 %v10976_v39, %v13903_v24  ;;  %v13905_v19 = vld [vmem:[#allocation30_spill] sm:$0xff] }
 0x63c   :  { %13896 = vst [vmem:[#allocation178_spill] sm:$0xff] %v11316_v1  ;;  %v11336_v33 = vadd.f32 %v10976_v39, %v13905_v19  ;;  %v13907_v1 = vld [vmem:[#allocation32_spill] sm:$0xff] }
 0x63d   :  { %13898 = vst [vmem:[#allocation180_spill] sm:$0xff] %v11320_v11  ;;  %v11340_v50 = vadd.f32 %v10976_v39, %v13907_v1  ;;  %v13909_v11 = vld [vmem:[#allocation35_spill] sm:$0xff] }
 0x63e   :  { %13900 = vst [vmem:[#allocation182_spill] sm:$0xff] %v11324_v25  ;;  %v11344_v61 = vadd.f32 %v10976_v39, %v13909_v11  ;;  %v13911_v25 = vld [vmem:[#allocation37_spill] sm:$0xff] }
 0x63f   :  { %13902 = vst [vmem:[#allocation184_spill] sm:$0xff] %v11328_v56  ;;  %v11348_v26 = vadd.f32 %v10976_v39, %v13911_v25  ;;  %v13913_v56 = vld [vmem:[#allocation39_spill] sm:$0xff] }
 0x640   :  { %13904 = vst [vmem:[#allocation188_spill] sm:$0xff] %v11332_v35  ;;  %v11352_v24 = vadd.f32 %v10976_v39, %v13913_v56  ;;  %v13915_v35 = vld [vmem:[#allocation41_spill] sm:$0xff] }
 0x641   :  { %13906 = vst [vmem:[#allocation189_spill] sm:$0xff] %v11336_v33  ;;  %v11356_v19 = vadd.f32 %v10976_v39, %v13915_v35  ;;  %v13917_v33 = vld [vmem:[#allocation43_spill] sm:$0xff] }
 0x642   :  { %13908 = vst [vmem:[#allocation190_spill] sm:$0xff] %v11340_v50  ;;  %v11360_v1 = vadd.f32 %v10976_v39, %v13917_v33  ;;  %v13919_v50 = vld [vmem:[#allocation45_spill] sm:$0xff] }
 0x643   :  { %13910 = vst [vmem:[#allocation191_spill] sm:$0xff] %v11344_v61  ;;  %v11364_v11 = vadd.f32 %v10976_v39, %v13919_v50  ;;  %v13921_v61 = vld [vmem:[#allocation47_spill] sm:$0xff] }
 0x644   :  { %13912 = vst [vmem:[#allocation192_spill] sm:$0xff] %v11348_v26  ;;  %v11368_v25 = vadd.f32 %v10976_v39, %v13921_v61  ;;  %v13923_v26 = vld [vmem:[#allocation49_spill] sm:$0xff] }
 0x645   :  { %13914 = vst [vmem:[#allocation194_spill] sm:$0xff] %v11352_v24  ;;  %v11372_v56 = vadd.f32 %v10976_v39, %v13923_v26  ;;  %v13925_v24 = vld [vmem:[#allocation51_spill] sm:$0xff] }
 0x646   :  { %13916 = vst [vmem:[#allocation195_spill] sm:$0xff] %v11356_v19  ;;  %v11376_v35 = vadd.f32 %v10976_v39, %v13925_v24  ;;  %v13927_v19 = vld [vmem:[#allocation53_spill] sm:$0xff] }
 0x647   :  { %13918 = vst [vmem:[#allocation196_spill] sm:$0xff] %v11360_v1  ;;  %v11380_v33 = vadd.f32 %v10976_v39, %v13927_v19  ;;  %v13929_v1 = vld [vmem:[#allocation55_spill] sm:$0xff] }
 0x648   :  { %13920 = vst [vmem:[#allocation197_spill] sm:$0xff] %v11364_v11  ;;  %v11384_v50 = vadd.f32 %v10976_v39, %v13929_v1  ;;  %v13931_v11 = vld [vmem:[#allocation57_spill] sm:$0xff] }
 0x649   :  { %13922 = vst [vmem:[#allocation198_spill] sm:$0xff] %v11368_v25  ;;  %v11388_v61 = vadd.f32 %v10976_v39, %v13931_v11  ;;  %v13933_v25 = vld [vmem:[#allocation59_spill] sm:$0xff] }
 0x64a   :  { %13924 = vst [vmem:[#allocation199_spill] sm:$0xff] %v11372_v56  ;;  %v11392_v26 = vadd.f32 %v10976_v39, %v13933_v25  ;;  %v13935_v56 = vld [vmem:[#allocation61_spill] sm:$0xff] }
 0x64b   :  { %13926 = vst [vmem:[#allocation26_spill] sm:$0xff] %v11376_v35  ;;  %v11396_v24 = vadd.f32 %v10976_v39, %v13935_v56  ;;  %v13937_v35 = vld [vmem:[#allocation63_spill] sm:$0xff] }
 0x64c   :  { %13928 = vst [vmem:[#allocation28_spill] sm:$0xff] %v11380_v33  ;;  %v11400_v19 = vadd.f32 %v10976_v39, %v13937_v35  ;;  %v13939_v33 = vld [vmem:[#allocation65_spill] sm:$0xff] }
 0x64d   :  { %13930 = vst [vmem:[#allocation30_spill] sm:$0xff] %v11384_v50  ;;  %v11404_v1 = vadd.f32 %v10976_v39, %v13939_v33  ;;  %v13941_v50 = vld [vmem:[#allocation67_spill] sm:$0xff] }
 0x64e   :  { %13932 = vst [vmem:[#allocation32_spill] sm:$0xff] %v11388_v61  ;;  %v11408_v11 = vadd.f32 %v10976_v39, %v13941_v50  ;;  %v13943_v61 = vld [vmem:[#allocation69_spill] sm:$0xff] }
 0x64f   :  { %13934 = vst [vmem:[#allocation35_spill] sm:$0xff] %v11392_v26  ;;  %v11412_v25 = vadd.f32 %v10976_v39, %v13943_v61  ;;  %v13945_v26 = vld [vmem:[#allocation71_spill] sm:$0xff] }
 0x650   :  { %13936 = vst [vmem:[#allocation37_spill] sm:$0xff] %v11396_v24  ;;  %v11416_v56 = vadd.f32 %v10976_v39, %v13945_v26  ;;  %v13947_v24 = vld [vmem:[#allocation73_spill] sm:$0xff] }
 0x651   :  { %13938 = vst [vmem:[#allocation39_spill] sm:$0xff] %v11400_v19  ;;  %v11420_v35 = vadd.f32 %v10976_v39, %v13947_v24  ;;  %v13949_v19 = vld [vmem:[#allocation75_spill] sm:$0xff] }
 0x652   :  { %13940 = vst [vmem:[#allocation41_spill] sm:$0xff] %v11404_v1  ;;  %v11424_v33 = vadd.f32 %v10976_v39, %v13949_v19  ;;  %v13951_v1 = vld [vmem:[#allocation77_spill] sm:$0xff] }
 0x653   :  { %13942 = vst [vmem:[#allocation43_spill] sm:$0xff] %v11408_v11  ;;  %v11428_v50 = vadd.f32 %v10976_v39, %v13951_v1  ;;  %v13953_v11 = vld [vmem:[#allocation79_spill] sm:$0xff] }
 0x654   :  { %13944 = vst [vmem:[#allocation45_spill] sm:$0xff] %v11412_v25  ;;  %v11432_v61 = vadd.f32 %v10976_v39, %v13953_v11  ;;  %v13955_v25 = vld [vmem:[#allocation81_spill] sm:$0xff] }
 0x655   :  { %13946 = vst [vmem:[#allocation47_spill] sm:$0xff] %v11416_v56  ;;  %v11436_v26 = vadd.f32 %v10976_v39, %v13955_v25  ;;  %v13957_v56 = vld [vmem:[#allocation83_spill] sm:$0xff] }
 0x656   :  { %13948 = vst [vmem:[#allocation49_spill] sm:$0xff] %v11420_v35  ;;  %v11440_v24 = vadd.f32 %v10976_v39, %v13957_v56  ;;  %v13959_v35 = vld [vmem:[#allocation85_spill] sm:$0xff] }
 0x657   :  { %13950 = vst [vmem:[#allocation51_spill] sm:$0xff] %v11424_v33  ;;  %v11444_v19 = vadd.f32 %v10976_v39, %v13959_v35  ;;  %v13961_v33 = vld [vmem:[#allocation87_spill] sm:$0xff] }
 0x658   :  { %13952 = vst [vmem:[#allocation53_spill] sm:$0xff] %v11428_v50  ;;  %v11448_v1 = vadd.f32 %v10976_v39, %v13961_v33  ;;  %v13963_v50 = vld [vmem:[#allocation89_spill] sm:$0xff] }
 0x659   :  { %13954 = vst [vmem:[#allocation55_spill] sm:$0xff] %v11432_v61  ;;  %v11452_v11 = vadd.f32 %v10976_v39, %v13963_v50  ;;  %v13965_v61 = vld [vmem:[#allocation91_spill] sm:$0xff] }
 0x65a   :  { %13956 = vst [vmem:[#allocation57_spill] sm:$0xff] %v11436_v26  ;;  %v11456_v25 = vadd.f32 %v10976_v39, %v13965_v61  ;;  %v13967_v26 = vld [vmem:[#allocation93_spill] sm:$0xff] }
 0x65b   :  { %13958 = vst [vmem:[#allocation59_spill] sm:$0xff] %v11440_v24  ;;  %v11460_v56 = vadd.f32 %v10976_v39, %v13967_v26  ;;  %v13969_v24 = vld [vmem:[#allocation95_spill] sm:$0xff] }
 0x65c   :  { %13960 = vst [vmem:[#allocation61_spill] sm:$0xff] %v11444_v19  ;;  %v11464_v35 = vadd.f32 %v10976_v39, %v13969_v24  ;;  %v13971_v19 = vld [vmem:[#allocation97_spill] sm:$0xff] }
 0x65d   :  { %13962 = vst [vmem:[#allocation63_spill] sm:$0xff] %v11448_v1  ;;  %v11468_v33 = vadd.f32 %v10976_v39, %v13971_v19  ;;  %v13973_v1 = vld [vmem:[#allocation99_spill] sm:$0xff] }
 0x65e   :  { %13964 = vst [vmem:[#allocation65_spill] sm:$0xff] %v11452_v11  ;;  %v11472_v50 = vadd.f32 %v10976_v39, %v13973_v1  ;;  %v13975_v11 = vld [vmem:[#allocation101_spill] sm:$0xff] }
 0x65f   :  { %13966 = vst [vmem:[#allocation67_spill] sm:$0xff] %v11456_v25  ;;  %v11476_v61 = vadd.f32 %v10976_v39, %v13975_v11  ;;  %v13977_v25 = vld [vmem:[#allocation103_spill] sm:$0xff] }
 0x660   :  { %13968 = vst [vmem:[#allocation69_spill] sm:$0xff] %v11460_v56  ;;  %v11480_v26 = vadd.f32 %v10976_v39, %v13977_v25  ;;  %v13979_v56 = vld [vmem:[#allocation105_spill] sm:$0xff] }
 0x661   :  { %13970 = vst [vmem:[#allocation71_spill] sm:$0xff] %v11464_v35  ;;  %v11484_v24 = vadd.f32 %v10976_v39, %v13979_v56  ;;  %v13980_v35 = vld [vmem:[#allocation107_spill] sm:$0xff] }
 0x662   :  { %13972 = vst [vmem:[#allocation73_spill] sm:$0xff] %v11468_v33  ;;  %v11488_v19 = vadd.f32 %v10976_v39, %v13980_v35  ;;  %v13981_v33 = vld [vmem:[#allocation109_spill] sm:$0xff]  ;;  %v11508_v35 = vadd.f32 %v10976_v39, %v10763_v42 }
 0x663   :  { %13974 = vst [vmem:[#allocation75_spill] sm:$0xff] %v11472_v50  ;;  %v11492_v1 = vadd.f32 %v10976_v39, %v13981_v33  ;;  %v13982_v50 = vld [vmem:[#allocation111_spill] sm:$0xff]  ;;  %v11512_v33 = vadd.f32 %v10976_v39, %v10767_v13  ;;  %v11532_v13 = vadd.f32 %v10976_v39, %v10787_v55  ;;  %v11552_v55 = vadd.f32 %v10976_v39, %v10807_v4 }
 0x664   :  { %13976 = vst [vmem:[#allocation77_spill] sm:$0xff] %v11476_v61  ;;  %v11496_v11 = vadd.f32 %v10976_v39, %v13982_v50  ;;  %v13983_v61 = vld [vmem:[#allocation113_spill] sm:$0xff]  ;;  %v11516_v50 = vadd.f32 %v10976_v39, %v10771_v49  ;;  %v11536_v49 = vadd.f32 %v10976_v39, %v10791_v17 }
 0x665   :  { %13978 = vst [vmem:[#allocation79_spill] sm:$0xff] %v11480_v26  ;;  %v11500_v25 = vadd.f32 %v10976_v39, %v13983_v61  ;;  %v13985_v26 = vld [vmem:[#allocation115_spill] sm:$0xff]  ;;  %v11520_v61 = vadd.f32 %v10976_v39, %v10775_v10  ;;  %v11540_v10 = vadd.f32 %v10976_v39, %v10795_v62 }
 0x666   :  { %v11504_v56 = vadd.f32 %v10976_v39, %v13985_v26  ;;  %13989 = vst [vmem:[#allocation85_spill] sm:$0xff] %v11532_v13  ;;  %v13994_v13 = vld [vmem:[#allocation121_spill] sm:$0xff] }
 0x667   :  { %13984 = vst [vmem:[#allocation81_spill] sm:$0xff] %v11500_v25  ;;  %v13987_v25 = vld [vmem:[#allocation117_spill] sm:$0xff]  ;;  %v11556_v17 = vadd.f32 %v10976_v39, %v13994_v13 }
 0x668   :  { %13986 = vst [vmem:[#allocation83_spill] sm:$0xff] %v11504_v56  ;;  %v11524_v26 = vadd.f32 %v10976_v39, %v13987_v25  ;;  %v13988_v56 = vld [vmem:[#allocation119_spill] sm:$0xff]  ;;  %v11544_v25 = vadd.f32 %v10976_v39, %v10799_v41  ;;  %v11564_v41 = vadd.f32 %v10976_v39, %v10819_v44 }
 0x669   :  { %v11528_v42 = vadd.f32 %v10976_v39, %v13988_v56  ;;  %13990 = vst [vmem:[#allocation87_spill] sm:$0xff] %v11536_v49  ;;  %v11548_v56 = vadd.f32 %v10976_v39, %v10803_v15  ;;  %v13996_v49 = vld [vmem:[#allocation123_spill] sm:$0xff] }
 0x66a   :  { %13991 = vst [vmem:[#allocation89_spill] sm:$0xff] %v11544_v25  ;;  %v11560_v62 = vadd.f32 %v10976_v39, %v13996_v49  ;;  %v13999_v25 = vld [vmem:[#allocation125_spill] sm:$0xff] }
 0x66b   :  { %13992 = vst [vmem:[#allocation91_spill] sm:$0xff] %v11548_v56  ;;  %v11568_v15 = vadd.f32 %v10976_v39, %v13999_v25  ;;  %v14001_v56 = vld [vmem:[#allocation127_spill] sm:$0xff] }
 0x66c   :  { %13993 = vst [vmem:[#allocation93_spill] sm:$0xff] %v11552_v55  ;;  %v11572_v4 = vadd.f32 %v10976_v39, %v14001_v56  ;;  %v14003_v55 = vld [vmem:[#allocation129_spill] sm:$0xff] }
 0x66d   :  { %13995 = vst [vmem:[#allocation95_spill] sm:$0xff] %v11556_v17  ;;  %v11576_v13 = vadd.f32 %v10976_v39, %v14003_v55  ;;  %v14004_v17 = vld [vmem:[#allocation131_spill] sm:$0xff] }
 0x66e   :  { %13997 = vst [vmem:[#allocation97_spill] sm:$0xff] %v11560_v62  ;;  %v11580_v49 = vadd.f32 %v10976_v39, %v14004_v17  ;;  %v14005_v62 = vld [vmem:[#allocation133_spill] sm:$0xff]  ;;  %v11600_v17 = vadd.f32 %v10976_v39, %v10855_v37 }
 0x66f   :  { %13998 = vst [vmem:[#allocation99_spill] sm:$0xff] %v11564_v41  ;;  %v11584_v44 = vadd.f32 %v10976_v39, %v14005_v62  ;;  %v14006_v41 = vld [vmem:[#allocation135_spill] sm:$0xff]  ;;  %v11604_v62 = vadd.f32 %v10976_v39, %v10859_v52  ;;  %v11624_v52 = vadd.f32 %v10976_v39, %v10879_v16  ;;  %v11644_v16 = vadd.f32 %v10976_v39, %v10899_v47 }
 0x670   :  { %14000 = vst [vmem:[#allocation101_spill] sm:$0xff] %v11568_v15  ;;  %v11588_v25 = vadd.f32 %v10976_v39, %v14006_v41  ;;  %v14007_v15 = vld [vmem:[#allocation137_spill] sm:$0xff]  ;;  %v11608_v41 = vadd.f32 %v10976_v39, %v10863_v5  ;;  %v11664_v47 = vadd.f32 %v10976_v39, %v10919_v12  ;;  %v11684_v12 = vadd.f32 %v10976_v39, %v10939_v57 }
 0x671   :  { %14002 = vst [vmem:[#allocation103_spill] sm:$0xff] %v11572_v4  ;;  %v11592_v56 = vadd.f32 %v10976_v39, %v14007_v15  ;;  %v14008_v4 = vld [vmem:[#allocation139_spill] sm:$0xff]  ;;  %v11612_v15 = vadd.f32 %v10976_v39, %v10867_v21  ;;  %v11632_v21 = vadd.f32 %v10976_v39, %v10887_v28  ;;  %v11652_v28 = vadd.f32 %v10976_v39, %v10907_v29 }
 0x672   :  { %v11596_v55 = vadd.f32 %v10976_v39, %v14008_v4  ;;  %14010 = vst [vmem:[#allocation107_spill] sm:$0xff] %v11604_v62  ;;  %v11616_v4 = vadd.f32 %v10976_v39, %v10871_v18  ;;  %v14012_v62 = vld [vmem:[#allocation143_spill] sm:$0xff]  ;;  %v11636_v18 = vadd.f32 %v10976_v39, %v10891_v20  ;;  %v11656_v20 = vadd.f32 %v10976_v39, %v10911_v3 }
 0x673   :  { %v11628_v5 = vadd.f32 %v10976_v39, %v14012_v62  ;;  %v11648_v62 = vadd.f32 %v10976_v39, %v10903_v60  ;;  %v11668_v60 = vadd.f32 %v10976_v39, %v10923_v27  ;;  %v11672_v29 = vadd.f32 %v10976_v39, %v10927_v38  ;;  %14014 = vst [vmem:[#allocation111_spill] sm:$0xff] %v11684_v12  ;;  %v14020_v12 = vld [vmem:[#allocation147_spill] sm:$0xff] }
 0x674   :  { %14009 = vst [vmem:[#allocation105_spill] sm:$0xff] %v11596_v55  ;;  %v14011_v55 = vld [vmem:[#allocation141_spill] sm:$0xff]  ;;  %v11676_v3 = vadd.f32 %v10976_v39, %v10931_v40  ;;  %v11688_v27 = vadd.f32 %v10976_v39, %v10943_v36  ;;  %v11692_v38 = vadd.f32 %v10976_v39, %v10947_v2  ;;  %v11696_v40 = vadd.f32 %v10976_v39, %v10951_v59 }
 0x675   :  { %v11620_v37 = vadd.f32 %v10976_v39, %v14011_v55  ;;  %v11640_v55 = vadd.f32 %v10976_v39, %v10895_v48  ;;  %v11660_v48 = vadd.f32 %v10976_v39, %v10915_v7  ;;  %v11680_v7 = vadd.f32 %v10976_v39, %v10935_v6 }
 0x676   :  { %14013 = vst [vmem:[#allocation109_spill] sm:$0xff] %v11676_v3  ;;  %v14017_v3 = vld [vmem:[#allocation145_spill] sm:$0xff]  ;;  %v11704_v57 = vadd.f32 %v10976_v39, %v10959_v63  ;;  %v11708_v36 = vadd.f32 %v10976_v39, %v14020_v12 }
 0x677   :  { %14015 = vst [vmem:[#allocation113_spill] sm:$0xff] %v11688_v27  ;;  %v11700_v6 = vadd.f32 %v10976_v39, %v14017_v3  ;;  %v14022_v27 = vld [vmem:[#allocation149_spill] sm:$0xff]  ;;  %v11720_v3 = vadd.f32 %v10976_v39, %v10980_v31 }
 0x678   :  { %14016 = vst [vmem:[#allocation115_spill] sm:$0xff] %v11692_v38  ;;  %v11712_v2 = vadd.f32 %v10976_v39, %v14022_v27  ;;  %v14024_v38 = vld [vmem:[#allocation159_spill] sm:$0xff] }
 0x679   :  { %14018 = vst [vmem:[#allocation117_spill] sm:$0xff] %v11700_v6  ;;  %v11716_v59 = vadd.f32 %v10976_v39, %v14024_v38  ;;  %v14026_v6 = vld [vmem:[#allocation161_spill] sm:$0xff] }
 0x67a   :  { %14019 = vst [vmem:[#allocation119_spill] sm:$0xff] %v11704_v57  ;;  %v11724_v63 = vadd.f32 %v10976_v39, %v14026_v6  ;;  %v14027_v57 = vld [vmem:[#allocation167_spill] sm:$0xff]  ;;  %v11744_v6 = vadd.f32 %v10976_v39, %v11004_v53  ;;  %v11764_v53 = vadd.f32 %v10976_v39, %v11024_v54 }
 0x67b   :  { %14021 = vst [vmem:[#allocation121_spill] sm:$0xff] %v11708_v36  ;;  %v11728_v12 = vadd.f32 %v10976_v39, %v14027_v57  ;;  %v14028_v36 = vld [vmem:[#allocation169_spill] sm:$0xff]  ;;  %v11748_v57 = vadd.f32 %v10976_v39, %v11008_v45  ;;  %v5455_v45 = vmax.f32 %v11032_v46, 0.0 }
 0x67c   :  { %14023 = vst [vmem:[#allocation123_spill] sm:$0xff] %v11712_v2  ;;  %v11732_v27 = vadd.f32 %v10976_v39, %v14028_v36  ;;  %v14030_v2 = vld [vmem:[#allocation171_spill] sm:$0xff]  ;;  %v11752_v36 = vadd.f32 %v10976_v39, %v11012_v22  ;;  %v14044_v46 = vld [vmem:[#allocation13_spill] sm:$0xff] }
 0x67d   :  { %14025 = vst [vmem:[#allocation125_spill] sm:$0xff] %v11716_v59  ;;  %v11736_v38 = vadd.f32 %v10976_v39, %v14030_v2  ;;  %v14032_v59 = vld [vmem:[#allocation173_spill] sm:$0xff]  ;;  %v11756_v2 = vadd.f32 %v10976_v39, %v11016_v32  ;;  %v14040_v22 = vld [vmem:[#allocation11_spill] sm:$0xff] }
 0x67e   :  { %14029 = vst [vmem:[#allocation127_spill] sm:$0xff] %v11732_v27  ;;  %v11740_v31 = vadd.f32 %v10976_v39, %v14032_v59  ;;  %v11760_v59 = vadd.f32 %v10976_v39, %v11020_v43  ;;  %v14042_v43 = vld [vmem:[#allocation12_spill] sm:$0xff] }
 0x67f   :  { %14031 = vst [vmem:[#allocation129_spill] sm:$0xff] %v11736_v38  ;;  %v14043_v38 = vld [vmem:[#allocation3_spill] sm:$0xff] }
 0x680   :  { %14033 = vst [vmem:[#allocation131_spill] sm:$0xff] %v11740_v31  ;;  %v14041_v31 = vld [vmem:[#allocation2_spill] sm:$0xff]  ;;  %v5221_v54 = vadd.f32 %v10976_v39, %v14043_v38 }
 0x681   :  { %14034 = vst [vmem:[#allocation133_spill] sm:$0xff] %v11744_v6  ;;  %v5454_v6 = vmax.f32 %v11028_v30, 0.0  ;;  %v5220_v32 = vadd.f32 %v10976_v39, %v14041_v31  ;;  %v5458_v30 = vmax.f32 %v11044_v9, 0.0  ;;  %v14045_v31 = vld [vmem:[#allocation175_spill] sm:$0xff] }
 0x682   :  { %14035 = vst [vmem:[#allocation135_spill] sm:$0xff] %v11748_v57  ;;  %v5456_v57 = vmax.f32 %v11036_v14, 0.0  ;;  %v4980_v14 = vmul.f32 %v10269_v8, %v14044_v46 }
 0x683   :  { %14036 = vst [vmem:[#allocation137_spill] sm:$0xff] %v11752_v36  ;;  %v4978_v36 = vmul.f32 %v10269_v8, %v14040_v22 }
 0x684   :  { %14037 = vst [vmem:[#allocation139_spill] sm:$0xff] %v11756_v2  ;;  %v5457_v2 = vmax.f32 %v11040_v34, 0.0  ;;  %v14046_v34 = vld [vmem:[#allocation14_spill] sm:$0xff]  ;;  %v5224_v46 = vadd.f32 %v10976_v39, %v4980_v14 }
 0x685   :  { %14038 = vst [vmem:[#allocation141_spill] sm:$0xff] %v11760_v59  ;;  %v4979_v59 = vmul.f32 %v10269_v8, %v14042_v43  ;;  %v5222_v22 = vadd.f32 %v10976_v39, %v4978_v36  ;;  %v4981_v38 = vmul.f32 %v10269_v8, %v14046_v34  ;;  %v14047_v43 = vld [vmem:[#allocation177_spill] sm:$0xff] }
 0x686   :  { %14039 = vst [vmem:[#allocation143_spill] sm:$0xff] %v11764_v53  ;;  %v5459_v53 = vmax.f32 %v14045_v31, 0.0  ;;  %v5460_v27 = vmax.f32 %v14047_v43, 0.0  ;;  %v5461_v31 = vmax.f32 %v5220_v32, 0.0  ;;  %v5462_v43 = vmax.f32 %v5221_v54, 0.0 }
 0x687   :  { %5695 = vst [vmem:[%s12844_s4] sm:$0xff] %v5454_v6  ;;  %v5223_v9 = vadd.f32 %v10976_v39, %v4979_v59  ;;  %v14048_v6 = vld [vmem:[#allocation15_spill] sm:$0xff]  ;;  %v5225_v59 = vadd.f32 %v10976_v39, %v4981_v38  ;;  %v5463_v32 = vmax.f32 %v5222_v22, 0.0  ;;  %v5465_v22 = vmax.f32 %v5224_v46, 0.0 }
 0x688   :  { %5696 = vst [vmem:[%s12844_s4 + $0x8] sm:$0xff] %v5455_v45  ;;  %v4982_v36 = vmul.f32 %v10269_v8, %v14048_v6  ;;  %v14049_v45 = vld [vmem:[#allocation16_spill] sm:$0xff] }
 0x689   :  { %5697 = vst [vmem:[%s12844_s4 + $0x10] sm:$0xff] %v5456_v57  ;;  %v4983_v34 = vmul.f32 %v10269_v8, %v14049_v45  ;;  %v14050_v57 = vld [vmem:[#allocation17_spill] sm:$0xff]  ;;  %v5464_v54 = vmax.f32 %v5223_v9, 0.0  ;;  %v5466_v9 = vmax.f32 %v5225_v59, 0.0 }
 0x68a   :  { %5698 = vst [vmem:[%s12844_s4 + $0x18] sm:$0xff] %v5457_v2  ;;  %v4984_v6 = vmul.f32 %v10269_v8, %v14050_v57  ;;  %v5226_v14 = vadd.f32 %v10976_v39, %v4982_v36  ;;  %v14051_v2 = vld [vmem:[#allocation18_spill] sm:$0xff] }
 0x68b   :  { %5699 = vst [vmem:[%s12844_s4 + $0x20] sm:$0xff] %v5458_v30  ;;  %v4985_v45 = vmul.f32 %v10269_v8, %v14051_v2  ;;  %v5227_v38 = vadd.f32 %v10976_v39, %v4983_v34  ;;  %v14052_v30 = vld [vmem:[#allocation19_spill] sm:$0xff] }
 0x68c   :  { %5700 = vst [vmem:[%s12844_s4 + $0x28] sm:$0xff] %v5459_v53  ;;  %v4986_v57 = vmul.f32 %v10269_v8, %v14052_v30  ;;  %v5228_v36 = vadd.f32 %v10976_v39, %v4984_v6  ;;  %v14053_v53 = vld [vmem:[#allocation20_spill] sm:$0xff]  ;;  %v5467_v46 = vmax.f32 %v5226_v14, 0.0 }
 0x68d   :  { %5701 = vst [vmem:[%s12844_s4 + $0x30] sm:$0xff] %v5460_v27  ;;  %v4987_v2 = vmul.f32 %v10269_v8, %v14053_v53  ;;  %v5229_v34 = vadd.f32 %v10976_v39, %v4985_v45  ;;  %v14054_v27 = vld [vmem:[#allocation21_spill] sm:$0xff]  ;;  %v5468_v59 = vmax.f32 %v5227_v38, 0.0 }
 0x68e   :  { %5702 = vst [vmem:[%s12844_s4 + $0x38] sm:$0xff] %v5461_v31  ;;  %v4988_v30 = vmul.f32 %v10269_v8, %v14054_v27  ;;  %v5230_v6 = vadd.f32 %v10976_v39, %v4986_v57  ;;  %v14055_v31 = vld [vmem:[#allocation22_spill] sm:$0xff]  ;;  %v5469_v14 = vmax.f32 %v5228_v36, 0.0 }
 0x68f   :  { %5703 = vst [vmem:[%s12844_s4 + $0x40] sm:$0xff] %v5462_v43  ;;  %v4989_v53 = vmul.f32 %v10269_v8, %v14055_v31  ;;  %v5231_v45 = vadd.f32 %v10976_v39, %v4987_v2  ;;  %v14056_v43 = vld [vmem:[#allocation23_spill] sm:$0xff]  ;;  %v5470_v38 = vmax.f32 %v5229_v34, 0.0 }
 0x690   :  { %5704 = vst [vmem:[%s12844_s4 + $0x48] sm:$0xff] %v5463_v32  ;;  %v4990_v27 = vmul.f32 %v10269_v8, %v14056_v43  ;;  %v5232_v57 = vadd.f32 %v10976_v39, %v4988_v30  ;;  %v14057_v32 = vld [vmem:[#allocation24_spill] sm:$0xff]  ;;  %v5471_v36 = vmax.f32 %v5230_v6, 0.0 }
 0x691   :  { %5705 = vst [vmem:[%s12844_s4 + $0x50] sm:$0xff] %v5464_v54  ;;  %v4991_v31 = vmul.f32 %v10269_v8, %v14057_v32  ;;  %v5233_v2 = vadd.f32 %v10976_v39, %v4989_v53  ;;  %v14058_v54 = vld [vmem:[#allocation25_spill] sm:$0xff]  ;;  %v5472_v34 = vmax.f32 %v5231_v45, 0.0 }
 0x692   :  { %5706 = vst [vmem:[%s12844_s4 + $0x58] sm:$0xff] %v5465_v22  ;;  %v4992_v43 = vmul.f32 %v10269_v8, %v14058_v54  ;;  %v5234_v30 = vadd.f32 %v10976_v39, %v4990_v27  ;;  %v14059_v22 = vld [vmem:[#allocation27_spill] sm:$0xff]  ;;  %v5473_v6 = vmax.f32 %v5232_v57, 0.0 }
 0x693   :  { %5707 = vst [vmem:[%s12844_s4 + $0x60] sm:$0xff] %v5466_v9  ;;  %v4993_v32 = vmul.f32 %v10269_v8, %v14059_v22  ;;  %v5235_v53 = vadd.f32 %v10976_v39, %v4991_v31  ;;  %v14060_v9 = vld [vmem:[#allocation29_spill] sm:$0xff]  ;;  %v5474_v45 = vmax.f32 %v5233_v2, 0.0 }
 0x694   :  { %5708 = vst [vmem:[%s12844_s4 + $0x68] sm:$0xff] %v5467_v46  ;;  %v4994_v54 = vmul.f32 %v10269_v8, %v14060_v9  ;;  %v5236_v27 = vadd.f32 %v10976_v39, %v4992_v43  ;;  %v14061_v46 = vld [vmem:[#allocation31_spill] sm:$0xff]  ;;  %v5475_v57 = vmax.f32 %v5234_v30, 0.0 }
 0x695   :  { %5709 = vst [vmem:[%s12844_s4 + $0x70] sm:$0xff] %v5468_v59  ;;  %v4995_v22 = vmul.f32 %v10269_v8, %v14061_v46  ;;  %v5237_v31 = vadd.f32 %v10976_v39, %v4993_v32  ;;  %v14062_v59 = vld [vmem:[#allocation33_spill] sm:$0xff]  ;;  %v5476_v2 = vmax.f32 %v5235_v53, 0.0 }
 0x696   :  { %5710 = vst [vmem:[%s12844_s4 + $0x78] sm:$0xff] %v5469_v14  ;;  %v4996_v9 = vmul.f32 %v10269_v8, %v14062_v59  ;;  %v5238_v43 = vadd.f32 %v10976_v39, %v4994_v54  ;;  %v14063_v14 = vld [vmem:[#allocation34_spill] sm:$0xff]  ;;  %v5477_v30 = vmax.f32 %v5236_v27, 0.0 }
 0x697   :  { %5711 = vst [vmem:[%s12844_s4 + $0x80] sm:$0xff] %v5470_v38  ;;  %v4997_v46 = vmul.f32 %v10269_v8, %v14063_v14  ;;  %v5239_v32 = vadd.f32 %v10976_v39, %v4995_v22  ;;  %v14064_v38 = vld [vmem:[#allocation36_spill] sm:$0xff]  ;;  %v5478_v53 = vmax.f32 %v5237_v31, 0.0 }
 0x698   :  { %5712 = vst [vmem:[%s12844_s4 + $0x88] sm:$0xff] %v5471_v36  ;;  %v4998_v59 = vmul.f32 %v10269_v8, %v14064_v38  ;;  %v5240_v54 = vadd.f32 %v10976_v39, %v4996_v9  ;;  %v14065_v36 = vld [vmem:[#allocation38_spill] sm:$0xff]  ;;  %v5479_v27 = vmax.f32 %v5238_v43, 0.0 }
 0x699   :  { %5713 = vst [vmem:[%s12844_s4 + $0x90] sm:$0xff] %v5472_v34  ;;  %v4999_v14 = vmul.f32 %v10269_v8, %v14065_v36  ;;  %v5241_v22 = vadd.f32 %v10976_v39, %v4997_v46  ;;  %v14066_v34 = vld [vmem:[#allocation40_spill] sm:$0xff]  ;;  %v5480_v31 = vmax.f32 %v5239_v32, 0.0 }
 0x69a   :  { %5714 = vst [vmem:[%s12844_s4 + $0x98] sm:$0xff] %v5473_v6  ;;  %v5000_v38 = vmul.f32 %v10269_v8, %v14066_v34  ;;  %v5242_v9 = vadd.f32 %v10976_v39, %v4998_v59  ;;  %v14067_v6 = vld [vmem:[#allocation42_spill] sm:$0xff]  ;;  %v5481_v43 = vmax.f32 %v5240_v54, 0.0 }
 0x69b   :  { %5715 = vst [vmem:[%s12844_s4 + $0xa0] sm:$0xff] %v5474_v45  ;;  %v5001_v36 = vmul.f32 %v10269_v8, %v14067_v6  ;;  %v5243_v46 = vadd.f32 %v10976_v39, %v4999_v14  ;;  %v14068_v45 = vld [vmem:[#allocation44_spill] sm:$0xff]  ;;  %v5482_v32 = vmax.f32 %v5241_v22, 0.0 }
 0x69c   :  { %5716 = vst [vmem:[%s12844_s4 + $0xa8] sm:$0xff] %v5475_v57  ;;  %v5002_v34 = vmul.f32 %v10269_v8, %v14068_v45  ;;  %v5244_v59 = vadd.f32 %v10976_v39, %v5000_v38  ;;  %v14069_v57 = vld [vmem:[#allocation46_spill] sm:$0xff]  ;;  %v5483_v54 = vmax.f32 %v5242_v9, 0.0 }
 0x69d   :  { %5717 = vst [vmem:[%s12844_s4 + $0xb0] sm:$0xff] %v5476_v2  ;;  %v5003_v6 = vmul.f32 %v10269_v8, %v14069_v57  ;;  %v5245_v14 = vadd.f32 %v10976_v39, %v5001_v36  ;;  %v14070_v2 = vld [vmem:[#allocation48_spill] sm:$0xff]  ;;  %v5484_v22 = vmax.f32 %v5243_v46, 0.0 }
 0x69e   :  { %5718 = vst [vmem:[%s12844_s4 + $0xb8] sm:$0xff] %v5477_v30  ;;  %v5004_v45 = vmul.f32 %v10269_v8, %v14070_v2  ;;  %v5246_v38 = vadd.f32 %v10976_v39, %v5002_v34  ;;  %v14071_v30 = vld [vmem:[#allocation50_spill] sm:$0xff]  ;;  %v5485_v9 = vmax.f32 %v5244_v59, 0.0 }
 0x69f   :  { %5719 = vst [vmem:[%s12844_s4 + $0xc0] sm:$0xff] %v5478_v53  ;;  %v5005_v57 = vmul.f32 %v10269_v8, %v14071_v30  ;;  %v5247_v36 = vadd.f32 %v10976_v39, %v5003_v6  ;;  %v14072_v53 = vld [vmem:[#allocation52_spill] sm:$0xff]  ;;  %v5486_v46 = vmax.f32 %v5245_v14, 0.0 }
 0x6a0   :  { %5720 = vst [vmem:[%s12844_s4 + $0xc8] sm:$0xff] %v5479_v27  ;;  %v5006_v2 = vmul.f32 %v10269_v8, %v14072_v53  ;;  %v5248_v34 = vadd.f32 %v10976_v39, %v5004_v45  ;;  %v14073_v27 = vld [vmem:[#allocation54_spill] sm:$0xff]  ;;  %v5487_v59 = vmax.f32 %v5246_v38, 0.0 }
 0x6a1   :  { %5721 = vst [vmem:[%s12844_s4 + $0xd0] sm:$0xff] %v5480_v31  ;;  %v5007_v30 = vmul.f32 %v10269_v8, %v14073_v27  ;;  %v5249_v6 = vadd.f32 %v10976_v39, %v5005_v57  ;;  %v14074_v31 = vld [vmem:[#allocation56_spill] sm:$0xff]  ;;  %v5488_v14 = vmax.f32 %v5247_v36, 0.0 }
 0x6a2   :  { %5722 = vst [vmem:[%s12844_s4 + $0xd8] sm:$0xff] %v5481_v43  ;;  %v5008_v53 = vmul.f32 %v10269_v8, %v14074_v31  ;;  %v5250_v45 = vadd.f32 %v10976_v39, %v5006_v2  ;;  %v14075_v43 = vld [vmem:[#allocation58_spill] sm:$0xff]  ;;  %v5489_v38 = vmax.f32 %v5248_v34, 0.0 }
 0x6a3   :  { %5723 = vst [vmem:[%s12844_s4 + $0xe0] sm:$0xff] %v5482_v32  ;;  %v5009_v27 = vmul.f32 %v10269_v8, %v14075_v43  ;;  %v5251_v57 = vadd.f32 %v10976_v39, %v5007_v30  ;;  %v14076_v32 = vld [vmem:[#allocation60_spill] sm:$0xff]  ;;  %v5490_v36 = vmax.f32 %v5249_v6, 0.0 }
 0x6a4   :  { %5724 = vst [vmem:[%s12844_s4 + $0xe8] sm:$0xff] %v5483_v54  ;;  %v5010_v31 = vmul.f32 %v10269_v8, %v14076_v32  ;;  %v5252_v2 = vadd.f32 %v10976_v39, %v5008_v53  ;;  %v14077_v54 = vld [vmem:[#allocation62_spill] sm:$0xff]  ;;  %v5491_v34 = vmax.f32 %v5250_v45, 0.0 }
 0x6a5   :  { %5725 = vst [vmem:[%s12844_s4 + $0xf0] sm:$0xff] %v5484_v22  ;;  %v5011_v43 = vmul.f32 %v10269_v8, %v14077_v54  ;;  %v5253_v30 = vadd.f32 %v10976_v39, %v5009_v27  ;;  %v14078_v22 = vld [vmem:[#allocation64_spill] sm:$0xff]  ;;  %v5492_v6 = vmax.f32 %v5251_v57, 0.0 }
 0x6a6   :  { %5726 = vst [vmem:[%s12844_s4 + $0xf8] sm:$0xff] %v5485_v9  ;;  %v5012_v32 = vmul.f32 %v10269_v8, %v14078_v22  ;;  %v5254_v53 = vadd.f32 %v10976_v39, %v5010_v31  ;;  %v14079_v9 = vld [vmem:[#allocation66_spill] sm:$0xff]  ;;  %v5493_v45 = vmax.f32 %v5252_v2, 0.0 }
 0x6a7   :  { %5727 = vst [vmem:[%s12844_s4 + $0x100] sm:$0xff] %v5486_v46  ;;  %v5013_v54 = vmul.f32 %v10269_v8, %v14079_v9  ;;  %v5255_v27 = vadd.f32 %v10976_v39, %v5011_v43  ;;  %v14080_v46 = vld [vmem:[#allocation68_spill] sm:$0xff]  ;;  %v5494_v57 = vmax.f32 %v5253_v30, 0.0 }
 0x6a8   :  { %5728 = vst [vmem:[%s12844_s4 + $0x108] sm:$0xff] %v5487_v59  ;;  %v5014_v22 = vmul.f32 %v10269_v8, %v14080_v46  ;;  %v5256_v31 = vadd.f32 %v10976_v39, %v5012_v32  ;;  %v14081_v59 = vld [vmem:[#allocation70_spill] sm:$0xff]  ;;  %v5495_v2 = vmax.f32 %v5254_v53, 0.0 }
 0x6a9   :  { %5729 = vst [vmem:[%s12844_s4 + $0x110] sm:$0xff] %v5488_v14  ;;  %v5015_v9 = vmul.f32 %v10269_v8, %v14081_v59  ;;  %v5257_v43 = vadd.f32 %v10976_v39, %v5013_v54  ;;  %v14082_v14 = vld [vmem:[#allocation72_spill] sm:$0xff]  ;;  %v5496_v30 = vmax.f32 %v5255_v27, 0.0 }
 0x6aa   :  { %5730 = vst [vmem:[%s12844_s4 + $0x118] sm:$0xff] %v5489_v38  ;;  %v5016_v46 = vmul.f32 %v10269_v8, %v14082_v14  ;;  %v5258_v32 = vadd.f32 %v10976_v39, %v5014_v22  ;;  %v14083_v38 = vld [vmem:[#allocation74_spill] sm:$0xff]  ;;  %v5497_v53 = vmax.f32 %v5256_v31, 0.0 }
 0x6ab   :  { %5731 = vst [vmem:[%s12844_s4 + $0x120] sm:$0xff] %v5490_v36  ;;  %v5017_v59 = vmul.f32 %v10269_v8, %v14083_v38  ;;  %v5259_v54 = vadd.f32 %v10976_v39, %v5015_v9  ;;  %v14084_v36 = vld [vmem:[#allocation76_spill] sm:$0xff]  ;;  %v5498_v27 = vmax.f32 %v5257_v43, 0.0 }
 0x6ac   :  { %5732 = vst [vmem:[%s12844_s4 + $0x128] sm:$0xff] %v5491_v34  ;;  %v5018_v14 = vmul.f32 %v10269_v8, %v14084_v36  ;;  %v5260_v22 = vadd.f32 %v10976_v39, %v5016_v46  ;;  %v14085_v34 = vld [vmem:[#allocation78_spill] sm:$0xff]  ;;  %v5499_v31 = vmax.f32 %v5258_v32, 0.0 }
 0x6ad   :  { %5733 = vst [vmem:[%s12844_s4 + $0x130] sm:$0xff] %v5492_v6  ;;  %v5019_v38 = vmul.f32 %v10269_v8, %v14085_v34  ;;  %v5261_v9 = vadd.f32 %v10976_v39, %v5017_v59  ;;  %v14086_v6 = vld [vmem:[#allocation80_spill] sm:$0xff]  ;;  %v5500_v43 = vmax.f32 %v5259_v54, 0.0 }
 0x6ae   :  { %5734 = vst [vmem:[%s12844_s4 + $0x138] sm:$0xff] %v5493_v45  ;;  %v5020_v36 = vmul.f32 %v10269_v8, %v14086_v6  ;;  %v5262_v46 = vadd.f32 %v10976_v39, %v5018_v14  ;;  %v14087_v45 = vld [vmem:[#allocation82_spill] sm:$0xff]  ;;  %v5501_v32 = vmax.f32 %v5260_v22, 0.0 }
 0x6af   :  { %5735 = vst [vmem:[%s12844_s4 + $0x140] sm:$0xff] %v5494_v57  ;;  %v5021_v34 = vmul.f32 %v10269_v8, %v14087_v45  ;;  %v5263_v59 = vadd.f32 %v10976_v39, %v5019_v38  ;;  %v14088_v57 = vld [vmem:[#allocation84_spill] sm:$0xff]  ;;  %v5502_v54 = vmax.f32 %v5261_v9, 0.0 }
 0x6b0   :  { %5736 = vst [vmem:[%s12844_s4 + $0x148] sm:$0xff] %v5495_v2  ;;  %v5022_v6 = vmul.f32 %v10269_v8, %v14088_v57  ;;  %v5264_v14 = vadd.f32 %v10976_v39, %v5020_v36  ;;  %v14089_v2 = vld [vmem:[#allocation86_spill] sm:$0xff]  ;;  %v5503_v22 = vmax.f32 %v5262_v46, 0.0 }
 0x6b1   :  { %5737 = vst [vmem:[%s12844_s4 + $0x150] sm:$0xff] %v5496_v30  ;;  %v5023_v45 = vmul.f32 %v10269_v8, %v14089_v2  ;;  %v5265_v38 = vadd.f32 %v10976_v39, %v5021_v34  ;;  %v14090_v30 = vld [vmem:[#allocation88_spill] sm:$0xff]  ;;  %v5504_v9 = vmax.f32 %v5263_v59, 0.0 }
 0x6b2   :  { %5738 = vst [vmem:[%s12844_s4 + $0x158] sm:$0xff] %v5497_v53  ;;  %v5024_v57 = vmul.f32 %v10269_v8, %v14090_v30  ;;  %v5266_v36 = vadd.f32 %v10976_v39, %v5022_v6  ;;  %v14091_v53 = vld [vmem:[#allocation90_spill] sm:$0xff]  ;;  %v5505_v46 = vmax.f32 %v5264_v14, 0.0 }
 0x6b3   :  { %5739 = vst [vmem:[%s12844_s4 + $0x160] sm:$0xff] %v5498_v27  ;;  %v5025_v2 = vmul.f32 %v10269_v8, %v14091_v53  ;;  %v5267_v34 = vadd.f32 %v10976_v39, %v5023_v45  ;;  %v14092_v27 = vld [vmem:[#allocation92_spill] sm:$0xff]  ;;  %v5506_v59 = vmax.f32 %v5265_v38, 0.0 }
 0x6b4   :  { %5740 = vst [vmem:[%s12844_s4 + $0x168] sm:$0xff] %v5499_v31  ;;  %v5026_v30 = vmul.f32 %v10269_v8, %v14092_v27  ;;  %v5268_v6 = vadd.f32 %v10976_v39, %v5024_v57  ;;  %v14093_v31 = vld [vmem:[#allocation94_spill] sm:$0xff]  ;;  %v5507_v14 = vmax.f32 %v5266_v36, 0.0 }
 0x6b5   :  { %5741 = vst [vmem:[%s12844_s4 + $0x170] sm:$0xff] %v5500_v43  ;;  %v5027_v53 = vmul.f32 %v10269_v8, %v14093_v31  ;;  %v5269_v45 = vadd.f32 %v10976_v39, %v5025_v2  ;;  %v14094_v43 = vld [vmem:[#allocation96_spill] sm:$0xff]  ;;  %v5508_v38 = vmax.f32 %v5267_v34, 0.0 }
 0x6b6   :  { %5742 = vst [vmem:[%s12844_s4 + $0x178] sm:$0xff] %v5501_v32  ;;  %v5028_v27 = vmul.f32 %v10269_v8, %v14094_v43  ;;  %v5270_v57 = vadd.f32 %v10976_v39, %v5026_v30  ;;  %v14095_v32 = vld [vmem:[#allocation98_spill] sm:$0xff]  ;;  %v5509_v36 = vmax.f32 %v5268_v6, 0.0 }
 0x6b7   :  { %5743 = vst [vmem:[%s12844_s4 + $0x180] sm:$0xff] %v5502_v54  ;;  %v5029_v31 = vmul.f32 %v10269_v8, %v14095_v32  ;;  %v5271_v2 = vadd.f32 %v10976_v39, %v5027_v53  ;;  %v14096_v54 = vld [vmem:[#allocation100_spill] sm:$0xff]  ;;  %v5510_v34 = vmax.f32 %v5269_v45, 0.0 }
 0x6b8   :  { %5744 = vst [vmem:[%s12844_s4 + $0x188] sm:$0xff] %v5503_v22  ;;  %v5030_v43 = vmul.f32 %v10269_v8, %v14096_v54  ;;  %v5272_v30 = vadd.f32 %v10976_v39, %v5028_v27  ;;  %v14097_v22 = vld [vmem:[#allocation102_spill] sm:$0xff]  ;;  %v5511_v54 = vmax.f32 %v5270_v57, 0.0  ;;  %v14098_v27 = vld [vmem:[#allocation179_spill] sm:$0xff] }
 0x6b9   :  { %5745 = vst [vmem:[%s12844_s4 + $0x190] sm:$0xff] %v5504_v9  ;;  %v5031_v32 = vmul.f32 %v10269_v8, %v14097_v22  ;;  %v5273_v53 = vadd.f32 %v10976_v39, %v5029_v31  ;;  %v5517_v57 = vmax.f32 %v14098_v27, 0.0 }
 0x6ba   :  { %5746 = vst [vmem:[%s12844_s4 + $0x198] sm:$0xff] %v5505_v46  ;;  %v5274_v9 = vadd.f32 %v10976_v39, %v5030_v43  ;;  %v5512_v46 = vmax.f32 %v5271_v2, 0.0  ;;  %v5513_v8 = vmax.f32 %v5272_v30, 0.0  ;;  %v14100_v2 = vld [vmem:[#allocation183_spill] sm:$0xff]  ;;  %v14101_v43 = vld [vmem:[#allocation185_spill] sm:$0xff] }
 0x6bb   :  { %5747 = vst [vmem:[%s12844_s4 + $0x1a0] sm:$0xff] %v5506_v59  ;;  %v5275_v6 = vadd.f32 %v10976_v39, %v5031_v32  ;;  %v5514_v45 = vmax.f32 %v5273_v53, 0.0  ;;  %v5520_v30 = vmax.f32 %v14101_v43, 0.0  ;;  %v14103_v32 = vld [vmem:[#allocation193_spill] sm:$0xff]  ;;  %v14111_v43 = vld [vmem:[#allocation152_spill] sm:$0xff] }
 0x6bc   :  { %5748 = vst [vmem:[%s12844_s4 + $0x1a8] sm:$0xff] %v5507_v14  ;;  %v5515_v59 = vmax.f32 %v5274_v9, 0.0  ;;  %v14099_v14 = vld [vmem:[#allocation181_spill] sm:$0xff]  ;;  %v5522_v53 = vmax.f32 %v14103_v32, 0.0 }
 0x6bd   :  { %5749 = vst [vmem:[%s12844_s4 + $0x1b0] sm:$0xff] %v5508_v38  ;;  %v5516_v39 = vmax.f32 %v5275_v6, 0.0  ;;  %v5518_v31 = vmax.f32 %v14099_v14, 0.0  ;;  %v5519_v38 = vmax.f32 %v14100_v2, 0.0  ;;  %v14110_v2 = vld [vmem:[#allocation201_spill] sm:$0xff] }
 0x6be   :  { %5750 = vst [vmem:[%s12844_s4 + $0x1b8] sm:$0xff] %v5509_v36  ;;  %v14102_v36 = vld [vmem:[#allocation187_spill] sm:$0xff] }
 0x6bf   :  { %5751 = vst [vmem:[%s12844_s4 + $0x1c0] sm:$0xff] %v5510_v34  ;;  %v5521_v22 = vmax.f32 %v14102_v36, 0.0  ;;  %v14104_v34 = vld [vmem:[#allocation151_spill] sm:$0xff]  ;;  %v14112_v36 = vld [vmem:[#allocation202_spill] sm:$0xff] }
 0x6c0   :  { %5752 = vst [vmem:[%s12844_s4 + $0x1c8] sm:$0xff] %v5511_v54  ;;  %v5523_v9 = vmax.f32 %v14104_v34, 0.0  ;;  %v14105_v54 = vld [vmem:[#allocation153_spill] sm:$0xff]  ;;  %v14114_v34 = vld [vmem:[#allocation4_spill] sm:$0xff] }
 0x6c1   :  { %5753 = vst [vmem:[%s12844_s4 + $0x1d0] sm:$0xff] %v5512_v46  ;;  %v5524_v6 = vmax.f32 %v14105_v54, 0.0  ;;  %v14106_v46 = vld [vmem:[#allocation155_spill] sm:$0xff]  ;;  %v14115_v54 = vld [vmem:[#allocation5_spill] sm:$0xff] }
 0x6c2   :  { %5754 = vst [vmem:[%s12844_s4 + $0x1d8] sm:$0xff] %v5513_v8  ;;  %v5525_v8 = vmax.f32 %v14106_v46, 0.0  ;;  %v5537_v46 = vmax.f32 %v11136_v23, 0.0  ;;  %v14119_v23 = vld [vmem:[#allocation9_spill] sm:$0xff] }
 0x6c3   :  { %5755 = vst [vmem:[%s12844_s4 + $0x1e0] sm:$0xff] %v5514_v45  ;;  %v14107_v45 = vld [vmem:[#allocation157_spill] sm:$0xff] }
 0x6c4   :  { %5756 = vst [vmem:[%s12844_s4 + $0x1e8] sm:$0xff] %v5515_v59  ;;  %v5526_v59 = vmax.f32 %v14107_v45, 0.0  ;;  %v14117_v45 = vld [vmem:[#allocation7_spill] sm:$0xff] }
 0x6c5   :  { %5757 = vst [vmem:[%s12844_s4 + $0x1f0] sm:$0xff] %v5516_v39  ;;  %v14108_v39 = vld [vmem:[#allocation200_spill] sm:$0xff] }
 0x6c6   :  { %5758 = vst [vmem:[%s12844_s4 + $0x1f8] sm:$0xff] %v5517_v57  ;;  %v5527_v27 = vmax.f32 %v14108_v39, 0.0  ;;  %v14109_v57 = vld [vmem:[#allocation186_spill] sm:$0xff]  ;;  %v14118_v39 = vld [vmem:[#allocation8_spill] sm:$0xff] }
 0x6c7   :  { %5759 = vst [vmem:[%s12844_s4 + $0x200] sm:$0xff] %v5518_v31  ;;  %v5528_v14 = vmax.f32 %v14109_v57, 0.0  ;;  %v5529_v31 = vmax.f32 %v11104_v51, 0.0  ;;  %v14113_v51 = vld [vmem:[#allocation203_spill] sm:$0xff]  ;;  %v5541_v57 = vmax.f32 %v14119_v23, 0.0  ;;  %v14131_v23 = vld [vmem:[#allocation124_spill] sm:$0xff] }
 0x6c8   :  { %5760 = vst [vmem:[%s12844_s4 + $0x208] sm:$0xff] %v5519_v38  ;;  %v5530_v38 = vmax.f32 %v14110_v2, 0.0  ;;  %v5533_v32 = vmax.f32 %v14113_v51, 0.0  ;;  %v14124_v51 = vld [vmem:[#allocation110_spill] sm:$0xff] }
 0x6c9   :  { %5761 = vst [vmem:[%s12844_s4 + $0x210] sm:$0xff] %v5520_v30  ;;  %v5531_v30 = vmax.f32 %v14111_v43, 0.0 }
 0x6ca   :  { %5762 = vst [vmem:[%s12844_s4 + $0x218] sm:$0xff] %v5521_v22  ;;  %v5532_v22 = vmax.f32 %v14112_v36, 0.0 }
 0x6cb   :  { %5763 = vst [vmem:[%s12844_s4 + $0x220] sm:$0xff] %v5522_v53  ;;  %v5534_v53 = vmax.f32 %v11124_v0, 0.0  ;;  %v14116_v0 = vld [vmem:[#allocation6_spill] sm:$0xff] }
 0x6cc   :  { %5764 = vst [vmem:[%s12844_s4 + $0x228] sm:$0xff] %v5523_v9  ;;  %v5535_v9 = vmax.f32 %v14114_v34, 0.0 }
 0x6cd   :  { %5765 = vst [vmem:[%s12844_s4 + $0x230] sm:$0xff] %v5524_v6  ;;  %v5536_v6 = vmax.f32 %v14115_v54, 0.0 }
 0x6ce   :  { %5766 = vst [vmem:[%s12844_s4 + $0x238] sm:$0xff] %v5525_v8  ;;  %v5538_v8 = vmax.f32 %v14116_v0, 0.0  ;;  %v14128_v0 = vld [vmem:[#allocation118_spill] sm:$0xff] }
 0x6cf   :  { %5767 = vst [vmem:[%s12844_s4 + $0x240] sm:$0xff] %v5526_v59  ;;  %v5539_v59 = vmax.f32 %v14117_v45, 0.0  ;;  %v14129_v45 = vld [vmem:[#allocation120_spill] sm:$0xff] }
 0x6d0   :  { %5768 = vst [vmem:[%s12844_s4 + $0x248] sm:$0xff] %v5527_v27  ;;  %v5540_v27 = vmax.f32 %v14118_v39, 0.0  ;;  %v14130_v39 = vld [vmem:[#allocation122_spill] sm:$0xff] }
 0x6d1   :  { %5769 = vst [vmem:[%s12844_s4 + $0x250] sm:$0xff] %v5528_v14  ;;  %v5542_v14 = vmax.f32 %v11156_v58, 0.0  ;;  %v14123_v58 = vld [vmem:[#allocation108_spill] sm:$0xff] }
 0x6d2   :  { %5770 = vst [vmem:[%s12844_s4 + $0x258] sm:$0xff] %v5529_v31  ;;  %v14120_v31 = vld [vmem:[#allocation10_spill] sm:$0xff] }
 0x6d3   :  { %5771 = vst [vmem:[%s12844_s4 + $0x260] sm:$0xff] %v5530_v38  ;;  %v5543_v2 = vmax.f32 %v14120_v31, 0.0  ;;  %v14121_v38 = vld [vmem:[#allocation104_spill] sm:$0xff] }
 0x6d4   :  { %5772 = vst [vmem:[%s12844_s4 + $0x268] sm:$0xff] %v5531_v30  ;;  %v5544_v43 = vmax.f32 %v14121_v38, 0.0  ;;  %v14122_v30 = vld [vmem:[#allocation106_spill] sm:$0xff] }
 0x6d5   :  { %5773 = vst [vmem:[%s12844_s4 + $0x270] sm:$0xff] %v5532_v22  ;;  %v5545_v36 = vmax.f32 %v14122_v30, 0.0  ;;  %v5546_v22 = vmax.f32 %v14123_v58, 0.0 }
 0x6d6   :  { %5774 = vst [vmem:[%s12844_s4 + $0x278] sm:$0xff] %v5533_v32  ;;  %v5547_v32 = vmax.f32 %v14124_v51, 0.0 }
 0x6d7   :  { %5775 = vst [vmem:[%s12844_s4 + $0x280] sm:$0xff] %v5534_v53  ;;  %v14125_v53 = vld [vmem:[#allocation112_spill] sm:$0xff] }
 0x6d8   :  { %5776 = vst [vmem:[%s12844_s4 + $0x288] sm:$0xff] %v5535_v9  ;;  %v5548_v34 = vmax.f32 %v14125_v53, 0.0  ;;  %v14126_v9 = vld [vmem:[#allocation114_spill] sm:$0xff] }
 0x6d9   :  { %5777 = vst [vmem:[%s12844_s4 + $0x290] sm:$0xff] %v5536_v6  ;;  %v5549_v54 = vmax.f32 %v14126_v9, 0.0  ;;  %v14127_v6 = vld [vmem:[#allocation116_spill] sm:$0xff] }
 0x6da   :  { %5778 = vst [vmem:[%s12844_s4 + $0x298] sm:$0xff] %v5537_v46  ;;  %v5550_v46 = vmax.f32 %v14127_v6, 0.0 }
 0x6db   :  { %5779 = vst [vmem:[%s12844_s4 + $0x2a0] sm:$0xff] %v5538_v8  ;;  %v5551_v8 = vmax.f32 %v14128_v0, 0.0 }
 0x6dc   :  { %5780 = vst [vmem:[%s12844_s4 + $0x2a8] sm:$0xff] %v5539_v59  ;;  %v5552_v59 = vmax.f32 %v14129_v45, 0.0 }
 0x6dd   :  { %5781 = vst [vmem:[%s12844_s4 + $0x2b0] sm:$0xff] %v5540_v27  ;;  %v5553_v27 = vmax.f32 %v14130_v39, 0.0 }
 0x6de   :  { %5782 = vst [vmem:[%s12844_s4 + $0x2b8] sm:$0xff] %v5541_v57  ;;  %v5554_v57 = vmax.f32 %v14131_v23, 0.0 }
 0x6df   :  { %5783 = vst [vmem:[%s12844_s4 + $0x2c0] sm:$0xff] %v5542_v14  ;;  %v14132_v14 = vld [vmem:[#allocation126_spill] sm:$0xff] }
 0x6e0   :  { %5784 = vst [vmem:[%s12844_s4 + $0x2c8] sm:$0xff] %v5543_v2  ;;  %v5555_v31 = vmax.f32 %v14132_v14, 0.0  ;;  %v14133_v2 = vld [vmem:[#allocation128_spill] sm:$0xff] }
 0x6e1   :  { %5785 = vst [vmem:[%s12844_s4 + $0x2d0] sm:$0xff] %v5544_v43  ;;  %v5556_v38 = vmax.f32 %v14133_v2, 0.0  ;;  %v14134_v43 = vld [vmem:[#allocation130_spill] sm:$0xff] }
 0x6e2   :  { %5786 = vst [vmem:[%s12844_s4 + $0x2d8] sm:$0xff] %v5545_v36  ;;  %v5557_v30 = vmax.f32 %v14134_v43, 0.0  ;;  %v14135_v36 = vld [vmem:[#allocation132_spill] sm:$0xff] }
 0x6e3   :  { %5787 = vst [vmem:[%s12844_s4 + $0x2e0] sm:$0xff] %v5546_v22  ;;  %v5558_v58 = vmax.f32 %v14135_v36, 0.0  ;;  %v14136_v22 = vld [vmem:[#allocation134_spill] sm:$0xff] }
 0x6e4   :  { %5788 = vst [vmem:[%s12844_s4 + $0x2e8] sm:$0xff] %v5547_v32  ;;  %v5559_v51 = vmax.f32 %v14136_v22, 0.0  ;;  %v14137_v32 = vld [vmem:[#allocation136_spill] sm:$0xff] }
 0x6e5   :  { %5789 = vst [vmem:[%s12844_s4 + $0x2f0] sm:$0xff] %v5548_v34  ;;  %v5560_v53 = vmax.f32 %v14137_v32, 0.0  ;;  %v14138_v34 = vld [vmem:[#allocation138_spill] sm:$0xff] }
 0x6e6   :  { %5790 = vst [vmem:[%s12844_s4 + $0x2f8] sm:$0xff] %v5549_v54  ;;  %v5561_v9 = vmax.f32 %v14138_v34, 0.0  ;;  %v14139_v54 = vld [vmem:[#allocation140_spill] sm:$0xff] }
 0x6e7   :  { %5791 = vst [vmem:[%s12844_s4 + $0x300] sm:$0xff] %v5550_v46  ;;  %v5562_v6 = vmax.f32 %v14139_v54, 0.0  ;;  %v14140_v46 = vld [vmem:[#allocation142_spill] sm:$0xff] }
 0x6e8   :  { %5792 = vst [vmem:[%s12844_s4 + $0x308] sm:$0xff] %v5551_v8  ;;  %v5563_v0 = vmax.f32 %v14140_v46, 0.0  ;;  %v14141_v8 = vld [vmem:[#allocation144_spill] sm:$0xff] }
 0x6e9   :  { %5793 = vst [vmem:[%s12844_s4 + $0x310] sm:$0xff] %v5552_v59  ;;  %v5564_v45 = vmax.f32 %v14141_v8, 0.0  ;;  %v14142_v59 = vld [vmem:[#allocation146_spill] sm:$0xff] }
 0x6ea   :  { %5794 = vst [vmem:[%s12844_s4 + $0x318] sm:$0xff] %v5553_v27  ;;  %v5565_v39 = vmax.f32 %v14142_v59, 0.0  ;;  %v14143_v27 = vld [vmem:[#allocation148_spill] sm:$0xff] }
 0x6eb   :  { %5795 = vst [vmem:[%s12844_s4 + $0x320] sm:$0xff] %v5554_v57  ;;  %v5566_v23 = vmax.f32 %v14143_v27, 0.0  ;;  %v14144_v57 = vld [vmem:[#allocation150_spill] sm:$0xff] }
 0x6ec   :  { %5796 = vst [vmem:[%s12844_s4 + $0x328] sm:$0xff] %v5555_v31  ;;  %v5567_v14 = vmax.f32 %v14144_v57, 0.0  ;;  %v14145_v31 = vld [vmem:[#allocation154_spill] sm:$0xff] }
 0x6ed   :  { %5797 = vst [vmem:[%s12844_s4 + $0x330] sm:$0xff] %v5556_v38  ;;  %v5568_v2 = vmax.f32 %v14145_v31, 0.0  ;;  %v14146_v38 = vld [vmem:[#allocation156_spill] sm:$0xff] }
 0x6ee   :  { %5798 = vst [vmem:[%s12844_s4 + $0x338] sm:$0xff] %v5557_v30  ;;  %v5569_v43 = vmax.f32 %v14146_v38, 0.0  ;;  %v14147_v30 = vld [vmem:[#allocation158_spill] sm:$0xff] }
 0x6ef   :  { %5799 = vst [vmem:[%s12844_s4 + $0x340] sm:$0xff] %v5558_v58  ;;  %v5570_v36 = vmax.f32 %v14147_v30, 0.0  ;;  %v14148_v58 = vld [vmem:[#allocation160_spill] sm:$0xff] }
 0x6f0   :  { %5800 = vst [vmem:[%s12844_s4 + $0x348] sm:$0xff] %v5559_v51  ;;  %v5571_v22 = vmax.f32 %v14148_v58, 0.0  ;;  %v14149_v51 = vld [vmem:[#allocation162_spill] sm:$0xff] }
 0x6f1   :  { %5801 = vst [vmem:[%s12844_s4 + $0x350] sm:$0xff] %v5560_v53  ;;  %v5572_v32 = vmax.f32 %v14149_v51, 0.0  ;;  %v14150_v53 = vld [vmem:[#allocation163_spill] sm:$0xff] }
 0x6f2   :  { %5802 = vst [vmem:[%s12844_s4 + $0x358] sm:$0xff] %v5561_v9  ;;  %v5573_v34 = vmax.f32 %v14150_v53, 0.0  ;;  %v14151_v9 = vld [vmem:[#allocation164_spill] sm:$0xff] }
 0x6f3   :  { %5803 = vst [vmem:[%s12844_s4 + $0x360] sm:$0xff] %v5562_v6  ;;  %v5574_v54 = vmax.f32 %v14151_v9, 0.0  ;;  %v14152_v6 = vld [vmem:[#allocation165_spill] sm:$0xff] }
 0x6f4   :  { %5804 = vst [vmem:[%s12844_s4 + $0x368] sm:$0xff] %v5563_v0  ;;  %v5575_v46 = vmax.f32 %v14152_v6, 0.0  ;;  %v14153_v0 = vld [vmem:[#allocation166_spill] sm:$0xff] }
 0x6f5   :  { %5805 = vst [vmem:[%s12844_s4 + $0x370] sm:$0xff] %v5564_v45  ;;  %v5576_v8 = vmax.f32 %v14153_v0, 0.0  ;;  %v14154_v45 = vld [vmem:[#allocation168_spill] sm:$0xff] }
 0x6f6   :  { %5806 = vst [vmem:[%s12844_s4 + $0x378] sm:$0xff] %v5565_v39  ;;  %v5577_v59 = vmax.f32 %v14154_v45, 0.0  ;;  %v14155_v39 = vld [vmem:[#allocation170_spill] sm:$0xff] }
 0x6f7   :  { %5807 = vst [vmem:[%s12844_s4 + $0x380] sm:$0xff] %v5566_v23  ;;  %v5578_v27 = vmax.f32 %v14155_v39, 0.0  ;;  %v14156_v23 = vld [vmem:[#allocation172_spill] sm:$0xff] }
 0x6f8   :  { %5808 = vst [vmem:[%s12844_s4 + $0x388] sm:$0xff] %v5567_v14  ;;  %v5579_v57 = vmax.f32 %v14156_v23, 0.0  ;;  %v14157_v14 = vld [vmem:[#allocation174_spill] sm:$0xff] }
 0x6f9   :  { %5809 = vst [vmem:[%s12844_s4 + $0x390] sm:$0xff] %v5568_v2  ;;  %v5580_v31 = vmax.f32 %v14157_v14, 0.0  ;;  %v14158_v2 = vld [vmem:[#allocation176_spill] sm:$0xff] }
 0x6fa   :  { %5810 = vst [vmem:[%s12844_s4 + $0x398] sm:$0xff] %v5569_v43  ;;  %v5581_v38 = vmax.f32 %v14158_v2, 0.0  ;;  %v14159_v43 = vld [vmem:[#allocation178_spill] sm:$0xff] }
 0x6fb   :  { %5811 = vst [vmem:[%s12844_s4 + $0x3a0] sm:$0xff] %v5570_v36  ;;  %v5582_v30 = vmax.f32 %v14159_v43, 0.0  ;;  %v14160_v36 = vld [vmem:[#allocation180_spill] sm:$0xff] }
 0x6fc   :  { %5812 = vst [vmem:[%s12844_s4 + $0x3a8] sm:$0xff] %v5571_v22  ;;  %v5583_v58 = vmax.f32 %v14160_v36, 0.0  ;;  %v14161_v22 = vld [vmem:[#allocation182_spill] sm:$0xff] }
 0x6fd   :  { %5813 = vst [vmem:[%s12844_s4 + $0x3b0] sm:$0xff] %v5572_v32  ;;  %v5584_v51 = vmax.f32 %v14161_v22, 0.0  ;;  %v14162_v32 = vld [vmem:[#allocation184_spill] sm:$0xff] }
 0x6fe   :  { %5814 = vst [vmem:[%s12844_s4 + $0x3b8] sm:$0xff] %v5573_v34  ;;  %v5585_v53 = vmax.f32 %v14162_v32, 0.0  ;;  %v14163_v34 = vld [vmem:[#allocation188_spill] sm:$0xff] }
 0x6ff   :  { %5815 = vst [vmem:[%s12844_s4 + $0x3c0] sm:$0xff] %v5574_v54  ;;  %v5586_v9 = vmax.f32 %v14163_v34, 0.0  ;;  %v14164_v54 = vld [vmem:[#allocation189_spill] sm:$0xff] }
 0x700   :  { %5816 = vst [vmem:[%s12844_s4 + $0x3c8] sm:$0xff] %v5575_v46  ;;  %v5587_v6 = vmax.f32 %v14164_v54, 0.0  ;;  %v14165_v46 = vld [vmem:[#allocation190_spill] sm:$0xff] }
 0x701   :  { %5817 = vst [vmem:[%s12844_s4 + $0x3d0] sm:$0xff] %v5576_v8  ;;  %v5588_v0 = vmax.f32 %v14165_v46, 0.0  ;;  %v14166_v8 = vld [vmem:[#allocation191_spill] sm:$0xff] }
 0x702   :  { %5818 = vst [vmem:[%s12844_s4 + $0x3d8] sm:$0xff] %v5577_v59  ;;  %v5589_v45 = vmax.f32 %v14166_v8, 0.0  ;;  %v14167_v59 = vld [vmem:[#allocation192_spill] sm:$0xff] }
 0x703   :  { %5819 = vst [vmem:[%s12844_s4 + $0x3e0] sm:$0xff] %v5578_v27  ;;  %v5590_v39 = vmax.f32 %v14167_v59, 0.0  ;;  %v14168_v27 = vld [vmem:[#allocation194_spill] sm:$0xff] }
 0x704   :  { %5820 = vst [vmem:[%s12844_s4 + $0x3e8] sm:$0xff] %v5579_v57  ;;  %v5591_v23 = vmax.f32 %v14168_v27, 0.0  ;;  %v14169_v57 = vld [vmem:[#allocation195_spill] sm:$0xff] }
 0x705   :  { %5821 = vst [vmem:[%s12844_s4 + $0x3f0] sm:$0xff] %v5580_v31  ;;  %v5592_v14 = vmax.f32 %v14169_v57, 0.0  ;;  %v14170_v31 = vld [vmem:[#allocation196_spill] sm:$0xff] }
 0x706   :  { %5822 = vst [vmem:[%s12844_s4 + $0x3f8] sm:$0xff] %v5581_v38  ;;  %v5593_v2 = vmax.f32 %v14170_v31, 0.0  ;;  %v14171_v38 = vld [vmem:[#allocation197_spill] sm:$0xff] }
 0x707   :  { %5823 = vst [vmem:[%s12844_s4 + $0x400] sm:$0xff] %v5582_v30  ;;  %v5594_v43 = vmax.f32 %v14171_v38, 0.0  ;;  %v14172_v30 = vld [vmem:[#allocation198_spill] sm:$0xff] }
 0x708   :  { %5824 = vst [vmem:[%s12844_s4 + $0x408] sm:$0xff] %v5583_v58  ;;  %v5595_v36 = vmax.f32 %v14172_v30, 0.0  ;;  %v14173_v58 = vld [vmem:[#allocation199_spill] sm:$0xff] }
 0x709   :  { %5825 = vst [vmem:[%s12844_s4 + $0x410] sm:$0xff] %v5584_v51  ;;  %v5596_v22 = vmax.f32 %v14173_v58, 0.0  ;;  %v14174_v51 = vld [vmem:[#allocation26_spill] sm:$0xff] }
 0x70a   :  { %5826 = vst [vmem:[%s12844_s4 + $0x418] sm:$0xff] %v5585_v53  ;;  %v5597_v32 = vmax.f32 %v14174_v51, 0.0  ;;  %v14175_v53 = vld [vmem:[#allocation28_spill] sm:$0xff] }
 0x70b   :  { %5827 = vst [vmem:[%s12844_s4 + $0x420] sm:$0xff] %v5586_v9  ;;  %v5598_v34 = vmax.f32 %v14175_v53, 0.0  ;;  %v14176_v9 = vld [vmem:[#allocation30_spill] sm:$0xff] }
 0x70c   :  { %5828 = vst [vmem:[%s12844_s4 + $0x428] sm:$0xff] %v5587_v6  ;;  %v5599_v54 = vmax.f32 %v14176_v9, 0.0  ;;  %v14177_v6 = vld [vmem:[#allocation32_spill] sm:$0xff] }
 0x70d   :  { %5829 = vst [vmem:[%s12844_s4 + $0x430] sm:$0xff] %v5588_v0  ;;  %v5600_v46 = vmax.f32 %v14177_v6, 0.0  ;;  %v14178_v0 = vld [vmem:[#allocation35_spill] sm:$0xff] }
 0x70e   :  { %5830 = vst [vmem:[%s12844_s4 + $0x438] sm:$0xff] %v5589_v45  ;;  %v5601_v8 = vmax.f32 %v14178_v0, 0.0  ;;  %v14179_v45 = vld [vmem:[#allocation37_spill] sm:$0xff] }
 0x70f   :  { %5831 = vst [vmem:[%s12844_s4 + $0x440] sm:$0xff] %v5590_v39  ;;  %v5602_v59 = vmax.f32 %v14179_v45, 0.0  ;;  %v14180_v39 = vld [vmem:[#allocation39_spill] sm:$0xff] }
 0x710   :  { %5832 = vst [vmem:[%s12844_s4 + $0x448] sm:$0xff] %v5591_v23  ;;  %v5603_v27 = vmax.f32 %v14180_v39, 0.0  ;;  %v14181_v23 = vld [vmem:[#allocation41_spill] sm:$0xff] }
 0x711   :  { %5833 = vst [vmem:[%s12844_s4 + $0x450] sm:$0xff] %v5592_v14  ;;  %v5604_v57 = vmax.f32 %v14181_v23, 0.0  ;;  %v14182_v14 = vld [vmem:[#allocation43_spill] sm:$0xff] }
 0x712   :  { %5834 = vst [vmem:[%s12844_s4 + $0x458] sm:$0xff] %v5593_v2  ;;  %v5605_v31 = vmax.f32 %v14182_v14, 0.0  ;;  %v14183_v2 = vld [vmem:[#allocation45_spill] sm:$0xff] }
 0x713   :  { %5835 = vst [vmem:[%s12844_s4 + $0x460] sm:$0xff] %v5594_v43  ;;  %v5606_v38 = vmax.f32 %v14183_v2, 0.0  ;;  %v14184_v43 = vld [vmem:[#allocation47_spill] sm:$0xff] }
 0x714   :  { %5836 = vst [vmem:[%s12844_s4 + $0x468] sm:$0xff] %v5595_v36  ;;  %v5607_v30 = vmax.f32 %v14184_v43, 0.0  ;;  %v14185_v36 = vld [vmem:[#allocation49_spill] sm:$0xff] }
 0x715   :  { %5837 = vst [vmem:[%s12844_s4 + $0x470] sm:$0xff] %v5596_v22  ;;  %v5608_v58 = vmax.f32 %v14185_v36, 0.0  ;;  %v14186_v22 = vld [vmem:[#allocation51_spill] sm:$0xff] }
 0x716   :  { %5838 = vst [vmem:[%s12844_s4 + $0x478] sm:$0xff] %v5597_v32  ;;  %v5609_v51 = vmax.f32 %v14186_v22, 0.0  ;;  %v14187_v32 = vld [vmem:[#allocation53_spill] sm:$0xff] }
 0x717   :  { %5839 = vst [vmem:[%s12844_s4 + $0x480] sm:$0xff] %v5598_v34  ;;  %v5610_v53 = vmax.f32 %v14187_v32, 0.0  ;;  %v14188_v34 = vld [vmem:[#allocation55_spill] sm:$0xff] }
 0x718   :  { %5840 = vst [vmem:[%s12844_s4 + $0x488] sm:$0xff] %v5599_v54  ;;  %v5611_v9 = vmax.f32 %v14188_v34, 0.0  ;;  %v14189_v54 = vld [vmem:[#allocation57_spill] sm:$0xff] }
 0x719   :  { %5841 = vst [vmem:[%s12844_s4 + $0x490] sm:$0xff] %v5600_v46  ;;  %v5612_v6 = vmax.f32 %v14189_v54, 0.0  ;;  %v14190_v46 = vld [vmem:[#allocation59_spill] sm:$0xff]  ;;  %v5625_v54 = vmax.f32 %v11488_v19, 0.0 }
 0x71a   :  { %5842 = vst [vmem:[%s12844_s4 + $0x498] sm:$0xff] %v5601_v8  ;;  %v5613_v0 = vmax.f32 %v14190_v46, 0.0  ;;  %v14191_v8 = vld [vmem:[#allocation61_spill] sm:$0xff]  ;;  %v5627_v46 = vmax.f32 %v11496_v11, 0.0  ;;  %v14202_v19 = vld [vmem:[#allocation83_spill] sm:$0xff]  ;;  %v5631_v11 = vmax.f32 %v11512_v33, 0.0 }
 0x71b   :  { %5843 = vst [vmem:[%s12844_s4 + $0x4a0] sm:$0xff] %v5602_v59  ;;  %v5614_v45 = vmax.f32 %v14191_v8, 0.0  ;;  %v14192_v59 = vld [vmem:[#allocation63_spill] sm:$0xff]  ;;  %v5629_v8 = vmax.f32 %v14202_v19, 0.0  ;;  %v5635_v33 = vmax.f32 %v11528_v42, 0.0  ;;  %v14205_v42 = vld [vmem:[#allocation89_spill] sm:$0xff] }
 0x71c   :  { %5844 = vst [vmem:[%s12844_s4 + $0x4a8] sm:$0xff] %v5603_v27  ;;  %v5615_v39 = vmax.f32 %v14192_v59, 0.0  ;;  %v14193_v27 = vld [vmem:[#allocation65_spill] sm:$0xff]  ;;  %v5633_v59 = vmax.f32 %v11520_v61, 0.0  ;;  %v14204_v61 = vld [vmem:[#allocation87_spill] sm:$0xff]  ;;  %v5658_v19 = vmax.f32 %v11620_v37, 0.0 }
 0x71d   :  { %5845 = vst [vmem:[%s12844_s4 + $0x4b0] sm:$0xff] %v5604_v57  ;;  %v5616_v23 = vmax.f32 %v14193_v27, 0.0  ;;  %v14194_v57 = vld [vmem:[#allocation67_spill] sm:$0xff]  ;;  %v5637_v27 = vmax.f32 %v14204_v61, 0.0  ;;  %v5662_v37 = vmax.f32 %v11636_v18, 0.0  ;;  %v5666_v18 = vmax.f32 %v11652_v28, 0.0 }
 0x71e   :  { %5846 = vst [vmem:[%s12844_s4 + $0x4b8] sm:$0xff] %v5605_v31  ;;  %v5617_v14 = vmax.f32 %v14194_v57, 0.0  ;;  %v14195_v31 = vld [vmem:[#allocation69_spill] sm:$0xff]  ;;  %v14206_v57 = vld [vmem:[#allocation91_spill] sm:$0xff]  ;;  %v5670_v28 = vmax.f32 %v11668_v60, 0.0 }
 0x71f   :  { %5847 = vst [vmem:[%s12844_s4 + $0x4c0] sm:$0xff] %v5606_v38  ;;  %v5618_v2 = vmax.f32 %v14195_v31, 0.0  ;;  %v14196_v38 = vld [vmem:[#allocation71_spill] sm:$0xff]  ;;  %v14207_v31 = vld [vmem:[#allocation93_spill] sm:$0xff] }
 0x720   :  { %5848 = vst [vmem:[%s12844_s4 + $0x4c8] sm:$0xff] %v5607_v30  ;;  %v5619_v43 = vmax.f32 %v14196_v38, 0.0  ;;  %v14197_v30 = vld [vmem:[#allocation73_spill] sm:$0xff]  ;;  %v14216_v60 = vld [vmem:[#allocation111_spill] sm:$0xff] }
 0x721   :  { %5849 = vst [vmem:[%s12844_s4 + $0x4d0] sm:$0xff] %v5608_v58  ;;  %v5620_v36 = vmax.f32 %v14197_v30, 0.0  ;;  %v14198_v58 = vld [vmem:[#allocation75_spill] sm:$0xff]  ;;  %v14221_v61 = vld [vmem:[#allocation121_spill] sm:$0xff] }
 0x722   :  { %5850 = vst [vmem:[%s12844_s4 + $0x4d8] sm:$0xff] %v5609_v51  ;;  %v5621_v22 = vmax.f32 %v14198_v58, 0.0  ;;  %v14199_v51 = vld [vmem:[#allocation77_spill] sm:$0xff] }
 0x723   :  { %5851 = vst [vmem:[%s12844_s4 + $0x4e0] sm:$0xff] %v5610_v53  ;;  %v5622_v32 = vmax.f32 %v14199_v51, 0.0  ;;  %v14200_v53 = vld [vmem:[#allocation79_spill] sm:$0xff] }
 0x724   :  { %5852 = vst [vmem:[%s12844_s4 + $0x4e8] sm:$0xff] %v5611_v9  ;;  %v5623_v34 = vmax.f32 %v14200_v53, 0.0  ;;  %v5624_v9 = vmax.f32 %v11484_v24, 0.0  ;;  %v14201_v24 = vld [vmem:[#allocation81_spill] sm:$0xff] }
 0x725   :  { %5853 = vst [vmem:[%s12844_s4 + $0x4f0] sm:$0xff] %v5612_v6  ;;  %v5626_v6 = vmax.f32 %v11492_v1, 0.0  ;;  %v5630_v1 = vmax.f32 %v11508_v35, 0.0  ;;  %v5634_v35 = vmax.f32 %v11524_v26, 0.0  ;;  %v5638_v26 = vmax.f32 %v11540_v10, 0.0  ;;  %v14208_v10 = vld [vmem:[#allocation95_spill] sm:$0xff] }
 0x726   :  { %5854 = vst [vmem:[%s12844_s4 + $0x4f8] sm:$0xff] %v5613_v0  ;;  %v5628_v0 = vmax.f32 %v14201_v24, 0.0  ;;  %v5642_v38 = vmax.f32 %v14208_v10, 0.0 }
 0x727   :  { %5855 = vst [vmem:[%s12844_s4 + $0x500] sm:$0xff] %v5614_v45  ;;  %v5632_v45 = vmax.f32 %v11516_v50, 0.0  ;;  %v14203_v50 = vld [vmem:[#allocation85_spill] sm:$0xff] }
 0x728   :  { %5856 = vst [vmem:[%s12844_s4 + $0x508] sm:$0xff] %v5615_v39  ;;  %v5636_v39 = vmax.f32 %v14203_v50, 0.0  ;;  %v14220_v50 = vld [vmem:[#allocation119_spill] sm:$0xff] }
 0x729   :  { %5857 = vst [vmem:[%s12844_s4 + $0x510] sm:$0xff] %v5616_v23  ;;  %v5639_v23 = vmax.f32 %v14205_v42, 0.0  ;;  %v14223_v42 = vld [vmem:[#allocation125_spill] sm:$0xff] }
 0x72a   :  { %5858 = vst [vmem:[%s12844_s4 + $0x518] sm:$0xff] %v5617_v14  ;;  %v5640_v14 = vmax.f32 %v14206_v57, 0.0  ;;  %v5683_v57 = vmax.f32 %v11720_v3, 0.0  ;;  %v14225_v3 = vld [vmem:[#allocation129_spill] sm:$0xff] }
 0x72b   :  { %5859 = vst [vmem:[%s12844_s4 + $0x520] sm:$0xff] %v5618_v2  ;;  %v5641_v2 = vmax.f32 %v14207_v31, 0.0  ;;  %v5685_v31 = vmax.f32 %v11728_v12, 0.0  ;;  %v14227_v12 = vld [vmem:[#allocation133_spill] sm:$0xff] }
 0x72c   :  { %5860 = vst [vmem:[%s12844_s4 + $0x528] sm:$0xff] %v5619_v43  ;;  %v14209_v43 = vld [vmem:[#allocation97_spill] sm:$0xff] }
 0x72d   :  { %5861 = vst [vmem:[%s12844_s4 + $0x530] sm:$0xff] %v5620_v36  ;;  %v5643_v30 = vmax.f32 %v14209_v43, 0.0  ;;  %v14210_v36 = vld [vmem:[#allocation99_spill] sm:$0xff] }
 0x72e   :  { %5862 = vst [vmem:[%s12844_s4 + $0x538] sm:$0xff] %v5621_v22  ;;  %v5644_v58 = vmax.f32 %v14210_v36, 0.0  ;;  %v14211_v22 = vld [vmem:[#allocation101_spill] sm:$0xff]  ;;  %v14228_v36 = vld [vmem:[#allocation135_spill] sm:$0xff] }
 0x72f   :  { %5863 = vst [vmem:[%s12844_s4 + $0x540] sm:$0xff] %v5622_v32  ;;  %v5645_v51 = vmax.f32 %v14211_v22, 0.0  ;;  %v14212_v32 = vld [vmem:[#allocation103_spill] sm:$0xff]  ;;  %v14229_v22 = vld [vmem:[#allocation137_spill] sm:$0xff] }
 0x730   :  { %5864 = vst [vmem:[%s12844_s4 + $0x548] sm:$0xff] %v5623_v34  ;;  %v5646_v53 = vmax.f32 %v14212_v32, 0.0  ;;  %v5647_v34 = vmax.f32 %v11576_v13, 0.0  ;;  %v5651_v13 = vmax.f32 %v11592_v56, 0.0  ;;  %v5655_v56 = vmax.f32 %v11608_v41, 0.0  ;;  %v14230_v32 = vld [vmem:[#allocation139_spill] sm:$0xff] }
 0x731   :  { %5865 = vst [vmem:[%s12844_s4 + $0x550] sm:$0xff] %v5624_v9  ;;  %v5648_v9 = vmax.f32 %v11580_v49, 0.0  ;;  %v14213_v49 = vld [vmem:[#allocation105_spill] sm:$0xff]  ;;  %v5659_v41 = vmax.f32 %v11624_v52, 0.0  ;;  %v5663_v52 = vmax.f32 %v11640_v55, 0.0  ;;  %v5667_v55 = vmax.f32 %v11656_v20, 0.0 }
 0x732   :  { %5866 = vst [vmem:[%s12844_s4 + $0x558] sm:$0xff] %v5625_v54  ;;  %v5649_v54 = vmax.f32 %v11584_v44, 0.0  ;;  %v5653_v44 = vmax.f32 %v11600_v17, 0.0  ;;  %v5657_v17 = vmax.f32 %v11616_v4, 0.0  ;;  %v5661_v4 = vmax.f32 %v11632_v21, 0.0 }
 0x733   :  { %5867 = vst [vmem:[%s12844_s4 + $0x560] sm:$0xff] %v5626_v6  ;;  %v5650_v6 = vmax.f32 %v11588_v25, 0.0  ;;  %v14214_v25 = vld [vmem:[#allocation107_spill] sm:$0xff]  ;;  %v5665_v21 = vmax.f32 %v11648_v62, 0.0  ;;  %v5669_v62 = vmax.f32 %v11664_v47, 0.0  ;;  %v5671_v20 = vmax.f32 %v11672_v29, 0.0 }
 0x734   :  { %5868 = vst [vmem:[%s12844_s4 + $0x568] sm:$0xff] %v5627_v46  ;;  %v5652_v46 = vmax.f32 %v14213_v49, 0.0  ;;  %v5654_v24 = vmax.f32 %v14214_v25, 0.0  ;;  %v5673_v47 = vmax.f32 %v11680_v7, 0.0  ;;  %v14217_v29 = vld [vmem:[#allocation113_spill] sm:$0xff]  ;;  %v5677_v7 = vmax.f32 %v11696_v40, 0.0 }
 0x735   :  { %5869 = vst [vmem:[%s12844_s4 + $0x570] sm:$0xff] %v5628_v0  ;;  %v5656_v0 = vmax.f32 %v11612_v15, 0.0  ;;  %v5660_v15 = vmax.f32 %v11628_v5, 0.0  ;;  %v5664_v5 = vmax.f32 %v11644_v16, 0.0  ;;  %v5668_v16 = vmax.f32 %v11660_v48, 0.0  ;;  %v14215_v48 = vld [vmem:[#allocation109_spill] sm:$0xff] }
 0x736   :  { %5870 = vst [vmem:[%s12844_s4 + $0x578] sm:$0xff] %v5629_v8  ;;  %v5672_v8 = vmax.f32 %v14215_v48, 0.0  ;;  %v14222_v40 = vld [vmem:[#allocation123_spill] sm:$0xff] }
 0x737   :  { %5871 = vst [vmem:[%s12844_s4 + $0x580] sm:$0xff] %v5630_v1  ;;  %v5674_v1 = vmax.f32 %v14216_v60, 0.0 }
 0x738   :  { %5872 = vst [vmem:[%s12844_s4 + $0x588] sm:$0xff] %v5631_v11  ;;  %v5675_v11 = vmax.f32 %v14217_v29, 0.0 }
 0x739   :  { %5873 = vst [vmem:[%s12844_s4 + $0x590] sm:$0xff] %v5632_v45  ;;  %v14218_v45 = vld [vmem:[#allocation115_spill] sm:$0xff] }
 0x73a   :  { %5874 = vst [vmem:[%s12844_s4 + $0x598] sm:$0xff] %v5633_v59  ;;  %v5676_v59 = vmax.f32 %v14218_v45, 0.0 }
 0x73b   :  { %5875 = vst [vmem:[%s12844_s4 + $0x5a0] sm:$0xff] %v5634_v35  ;;  %v14219_v35 = vld [vmem:[#allocation117_spill] sm:$0xff] }
 0x73c   :  { %5876 = vst [vmem:[%s12844_s4 + $0x5a8] sm:$0xff] %v5635_v33  ;;  %v5678_v33 = vmax.f32 %v14219_v35, 0.0 }
 0x73d   :  { %5877 = vst [vmem:[%s12844_s4 + $0x5b0] sm:$0xff] %v5636_v39  ;;  %v5679_v39 = vmax.f32 %v14220_v50, 0.0 }
 0x73e   :  { %5878 = vst [vmem:[%s12844_s4 + $0x5b8] sm:$0xff] %v5637_v27  ;;  %v5680_v27 = vmax.f32 %v14221_v61, 0.0 }
 0x73f   :  { %5879 = vst [vmem:[%s12844_s4 + $0x5c0] sm:$0xff] %v5638_v26  ;;  %v5681_v26 = vmax.f32 %v14222_v40, 0.0 }
 0x740   :  { %5880 = vst [vmem:[%s12844_s4 + $0x5c8] sm:$0xff] %v5639_v23  ;;  %v5682_v23 = vmax.f32 %v14223_v42, 0.0 }
 0x741   :  { %5881 = vst [vmem:[%s12844_s4 + $0x5d0] sm:$0xff] %v5640_v14  ;;  %v5684_v14 = vmax.f32 %v11724_v63, 0.0  ;;  %v14226_v63 = vld [vmem:[#allocation131_spill] sm:$0xff] }
 0x742   :  { %5882 = vst [vmem:[%s12844_s4 + $0x5d8] sm:$0xff] %v5641_v2  ;;  %v14224_v2 = vld [vmem:[#allocation127_spill] sm:$0xff]  ;;  %v5688_v43 = vmax.f32 %v14226_v63, 0.0 }
 0x743   :  { %5883 = vst [vmem:[%s12844_s4 + $0x5e0] sm:$0xff] %v5642_v38  ;;  %v5686_v10 = vmax.f32 %v14224_v2, 0.0  ;;  %v5687_v38 = vmax.f32 %v14225_v3, 0.0 }
 0x744   :  { %5884 = vst [vmem:[%s12844_s4 + $0x5e8] sm:$0xff] %v5643_v30  ;;  %v5689_v30 = vmax.f32 %v14227_v12, 0.0 }
 0x745   :  { %5885 = vst [vmem:[%s12844_s4 + $0x5f0] sm:$0xff] %v5644_v58  ;;  %v5690_v58 = vmax.f32 %v14228_v36, 0.0 }
 0x746   :  { %5886 = vst [vmem:[%s12844_s4 + $0x5f8] sm:$0xff] %v5645_v51  ;;  %v5691_v51 = vmax.f32 %v14229_v22, 0.0 }
 0x747   :  { %5887 = vst [vmem:[%s12844_s4 + $0x600] sm:$0xff] %v5646_v53  ;;  %v5692_v53 = vmax.f32 %v14230_v32, 0.0 }
 0x748   :  { %5888 = vst [vmem:[%s12844_s4 + $0x608] sm:$0xff] %v5647_v34  ;;  %v14231_v34 = vld [vmem:[#allocation141_spill] sm:$0xff] }
 0x749   :  { %5889 = vst [vmem:[%s12844_s4 + $0x610] sm:$0xff] %v5648_v9  ;;  %v5693_v9 = vmax.f32 %v14231_v34, 0.0 }
 0x74a   :  { %5890 = vst [vmem:[%s12844_s4 + $0x618] sm:$0xff] %v5649_v54  ;;  %v14232_v54 = vld [vmem:[#allocation143_spill] sm:$0xff] }
 0x74b   :  { %5891 = vst [vmem:[%s12844_s4 + $0x620] sm:$0xff] %v5650_v6  ;;  %v5694_v6 = vmax.f32 %v14232_v54, 0.0 }
 0x74c   :  { %5892 = vst [vmem:[%s12844_s4 + $0x628] sm:$0xff] %v5651_v13 }
 0x74d   :  { %5893 = vst [vmem:[%s12844_s4 + $0x630] sm:$0xff] %v5652_v46 }
 0x74e   :  { %5894 = vst [vmem:[%s12844_s4 + $0x638] sm:$0xff] %v5653_v44 }
 0x74f   :  { %5895 = vst [vmem:[%s12844_s4 + $0x640] sm:$0xff] %v5654_v24 }
 0x750   :  { %5896 = vst [vmem:[%s12844_s4 + $0x648] sm:$0xff] %v5655_v56 }
 0x751   :  { %5897 = vst [vmem:[%s12844_s4 + $0x650] sm:$0xff] %v5656_v0 }
 0x752   :  { %5898 = vst [vmem:[%s12844_s4 + $0x658] sm:$0xff] %v5657_v17 }
 0x753   :  { %5899 = vst [vmem:[%s12844_s4 + $0x660] sm:$0xff] %v5658_v19 }
 0x754   :  { %5900 = vst [vmem:[%s12844_s4 + $0x668] sm:$0xff] %v5659_v41 }
 0x755   :  { %5901 = vst [vmem:[%s12844_s4 + $0x670] sm:$0xff] %v5660_v15 }
 0x756   :  { %5902 = vst [vmem:[%s12844_s4 + $0x678] sm:$0xff] %v5661_v4 }
 0x757   :  { %5903 = vst [vmem:[%s12844_s4 + $0x680] sm:$0xff] %v5662_v37 }
 0x758   :  { %5904 = vst [vmem:[%s12844_s4 + $0x688] sm:$0xff] %v5663_v52 }
 0x759   :  { %5905 = vst [vmem:[%s12844_s4 + $0x690] sm:$0xff] %v5664_v5 }
 0x75a   :  { %5906 = vst [vmem:[%s12844_s4 + $0x698] sm:$0xff] %v5665_v21 }
 0x75b   :  { %5907 = vst [vmem:[%s12844_s4 + $0x6a0] sm:$0xff] %v5666_v18 }
 0x75c   :  { %5908 = vst [vmem:[%s12844_s4 + $0x6a8] sm:$0xff] %v5667_v55 }
 0x75d   :  { %5909 = vst [vmem:[%s12844_s4 + $0x6b0] sm:$0xff] %v5668_v16 }
 0x75e   :  { %5910 = vst [vmem:[%s12844_s4 + $0x6b8] sm:$0xff] %v5669_v62 }
 0x75f   :  { %5911 = vst [vmem:[%s12844_s4 + $0x6c0] sm:$0xff] %v5670_v28 }
 0x760   :  { %5912 = vst [vmem:[%s12844_s4 + $0x6c8] sm:$0xff] %v5671_v20 }
 0x761   :  { %5913 = vst [vmem:[%s12844_s4 + $0x6d0] sm:$0xff] %v5672_v8 }
 0x762   :  { %5914 = vst [vmem:[%s12844_s4 + $0x6d8] sm:$0xff] %v5673_v47 }
 0x763   :  { %5915 = vst [vmem:[%s12844_s4 + $0x6e0] sm:$0xff] %v5674_v1 }
 0x764   :  { %5916 = vst [vmem:[%s12844_s4 + $0x6e8] sm:$0xff] %v5675_v11 }
 0x765   :  { %5917 = vst [vmem:[%s12844_s4 + $0x6f0] sm:$0xff] %v5676_v59 }
 0x766   :  { %5918 = vst [vmem:[%s12844_s4 + $0x6f8] sm:$0xff] %v5677_v7 }
 0x767   :  { %5919 = vst [vmem:[%s12844_s4 + $0x700] sm:$0xff] %v5678_v33 }
 0x768   :  { %5920 = vst [vmem:[%s12844_s4 + $0x708] sm:$0xff] %v5679_v39 }
 0x769   :  { %5921 = vst [vmem:[%s12844_s4 + $0x710] sm:$0xff] %v5680_v27 }
 0x76a   :  { %5922 = vst [vmem:[%s12844_s4 + $0x718] sm:$0xff] %v5681_v26 }
 0x76b   :  { %5923 = vst [vmem:[%s12844_s4 + $0x720] sm:$0xff] %v5682_v23 }
 0x76c   :  { %5924 = vst [vmem:[%s12844_s4 + $0x728] sm:$0xff] %v5683_v57 }
 0x76d   :  { %5925 = vst [vmem:[%s12844_s4 + $0x730] sm:$0xff] %v5684_v14 }
 0x76e   :  { %5926 = vst [vmem:[%s12844_s4 + $0x738] sm:$0xff] %v5685_v31 }
 0x76f   :  { %5927 = vst [vmem:[%s12844_s4 + $0x740] sm:$0xff] %v5686_v10 }
 0x770   :  { %5928 = vst [vmem:[%s12844_s4 + $0x748] sm:$0xff] %v5687_v38 }
 0x771   :  { %5929 = vst [vmem:[%s12844_s4 + $0x750] sm:$0xff] %v5688_v43 }
 0x772   :  { %5930 = vst [vmem:[%s12844_s4 + $0x758] sm:$0xff] %v5689_v30 }
 0x773   :  { %5931 = vst [vmem:[%s12844_s4 + $0x760] sm:$0xff] %v5690_v58 }
 0x774   :  { %5932 = vst [vmem:[%s12844_s4 + $0x768] sm:$0xff] %v5691_v51 }
 0x775   :  { %5933 = vst [vmem:[%s12844_s4 + $0x770] sm:$0xff] %v5692_v53 }
 0x776   :  { %5934 = vst [vmem:[%s12844_s4 + $0x778] sm:$0xff] %v5693_v9 }
 0x777   :  { %5935 = vst [vmem:[%s12844_s4 + $0x780] sm:$0xff] %v5694_v6 }

// kernel: _lambda_.9
= control target key start
LH: loop header
LB: loop body
LE: loop exit
PB: predicated region body
PF: predicated region fallthrough
CT: control target
= control target key end

     0   :  { %s2084_s12 = smov 0   ;;  %s2463_s0 = inlined_call_operand.vmem [shape: bf16[8192,128], index: 0, kind: input, shape index: {}]   ;;  %s2464_s1 = inlined_call_operand.vmem [shape: bf16[128,128], index: 1, kind: input, shape index: {}]   ;;  %s2465_s2 = inlined_call_operand.vmem [shape: f32[1,128], index: 2, kind: input, shape index: {}]   ;;  %s2466_s3 = inlined_call_operand.vmem [shape: f32[8192,128], index: 3, kind: output, shape index: {}]  }
   0x1 LB: > { %s1395_s13 = sadd.s32 4294967295, %s2062_s12   ;;  %p1399_p0 = scmp.ge.s32.totalorder %s2062_s12, 1  ;;  %s2062_s12 = sphi %s2084_s12, %s13_s12  }
   0x2   : > { %p138_p1 = scmp.lt.s32.totalorder %s2062_s12, 9 }
   0x4   : > { %p139_p2 = pnand %p1399_p0, %p138_p1 }
   0x5   : > { %s1400_s22 = sshll.u32 (!%p139_p2), %s1395_s13, 7 }
   0x6   : > { %142 = sbr.rel (%p139_p2) target bundleno = 435 (0x1b3), region = 32  ;;  %p163_p3 = scmp.lt.s32.totalorder (!%p139_p2), %s1400_s22, 1023 }
   0xb   : > { %v1765_v0 = vld [vmem:[%s2464_s1 + $0x38] sm:$0xff]  ;;  %v1764_v1 = vld [vmem:[%s2464_s1 + $0x30] sm:$0xff]  ;;  %v1763_v2 = vld [vmem:[%s2464_s1 + $0x28] sm:$0xff]  ;;  %s2468_s22 = smov (!%p163_p3, %s1400_s22), 1023 }
   0xc   : > { %754 = vmatpush.bf16.msra.mxu0 %v1765_v0  ;;  %1766 = vmatpush.bf16.msra.mxu1 %v1765_v0  ;;  %v1762_v3 = vld [vmem:[%s2464_s1 + $0x20] sm:$0xff]  ;;  %v1761_v4 = vld [vmem:[%s2464_s1 + $0x18] sm:$0xff]  ;;  %v1760_v5 = vld [vmem:[%s2464_s1 + $0x10] sm:$0xff]  ;;  %s1401_s29 = sshll.u32 %s2468_s22, 2  ;;  %s1403_s10 = sshll.u32 %s2468_s22, 3 }
   0xd   : > { %1767 = vmatpush.bf16.msra.mxu2 %v1765_v0  ;;  %1768 = vmatpush.bf16.msra.mxu3 %v1765_v0  ;;  %v1759_v6 = vld [vmem:[%s2464_s1 + $0x8] sm:$0xff]  ;;  %v1758_v7 = vld [vmem:[%s2464_s1] sm:$0xff]  ;;  %s2122_s7 = scalar_lea.vmem %s2463_s0, %s1401_s29  ;;  %s2171_s14 = scalar_lea.vmem %s2466_s3, %s1403_s10 }
   0xe   : > { %v1694_v8 = vld [vmem:[%s2122_s7] sm:$0xff]  ;;  %v1695_v12 = vld [vmem:[%s2122_s7 + $0x8] sm:$0xff]  ;;  %v1696_v16 = vld [vmem:[%s2122_s7 + $0x10] sm:$0xff] }
   0xf   : > { %v1710_v9 = vld [vmem:[%s2122_s7 + $0x80] sm:$0xff]  ;;  %v1711_v13 = vld [vmem:[%s2122_s7 + $0x88] sm:$0xff]  ;;  %v1712_v17 = vld [vmem:[%s2122_s7 + $0x90] sm:$0xff] }
  0x10   : > { %755 = vmatpush.bf16.msra.mxu0 %v1764_v1  ;;  %1769 = vmatpush.bf16.msra.mxu1 %v1764_v1  ;;  %v1726_v10 = vld [vmem:[%s2122_s7 + $0x100] sm:$0xff]  ;;  %v1727_v14 = vld [vmem:[%s2122_s7 + $0x108] sm:$0xff]  ;;  %v1728_v18 = vld [vmem:[%s2122_s7 + $0x110] sm:$0xff] }
  0x11   : > { %1770 = vmatpush.bf16.msra.mxu2 %v1764_v1  ;;  %1771 = vmatpush.bf16.msra.mxu3 %v1764_v1  ;;  %v1742_v11 = vld [vmem:[%s2122_s7 + $0x180] sm:$0xff]  ;;  %v1743_v15 = vld [vmem:[%s2122_s7 + $0x188] sm:$0xff]  ;;  %v1744_v19 = vld [vmem:[%s2122_s7 + $0x190] sm:$0xff] }
  0x12   : > { %v1697_v20 = vld [vmem:[%s2122_s7 + $0x18] sm:$0xff]  ;;  %v1698_v24 = vld [vmem:[%s2122_s7 + $0x20] sm:$0xff]  ;;  %v1699_v28 = vld [vmem:[%s2122_s7 + $0x28] sm:$0xff] }
  0x13   : > { %v1713_v21 = vld [vmem:[%s2122_s7 + $0x98] sm:$0xff]  ;;  %v1714_v25 = vld [vmem:[%s2122_s7 + $0xa0] sm:$0xff]  ;;  %v1715_v29 = vld [vmem:[%s2122_s7 + $0xa8] sm:$0xff] }
  0x14   : > { %756 = vmatpush.bf16.msra.mxu0 %v1763_v2  ;;  %1772 = vmatpush.bf16.msra.mxu1 %v1763_v2  ;;  %v1729_v22 = vld [vmem:[%s2122_s7 + $0x118] sm:$0xff]  ;;  %v1730_v26 = vld [vmem:[%s2122_s7 + $0x120] sm:$0xff]  ;;  %v1731_v30 = vld [vmem:[%s2122_s7 + $0x128] sm:$0xff] }
  0x15   : > { %1773 = vmatpush.bf16.msra.mxu2 %v1763_v2  ;;  %1774 = vmatpush.bf16.msra.mxu3 %v1763_v2  ;;  %v1745_v23 = vld [vmem:[%s2122_s7 + $0x198] sm:$0xff]  ;;  %v1746_v27 = vld [vmem:[%s2122_s7 + $0x1a0] sm:$0xff]  ;;  %v1747_v31 = vld [vmem:[%s2122_s7 + $0x1a8] sm:$0xff] }
  0x16   : > { %v1700_v32 = vld [vmem:[%s2122_s7 + $0x30] sm:$0xff]  ;;  %v1701_v36 = vld [vmem:[%s2122_s7 + $0x38] sm:$0xff]  ;;  %v2159_v40 = vld [vmem:[%s2465_s2] ss:$0 sm:$0xff] }
  0x17   : > { %v1716_v33 = vld [vmem:[%s2122_s7 + $0xb0] sm:$0xff]  ;;  %v1717_v37 = vld [vmem:[%s2122_s7 + $0xb8] sm:$0xff]  ;;  %v1702_v41 = vld [vmem:[%s2122_s7 + $0x40] sm:$0xff] }
  0x18   : > { %757 = vmatpush.bf16.msra.mxu0 %v1762_v3  ;;  %1775 = vmatpush.bf16.msra.mxu1 %v1762_v3  ;;  %v1732_v34 = vld [vmem:[%s2122_s7 + $0x130] sm:$0xff]  ;;  %v1733_v38 = vld [vmem:[%s2122_s7 + $0x138] sm:$0xff]  ;;  %v1718_v42 = vld [vmem:[%s2122_s7 + $0xc0] sm:$0xff] }
  0x19   : > { %1776 = vmatpush.bf16.msra.mxu2 %v1762_v3  ;;  %1777 = vmatpush.bf16.msra.mxu3 %v1762_v3  ;;  %v1748_v35 = vld [vmem:[%s2122_s7 + $0x1b0] sm:$0xff]  ;;  %v1749_v39 = vld [vmem:[%s2122_s7 + $0x1b8] sm:$0xff]  ;;  %v1734_v45 = vld [vmem:[%s2122_s7 + $0x140] sm:$0xff] }
  0x1a   : > { %v1750_v46 = vld [vmem:[%s2122_s7 + $0x1c0] sm:$0xff]  ;;  %v1703_v61 = vld [vmem:[%s2122_s7 + $0x48] sm:$0xff] }
  0x1b   : > { %v1719_v62 = vld [vmem:[%s2122_s7 + $0xc8] sm:$0xff] }
  0x1c   : > { %758 = vmatpush.bf16.msra.mxu0 %v1761_v4  ;;  %1778 = vmatpush.bf16.msra.mxu1 %v1761_v4 }
  0x1d   : > { %1779 = vmatpush.bf16.msra.mxu2 %v1761_v4  ;;  %1780 = vmatpush.bf16.msra.mxu3 %v1761_v4  ;;  %v1735_v4 = vld [vmem:[%s2122_s7 + $0x148] sm:$0xff] }
  0x20   : > { %759 = vmatpush.bf16.msra.mxu0 %v1760_v5  ;;  %1781 = vmatpush.bf16.msra.mxu1 %v1760_v5 }
  0x21   : > { %1782 = vmatpush.bf16.msra.mxu2 %v1760_v5  ;;  %1783 = vmatpush.bf16.msra.mxu3 %v1760_v5  ;;  %v1751_v5 = vld [vmem:[%s2122_s7 + $0x1c8] sm:$0xff] }
  0x24   : > { %760 = vmatpush.bf16.msra.mxu0 %v1759_v6  ;;  %1784 = vmatpush.bf16.msra.mxu1 %v1759_v6 }
  0x25   : > { %1785 = vmatpush.bf16.msra.mxu2 %v1759_v6  ;;  %1786 = vmatpush.bf16.msra.mxu3 %v1759_v6 }
  0x28   : > { %761 = vmatpush.bf16.msra.mxu0 %v1758_v7  ;;  %1787 = vmatpush.bf16.msra.mxu1 %v1758_v7 }
  0x29   : > { %1788 = vmatpush.bf16.msra.mxu2 %v1758_v7  ;;  %1789 = vmatpush.bf16.msra.mxu3 %v1758_v7 }
  0x2b   : > { %762 = vmatmul.bf16.vlgmr.msra.gmra.mxu0 %v1694_v8  ;;  %842 = vmatmul.bf16.vlgmr.msra.gmra.mxu1 %v1710_v9 }
  0x2c   : > { %922 = vmatmul.bf16.vlgmr.msra.gmra.mxu2 %v1726_v10  ;;  %1002 = vmatmul.bf16.vlgmr.msra.gmra.mxu3 %v1742_v11 }
  0x3b   : > { %767 = vmatmul.bf16.gmra.mxu0 %v1695_v12  ;;  %847 = vmatmul.bf16.gmra.mxu1 %v1711_v13 }
  0x3c   : > { %927 = vmatmul.bf16.gmra.mxu2 %v1727_v14  ;;  %1007 = vmatmul.bf16.gmra.mxu3 %v1743_v15 }
  0x4b   : > { %772 = vmatmul.bf16.gmra.mxu0 %v1696_v16  ;;  %852 = vmatmul.bf16.gmra.mxu1 %v1712_v17 }
  0x4c   : > { %932 = vmatmul.bf16.gmra.mxu2 %v1728_v18  ;;  %1012 = vmatmul.bf16.gmra.mxu3 %v1744_v19 }
  0x5b   : > { %777 = vmatmul.bf16.gmra.mxu0 %v1697_v20  ;;  %857 = vmatmul.bf16.gmra.mxu1 %v1713_v21 }
  0x5c   : > { %937 = vmatmul.bf16.gmra.mxu2 %v1729_v22  ;;  %1017 = vmatmul.bf16.gmra.mxu3 %v1745_v23 }
  0x6b   : > { %782 = vmatmul.bf16.gmra.mxu0 %v1698_v24  ;;  %862 = vmatmul.bf16.gmra.mxu1 %v1714_v25  ;;  %v1704_v25 = vld [vmem:[%s2122_s7 + $0x50] sm:$0xff] }
  0x6c   : > { %942 = vmatmul.bf16.gmra.mxu2 %v1730_v26  ;;  %1022 = vmatmul.bf16.gmra.mxu3 %v1746_v27  ;;  %v1720_v26 = vld [vmem:[%s2122_s7 + $0xd0] sm:$0xff] }
  0x7b   : > { %787 = vmatmul.bf16.gmra.mxu0 %v1699_v28  ;;  %867 = vmatmul.bf16.gmra.mxu1 %v1715_v29 }
  0x7c   : > { %947 = vmatmul.bf16.gmra.mxu2 %v1731_v30  ;;  %1027 = vmatmul.bf16.gmra.mxu3 %v1747_v31 }
  0x8b   : > { %792 = vmatmul.bf16.gmra.mxu0 %v1700_v32  ;;  %872 = vmatmul.bf16.gmra.mxu1 %v1716_v33  ;;  %v1736_v32 = vld [vmem:[%s2122_s7 + $0x150] sm:$0xff] }
  0x8c   : > { %952 = vmatmul.bf16.gmra.mxu2 %v1732_v34  ;;  %1032 = vmatmul.bf16.gmra.mxu3 %v1748_v35  ;;  %v1752_v33 = vld [vmem:[%s2122_s7 + $0x1d0] sm:$0xff] }
  0x9b   : > { %797 = vmatmul.bf16.gmra.mxu0 %v1701_v36  ;;  %877 = vmatmul.bf16.gmra.mxu1 %v1717_v37 }
  0x9c   : > { %957 = vmatmul.bf16.gmra.mxu2 %v1733_v38  ;;  %1037 = vmatmul.bf16.gmra.mxu3 %v1749_v39 }
  0xa8   : > { %v763_v43 = vpop.f32.mrf.mxu0  ;;  %v843_v44 = vpop.f32.mrf.mxu1 }
  0xa9   : > { %v764_v47 = vadd.f32 %v2159_v40, %v763_v43  ;;  %v844_v48 = vadd.f32 %v2159_v40, %v843_v44 }
  0xab   : > { %1799 = vtanh.f32 %v764_v47  ;;  %802 = vmatmul.bf16.gmra.mxu0 %v1702_v41  ;;  %882 = vmatmul.bf16.gmra.mxu1 %v1718_v42 }
  0xac   : > { %1801 = vtanh.f32 %v844_v48  ;;  %962 = vmatmul.bf16.gmra.mxu2 %v1734_v45  ;;  %1042 = vmatmul.bf16.gmra.mxu3 %v1750_v46 }
  0xaf   : > { %v923_v49 = vpop.f32.mrf.mxu2  ;;  %v1003_v50 = vpop.f32.mrf.mxu3 }
  0xb0   : > { %v924_v51 = vadd.f32 %v2159_v40, %v923_v49  ;;  %v1004_v52 = vadd.f32 %v2159_v40, %v1003_v50  ;;  %v765_v53 = vpop.f32.mrf.mxu0  ;;  %v845_v54 = vpop.f32.mrf.mxu1 }
  0xb1   : > { %v1800_v55 = vpop.eup %1799  ;;  %v766_v56 = vadd.f32 %v2159_v40, %v765_v53  ;;  %v846_v57 = vadd.f32 %v2159_v40, %v845_v54  ;;  %v1705_v54 = vld [vmem:[%s2122_s7 + $0x58] sm:$0xff] }
  0xb2   : > { %v1802_v58 = vpop.eup %1801  ;;  %1211 = vst [vmem:[%s2171_s14] sm:$0xff] %v1800_v55  ;;  %1803 = vtanh.f32 %v924_v51  ;;  %v1721_v55 = vld [vmem:[%s2122_s7 + $0xd8] sm:$0xff] }
  0xb3   : > { %1243 = vst [vmem:[%s2171_s14 + $0x100] sm:$0xff] %v1802_v58  ;;  %1805 = vtanh.f32 %v1004_v52 }
  0xb4   : > { %1807 = vtanh.f32 %v766_v56 }
  0xb5   : > { %1809 = vtanh.f32 %v846_v57 }
  0xb7   : > { %v925_v59 = vpop.f32.mrf.mxu2  ;;  %v1005_v60 = vpop.f32.mrf.mxu3 }
  0xb8   : > { %v1804_v63 = vpop.eup %1803  ;;  %v926_v0 = vadd.f32 %v2159_v40, %v925_v59  ;;  %v1006_v1 = vadd.f32 %v2159_v40, %v1005_v60  ;;  %v768_v2 = vpop.f32.mrf.mxu0 }
  0xb9   : > { %v848_v3 = vpop.f32.mrf.mxu1  ;;  %v1806_v6 = vpop.eup %1805  ;;  %1275 = vst [vmem:[%s2171_s14 + $0x200] sm:$0xff] %v1804_v63  ;;  %v769_v7 = vadd.f32 %v2159_v40, %v768_v2 }
  0xba   : > { %v849_v8 = vadd.f32 %v2159_v40, %v848_v3  ;;  %v1808_v9 = vpop.eup %1807  ;;  %1307 = vst [vmem:[%s2171_s14 + $0x300] sm:$0xff] %v1806_v6  ;;  %1811 = vtanh.f32 %v926_v0 }
  0xbb   : > { %v1810_v10 = vpop.eup %1809  ;;  %1212 = vst [vmem:[%s2171_s14 + $0x8] sm:$0xff] %v1808_v9  ;;  %1813 = vtanh.f32 %v1006_v1  ;;  %807 = vmatmul.bf16.gmra.mxu0 %v1703_v61  ;;  %887 = vmatmul.bf16.gmra.mxu1 %v1719_v62  ;;  %v1737_v61 = vld [vmem:[%s2122_s7 + $0x158] sm:$0xff] }
  0xbc   : > { %1244 = vst [vmem:[%s2171_s14 + $0x108] sm:$0xff] %v1810_v10  ;;  %1815 = vtanh.f32 %v769_v7  ;;  %967 = vmatmul.bf16.gmra.mxu2 %v1735_v4  ;;  %1047 = vmatmul.bf16.gmra.mxu3 %v1751_v5  ;;  %v1753_v62 = vld [vmem:[%s2122_s7 + $0x1d8] sm:$0xff] }
  0xbd   : > { %1817 = vtanh.f32 %v849_v8 }
  0xbf   : > { %v928_v11 = vpop.f32.mrf.mxu2  ;;  %v1008_v12 = vpop.f32.mrf.mxu3 }
  0xc0   : > { %v1812_v13 = vpop.eup %1811  ;;  %v929_v14 = vadd.f32 %v2159_v40, %v928_v11  ;;  %v1009_v15 = vadd.f32 %v2159_v40, %v1008_v12  ;;  %v770_v16 = vpop.f32.mrf.mxu0 }
  0xc1   : > { %v850_v17 = vpop.f32.mrf.mxu1  ;;  %v1814_v18 = vpop.eup %1813  ;;  %1276 = vst [vmem:[%s2171_s14 + $0x208] sm:$0xff] %v1812_v13  ;;  %v771_v19 = vadd.f32 %v2159_v40, %v770_v16 }
  0xc2   : > { %v851_v20 = vadd.f32 %v2159_v40, %v850_v17  ;;  %v1816_v21 = vpop.eup %1815  ;;  %1308 = vst [vmem:[%s2171_s14 + $0x308] sm:$0xff] %v1814_v18  ;;  %1819 = vtanh.f32 %v929_v14  ;;  %v1706_v18 = vld [vmem:[%s2122_s7 + $0x60] sm:$0xff] }
  0xc3   : > { %v1818_v22 = vpop.eup %1817  ;;  %1213 = vst [vmem:[%s2171_s14 + $0x10] sm:$0xff] %v1816_v21  ;;  %1821 = vtanh.f32 %v1009_v15 }
  0xc4   : > { %1245 = vst [vmem:[%s2171_s14 + $0x110] sm:$0xff] %v1818_v22  ;;  %1823 = vtanh.f32 %v771_v19  ;;  %v1722_v19 = vld [vmem:[%s2122_s7 + $0xe0] sm:$0xff] }
  0xc5   : > { %1825 = vtanh.f32 %v851_v20 }
  0xc7   : > { %v930_v23 = vpop.f32.mrf.mxu2  ;;  %v1010_v24 = vpop.f32.mrf.mxu3 }
  0xc8   : > { %v1820_v27 = vpop.eup %1819  ;;  %v931_v28 = vadd.f32 %v2159_v40, %v930_v23  ;;  %v1011_v29 = vadd.f32 %v2159_v40, %v1010_v24  ;;  %v773_v30 = vpop.f32.mrf.mxu0 }
  0xc9   : > { %v853_v31 = vpop.f32.mrf.mxu1  ;;  %v1822_v34 = vpop.eup %1821  ;;  %1277 = vst [vmem:[%s2171_s14 + $0x210] sm:$0xff] %v1820_v27  ;;  %v774_v35 = vadd.f32 %v2159_v40, %v773_v30 }
  0xca   : > { %v854_v36 = vadd.f32 %v2159_v40, %v853_v31  ;;  %v1824_v37 = vpop.eup %1823  ;;  %1309 = vst [vmem:[%s2171_s14 + $0x310] sm:$0xff] %v1822_v34  ;;  %1827 = vtanh.f32 %v931_v28 }
  0xcb   : > { %v1826_v38 = vpop.eup %1825  ;;  %1214 = vst [vmem:[%s2171_s14 + $0x18] sm:$0xff] %v1824_v37  ;;  %1829 = vtanh.f32 %v1011_v29  ;;  %812 = vmatmul.bf16.gmra.mxu0 %v1704_v25  ;;  %892 = vmatmul.bf16.gmra.mxu1 %v1720_v26  ;;  %v1738_v25 = vld [vmem:[%s2122_s7 + $0x160] sm:$0xff] }
  0xcc   : > { %1246 = vst [vmem:[%s2171_s14 + $0x118] sm:$0xff] %v1826_v38  ;;  %1831 = vtanh.f32 %v774_v35  ;;  %972 = vmatmul.bf16.gmra.mxu2 %v1736_v32  ;;  %1052 = vmatmul.bf16.gmra.mxu3 %v1752_v33  ;;  %v1754_v26 = vld [vmem:[%s2122_s7 + $0x1e0] sm:$0xff] }
  0xcd   : > { %1833 = vtanh.f32 %v854_v36 }
  0xcf   : > { %v933_v39 = vpop.f32.mrf.mxu2  ;;  %v1013_v41 = vpop.f32.mrf.mxu3 }
  0xd0   : > { %v1828_v42 = vpop.eup %1827  ;;  %v934_v43 = vadd.f32 %v2159_v40, %v933_v39  ;;  %v1014_v44 = vadd.f32 %v2159_v40, %v1013_v41  ;;  %v775_v45 = vpop.f32.mrf.mxu0 }
  0xd1   : > { %v855_v46 = vpop.f32.mrf.mxu1  ;;  %v1830_v47 = vpop.eup %1829  ;;  %1278 = vst [vmem:[%s2171_s14 + $0x218] sm:$0xff] %v1828_v42  ;;  %v776_v48 = vadd.f32 %v2159_v40, %v775_v45 }
  0xd2   : > { %v856_v49 = vadd.f32 %v2159_v40, %v855_v46  ;;  %v1832_v50 = vpop.eup %1831  ;;  %1310 = vst [vmem:[%s2171_s14 + $0x318] sm:$0xff] %v1830_v47  ;;  %1835 = vtanh.f32 %v934_v43  ;;  %v1707_v47 = vld [vmem:[%s2122_s7 + $0x68] sm:$0xff] }
  0xd3   : > { %v1834_v51 = vpop.eup %1833  ;;  %1215 = vst [vmem:[%s2171_s14 + $0x20] sm:$0xff] %v1832_v50  ;;  %1837 = vtanh.f32 %v1014_v44 }
  0xd4   : > { %1247 = vst [vmem:[%s2171_s14 + $0x120] sm:$0xff] %v1834_v51  ;;  %1839 = vtanh.f32 %v776_v48  ;;  %v1723_v48 = vld [vmem:[%s2122_s7 + $0xe8] sm:$0xff] }
  0xd5   : > { %1841 = vtanh.f32 %v856_v49 }
  0xd7   : > { %v935_v52 = vpop.f32.mrf.mxu2  ;;  %v1015_v53 = vpop.f32.mrf.mxu3 }
  0xd8   : > { %v1836_v56 = vpop.eup %1835  ;;  %v936_v57 = vadd.f32 %v2159_v40, %v935_v52  ;;  %v1016_v58 = vadd.f32 %v2159_v40, %v1015_v53  ;;  %v778_v59 = vpop.f32.mrf.mxu0 }
  0xd9   : > { %v858_v60 = vpop.f32.mrf.mxu1  ;;  %v1838_v63 = vpop.eup %1837  ;;  %1279 = vst [vmem:[%s2171_s14 + $0x220] sm:$0xff] %v1836_v56  ;;  %v779_v0 = vadd.f32 %v2159_v40, %v778_v59 }
  0xda   : > { %v859_v1 = vadd.f32 %v2159_v40, %v858_v60  ;;  %v1840_v2 = vpop.eup %1839  ;;  %1311 = vst [vmem:[%s2171_s14 + $0x320] sm:$0xff] %v1838_v63  ;;  %1843 = vtanh.f32 %v936_v57 }
  0xdb   : > { %v1842_v3 = vpop.eup %1841  ;;  %1216 = vst [vmem:[%s2171_s14 + $0x28] sm:$0xff] %v1840_v2  ;;  %1845 = vtanh.f32 %v1016_v58  ;;  %817 = vmatmul.bf16.gmra.mxu0 %v1705_v54  ;;  %897 = vmatmul.bf16.gmra.mxu1 %v1721_v55  ;;  %v1739_v54 = vld [vmem:[%s2122_s7 + $0x168] sm:$0xff] }
  0xdc   : > { %1248 = vst [vmem:[%s2171_s14 + $0x128] sm:$0xff] %v1842_v3  ;;  %1847 = vtanh.f32 %v779_v0  ;;  %977 = vmatmul.bf16.gmra.mxu2 %v1737_v61  ;;  %1057 = vmatmul.bf16.gmra.mxu3 %v1753_v62  ;;  %v1755_v55 = vld [vmem:[%s2122_s7 + $0x1e8] sm:$0xff] }
  0xdd   : > { %1849 = vtanh.f32 %v859_v1 }
  0xdf   : > { %v938_v4 = vpop.f32.mrf.mxu2  ;;  %v1018_v5 = vpop.f32.mrf.mxu3 }
  0xe0   : > { %v1844_v6 = vpop.eup %1843  ;;  %v939_v7 = vadd.f32 %v2159_v40, %v938_v4  ;;  %v1019_v8 = vadd.f32 %v2159_v40, %v1018_v5  ;;  %v780_v9 = vpop.f32.mrf.mxu0 }
  0xe1   : > { %v860_v10 = vpop.f32.mrf.mxu1  ;;  %v1846_v11 = vpop.eup %1845  ;;  %1280 = vst [vmem:[%s2171_s14 + $0x228] sm:$0xff] %v1844_v6  ;;  %v781_v12 = vadd.f32 %v2159_v40, %v780_v9 }
  0xe2   : > { %v861_v13 = vadd.f32 %v2159_v40, %v860_v10  ;;  %v1848_v14 = vpop.eup %1847  ;;  %1312 = vst [vmem:[%s2171_s14 + $0x328] sm:$0xff] %v1846_v11  ;;  %1851 = vtanh.f32 %v939_v7  ;;  %v1708_v11 = vld [vmem:[%s2122_s7 + $0x70] sm:$0xff] }
  0xe3   : > { %v1850_v15 = vpop.eup %1849  ;;  %1217 = vst [vmem:[%s2171_s14 + $0x30] sm:$0xff] %v1848_v14  ;;  %1853 = vtanh.f32 %v1019_v8 }
  0xe4   : > { %1249 = vst [vmem:[%s2171_s14 + $0x130] sm:$0xff] %v1850_v15  ;;  %1855 = vtanh.f32 %v781_v12  ;;  %v1724_v12 = vld [vmem:[%s2122_s7 + $0xf0] sm:$0xff] }
  0xe5   : > { %1857 = vtanh.f32 %v861_v13 }
  0xe7   : > { %v940_v16 = vpop.f32.mrf.mxu2  ;;  %v1020_v17 = vpop.f32.mrf.mxu3 }
  0xe8   : > { %v1852_v20 = vpop.eup %1851  ;;  %v941_v21 = vadd.f32 %v2159_v40, %v940_v16  ;;  %v1021_v22 = vadd.f32 %v2159_v40, %v1020_v17  ;;  %v783_v23 = vpop.f32.mrf.mxu0 }
  0xe9   : > { %v863_v24 = vpop.f32.mrf.mxu1  ;;  %v1854_v27 = vpop.eup %1853  ;;  %1281 = vst [vmem:[%s2171_s14 + $0x230] sm:$0xff] %v1852_v20  ;;  %v784_v28 = vadd.f32 %v2159_v40, %v783_v23 }
  0xea   : > { %v864_v29 = vadd.f32 %v2159_v40, %v863_v24  ;;  %v1856_v30 = vpop.eup %1855  ;;  %1313 = vst [vmem:[%s2171_s14 + $0x330] sm:$0xff] %v1854_v27  ;;  %1859 = vtanh.f32 %v941_v21 }
  0xeb   : > { %v1858_v31 = vpop.eup %1857  ;;  %1218 = vst [vmem:[%s2171_s14 + $0x38] sm:$0xff] %v1856_v30  ;;  %1861 = vtanh.f32 %v1021_v22  ;;  %822 = vmatmul.bf16.gmra.mxu0 %v1706_v18  ;;  %902 = vmatmul.bf16.gmra.mxu1 %v1722_v19  ;;  %v1740_v18 = vld [vmem:[%s2122_s7 + $0x170] sm:$0xff] }
  0xec   : > { %1250 = vst [vmem:[%s2171_s14 + $0x138] sm:$0xff] %v1858_v31  ;;  %1863 = vtanh.f32 %v784_v28  ;;  %982 = vmatmul.bf16.gmra.mxu2 %v1738_v25  ;;  %1062 = vmatmul.bf16.gmra.mxu3 %v1754_v26  ;;  %v1756_v19 = vld [vmem:[%s2122_s7 + $0x1f0] sm:$0xff] }
  0xed   : > { %1865 = vtanh.f32 %v864_v29 }
  0xef   : > { %v943_v32 = vpop.f32.mrf.mxu2  ;;  %v1023_v33 = vpop.f32.mrf.mxu3 }
  0xf0   : > { %v1860_v34 = vpop.eup %1859  ;;  %v944_v35 = vadd.f32 %v2159_v40, %v943_v32  ;;  %v1024_v36 = vadd.f32 %v2159_v40, %v1023_v33  ;;  %v785_v37 = vpop.f32.mrf.mxu0 }
  0xf1   : > { %v865_v38 = vpop.f32.mrf.mxu1  ;;  %v1862_v39 = vpop.eup %1861  ;;  %1282 = vst [vmem:[%s2171_s14 + $0x238] sm:$0xff] %v1860_v34  ;;  %v786_v41 = vadd.f32 %v2159_v40, %v785_v37 }
  0xf2   : > { %v866_v42 = vadd.f32 %v2159_v40, %v865_v38  ;;  %v1864_v43 = vpop.eup %1863  ;;  %1314 = vst [vmem:[%s2171_s14 + $0x338] sm:$0xff] %v1862_v39  ;;  %1867 = vtanh.f32 %v944_v35  ;;  %v1709_v39 = vld [vmem:[%s2122_s7 + $0x78] sm:$0xff] }
  0xf3   : > { %v1866_v44 = vpop.eup %1865  ;;  %1219 = vst [vmem:[%s2171_s14 + $0x40] sm:$0xff] %v1864_v43  ;;  %1869 = vtanh.f32 %v1024_v36 }
  0xf4   : > { %1251 = vst [vmem:[%s2171_s14 + $0x140] sm:$0xff] %v1866_v44  ;;  %1871 = vtanh.f32 %v786_v41  ;;  %v1725_v41 = vld [vmem:[%s2122_s7 + $0xf8] sm:$0xff] }
  0xf5   : > { %1873 = vtanh.f32 %v866_v42 }
  0xf7   : > { %v945_v45 = vpop.f32.mrf.mxu2  ;;  %v1025_v46 = vpop.f32.mrf.mxu3 }
  0xf8   : > { %v1868_v49 = vpop.eup %1867  ;;  %v946_v50 = vadd.f32 %v2159_v40, %v945_v45  ;;  %v1026_v51 = vadd.f32 %v2159_v40, %v1025_v46  ;;  %v788_v52 = vpop.f32.mrf.mxu0 }
  0xf9   : > { %v868_v53 = vpop.f32.mrf.mxu1  ;;  %v1870_v56 = vpop.eup %1869  ;;  %1283 = vst [vmem:[%s2171_s14 + $0x240] sm:$0xff] %v1868_v49  ;;  %v789_v57 = vadd.f32 %v2159_v40, %v788_v52 }
  0xfa   : > { %v869_v58 = vadd.f32 %v2159_v40, %v868_v53  ;;  %v1872_v59 = vpop.eup %1871  ;;  %1315 = vst [vmem:[%s2171_s14 + $0x340] sm:$0xff] %v1870_v56  ;;  %1875 = vtanh.f32 %v946_v50 }
  0xfb   : > { %v1874_v60 = vpop.eup %1873  ;;  %1220 = vst [vmem:[%s2171_s14 + $0x48] sm:$0xff] %v1872_v59  ;;  %1877 = vtanh.f32 %v1026_v51  ;;  %827 = vmatmul.bf16.gmra.mxu0 %v1707_v47  ;;  %907 = vmatmul.bf16.gmra.mxu1 %v1723_v48  ;;  %v1741_v47 = vld [vmem:[%s2122_s7 + $0x178] sm:$0xff] }
  0xfc   : > { %1252 = vst [vmem:[%s2171_s14 + $0x148] sm:$0xff] %v1874_v60  ;;  %1879 = vtanh.f32 %v789_v57  ;;  %987 = vmatmul.bf16.gmra.mxu2 %v1739_v54  ;;  %1067 = vmatmul.bf16.gmra.mxu3 %v1755_v55  ;;  %v1757_v48 = vld [vmem:[%s2122_s7 + $0x1f8] sm:$0xff] }
  0xfd   : > { %1881 = vtanh.f32 %v869_v58 }
  0xff   : > { %v948_v61 = vpop.f32.mrf.mxu2  ;;  %v1028_v62 = vpop.f32.mrf.mxu3 }
 0x100   : > { %v1876_v63 = vpop.eup %1875  ;;  %v949_v0 = vadd.f32 %v2159_v40, %v948_v61  ;;  %v1029_v1 = vadd.f32 %v2159_v40, %v1028_v62  ;;  %v790_v2 = vpop.f32.mrf.mxu0 }
 0x101   : > { %v870_v3 = vpop.f32.mrf.mxu1  ;;  %v1878_v4 = vpop.eup %1877  ;;  %1284 = vst [vmem:[%s2171_s14 + $0x248] sm:$0xff] %v1876_v63  ;;  %v791_v5 = vadd.f32 %v2159_v40, %v790_v2 }
 0x102   : > { %v871_v6 = vadd.f32 %v2159_v40, %v870_v3  ;;  %v1880_v7 = vpop.eup %1879  ;;  %1316 = vst [vmem:[%s2171_s14 + $0x348] sm:$0xff] %v1878_v4  ;;  %1883 = vtanh.f32 %v949_v0 }
 0x103   : > { %v1882_v8 = vpop.eup %1881  ;;  %1221 = vst [vmem:[%s2171_s14 + $0x50] sm:$0xff] %v1880_v7  ;;  %1885 = vtanh.f32 %v1029_v1 }
 0x104   : > { %1253 = vst [vmem:[%s2171_s14 + $0x150] sm:$0xff] %v1882_v8  ;;  %1887 = vtanh.f32 %v791_v5 }
 0x105   : > { %1889 = vtanh.f32 %v871_v6 }
 0x107   : > { %v950_v9 = vpop.f32.mrf.mxu2  ;;  %v1030_v10 = vpop.f32.mrf.mxu3 }
 0x108   : > { %v1884_v13 = vpop.eup %1883  ;;  %v951_v14 = vadd.f32 %v2159_v40, %v950_v9  ;;  %v1031_v15 = vadd.f32 %v2159_v40, %v1030_v10  ;;  %v793_v16 = vpop.f32.mrf.mxu0 }
 0x109   : > { %v873_v17 = vpop.f32.mrf.mxu1  ;;  %v1886_v20 = vpop.eup %1885  ;;  %1285 = vst [vmem:[%s2171_s14 + $0x250] sm:$0xff] %v1884_v13  ;;  %v794_v21 = vadd.f32 %v2159_v40, %v793_v16 }
 0x10a   : > { %v874_v22 = vadd.f32 %v2159_v40, %v873_v17  ;;  %v1888_v23 = vpop.eup %1887  ;;  %1317 = vst [vmem:[%s2171_s14 + $0x350] sm:$0xff] %v1886_v20  ;;  %1891 = vtanh.f32 %v951_v14 }
 0x10b   : > { %v1890_v24 = vpop.eup %1889  ;;  %1222 = vst [vmem:[%s2171_s14 + $0x58] sm:$0xff] %v1888_v23  ;;  %1893 = vtanh.f32 %v1031_v15  ;;  %832 = vmatmul.bf16.gmra.mxu0 %v1708_v11  ;;  %912 = vmatmul.bf16.gmra.mxu1 %v1724_v12 }
 0x10c   : > { %1254 = vst [vmem:[%s2171_s14 + $0x158] sm:$0xff] %v1890_v24  ;;  %1895 = vtanh.f32 %v794_v21  ;;  %992 = vmatmul.bf16.gmra.mxu2 %v1740_v18  ;;  %1072 = vmatmul.bf16.gmra.mxu3 %v1756_v19 }
 0x10d   : > { %1897 = vtanh.f32 %v874_v22 }
 0x10f   : > { %v953_v25 = vpop.f32.mrf.mxu2  ;;  %v1033_v26 = vpop.f32.mrf.mxu3 }
 0x110   : > { %v1892_v27 = vpop.eup %1891  ;;  %v954_v28 = vadd.f32 %v2159_v40, %v953_v25  ;;  %v1034_v29 = vadd.f32 %v2159_v40, %v1033_v26  ;;  %v795_v30 = vpop.f32.mrf.mxu0 }
 0x111   : > { %v875_v31 = vpop.f32.mrf.mxu1  ;;  %v1894_v32 = vpop.eup %1893  ;;  %1286 = vst [vmem:[%s2171_s14 + $0x258] sm:$0xff] %v1892_v27  ;;  %v796_v33 = vadd.f32 %v2159_v40, %v795_v30 }
 0x112   : > { %v876_v34 = vadd.f32 %v2159_v40, %v875_v31  ;;  %v1896_v35 = vpop.eup %1895  ;;  %1318 = vst [vmem:[%s2171_s14 + $0x358] sm:$0xff] %v1894_v32  ;;  %1899 = vtanh.f32 %v954_v28 }
 0x113   : > { %v1898_v36 = vpop.eup %1897  ;;  %1223 = vst [vmem:[%s2171_s14 + $0x60] sm:$0xff] %v1896_v35  ;;  %1901 = vtanh.f32 %v1034_v29 }
 0x114   : > { %1255 = vst [vmem:[%s2171_s14 + $0x160] sm:$0xff] %v1898_v36  ;;  %1903 = vtanh.f32 %v796_v33 }
 0x115   : > { %1905 = vtanh.f32 %v876_v34 }
 0x117   : > { %v955_v37 = vpop.f32.mrf.mxu2  ;;  %v1035_v38 = vpop.f32.mrf.mxu3 }
 0x118   : > { %v1900_v42 = vpop.eup %1899  ;;  %v956_v43 = vadd.f32 %v2159_v40, %v955_v37  ;;  %v1036_v44 = vadd.f32 %v2159_v40, %v1035_v38  ;;  %v798_v45 = vpop.f32.mrf.mxu0 }
 0x119   : > { %v878_v46 = vpop.f32.mrf.mxu1  ;;  %v1902_v49 = vpop.eup %1901  ;;  %1287 = vst [vmem:[%s2171_s14 + $0x260] sm:$0xff] %v1900_v42  ;;  %v799_v50 = vadd.f32 %v2159_v40, %v798_v45 }
 0x11a   : > { %v879_v51 = vadd.f32 %v2159_v40, %v878_v46  ;;  %v1904_v52 = vpop.eup %1903  ;;  %1319 = vst [vmem:[%s2171_s14 + $0x360] sm:$0xff] %v1902_v49  ;;  %1907 = vtanh.f32 %v956_v43 }
 0x11b   : > { %v1906_v53 = vpop.eup %1905  ;;  %1224 = vst [vmem:[%s2171_s14 + $0x68] sm:$0xff] %v1904_v52  ;;  %1909 = vtanh.f32 %v1036_v44  ;;  %837 = vmatmul.bf16.gmra.mxu0 %v1709_v39  ;;  %917 = vmatmul.bf16.gmra.mxu1 %v1725_v41 }
 0x11c   : > { %1256 = vst [vmem:[%s2171_s14 + $0x168] sm:$0xff] %v1906_v53  ;;  %1911 = vtanh.f32 %v799_v50  ;;  %997 = vmatmul.bf16.gmra.mxu2 %v1741_v47  ;;  %1077 = vmatmul.bf16.gmra.mxu3 %v1757_v48 }
 0x11d   : > { %1913 = vtanh.f32 %v879_v51 }
 0x11f   : > { %v958_v54 = vpop.f32.mrf.mxu2  ;;  %v1038_v55 = vpop.f32.mrf.mxu3 }
 0x120   : > { %v1908_v56 = vpop.eup %1907  ;;  %v959_v57 = vadd.f32 %v2159_v40, %v958_v54  ;;  %v1039_v58 = vadd.f32 %v2159_v40, %v1038_v55  ;;  %v800_v59 = vpop.f32.mrf.mxu0 }
 0x121   : > { %v880_v60 = vpop.f32.mrf.mxu1  ;;  %v1910_v61 = vpop.eup %1909  ;;  %1288 = vst [vmem:[%s2171_s14 + $0x268] sm:$0xff] %v1908_v56  ;;  %v801_v62 = vadd.f32 %v2159_v40, %v800_v59 }
 0x122   : > { %v881_v63 = vadd.f32 %v2159_v40, %v880_v60  ;;  %v1912_v0 = vpop.eup %1911  ;;  %1320 = vst [vmem:[%s2171_s14 + $0x368] sm:$0xff] %v1910_v61  ;;  %1915 = vtanh.f32 %v959_v57 }
 0x123   : > { %v1914_v1 = vpop.eup %1913  ;;  %1225 = vst [vmem:[%s2171_s14 + $0x70] sm:$0xff] %v1912_v0  ;;  %1917 = vtanh.f32 %v1039_v58 }
 0x124   : > { %1257 = vst [vmem:[%s2171_s14 + $0x170] sm:$0xff] %v1914_v1  ;;  %1919 = vtanh.f32 %v801_v62 }
 0x125   : > { %1921 = vtanh.f32 %v881_v63 }
 0x127   : > { %v960_v2 = vpop.f32.mrf.mxu2  ;;  %v1040_v3 = vpop.f32.mrf.mxu3 }
 0x128   : > { %v1916_v4 = vpop.eup %1915  ;;  %v961_v5 = vadd.f32 %v2159_v40, %v960_v2  ;;  %v1041_v6 = vadd.f32 %v2159_v40, %v1040_v3  ;;  %v803_v7 = vpop.f32.mrf.mxu0 }
 0x129   : > { %v883_v8 = vpop.f32.mrf.mxu1  ;;  %v1918_v9 = vpop.eup %1917  ;;  %1289 = vst [vmem:[%s2171_s14 + $0x270] sm:$0xff] %v1916_v4  ;;  %v804_v10 = vadd.f32 %v2159_v40, %v803_v7 }
 0x12a   : > { %v884_v11 = vadd.f32 %v2159_v40, %v883_v8  ;;  %v1920_v12 = vpop.eup %1919  ;;  %1321 = vst [vmem:[%s2171_s14 + $0x370] sm:$0xff] %v1918_v9  ;;  %1923 = vtanh.f32 %v961_v5 }
 0x12b   : > { %v1922_v13 = vpop.eup %1921  ;;  %1226 = vst [vmem:[%s2171_s14 + $0x78] sm:$0xff] %v1920_v12  ;;  %1925 = vtanh.f32 %v1041_v6 }
 0x12c   : > { %1258 = vst [vmem:[%s2171_s14 + $0x178] sm:$0xff] %v1922_v13  ;;  %1927 = vtanh.f32 %v804_v10 }
 0x12d   : > { %1929 = vtanh.f32 %v884_v11 }
 0x12f   : > { %v963_v14 = vpop.f32.mrf.mxu2  ;;  %v1043_v15 = vpop.f32.mrf.mxu3 }
 0x130   : > { %v1924_v16 = vpop.eup %1923  ;;  %v964_v17 = vadd.f32 %v2159_v40, %v963_v14  ;;  %v1044_v18 = vadd.f32 %v2159_v40, %v1043_v15  ;;  %v805_v19 = vpop.f32.mrf.mxu0 }
 0x131   : > { %v885_v20 = vpop.f32.mrf.mxu1  ;;  %v1926_v21 = vpop.eup %1925  ;;  %1290 = vst [vmem:[%s2171_s14 + $0x278] sm:$0xff] %v1924_v16  ;;  %v806_v22 = vadd.f32 %v2159_v40, %v805_v19 }
 0x132   : > { %v886_v23 = vadd.f32 %v2159_v40, %v885_v20  ;;  %v1928_v24 = vpop.eup %1927  ;;  %1322 = vst [vmem:[%s2171_s14 + $0x378] sm:$0xff] %v1926_v21  ;;  %1931 = vtanh.f32 %v964_v17 }
 0x133   : > { %v1930_v25 = vpop.eup %1929  ;;  %1227 = vst [vmem:[%s2171_s14 + $0x80] sm:$0xff] %v1928_v24  ;;  %1933 = vtanh.f32 %v1044_v18 }
 0x134   : > { %1259 = vst [vmem:[%s2171_s14 + $0x180] sm:$0xff] %v1930_v25  ;;  %1935 = vtanh.f32 %v806_v22 }
 0x135   : > { %1937 = vtanh.f32 %v886_v23 }
 0x137   : > { %v965_v26 = vpop.f32.mrf.mxu2  ;;  %v1045_v27 = vpop.f32.mrf.mxu3 }
 0x138   : > { %v1932_v28 = vpop.eup %1931  ;;  %v966_v29 = vadd.f32 %v2159_v40, %v965_v26  ;;  %v1046_v30 = vadd.f32 %v2159_v40, %v1045_v27  ;;  %v808_v31 = vpop.f32.mrf.mxu0 }
 0x139   : > { %v888_v32 = vpop.f32.mrf.mxu1  ;;  %v1934_v33 = vpop.eup %1933  ;;  %1291 = vst [vmem:[%s2171_s14 + $0x280] sm:$0xff] %v1932_v28  ;;  %v809_v34 = vadd.f32 %v2159_v40, %v808_v31 }
 0x13a   : > { %v889_v35 = vadd.f32 %v2159_v40, %v888_v32  ;;  %v1936_v36 = vpop.eup %1935  ;;  %1323 = vst [vmem:[%s2171_s14 + $0x380] sm:$0xff] %v1934_v33  ;;  %1939 = vtanh.f32 %v966_v29 }
 0x13b   : > { %v1938_v37 = vpop.eup %1937  ;;  %1228 = vst [vmem:[%s2171_s14 + $0x88] sm:$0xff] %v1936_v36  ;;  %1941 = vtanh.f32 %v1046_v30 }
 0x13c   : > { %1260 = vst [vmem:[%s2171_s14 + $0x188] sm:$0xff] %v1938_v37  ;;  %1943 = vtanh.f32 %v809_v34 }
 0x13d   : > { %1945 = vtanh.f32 %v889_v35 }
 0x13f   : > { %v968_v38 = vpop.f32.mrf.mxu2  ;;  %v1048_v39 = vpop.f32.mrf.mxu3 }
 0x140   : > { %v1940_v41 = vpop.eup %1939  ;;  %v969_v42 = vadd.f32 %v2159_v40, %v968_v38  ;;  %v1049_v43 = vadd.f32 %v2159_v40, %v1048_v39  ;;  %v810_v44 = vpop.f32.mrf.mxu0 }
 0x141   : > { %v890_v45 = vpop.f32.mrf.mxu1  ;;  %v1942_v46 = vpop.eup %1941  ;;  %1292 = vst [vmem:[%s2171_s14 + $0x288] sm:$0xff] %v1940_v41  ;;  %v811_v47 = vadd.f32 %v2159_v40, %v810_v44 }
 0x142   : > { %v891_v48 = vadd.f32 %v2159_v40, %v890_v45  ;;  %v1944_v49 = vpop.eup %1943  ;;  %1324 = vst [vmem:[%s2171_s14 + $0x388] sm:$0xff] %v1942_v46  ;;  %1947 = vtanh.f32 %v969_v42 }
 0x143   : > { %v1946_v50 = vpop.eup %1945  ;;  %1229 = vst [vmem:[%s2171_s14 + $0x90] sm:$0xff] %v1944_v49  ;;  %1949 = vtanh.f32 %v1049_v43 }
 0x144   : > { %1261 = vst [vmem:[%s2171_s14 + $0x190] sm:$0xff] %v1946_v50  ;;  %1951 = vtanh.f32 %v811_v47 }
 0x145   : > { %1953 = vtanh.f32 %v891_v48 }
 0x147   : > { %v970_v51 = vpop.f32.mrf.mxu2  ;;  %v1050_v52 = vpop.f32.mrf.mxu3 }
 0x148   : > { %v1948_v53 = vpop.eup %1947  ;;  %v971_v54 = vadd.f32 %v2159_v40, %v970_v51  ;;  %v1051_v55 = vadd.f32 %v2159_v40, %v1050_v52  ;;  %v813_v56 = vpop.f32.mrf.mxu0 }
 0x149   : > { %v893_v57 = vpop.f32.mrf.mxu1  ;;  %v1950_v58 = vpop.eup %1949  ;;  %1293 = vst [vmem:[%s2171_s14 + $0x290] sm:$0xff] %v1948_v53  ;;  %v814_v59 = vadd.f32 %v2159_v40, %v813_v56 }
 0x14a   : > { %v894_v60 = vadd.f32 %v2159_v40, %v893_v57  ;;  %v1952_v61 = vpop.eup %1951  ;;  %1325 = vst [vmem:[%s2171_s14 + $0x390] sm:$0xff] %v1950_v58  ;;  %1955 = vtanh.f32 %v971_v54 }
 0x14b   : > { %v1954_v62 = vpop.eup %1953  ;;  %1230 = vst [vmem:[%s2171_s14 + $0x98] sm:$0xff] %v1952_v61  ;;  %1957 = vtanh.f32 %v1051_v55 }
 0x14c   : > { %1262 = vst [vmem:[%s2171_s14 + $0x198] sm:$0xff] %v1954_v62  ;;  %1959 = vtanh.f32 %v814_v59 }
 0x14d   : > { %1961 = vtanh.f32 %v894_v60 }
 0x14f   : > { %v973_v63 = vpop.f32.mrf.mxu2  ;;  %v1053_v0 = vpop.f32.mrf.mxu3 }
 0x150   : > { %v1956_v1 = vpop.eup %1955  ;;  %v974_v2 = vadd.f32 %v2159_v40, %v973_v63  ;;  %v1054_v3 = vadd.f32 %v2159_v40, %v1053_v0  ;;  %v815_v4 = vpop.f32.mrf.mxu0 }
 0x151   : > { %v895_v5 = vpop.f32.mrf.mxu1  ;;  %v1958_v6 = vpop.eup %1957  ;;  %1294 = vst [vmem:[%s2171_s14 + $0x298] sm:$0xff] %v1956_v1  ;;  %v816_v7 = vadd.f32 %v2159_v40, %v815_v4 }
 0x152   : > { %v896_v8 = vadd.f32 %v2159_v40, %v895_v5  ;;  %v1960_v9 = vpop.eup %1959  ;;  %1326 = vst [vmem:[%s2171_s14 + $0x398] sm:$0xff] %v1958_v6  ;;  %1963 = vtanh.f32 %v974_v2 }
 0x153   : > { %v1962_v10 = vpop.eup %1961  ;;  %1231 = vst [vmem:[%s2171_s14 + $0xa0] sm:$0xff] %v1960_v9  ;;  %1965 = vtanh.f32 %v1054_v3 }
 0x154   : > { %1263 = vst [vmem:[%s2171_s14 + $0x1a0] sm:$0xff] %v1962_v10  ;;  %1967 = vtanh.f32 %v816_v7 }
 0x155   : > { %1969 = vtanh.f32 %v896_v8 }
 0x157   : > { %v975_v11 = vpop.f32.mrf.mxu2  ;;  %v1055_v12 = vpop.f32.mrf.mxu3 }
 0x158   : > { %v1964_v13 = vpop.eup %1963  ;;  %v976_v14 = vadd.f32 %v2159_v40, %v975_v11  ;;  %v1056_v15 = vadd.f32 %v2159_v40, %v1055_v12  ;;  %v818_v16 = vpop.f32.mrf.mxu0 }
 0x159   : > { %v898_v17 = vpop.f32.mrf.mxu1  ;;  %v1966_v18 = vpop.eup %1965  ;;  %1295 = vst [vmem:[%s2171_s14 + $0x2a0] sm:$0xff] %v1964_v13  ;;  %v819_v19 = vadd.f32 %v2159_v40, %v818_v16 }
 0x15a   : > { %v899_v20 = vadd.f32 %v2159_v40, %v898_v17  ;;  %v1968_v21 = vpop.eup %1967  ;;  %1327 = vst [vmem:[%s2171_s14 + $0x3a0] sm:$0xff] %v1966_v18  ;;  %1971 = vtanh.f32 %v976_v14  ;;  %v2378_v40 = vld [vmem:[%s2465_s2] ss:$0 sm:$0xff] }
 0x15b   : > { %v1970_v22 = vpop.eup %1969  ;;  %1232 = vst [vmem:[%s2171_s14 + $0xa8] sm:$0xff] %v1968_v21  ;;  %1973 = vtanh.f32 %v1056_v15 }
 0x15c   : > { %1264 = vst [vmem:[%s2171_s14 + $0x1a8] sm:$0xff] %v1970_v22  ;;  %1975 = vtanh.f32 %v819_v19 }
 0x15d   : > { %1977 = vtanh.f32 %v899_v20 }
 0x15f   : > { %v978_v23 = vpop.f32.mrf.mxu2  ;;  %v1058_v24 = vpop.f32.mrf.mxu3 }
 0x160   : > { %v1972_v25 = vpop.eup %1971  ;;  %v979_v26 = vadd.f32 %v2378_v40, %v978_v23  ;;  %v1059_v27 = vadd.f32 %v2378_v40, %v1058_v24  ;;  %v820_v28 = vpop.f32.mrf.mxu0 }
 0x161   : > { %v900_v29 = vpop.f32.mrf.mxu1  ;;  %v1974_v30 = vpop.eup %1973  ;;  %1296 = vst [vmem:[%s2171_s14 + $0x2a8] sm:$0xff] %v1972_v25  ;;  %v821_v31 = vadd.f32 %v2378_v40, %v820_v28 }
 0x162   : > { %v901_v32 = vadd.f32 %v2378_v40, %v900_v29  ;;  %v1976_v33 = vpop.eup %1975  ;;  %1328 = vst [vmem:[%s2171_s14 + $0x3a8] sm:$0xff] %v1974_v30  ;;  %1979 = vtanh.f32 %v979_v26 }
 0x163   : > { %v1978_v34 = vpop.eup %1977  ;;  %1233 = vst [vmem:[%s2171_s14 + $0xb0] sm:$0xff] %v1976_v33  ;;  %1981 = vtanh.f32 %v1059_v27 }
 0x164   : > { %1265 = vst [vmem:[%s2171_s14 + $0x1b0] sm:$0xff] %v1978_v34  ;;  %1983 = vtanh.f32 %v821_v31 }
 0x165   : > { %1985 = vtanh.f32 %v901_v32 }
 0x167   : > { %v980_v35 = vpop.f32.mrf.mxu2  ;;  %v1060_v36 = vpop.f32.mrf.mxu3 }
 0x168   : > { %v1980_v37 = vpop.eup %1979  ;;  %v981_v38 = vadd.f32 %v2378_v40, %v980_v35  ;;  %v1061_v39 = vadd.f32 %v2378_v40, %v1060_v36  ;;  %v823_v41 = vpop.f32.mrf.mxu0 }
 0x169   : > { %v903_v42 = vpop.f32.mrf.mxu1  ;;  %v1982_v43 = vpop.eup %1981  ;;  %1297 = vst [vmem:[%s2171_s14 + $0x2b0] sm:$0xff] %v1980_v37  ;;  %v824_v44 = vadd.f32 %v2378_v40, %v823_v41 }
 0x16a   : > { %v904_v45 = vadd.f32 %v2378_v40, %v903_v42  ;;  %v1984_v46 = vpop.eup %1983  ;;  %1329 = vst [vmem:[%s2171_s14 + $0x3b0] sm:$0xff] %v1982_v43  ;;  %1987 = vtanh.f32 %v981_v38 }
 0x16b   : > { %v1986_v47 = vpop.eup %1985  ;;  %1234 = vst [vmem:[%s2171_s14 + $0xb8] sm:$0xff] %v1984_v46  ;;  %1989 = vtanh.f32 %v1061_v39 }
 0x16c   : > { %1266 = vst [vmem:[%s2171_s14 + $0x1b8] sm:$0xff] %v1986_v47  ;;  %1991 = vtanh.f32 %v824_v44 }
 0x16d   : > { %1993 = vtanh.f32 %v904_v45 }
 0x16f   : > { %v983_v48 = vpop.f32.mrf.mxu2  ;;  %v1063_v49 = vpop.f32.mrf.mxu3 }
 0x170   : > { %v1988_v50 = vpop.eup %1987  ;;  %v984_v51 = vadd.f32 %v2378_v40, %v983_v48  ;;  %v1064_v52 = vadd.f32 %v2378_v40, %v1063_v49  ;;  %v825_v53 = vpop.f32.mrf.mxu0 }
 0x171   : > { %v905_v54 = vpop.f32.mrf.mxu1  ;;  %v1990_v55 = vpop.eup %1989  ;;  %1298 = vst [vmem:[%s2171_s14 + $0x2b8] sm:$0xff] %v1988_v50  ;;  %v826_v56 = vadd.f32 %v2378_v40, %v825_v53 }
 0x172   : > { %v906_v57 = vadd.f32 %v2378_v40, %v905_v54  ;;  %v1992_v58 = vpop.eup %1991  ;;  %1330 = vst [vmem:[%s2171_s14 + $0x3b8] sm:$0xff] %v1990_v55  ;;  %1995 = vtanh.f32 %v984_v51 }
 0x173   : > { %v1994_v59 = vpop.eup %1993  ;;  %1235 = vst [vmem:[%s2171_s14 + $0xc0] sm:$0xff] %v1992_v58  ;;  %1997 = vtanh.f32 %v1064_v52 }
 0x174   : > { %1267 = vst [vmem:[%s2171_s14 + $0x1c0] sm:$0xff] %v1994_v59  ;;  %1999 = vtanh.f32 %v826_v56 }
 0x175   : > { %2001 = vtanh.f32 %v906_v57 }
 0x177   : > { %v985_v60 = vpop.f32.mrf.mxu2  ;;  %v1065_v61 = vpop.f32.mrf.mxu3 }
 0x178   : > { %v1996_v62 = vpop.eup %1995  ;;  %v986_v63 = vadd.f32 %v2378_v40, %v985_v60  ;;  %v1066_v0 = vadd.f32 %v2378_v40, %v1065_v61  ;;  %v828_v1 = vpop.f32.mrf.mxu0 }
 0x179   : > { %v908_v2 = vpop.f32.mrf.mxu1  ;;  %v1998_v3 = vpop.eup %1997  ;;  %1299 = vst [vmem:[%s2171_s14 + $0x2c0] sm:$0xff] %v1996_v62  ;;  %v829_v4 = vadd.f32 %v2378_v40, %v828_v1 }
 0x17a   : > { %v909_v5 = vadd.f32 %v2378_v40, %v908_v2  ;;  %v2000_v6 = vpop.eup %1999  ;;  %1331 = vst [vmem:[%s2171_s14 + $0x3c0] sm:$0xff] %v1998_v3  ;;  %2003 = vtanh.f32 %v986_v63 }
 0x17b   : > { %v2002_v7 = vpop.eup %2001  ;;  %1236 = vst [vmem:[%s2171_s14 + $0xc8] sm:$0xff] %v2000_v6  ;;  %2005 = vtanh.f32 %v1066_v0 }
 0x17c   : > { %1268 = vst [vmem:[%s2171_s14 + $0x1c8] sm:$0xff] %v2002_v7  ;;  %2007 = vtanh.f32 %v829_v4 }
 0x17d   : > { %2009 = vtanh.f32 %v909_v5 }
 0x17f   : > { %v988_v8 = vpop.f32.mrf.mxu2  ;;  %v1068_v9 = vpop.f32.mrf.mxu3 }
 0x180   : > { %v2004_v10 = vpop.eup %2003  ;;  %v989_v11 = vadd.f32 %v2378_v40, %v988_v8  ;;  %v1069_v12 = vadd.f32 %v2378_v40, %v1068_v9  ;;  %v830_v13 = vpop.f32.mrf.mxu0 }
 0x181   : > { %v910_v14 = vpop.f32.mrf.mxu1  ;;  %v2006_v15 = vpop.eup %2005  ;;  %1300 = vst [vmem:[%s2171_s14 + $0x2c8] sm:$0xff] %v2004_v10  ;;  %v831_v16 = vadd.f32 %v2378_v40, %v830_v13 }
 0x182   : > { %v911_v17 = vadd.f32 %v2378_v40, %v910_v14  ;;  %v2008_v18 = vpop.eup %2007  ;;  %1332 = vst [vmem:[%s2171_s14 + $0x3c8] sm:$0xff] %v2006_v15  ;;  %2011 = vtanh.f32 %v989_v11 }
 0x183   : > { %v2010_v19 = vpop.eup %2009  ;;  %1237 = vst [vmem:[%s2171_s14 + $0xd0] sm:$0xff] %v2008_v18  ;;  %2013 = vtanh.f32 %v1069_v12 }
 0x184   : > { %1269 = vst [vmem:[%s2171_s14 + $0x1d0] sm:$0xff] %v2010_v19  ;;  %2015 = vtanh.f32 %v831_v16 }
 0x185   : > { %2017 = vtanh.f32 %v911_v17 }
 0x187   : > { %v990_v20 = vpop.f32.mrf.mxu2  ;;  %v1070_v21 = vpop.f32.mrf.mxu3 }
 0x188   : > { %v2012_v22 = vpop.eup %2011  ;;  %v991_v23 = vadd.f32 %v2378_v40, %v990_v20  ;;  %v1071_v24 = vadd.f32 %v2378_v40, %v1070_v21  ;;  %v833_v25 = vpop.f32.mrf.mxu0 }
 0x189   : > { %v913_v26 = vpop.f32.mrf.mxu1  ;;  %v2014_v27 = vpop.eup %2013  ;;  %1301 = vst [vmem:[%s2171_s14 + $0x2d0] sm:$0xff] %v2012_v22  ;;  %v834_v28 = vadd.f32 %v2378_v40, %v833_v25 }
 0x18a   : > { %v914_v29 = vadd.f32 %v2378_v40, %v913_v26  ;;  %v2016_v30 = vpop.eup %2015  ;;  %1333 = vst [vmem:[%s2171_s14 + $0x3d0] sm:$0xff] %v2014_v27  ;;  %2019 = vtanh.f32 %v991_v23 }
 0x18b   : > { %v2018_v31 = vpop.eup %2017  ;;  %1238 = vst [vmem:[%s2171_s14 + $0xd8] sm:$0xff] %v2016_v30  ;;  %2021 = vtanh.f32 %v1071_v24 }
 0x18c   : > { %1270 = vst [vmem:[%s2171_s14 + $0x1d8] sm:$0xff] %v2018_v31  ;;  %2023 = vtanh.f32 %v834_v28 }
 0x18d   : > { %2025 = vtanh.f32 %v914_v29 }
 0x18f   : > { %v993_v32 = vpop.f32.mrf.mxu2  ;;  %v1073_v33 = vpop.f32.mrf.mxu3 }
 0x190   : > { %v2020_v34 = vpop.eup %2019  ;;  %v994_v35 = vadd.f32 %v2378_v40, %v993_v32  ;;  %v1074_v36 = vadd.f32 %v2378_v40, %v1073_v33  ;;  %v835_v37 = vpop.f32.mrf.mxu0 }
 0x191   : > { %v915_v38 = vpop.f32.mrf.mxu1  ;;  %v2022_v39 = vpop.eup %2021  ;;  %1302 = vst [vmem:[%s2171_s14 + $0x2d8] sm:$0xff] %v2020_v34  ;;  %v836_v41 = vadd.f32 %v2378_v40, %v835_v37 }
 0x192   : > { %v916_v42 = vadd.f32 %v2378_v40, %v915_v38  ;;  %v2024_v43 = vpop.eup %2023  ;;  %1334 = vst [vmem:[%s2171_s14 + $0x3d8] sm:$0xff] %v2022_v39  ;;  %2027 = vtanh.f32 %v994_v35 }
 0x193   : > { %v2026_v44 = vpop.eup %2025  ;;  %1239 = vst [vmem:[%s2171_s14 + $0xe0] sm:$0xff] %v2024_v43  ;;  %2029 = vtanh.f32 %v1074_v36 }
 0x194   : > { %1271 = vst [vmem:[%s2171_s14 + $0x1e0] sm:$0xff] %v2026_v44  ;;  %2031 = vtanh.f32 %v836_v41 }
 0x195   : > { %2033 = vtanh.f32 %v916_v42 }
 0x197   : > { %v995_v45 = vpop.f32.mrf.mxu2  ;;  %v1075_v46 = vpop.f32.mrf.mxu3 }
 0x198   : > { %v2028_v47 = vpop.eup %2027  ;;  %v996_v48 = vadd.f32 %v2378_v40, %v995_v45  ;;  %v1076_v49 = vadd.f32 %v2378_v40, %v1075_v46  ;;  %v838_v50 = vpop.f32.mrf.mxu0 }
 0x199   : > { %v918_v51 = vpop.f32.mrf.mxu1  ;;  %v2030_v52 = vpop.eup %2029  ;;  %1303 = vst [vmem:[%s2171_s14 + $0x2e0] sm:$0xff] %v2028_v47  ;;  %v839_v53 = vadd.f32 %v2378_v40, %v838_v50 }
 0x19a   : > { %v919_v54 = vadd.f32 %v2378_v40, %v918_v51  ;;  %v2032_v55 = vpop.eup %2031  ;;  %1335 = vst [vmem:[%s2171_s14 + $0x3e0] sm:$0xff] %v2030_v52  ;;  %2035 = vtanh.f32 %v996_v48 }
 0x19b   : > { %v2034_v56 = vpop.eup %2033  ;;  %1240 = vst [vmem:[%s2171_s14 + $0xe8] sm:$0xff] %v2032_v55  ;;  %2037 = vtanh.f32 %v1076_v49 }
 0x19c   : > { %1272 = vst [vmem:[%s2171_s14 + $0x1e8] sm:$0xff] %v2034_v56  ;;  %2039 = vtanh.f32 %v839_v53 }
 0x19d   : > { %2041 = vtanh.f32 %v919_v54 }
 0x19f   : > { %v998_v57 = vpop.f32.mrf.mxu2  ;;  %v1078_v58 = vpop.f32.mrf.mxu3 }
 0x1a0   : > { %v2036_v59 = vpop.eup %2035  ;;  %v999_v60 = vadd.f32 %v2378_v40, %v998_v57  ;;  %v1079_v61 = vadd.f32 %v2378_v40, %v1078_v58  ;;  %v840_v62 = vpop.f32.mrf.mxu0 }
 0x1a1   : > { %v920_v63 = vpop.f32.mrf.mxu1  ;;  %v2038_v0 = vpop.eup %2037  ;;  %1304 = vst [vmem:[%s2171_s14 + $0x2e8] sm:$0xff] %v2036_v59  ;;  %v841_v1 = vadd.f32 %v2378_v40, %v840_v62 }
 0x1a2   : > { %v921_v2 = vadd.f32 %v2378_v40, %v920_v63  ;;  %v2040_v3 = vpop.eup %2039  ;;  %1336 = vst [vmem:[%s2171_s14 + $0x3e8] sm:$0xff] %v2038_v0  ;;  %2043 = vtanh.f32 %v999_v60 }
 0x1a3   : > { %v2042_v4 = vpop.eup %2041  ;;  %1241 = vst [vmem:[%s2171_s14 + $0xf0] sm:$0xff] %v2040_v3  ;;  %2045 = vtanh.f32 %v1079_v61 }
 0x1a4   : > { %1273 = vst [vmem:[%s2171_s14 + $0x1f0] sm:$0xff] %v2042_v4  ;;  %2047 = vtanh.f32 %v841_v1 }
 0x1a5   : > { %2049 = vtanh.f32 %v921_v2 }
 0x1a7   : > { %v1000_v5 = vpop.f32.mrf.mxu2  ;;  %v1080_v6 = vpop.f32.mrf.mxu3 }
 0x1a8   : > { %v2044_v7 = vpop.eup %2043  ;;  %v1001_v8 = vadd.f32 %v2378_v40, %v1000_v5  ;;  %v1081_v9 = vadd.f32 %v2378_v40, %v1080_v6 }
 0x1a9   : > { %v2046_v10 = vpop.eup %2045  ;;  %1305 = vst [vmem:[%s2171_s14 + $0x2f0] sm:$0xff] %v2044_v7 }
 0x1aa   : > { %v2048_v11 = vpop.eup %2047  ;;  %1337 = vst [vmem:[%s2171_s14 + $0x3f0] sm:$0xff] %v2046_v10  ;;  %2051 = vtanh.f32 %v1001_v8 }
 0x1ab   : > { %v2050_v12 = vpop.eup %2049  ;;  %1242 = vst [vmem:[%s2171_s14 + $0xf8] sm:$0xff] %v2048_v11  ;;  %2053 = vtanh.f32 %v1081_v9 }
 0x1ac   : > { %1274 = vst [vmem:[%s2171_s14 + $0x1f8] sm:$0xff] %v2050_v12 }
 0x1b0   : > { %v2052_v13 = vpop.eup %2051 }
 0x1b1   : > { %v2054_v14 = vpop.eup %2053  ;;  %1306 = vst [vmem:[%s2171_s14 + $0x2f8] sm:$0xff] %v2052_v13 }
 0x1b2   : > { %1338 = vst [vmem:[%s2171_s14 + $0x3f8] sm:$0xff] %v2054_v14 }
 0x1b3 PF: > { %s13_s12 = sadd.s32 1, %s2062_s12  }
 0x1b4   : > { %p10_p4 = scmp.ge.s32.totalorder %s13_s12, 10  }
 0x1b6   :  { %12 = sbr.rel (!%p10_p4) target bundleno = 1 (0x1), region = 62 }

</bundles_post_ra>
